<compile_context>
chip_gen: v5e
topology: v5e:2x2
jax: 0.10.0
libtpu: 0.0.40
codegen_flags: <defaults>
</compile_context>

<pallas_src>
import functools

import jax
import jax.numpy as jnp
import numpy as np
from jax import lax
from jax.experimental import pallas as pl
from jax.experimental.pallas import tpu as pltpu


def _leaky(x, slope):
    return jnp.where(x >= 0, x, slope * x)


def _pad_hw1_cmajor(x):
    """Zero-pad a (C, H, W) value by one pixel on each side of H and W."""
    C, H, W = x.shape
    zc = jnp.zeros((C, H, 1), x.dtype)
    x = jnp.concatenate([zc, x, zc], axis=2)           # (C, H, W + 2)
    zr = jnp.zeros((C, 1, W + 2), x.dtype)
    return jnp.concatenate([zr, x, zr], axis=1)        # (C, H + 2, W + 2)


def _conv3x3_cmajor(xp, w_ref, b_ref, slope):
    """3x3 conv (input already padded) + bias + LeakyReLU as ONE C-major matmul.

    xp    : (Cin, H+2, W+2) value (compute dtype)
    w_ref : (Cout, 9*Cin) ref, row-major flattening over (kh, kw, ci)
    b_ref : (Cout, 1) ref (f32)
    returns (Cout, H*W) f32 with H*W on the lane axis (lane dense).
    """
    Cin, Hp, Wp = xp.shape
    H, W = Hp - 2, Wp - 2
    taps = [xp[:, dy:dy + H, dx:dx + W] for dy in range(3) for dx in range(3)]
    slab = jnp.concatenate(taps, axis=0).reshape(9 * Cin, H * W)   # K-axis concat
    acc = jnp.dot(w_ref[...], slab, preferred_element_type=jnp.float32)
    return _leaky(acc + b_ref[...], slope)


def unet_fused_kernel(x_ref, w1_ref, b1_ref, w2_ref, b2_ref, *rest,
                      slope, downsample, compute_dtype):
    """Fused conv1 + LReLU + conv2 + LReLU (+ 4x4 stride-2 conv_down)."""
    if downsample:
        wd_ref, out_ref, down_ref, dce_ref, dco_ref = rest
    else:
        (out_ref,) = rest
    cdt = compute_dtype
    _, Cin, H, W = x_ref.shape
    C1 = out_ref.shape[1]

    # ---- conv1 (3x3, pad 1, bias) + LeakyReLU ----
    xp = _pad_hw1_cmajor(x_ref[0].astype(cdt))                    # (Cin, H+2, W+2)
    a1 = _conv3x3_cmajor(xp, w1_ref, b1_ref, slope)               # (C1, H*W) f32

    # ---- conv2 (3x3, pad 1, bias) + LeakyReLU ----
    a1p = _pad_hw1_cmajor(a1.astype(cdt).reshape(C1, H, W))
    a2 = _conv3x3_cmajor(a1p, w2_ref, b2_ref, slope)              # (C1, H*W) f32

    # Lane-dense store: output block is (1, C1, H*W).
    out_ref[0] = a2.astype(out_ref.dtype)

    if downsample:
        # ---- conv_down: 4x4, stride 2, pad 1, no bias (fused from VMEM) ----
        Ho, Wo = H // 2, W // 2
        a2p = _pad_hw1_cmajor(a2.reshape(C1, H, W))               # (C1, H+2, W+2) f32

        # Column (lane-axis) de-interleave via exact 0/1 selection matmuls.
        r = lax.broadcasted_iota(jnp.int32, (W + 2, Wo + 1), 0)
        c = lax.broadcasted_iota(jnp.int32, (W + 2, Wo + 1), 1)
        sel_even = (r == 2 * c).astype(jnp.float32)
        sel_odd = (r == 2 * c + 1).astype(jnp.float32)
        a2p2 = a2p.reshape(C1 * (H + 2), W + 2)
        dce_ref[...] = jnp.dot(a2p2, sel_even,
                               preferred_element_type=jnp.float32
                               ).reshape(C1, H + 2, Wo + 1)       # even cols
        dco_ref[...] = jnp.dot(a2p2, sel_odd,
                               preferred_element_type=jnp.float32
                               ).reshape(C1, H + 2, Wo + 1)       # odd cols

        # Row (sublane-axis) de-interleave via strided scratch reads; the 16
        # taps are then concatenated along the K axis for one MXU matmul.
        taps = []
        for ky in range(4):
            for kx in range(4):
                src = dce_ref if kx % 2 == 0 else dco_ref
                rows = src[:, pl.ds(ky, Ho, stride=2), :]         # (C1, Ho, Wo+1)
                taps.append(rows[:, :, kx // 2:kx // 2 + Wo])     # (C1, Ho, Wo)
        dslab = jnp.concatenate(taps, axis=0).reshape(16 * C1, Ho * Wo)
        acc = jnp.dot(wd_ref[...], dslab.astype(cdt),
                      preferred_element_type=jnp.float32)         # (C1, Ho*Wo)
        down_ref[0] = acc.astype(down_ref.dtype)


def conv_block_pallas(x_nchw, params, slope, downsample,
                      compute_dtype=jnp.float32):
    N, Cin, H, W = x_nchw.shape
    C1 = params["w1"].shape[-1]
    if downsample and (H % 2 != 0 or W % 2 != 0):
        raise ValueError("downsample path requires even H and W")
    Ho, Wo = H // 2, W // 2
    cdt = compute_dtype
    out_dtype = x_nchw.dtype

    # Weights pre-oriented C-major: (C_out, kh*kw*C_in), row-major over (kh,kw,ci).
    w1m = jnp.transpose(params["w1"], (3, 0, 1, 2)).reshape(C1, 9 * Cin).astype(cdt)
    w2m = jnp.transpose(params["w2"], (3, 0, 1, 2)).reshape(C1, 9 * C1).astype(cdt)
    b1 = params["b1"].reshape(C1, 1).astype(jnp.float32)
    b2 = params["b2"].reshape(C1, 1).astype(jnp.float32)

    inputs = [x_nchw, w1m, b1, w2m, b2]
    in_specs = [
        pl.BlockSpec((1, Cin, H, W), lambda n: (n, 0, 0, 0)),
        pl.BlockSpec((C1, 9 * Cin), lambda n: (0, 0)),
        pl.BlockSpec((C1, 1), lambda n: (0, 0)),
        pl.BlockSpec((C1, 9 * C1), lambda n: (0, 0)),
        pl.BlockSpec((C1, 1), lambda n: (0, 0)),
    ]
    scratch = []
    if downsample:
        wdm = jnp.transpose(params["wd"], (3, 0, 1, 2)).reshape(C1, 16 * C1).astype(cdt)
        inputs.append(wdm)
        in_specs.append(pl.BlockSpec((C1, 16 * C1), lambda n: (0, 0)))
        out_shape = (jax.ShapeDtypeStruct((N, C1, H * W), out_dtype),
                     jax.ShapeDtypeStruct((N, C1, Ho * Wo), out_dtype))
        out_specs = (pl.BlockSpec((1, C1, H * W), lambda n: (n, 0, 0)),
                     pl.BlockSpec((1, C1, Ho * Wo), lambda n: (n, 0, 0)))
        # f32 scratch (sublane-strided reads kept on the proven f32 path).
        scratch = [pltpu.VMEM((C1, H + 2, Wo + 1), jnp.float32),
                   pltpu.VMEM((C1, H + 2, Wo + 1), jnp.float32)]
    else:
        out_shape = jax.ShapeDtypeStruct((N, C1, H * W), out_dtype)
        out_specs = pl.BlockSpec((1, C1, H * W), lambda n: (n, 0, 0))

    act_b = jnp.dtype(cdt).itemsize
    out_b = jnp.dtype(out_dtype).itemsize
    in_b = jnp.dtype(x_nchw.dtype).itemsize
    flops = 2 * N * H * W * 9 * (Cin + C1) * C1
    bytes_accessed = (N * H * W * Cin * in_b
                      + (9 * Cin + 9 * C1) * C1 * act_b + 2 * C1 * 4
                      + N * H * W * C1 * out_b)
    if downsample:
        flops += 2 * N * Ho * Wo * 16 * C1 * C1
        flops += 2 * 2 * N * C1 * (H + 2) * (W + 2) * (Wo + 1)   # selection matmuls
        bytes_accessed += 16 * C1 * C1 * act_b + N * Ho * Wo * C1 * out_b

    kernel = functools.partial(unet_fused_kernel, slope=slope,
                               downsample=downsample, compute_dtype=cdt)
    res = pl.pallas_call(
        kernel,
        out_shape=out_shape,
        grid_spec=pltpu.PrefetchScalarGridSpec(
            num_scalar_prefetch=0,
            grid=(N,),
            in_specs=in_specs,
            out_specs=out_specs,
            scratch_shapes=scratch,
        ),
        compiler_params=pltpu.CompilerParams(
            dimension_semantics=("parallel",)),
        cost_estimate=pl.CostEstimate(flops=int(flops), transcendentals=0,
                                      bytes_accessed=int(bytes_accessed)),
    )(*inputs)

    if downsample:
        out_flat, down_flat = res
        return (out_flat.reshape(N, C1, H, W),
                down_flat.reshape(N, C1, Ho, Wo))
    return res.reshape(N, C1, H, W)


# ---------------- public wrapper (matches UNetConvBlock.forward) -------------
def unet_conv_block(x_nchw, params, downsample, relu_slope,
                    compute_dtype=jnp.float32):
    """Pallas forward matching UNetConvBlock.forward (NCHW in / NCHW out)."""
    if downsample:
        out, down = conv_block_pallas(x_nchw, params, relu_slope, True,
                                      compute_dtype)
        return down, out
    return conv_block_pallas(x_nchw, params, relu_slope, False, compute_dtype)


def ref_unet_conv_block(x_nchw, params, downsample, relu_slope):
    """Pure-JAX reference (same math as the PyTorch module)."""
    dn = ("NHWC", "HWIO", "NHWC")
    x = jnp.transpose(x_nchw, (0, 2, 3, 1))
    y = lax.conv_general_dilated(x, params["w1"], (1, 1), ((1, 1), (1, 1)),
                                 dimension_numbers=dn) + params["b1"]
    y = jnp.where(y >= 0, y, relu_slope * y)
    y = lax.conv_general_dilated(y, params["w2"], (1, 1), ((1, 1), (1, 1)),
                                 dimension_numbers=dn) + params["b2"]
    y = jnp.where(y >= 0, y, relu_slope * y)
    y_nchw = jnp.transpose(y, (0, 3, 1, 2))
    if downsample:
        yd = lax.conv_general_dilated(y, params["wd"], (2, 2), ((1, 1), (1, 1)),
                                      dimension_numbers=dn)
        return jnp.transpose(yd, (0, 3, 1, 2)), y_nchw
    return y_nchw


if __name__ == "__main__":
    key = jax.random.PRNGKey(0)
    N, Cin, H, W = 2, 4, 16, 16            # small NCHW input, like the torch module
    Cout = 8
    relu_slope = 0.2
    ks = jax.random.split(key, 6)
    x = jax.random.normal(ks[0], (N, Cin, H, W), jnp.float32)
    params = {
        "w1": jax.random.normal(ks[1], (3, 3, Cin, Cout), jnp.float32) * 0.2,
        "b1": jax.random.normal(ks[2], (Cout,), jnp.float32) * 0.1,
        "w2": jax.random.normal(ks[3], (3, 3, Cout, Cout), jnp.float32) * 0.2,
        "b2": jax.random.normal(ks[4], (Cout,), jnp.float32) * 0.1,
        "wd": jax.random.normal(ks[5], (4, 4, Cout, Cout), jnp.float32) * 0.2,
    }

    ref_down, ref_out = ref_unet_conv_block(x, params, True, relu_slope)

    # f32 MXU operands
    out_down, out = unet_conv_block(x, params, True, relu_slope,
                                    compute_dtype=jnp.float32)
    jax.block_until_ready((out_down, out))
    assert out.shape == (N, Cout, H, W)
    assert out_down.shape == (N, Cout, H // 2, W // 2)
    np.testing.assert_allclose(np.asarray(out), np.asarray(ref_out),
                               rtol=5e-2, atol=5e-2)
    np.testing.assert_allclose(np.asarray(out_down), np.asarray(ref_down),
                               rtol=5e-2, atol=5e-2)

    # bf16 MXU operands (recommended on v6e/v7x), f32 accumulation/bias/LReLU
    out_down_bf, out_bf = unet_conv_block(x, params, True, relu_slope,
                                          compute_dtype=jnp.bfloat16)
    jax.block_until_ready((out_down_bf, out_bf))
    np.testing.assert_allclose(np.asarray(out_bf), np.asarray(ref_out),
                               rtol=2e-1, atol=2e-1)
    np.testing.assert_allclose(np.asarray(out_down_bf), np.asarray(ref_down),
                               rtol=2e-1, atol=2e-1)

    # downsample=False branch
    out_only = unet_conv_block(x, params, False, relu_slope)
    jax.block_until_ready(out_only)
    np.testing.assert_allclose(np.asarray(out_only), np.asarray(ref_out),
                               rtol=5e-2, atol=5e-2)

    print("KERNEL_OK")
</pallas_src>

<mosaic_0001>
module attributes {stable_mosaic.version = 11 : i64} {
  func.func @unet_fused_kernel(%arg0: i32, %arg1: memref<1x4x16x16xf32, #tpu.memory_space<vmem>>, %arg2: memref<8x36xf32, #tpu.memory_space<vmem>>, %arg3: memref<8x1xf32, #tpu.memory_space<vmem>>, %arg4: memref<8x72xf32, #tpu.memory_space<vmem>>, %arg5: memref<8x1xf32, #tpu.memory_space<vmem>>, %arg6: memref<8x128xf32, #tpu.memory_space<vmem>>, %arg7: memref<1x8x256xf32, #tpu.memory_space<vmem>>, %arg8: memref<1x8x64xf32, #tpu.memory_space<vmem>>, %arg9: memref<8x18x9xf32, #tpu.memory_space<vmem>>, %arg10: memref<8x18x9xf32, #tpu.memory_space<vmem>>) attributes {dimension_semantics = [#tpu.dimension_semantics<parallel>], iteration_bounds = array<i64: 2>, scalar_prefetch = 0 : i64, scratch_operands = 2 : i64, tpu.core_type = #tpu.core_type<tc>, window_params = [{transform_indices = @transform_0, window_bounds = array<i64: 1, 4, 16, 16>}, {pipeline_mode = #tpu.pipeline_mode<synchronous>, transform_indices = @transform_1, window_bounds = array<i64: 8, 36>}, {pipeline_mode = #tpu.pipeline_mode<synchronous>, transform_indices = @transform_2, window_bounds = array<i64: 8, 1>}, {pipeline_mode = #tpu.pipeline_mode<synchronous>, transform_indices = @transform_3, window_bounds = array<i64: 8, 72>}, {pipeline_mode = #tpu.pipeline_mode<synchronous>, transform_indices = @transform_4, window_bounds = array<i64: 8, 1>}, {pipeline_mode = #tpu.pipeline_mode<synchronous>, transform_indices = @transform_5, window_bounds = array<i64: 8, 128>}, {transform_indices = @transform_6, window_bounds = array<i64: 1, 8, 256>}, {transform_indices = @transform_7, window_bounds = array<i64: 1, 8, 64>}]} {
    %c0 = arith.constant 0 : index
    %c0_0 = arith.constant 0 : index
    %c0_1 = arith.constant 0 : index
    %c0_2 = arith.constant 0 : index
    %0 = vector.load %arg1[%c0, %c0_0, %c0_1, %c0_2] : memref<1x4x16x16xf32, #tpu.memory_space<vmem>>, vector<1x4x16x16xf32>
    %1 = vector.shape_cast %0 : vector<1x4x16x16xf32> to vector<4x16x16xf32>
    %cst = arith.constant 0.000000e+00 : f32
    %2 = vector.broadcast %cst : f32 to vector<4x16x1xf32>
    %3 = tpu.concatenate %2, %1, %2 in 2 : vector<4x16x1xf32>, vector<4x16x16xf32>, vector<4x16x1xf32> -> vector<4x16x18xf32>
    %cst_3 = arith.constant 0.000000e+00 : f32
    %4 = vector.broadcast %cst_3 : f32 to vector<4x1x18xf32>
    %5 = tpu.concatenate %4, %3, %4 in 1 : vector<4x1x18xf32>, vector<4x16x18xf32>, vector<4x1x18xf32> -> vector<4x18x18xf32>
    %6 = vector.extract_strided_slice %5 {offsets = [0, 0, 0], sizes = [4, 16, 16], strides = [1, 1, 1]} : vector<4x18x18xf32> to vector<4x16x16xf32>
    %7 = vector.extract_strided_slice %5 {offsets = [0, 0, 1], sizes = [4, 16, 16], strides = [1, 1, 1]} : vector<4x18x18xf32> to vector<4x16x16xf32>
    %8 = vector.extract_strided_slice %5 {offsets = [0, 0, 2], sizes = [4, 16, 16], strides = [1, 1, 1]} : vector<4x18x18xf32> to vector<4x16x16xf32>
    %9 = vector.extract_strided_slice %5 {offsets = [0, 1, 0], sizes = [4, 16, 16], strides = [1, 1, 1]} : vector<4x18x18xf32> to vector<4x16x16xf32>
    %10 = vector.extract_strided_slice %5 {offsets = [0, 1, 1], sizes = [4, 16, 16], strides = [1, 1, 1]} : vector<4x18x18xf32> to vector<4x16x16xf32>
    %11 = vector.extract_strided_slice %5 {offsets = [0, 1, 2], sizes = [4, 16, 16], strides = [1, 1, 1]} : vector<4x18x18xf32> to vector<4x16x16xf32>
    %12 = vector.extract_strided_slice %5 {offsets = [0, 2, 0], sizes = [4, 16, 16], strides = [1, 1, 1]} : vector<4x18x18xf32> to vector<4x16x16xf32>
    %13 = vector.extract_strided_slice %5 {offsets = [0, 2, 1], sizes = [4, 16, 16], strides = [1, 1, 1]} : vector<4x18x18xf32> to vector<4x16x16xf32>
    %14 = vector.extract_strided_slice %5 {offsets = [0, 2, 2], sizes = [4, 16, 16], strides = [1, 1, 1]} : vector<4x18x18xf32> to vector<4x16x16xf32>
    %15 = tpu.concatenate %6, %7, %8, %9, %10, %11, %12, %13, %14 in 0 : vector<4x16x16xf32>, vector<4x16x16xf32>, vector<4x16x16xf32>, vector<4x16x16xf32>, vector<4x16x16xf32>, vector<4x16x16xf32>, vector<4x16x16xf32>, vector<4x16x16xf32>, vector<4x16x16xf32> -> vector<36x16x16xf32>
    %16 = vector.shape_cast %15 : vector<36x16x16xf32> to vector<36x256xf32>
    %c0_4 = arith.constant 0 : index
    %c0_5 = arith.constant 0 : index
    %17 = vector.load %arg2[%c0_4, %c0_5] : memref<8x36xf32, #tpu.memory_space<vmem>>, vector<8x36xf32>
    %cst_6 = arith.constant dense<0.000000e+00> : vector<8x256xf32>
    %18 = tpu.matmul %17, %16, %cst_6 {dimension_numbers = #tpu.dot_dimension_numbers<[1], [0], [0], [1], [0, 0, 1, 1], [], []>} : vector<8x36xf32>, vector<36x256xf32>, vector<8x256xf32> -> vector<8x256xf32>
    %c0_7 = arith.constant 0 : index
    %c0_8 = arith.constant 0 : index
    %19 = vector.load %arg3[%c0_7, %c0_8] : memref<8x1xf32, #tpu.memory_space<vmem>>, vector<8x1xf32>
    %20 = vector.broadcast %19 : vector<8x1xf32> to vector<8x256xf32>
    %21 = arith.addf %18, %20 : vector<8x256xf32>
    %cst_9 = arith.constant 0.000000e+00 : f32
    %22 = vector.broadcast %cst_9 : f32 to vector<8x256xf32>
    %23 = arith.cmpf oge, %21, %22 : vector<8x256xf32>
    %cst_10 = arith.constant 2.000000e-01 : f32
    %24 = vector.broadcast %cst_10 : f32 to vector<8x256xf32>
    %25 = arith.mulf %24, %21 : vector<8x256xf32>
    %26 = arith.select %23, %21, %25 : vector<8x256xi1>, vector<8x256xf32>
    %27 = vector.shape_cast %26 : vector<8x256xf32> to vector<8x16x16xf32>
    %cst_11 = arith.constant 0.000000e+00 : f32
    %28 = vector.broadcast %cst_11 : f32 to vector<8x16x1xf32>
    %29 = tpu.concatenate %28, %27, %28 in 2 : vector<8x16x1xf32>, vector<8x16x16xf32>, vector<8x16x1xf32> -> vector<8x16x18xf32>
    %cst_12 = arith.constant 0.000000e+00 : f32
    %30 = vector.broadcast %cst_12 : f32 to vector<8x1x18xf32>
    %31 = tpu.concatenate %30, %29, %30 in 1 : vector<8x1x18xf32>, vector<8x16x18xf32>, vector<8x1x18xf32> -> vector<8x18x18xf32>
    %32 = vector.extract_strided_slice %31 {offsets = [0, 0, 0], sizes = [8, 16, 16], strides = [1, 1, 1]} : vector<8x18x18xf32> to vector<8x16x16xf32>
    %33 = vector.extract_strided_slice %31 {offsets = [0, 0, 1], sizes = [8, 16, 16], strides = [1, 1, 1]} : vector<8x18x18xf32> to vector<8x16x16xf32>
    %34 = vector.extract_strided_slice %31 {offsets = [0, 0, 2], sizes = [8, 16, 16], strides = [1, 1, 1]} : vector<8x18x18xf32> to vector<8x16x16xf32>
    %35 = vector.extract_strided_slice %31 {offsets = [0, 1, 0], sizes = [8, 16, 16], strides = [1, 1, 1]} : vector<8x18x18xf32> to vector<8x16x16xf32>
    %36 = vector.extract_strided_slice %31 {offsets = [0, 1, 1], sizes = [8, 16, 16], strides = [1, 1, 1]} : vector<8x18x18xf32> to vector<8x16x16xf32>
    %37 = vector.extract_strided_slice %31 {offsets = [0, 1, 2], sizes = [8, 16, 16], strides = [1, 1, 1]} : vector<8x18x18xf32> to vector<8x16x16xf32>
    %38 = vector.extract_strided_slice %31 {offsets = [0, 2, 0], sizes = [8, 16, 16], strides = [1, 1, 1]} : vector<8x18x18xf32> to vector<8x16x16xf32>
    %39 = vector.extract_strided_slice %31 {offsets = [0, 2, 1], sizes = [8, 16, 16], strides = [1, 1, 1]} : vector<8x18x18xf32> to vector<8x16x16xf32>
    %40 = vector.extract_strided_slice %31 {offsets = [0, 2, 2], sizes = [8, 16, 16], strides = [1, 1, 1]} : vector<8x18x18xf32> to vector<8x16x16xf32>
    %41 = tpu.concatenate %32, %33, %34, %35, %36, %37, %38, %39, %40 in 0 : vector<8x16x16xf32>, vector<8x16x16xf32>, vector<8x16x16xf32>, vector<8x16x16xf32>, vector<8x16x16xf32>, vector<8x16x16xf32>, vector<8x16x16xf32>, vector<8x16x16xf32>, vector<8x16x16xf32> -> vector<72x16x16xf32>
    %42 = vector.shape_cast %41 : vector<72x16x16xf32> to vector<72x256xf32>
    %c0_13 = arith.constant 0 : index
    %c0_14 = arith.constant 0 : index
    %43 = vector.load %arg4[%c0_13, %c0_14] : memref<8x72xf32, #tpu.memory_space<vmem>>, vector<8x72xf32>
    %cst_15 = arith.constant dense<0.000000e+00> : vector<8x256xf32>
    %44 = tpu.matmul %43, %42, %cst_15 {dimension_numbers = #tpu.dot_dimension_numbers<[1], [0], [0], [1], [0, 0, 1, 1], [], []>} : vector<8x72xf32>, vector<72x256xf32>, vector<8x256xf32> -> vector<8x256xf32>
    %c0_16 = arith.constant 0 : index
    %c0_17 = arith.constant 0 : index
    %45 = vector.load %arg5[%c0_16, %c0_17] : memref<8x1xf32, #tpu.memory_space<vmem>>, vector<8x1xf32>
    %46 = vector.broadcast %45 : vector<8x1xf32> to vector<8x256xf32>
    %47 = arith.addf %44, %46 : vector<8x256xf32>
    %cst_18 = arith.constant 0.000000e+00 : f32
    %48 = vector.broadcast %cst_18 : f32 to vector<8x256xf32>
    %49 = arith.cmpf oge, %47, %48 : vector<8x256xf32>
    %cst_19 = arith.constant 2.000000e-01 : f32
    %50 = vector.broadcast %cst_19 : f32 to vector<8x256xf32>
    %51 = arith.mulf %50, %47 : vector<8x256xf32>
    %52 = arith.select %49, %47, %51 : vector<8x256xi1>, vector<8x256xf32>
    %c0_20 = arith.constant 0 : index
    %c0_21 = arith.constant 0 : index
    %c0_22 = arith.constant 0 : index
    %53 = vector.load %arg7[%c0_20, %c0_21, %c0_22] : memref<1x8x256xf32, #tpu.memory_space<vmem>>, vector<1x8x256xf32>
    %54 = vector.shape_cast %53 : vector<1x8x256xf32> to vector<8x256xf32>
    %55 = vector.shape_cast %52 : vector<8x256xf32> to vector<1x8x256xf32>
    tpu.vector_store %arg7[%c0_20, %c0_21, %c0_22], %55 {strides = array<i32>} : memref<1x8x256xf32, #tpu.memory_space<vmem>>, vector<1x8x256xf32>,
    %56 = vector.shape_cast %52 : vector<8x256xf32> to vector<8x16x16xf32>
    %cst_23 = arith.constant 0.000000e+00 : f32
    %57 = vector.broadcast %cst_23 : f32 to vector<8x16x1xf32>
    %58 = tpu.concatenate %57, %56, %57 in 2 : vector<8x16x1xf32>, vector<8x16x16xf32>, vector<8x16x1xf32> -> vector<8x16x18xf32>
    %cst_24 = arith.constant 0.000000e+00 : f32
    %59 = vector.broadcast %cst_24 : f32 to vector<8x1x18xf32>
    %60 = tpu.concatenate %59, %58, %59 in 1 : vector<8x1x18xf32>, vector<8x16x18xf32>, vector<8x1x18xf32> -> vector<8x18x18xf32>
    %61 = tpu.iota {dimensions = array<i32: 0>} : vector<18x9xi32>
    %62 = tpu.iota {dimensions = array<i32: 1>} : vector<18x9xi32>
    %c2_i32 = arith.constant 2 : i32
    %63 = vector.broadcast %c2_i32 : i32 to vector<18x9xi32>
    %64 = arith.muli %63, %62 : vector<18x9xi32>
    %65 = arith.cmpi eq, %61, %64 : vector<18x9xi32>
    %66 = arith.extui %65 : vector<18x9xi1> to vector<18x9xi32>
    %67 = arith.sitofp %66 : vector<18x9xi32> to vector<18x9xf32>
    %c2_i32_25 = arith.constant 2 : i32
    %68 = vector.broadcast %c2_i32_25 : i32 to vector<18x9xi32>
    %69 = arith.muli %68, %62 : vector<18x9xi32>
    %c1_i32 = arith.constant 1 : i32
    %70 = vector.broadcast %c1_i32 : i32 to vector<18x9xi32>
    %71 = arith.addi %69, %70 : vector<18x9xi32>
    %72 = arith.cmpi eq, %61, %71 : vector<18x9xi32>
    %73 = arith.extui %72 : vector<18x9xi1> to vector<18x9xi32>
    %74 = arith.sitofp %73 : vector<18x9xi32> to vector<18x9xf32>
    %75 = vector.shape_cast %60 : vector<8x18x18xf32> to vector<144x18xf32>
    %cst_26 = arith.constant dense<0.000000e+00> : vector<144x9xf32>
    %76 = tpu.matmul %75, %67, %cst_26 {dimension_numbers = #tpu.dot_dimension_numbers<[1], [0], [0], [1], [0, 0, 1, 1], [], []>} : vector<144x18xf32>, vector<18x9xf32>, vector<144x9xf32> -> vector<144x9xf32>
    %77 = vector.shape_cast %76 : vector<144x9xf32> to vector<8x18x9xf32>
    %c0_27 = arith.constant 0 : index
    %c0_28 = arith.constant 0 : index
    %c0_29 = arith.constant 0 : index
    %78 = vector.load %arg9[%c0_27, %c0_28, %c0_29] : memref<8x18x9xf32, #tpu.memory_space<vmem>>, vector<8x18x9xf32>
    tpu.vector_store %arg9[%c0_27, %c0_28, %c0_29], %77 {strides = array<i32>} : memref<8x18x9xf32, #tpu.memory_space<vmem>>, vector<8x18x9xf32>,
    %cst_30 = arith.constant dense<0.000000e+00> : vector<144x9xf32>
    %79 = tpu.matmul %75, %74, %cst_30 {dimension_numbers = #tpu.dot_dimension_numbers<[1], [0], [0], [1], [0, 0, 1, 1], [], []>} : vector<144x18xf32>, vector<18x9xf32>, vector<144x9xf32> -> vector<144x9xf32>
    %80 = vector.shape_cast %79 : vector<144x9xf32> to vector<8x18x9xf32>
    %c0_31 = arith.constant 0 : index
    %c0_32 = arith.constant 0 : index
    %c0_33 = arith.constant 0 : index
    %81 = vector.load %arg10[%c0_31, %c0_32, %c0_33] : memref<8x18x9xf32, #tpu.memory_space<vmem>>, vector<8x18x9xf32>
    tpu.vector_store %arg10[%c0_31, %c0_32, %c0_33], %80 {strides = array<i32>} : memref<8x18x9xf32, #tpu.memory_space<vmem>>, vector<8x18x9xf32>,
    %c0_34 = arith.constant 0 : index
    %c0_35 = arith.constant 0 : index
    %c0_36 = arith.constant 0 : index
    %82 = tpu.strided_load %arg9[%c0_34, %c0_35, %c0_36] {strides = array<i32: 1, 2, 1>} : memref<8x18x9xf32, #tpu.memory_space<vmem>>, vector<8x8x9xf32>
    %83 = vector.extract_strided_slice %82 {offsets = [0, 0, 0], sizes = [8, 8, 8], strides = [1, 1, 1]} : vector<8x8x9xf32> to vector<8x8x8xf32>
    %c0_37 = arith.constant 0 : index
    %c0_38 = arith.constant 0 : index
    %c0_39 = arith.constant 0 : index
    %84 = tpu.strided_load %arg10[%c0_37, %c0_38, %c0_39] {strides = array<i32: 1, 2, 1>} : memref<8x18x9xf32, #tpu.memory_space<vmem>>, vector<8x8x9xf32>
    %85 = vector.extract_strided_slice %84 {offsets = [0, 0, 0], sizes = [8, 8, 8], strides = [1, 1, 1]} : vector<8x8x9xf32> to vector<8x8x8xf32>
    %c0_40 = arith.constant 0 : index
    %c0_41 = arith.constant 0 : index
    %c0_42 = arith.constant 0 : index
    %86 = tpu.strided_load %arg9[%c0_40, %c0_41, %c0_42] {strides = array<i32: 1, 2, 1>} : memref<8x18x9xf32, #tpu.memory_space<vmem>>, vector<8x8x9xf32>
    %87 = vector.extract_strided_slice %86 {offsets = [0, 0, 1], sizes = [8, 8, 8], strides = [1, 1, 1]} : vector<8x8x9xf32> to vector<8x8x8xf32>
    %c0_43 = arith.constant 0 : index
    %c0_44 = arith.constant 0 : index
    %c0_45 = arith.constant 0 : index
    %88 = tpu.strided_load %arg10[%c0_43, %c0_44, %c0_45] {strides = array<i32: 1, 2, 1>} : memref<8x18x9xf32, #tpu.memory_space<vmem>>, vector<8x8x9xf32>
    %89 = vector.extract_strided_slice %88 {offsets = [0, 0, 1], sizes = [8, 8, 8], strides = [1, 1, 1]} : vector<8x8x9xf32> to vector<8x8x8xf32>
    %c0_46 = arith.constant 0 : index
    %c1 = arith.constant 1 : index
    %c0_47 = arith.constant 0 : index
    %90 = tpu.strided_load %arg9[%c0_46, %c1, %c0_47] {strides = array<i32: 1, 2, 1>} : memref<8x18x9xf32, #tpu.memory_space<vmem>>, vector<8x8x9xf32>
    %91 = vector.extract_strided_slice %90 {offsets = [0, 0, 0], sizes = [8, 8, 8], strides = [1, 1, 1]} : vector<8x8x9xf32> to vector<8x8x8xf32>
    %c0_48 = arith.constant 0 : index
    %c1_49 = arith.constant 1 : index
    %c0_50 = arith.constant 0 : index
    %92 = tpu.strided_load %arg10[%c0_48, %c1_49, %c0_50] {strides = array<i32: 1, 2, 1>} : memref<8x18x9xf32, #tpu.memory_space<vmem>>, vector<8x8x9xf32>
    %93 = vector.extract_strided_slice %92 {offsets = [0, 0, 0], sizes = [8, 8, 8], strides = [1, 1, 1]} : vector<8x8x9xf32> to vector<8x8x8xf32>
    %c0_51 = arith.constant 0 : index
    %c1_52 = arith.constant 1 : index
    %c0_53 = arith.constant 0 : index
    %94 = tpu.strided_load %arg9[%c0_51, %c1_52, %c0_53] {strides = array<i32: 1, 2, 1>} : memref<8x18x9xf32, #tpu.memory_space<vmem>>, vector<8x8x9xf32>
    %95 = vector.extract_strided_slice %94 {offsets = [0, 0, 1], sizes = [8, 8, 8], strides = [1, 1, 1]} : vector<8x8x9xf32> to vector<8x8x8xf32>
    %c0_54 = arith.constant 0 : index
    %c1_55 = arith.constant 1 : index
    %c0_56 = arith.constant 0 : index
    %96 = tpu.strided_load %arg10[%c0_54, %c1_55, %c0_56] {strides = array<i32: 1, 2, 1>} : memref<8x18x9xf32, #tpu.memory_space<vmem>>, vector<8x8x9xf32>
    %97 = vector.extract_strided_slice %96 {offsets = [0, 0, 1], sizes = [8, 8, 8], strides = [1, 1, 1]} : vector<8x8x9xf32> to vector<8x8x8xf32>
    %c0_57 = arith.constant 0 : index
    %c2 = arith.constant 2 : index
    %c0_58 = arith.constant 0 : index
    %98 = tpu.strided_load %arg9[%c0_57, %c2, %c0_58] {strides = array<i32: 1, 2, 1>} : memref<8x18x9xf32, #tpu.memory_space<vmem>>, vector<8x8x9xf32>
    %99 = vector.extract_strided_slice %98 {offsets = [0, 0, 0], sizes = [8, 8, 8], strides = [1, 1, 1]} : vector<8x8x9xf32> to vector<8x8x8xf32>
    %c0_59 = arith.constant 0 : index
    %c2_60 = arith.constant 2 : index
    %c0_61 = arith.constant 0 : index
    %100 = tpu.strided_load %arg10[%c0_59, %c2_60, %c0_61] {strides = array<i32: 1, 2, 1>} : memref<8x18x9xf32, #tpu.memory_space<vmem>>, vector<8x8x9xf32>
    %101 = vector.extract_strided_slice %100 {offsets = [0, 0, 0], sizes = [8, 8, 8], strides = [1, 1, 1]} : vector<8x8x9xf32> to vector<8x8x8xf32>
    %c0_62 = arith.constant 0 : index
    %c2_63 = arith.constant 2 : index
    %c0_64 = arith.constant 0 : index
    %102 = tpu.strided_load %arg9[%c0_62, %c2_63, %c0_64] {strides = array<i32: 1, 2, 1>} : memref<8x18x9xf32, #tpu.memory_space<vmem>>, vector<8x8x9xf32>
    %103 = vector.extract_strided_slice %102 {offsets = [0, 0, 1], sizes = [8, 8, 8], strides = [1, 1, 1]} : vector<8x8x9xf32> to vector<8x8x8xf32>
    %c0_65 = arith.constant 0 : index
    %c2_66 = arith.constant 2 : index
    %c0_67 = arith.constant 0 : index
    %104 = tpu.strided_load %arg10[%c0_65, %c2_66, %c0_67] {strides = array<i32: 1, 2, 1>} : memref<8x18x9xf32, #tpu.memory_space<vmem>>, vector<8x8x9xf32>
    %105 = vector.extract_strided_slice %104 {offsets = [0, 0, 1], sizes = [8, 8, 8], strides = [1, 1, 1]} : vector<8x8x9xf32> to vector<8x8x8xf32>
    %c0_68 = arith.constant 0 : index
    %c3 = arith.constant 3 : index
    %c0_69 = arith.constant 0 : index
    %106 = tpu.strided_load %arg9[%c0_68, %c3, %c0_69] {strides = array<i32: 1, 2, 1>} : memref<8x18x9xf32, #tpu.memory_space<vmem>>, vector<8x8x9xf32>
    %107 = vector.extract_strided_slice %106 {offsets = [0, 0, 0], sizes = [8, 8, 8], strides = [1, 1, 1]} : vector<8x8x9xf32> to vector<8x8x8xf32>
    %c0_70 = arith.constant 0 : index
    %c3_71 = arith.constant 3 : index
    %c0_72 = arith.constant 0 : index
    %108 = tpu.strided_load %arg10[%c0_70, %c3_71, %c0_72] {strides = array<i32: 1, 2, 1>} : memref<8x18x9xf32, #tpu.memory_space<vmem>>, vector<8x8x9xf32>
    %109 = vector.extract_strided_slice %108 {offsets = [0, 0, 0], sizes = [8, 8, 8], strides = [1, 1, 1]} : vector<8x8x9xf32> to vector<8x8x8xf32>
    %c0_73 = arith.constant 0 : index
    %c3_74 = arith.constant 3 : index
    %c0_75 = arith.constant 0 : index
    %110 = tpu.strided_load %arg9[%c0_73, %c3_74, %c0_75] {strides = array<i32: 1, 2, 1>} : memref<8x18x9xf32, #tpu.memory_space<vmem>>, vector<8x8x9xf32>
    %111 = vector.extract_strided_slice %110 {offsets = [0, 0, 1], sizes = [8, 8, 8], strides = [1, 1, 1]} : vector<8x8x9xf32> to vector<8x8x8xf32>
    %c0_76 = arith.constant 0 : index
    %c3_77 = arith.constant 3 : index
    %c0_78 = arith.constant 0 : index
    %112 = tpu.strided_load %arg10[%c0_76, %c3_77, %c0_78] {strides = array<i32: 1, 2, 1>} : memref<8x18x9xf32, #tpu.memory_space<vmem>>, vector<8x8x9xf32>
    %113 = vector.extract_strided_slice %112 {offsets = [0, 0, 1], sizes = [8, 8, 8], strides = [1, 1, 1]} : vector<8x8x9xf32> to vector<8x8x8xf32>
    %114 = tpu.concatenate %83, %85, %87, %89, %91, %93, %95, %97, %99, %101, %103, %105, %107, %109, %111, %113 in 0 : vector<8x8x8xf32>, vector<8x8x8xf32>, vector<8x8x8xf32>, vector<8x8x8xf32>, vector<8x8x8xf32>, vector<8x8x8xf32>, vector<8x8x8xf32>, vector<8x8x8xf32>, vector<8x8x8xf32>, vector<8x8x8xf32>, vector<8x8x8xf32>, vector<8x8x8xf32>, vector<8x8x8xf32>, vector<8x8x8xf32>, vector<8x8x8xf32>, vector<8x8x8xf32> -> vector<128x8x8xf32>
    %115 = vector.shape_cast %114 : vector<128x8x8xf32> to vector<128x64xf32>
    %c0_79 = arith.constant 0 : index
    %c0_80 = arith.constant 0 : index
    %116 = vector.load %arg6[%c0_79, %c0_80] : memref<8x128xf32, #tpu.memory_space<vmem>>, vector<8x128xf32>
    %cst_81 = arith.constant dense<0.000000e+00> : vector<8x64xf32>
    %117 = tpu.matmul %116, %115, %cst_81 {dimension_numbers = #tpu.dot_dimension_numbers<[1], [0], [0], [1], [0, 0, 1, 1], [], []>} : vector<8x128xf32>, vector<128x64xf32>, vector<8x64xf32> -> vector<8x64xf32>
    %c0_82 = arith.constant 0 : index
    %c0_83 = arith.constant 0 : index
    %c0_84 = arith.constant 0 : index
    %118 = vector.load %arg8[%c0_82, %c0_83, %c0_84] : memref<1x8x64xf32, #tpu.memory_space<vmem>>, vector<1x8x64xf32>
    %119 = vector.shape_cast %118 : vector<1x8x64xf32> to vector<8x64xf32>
    %120 = vector.shape_cast %117 : vector<8x64xf32> to vector<1x8x64xf32>
    tpu.vector_store %arg8[%c0_82, %c0_83, %c0_84], %120 {strides = array<i32>} : memref<1x8x64xf32, #tpu.memory_space<vmem>>, vector<1x8x64xf32>,
    return
  }
  func.func @transform_0(%arg0: i32) -> (i32, i32, i32, i32) {
    %c0_i32 = arith.constant 0 : i32
    %c0_i32_0 = arith.constant 0 : i32
    %c0_i32_1 = arith.constant 0 : i32
    %c0_i32_2 = arith.constant 0 : i32
    return %arg0, %c0_i32, %c0_i32_0, %c0_i32_1 : i32, i32, i32, i32
  }
  func.func @transform_1(%arg0: i32) -> (i32, i32) {
    %c0_i32 = arith.constant 0 : i32
    %c0_i32_0 = arith.constant 0 : i32
    %c0_i32_1 = arith.constant 0 : i32
    return %c0_i32, %c0_i32_0 : i32, i32
  }
  func.func @transform_2(%arg0: i32) -> (i32, i32) {
    %c0_i32 = arith.constant 0 : i32
    %c0_i32_0 = arith.constant 0 : i32
    %c0_i32_1 = arith.constant 0 : i32
    return %c0_i32, %c0_i32_0 : i32, i32
  }
  func.func @transform_3(%arg0: i32) -> (i32, i32) {
    %c0_i32 = arith.constant 0 : i32
    %c0_i32_0 = arith.constant 0 : i32
    %c0_i32_1 = arith.constant 0 : i32
    return %c0_i32, %c0_i32_0 : i32, i32
  }
  func.func @transform_4(%arg0: i32) -> (i32, i32) {
    %c0_i32 = arith.constant 0 : i32
    %c0_i32_0 = arith.constant 0 : i32
    %c0_i32_1 = arith.constant 0 : i32
    return %c0_i32, %c0_i32_0 : i32, i32
  }
  func.func @transform_5(%arg0: i32) -> (i32, i32) {
    %c0_i32 = arith.constant 0 : i32
    %c0_i32_0 = arith.constant 0 : i32
    %c0_i32_1 = arith.constant 0 : i32
    return %c0_i32, %c0_i32_0 : i32, i32
  }
  func.func @transform_6(%arg0: i32) -> (i32, i32, i32) {
    %c0_i32 = arith.constant 0 : i32
    %c0_i32_0 = arith.constant 0 : i32
    %c0_i32_1 = arith.constant 0 : i32
    return %arg0, %c0_i32, %c0_i32_0 : i32, i32, i32
  }
  func.func @transform_7(%arg0: i32) -> (i32, i32, i32) {
    %c0_i32 = arith.constant 0 : i32
    %c0_i32_0 = arith.constant 0 : i32
    %c0_i32_1 = arith.constant 0 : i32
    return %arg0, %c0_i32, %c0_i32_0 : i32, i32, i32
  }
}

</mosaic_0001>

<bundles_post_ra>
// kernel: tpu_custom_call.1
= control target key start
LH: loop header
LB: loop body
LE: loop exit
PB: predicated region body
PF: predicated region fallthrough
CT: control target
= control target key end

     0   :  { %s19781_s0 = inlined_call_operand.hbm [shape: f32[2,4,16,16], index: 0, kind: input, shape index: {}]   ;;  %s19782_s1 = inlined_call_operand.vmem [shape: f32[8,36], index: 1, kind: input, shape index: {}]   ;;  %s19783_s2 = inlined_call_operand.vmem [shape: f32[8,1], index: 2, kind: input, shape index: {}]   ;;  %s19784_s3 = inlined_call_operand.vmem [shape: f32[8,72], index: 3, kind: input, shape index: {}]   ;;  %s19785_s4 = inlined_call_operand.vmem [shape: f32[8,1], index: 4, kind: input, shape index: {}]   ;;  %s19786_s5 = inlined_call_operand.hbm [shape: f32[8,128], index: 5, kind: input, shape index: {}]   ;;  %s19787_s6 = inlined_call_operand.hbm [shape: f32[2,8,256], index: 6, kind: output, shape index: {0}]   ;;  %s19788_s7 = inlined_call_operand.hbm [shape: f32[2,8,64], index: 7, kind: output, shape index: {1}]  }
   0x1   :  { %20059 = sst [smem:[#allocation106_spill]] %s19786_s5 }
   0x2   :  { %13 = vsyncpa [#allocation5], 0 }
   0x3   :  { %15 = vsyncpa [#allocation5 + $0x1], 0 }
   0x4   :  { %16 = vsyncpa [#allocation8], 0 }
   0x5   :  { %17 = vsyncpa [#allocation6], 0 }
   0x6   :  { %19 = vsyncpa [#allocation6 + $0x1], 0 }
   0x7   :  { %20 = vsyncpa [#allocation11], 0 }
   0x8   :  { %22 = vsyncpa [#allocation11 + $0x1], 0  ;;  %s11630_s24 = smov 0   ;;  %s11632_s25 = smov 0  }
   0x9   :  { %s11634_s26 = smov 0   ;;  %s11636_s27 = smov 0  }
   0xa LB: > { %20060 = sst [smem:[#allocation16_spill]] %s11562_s26  ;;  %s11651_s28 = sadd.s32 4294967295, %s11566_s27   ;;  %s11566_s27 = sphi %s11636_s27, %s20934_s27   ;;  %s11562_s26 = sphi %s11634_s26, %s20936_s26   ;;  %s11558_s25 = sphi %s11632_s25, %s20938_s25   ;;  %s11554_s24 = sphi %s11630_s24, %s20937_s24  }
   0xb   : > { %s9928_s29 = sadd.s32 4294967294, %s11566_s27   ;;  %s11655_s30 = sadd.s32 1, %s11566_s27  }
   0xc   : > { %20061 = sst [smem:[#allocation17_spill]] %s11655_s30  ;;  %s35_s8 = sadd.s32 1, %s11562_s26 }
   0xd   : > { %s32_s9 = ssub.s32 %s11566_s27, %s11655_s30  ;;  %p42_p0 = scmp.ne.s32.totalorder %s11562_s26, %s11558_s25 }
   0xe   : > { %p33_p1 = scmp.eq.s32.totalorder %s32_s9, 0  ;;  %p43_p2 = scmp.eq.s32.totalorder %s11566_s27, 0 }
   0xf   : > { %p48_p3 = scmp.ne.s32.totalorder %s11558_s25, %s11554_s24  ;;  %p49_p4 = scmp.eq.s32.totalorder %s11651_s28, 0 }
  0x10   : > { %s11667_s10 = scalar_select %p33_p1, %s11562_s26, %s35_s8  }
  0x11   : > { %p11669_p5 = por %p43_p2, %p42_p0  ;;  %p11675_p6 = por %p49_p4, %p48_p3 }
  0x12   : > { %20062 = sst [smem:[#allocation18_spill]] %s11667_s10  ;;  %p177_p7 = scmp.eq.s32.totalorder %s11651_s28, 1 }
  0x13   : > { %p183_p8 = scmp.eq.s32.totalorder %s9928_s29, 1  ;;  %p9929_p9 = scmp.ge.s32.totalorder %s11566_s27, 1 }
  0x14   : > { %p216_p10 = scmp.lt.s32.totalorder %s11566_s27, 3  ;;  %p11682_p11 = por %p177_p7, %p42_p0 }
  0x15   : > { %p11686_p12 = por %p183_p8, %p48_p3  ;;  %s20068_s5 = sld [smem:[#allocation106_spill]] }
  0x16   : > { %p11690_p13 = pnand %p9929_p9, %p216_p10  ;;  %s11568_s19 = smov [#allocation7]  }
  0x17   : > { %s242_s20 = sshll.u32 %s11568_s19, 4  ;;  %p10035_p3 = scmp.lt.s32.totalorder %s11566_s27, 2  ;;  %s243_s20 = int_to_ptr.vmem [resolvable:$true] %s242_s20 }
  0x18   : > { %p10019_p1 = pneg %p11690_p13  ;;  %s253_s21 = sand.u32 1, %s11562_s26  }
  0x19   : > { %p11706_p7 = pnand %p10035_p3, %p11669_p5  ;;  %s9932_s23 = sshll.u32 %s253_s21, 6 }
  0x1a   : > { %p10020_p2 = pnand %p10019_p1, %p49_p4  ;;  %s10001_s29 = sshll.u32 %s11566_s27, 6 }
  0x1b   : > { %s240_s18 = sshll.u32 %s20068_s5, 4  ;;  %s262_s16 = scalar_lea.hbm %s19781_s0, %s10001_s29  ;;  %s241_s18 = int_to_ptr.hbm [resolvable:$true] %s240_s18 }
  0x1c   : > { %10022 = dma.hbm_to_vmem [thread:$0]  (!%p10020_p2), %s241_s18, 128, %s243_s20, [#allocation8]  }
  0x1d   : > { %s263_s17 = sshll.u32 %s262_s16, 4  ;;  %s257_s19 = scalar_lea.vmem [#allocation4], %s9932_s23  ;;  %s264_s17 = int_to_ptr.hbm [resolvable:$true] %s263_s17 }
  0x1e   : > { %s265_s5 = sshll.u32 %s257_s19, 4  ;;  %s254_s10 = scalar_lea.sflag [#allocation5], %s253_s21  ;;  %s266_s5 = int_to_ptr.vmem [resolvable:$true] %s265_s5 }
  0x1f   : > { %s11434_s26 = sshra.s32 %s264_s17, 4  ;;  %p11438_p8 = pneg %p11706_p7  ;;  %s11435_s26 = int_to_ptr.hbm [resolvable:$true] %s11434_s26 }
  0x20   : > { %s11436_s11 = scalar_lea.hbm %s11435_s26, 64  ;;  %s11441_s30 = scalar_lea.hbm %s19781_s0, 128 }
  0x21   : > { %p11437_p5 = scmp.ne.s32.totalorder %s11435_s26, %s11436_s11  ;;  %p11442_p1 = scmp.lt.s32.totalorder %s11435_s26, %s19781_s0 }
  0x22   : > { %p11443_p2 = scmp.lt.s32.totalorder %s11441_s30, %s11436_s11 }
  0x23   : > { %p11439_p9 = pnand %p11438_p8, %p11437_p5 }
  0x24   : > { %p11444_p3 = por %p11443_p2, %p11442_p1 }
  0x25   : > { %p11440_p10 = pneg %p11439_p9 }
  0x27   : > { %p11445_p0 = pnand %p11444_p3, %p11440_p10 }
  0x29   : > { %11448 = shalt.err (!%p11445_p0)
}
  0x2a   : > { %s11569_s21 = smov 128   ;;  %s11570_s23 = smov 8  }
  0x2b   : > { %10026 = dma.hbm_to_vmem [thread:$0]  (!%p11706_p7), %s264_s17, 1024, %s266_s5, %s254_s10, %s11569_s21, %s11569_s21, %s11570_s23  }
  0x2c   : > { %277 = sbr.rel (%p11690_p13) target bundleno = 3014 (0xbc6), region = 44 }
  0x31   : > { %s11727_s9 = sand.u32 1, %s11558_s25  }
  0x32   : > { %s9936_s16 = sshll.u32 %s11727_s9, 6  ;;  %s280_s26 = scalar_lea.sflag [#allocation5], %s11727_s9 }
  0x33   : > { %s283_s30 = scalar_lea.vmem [#allocation4], %s9936_s16 }
  0x34   : > { %11537 = dma.done.wait (%p11675_p6), %s280_s26, 1024  }
  0x35   : > { %11539 = vsyncadd (%p11675_p6), %s280_s26, 4294966272 }
  0x36   : > { %11541 = dma.done.wait (%p49_p4), [#allocation8], 128  }
  0x37   : > { %11543 = vsyncadd (%p49_p4), [#allocation8], 4294967168  ;;  %v329_v0 = vld [vmem:[%s283_s30 + $0x20] sm:$0xff]  ;;  %v327_v1 = vld [vmem:[%s283_s30 + $0x10] sm:$0xff]  ;;  %s11571_s5 = smov 1   ;;  %vm365_vm0 = vcmask 7168  }
  0x38   : > { %v325_v2 = vld [vmem:[%s283_s30] sm:$0xff]  ;;  %349 = vrot.lane.b32.xlu2 %v329_v0, %s11571_s5  ;;  %345 = vrot.lane.b32.xlu1 %v327_v1, %s11571_s5  ;;  %v330_v3 = vld [vmem:[%s283_s30 + $0x28] sm:$0xff]  ;;  %vm374_vm1 = vcmask 138240   ;;  %vm391_vm2 = vcmask 1040384   ;;  %s11572_s10 = smov 127   ;;  %vm635_vm3 = vcmask 1047556  }
  0x39   : > { %341 = vrot.lane.b32.xlu0 %v325_v2, %s11571_s5  ;;  %v328_v4 = vld [vmem:[%s283_s30 + $0x18] sm:$0xff]  ;;  %v326_v5 = vld [vmem:[%s283_s30 + $0x8] sm:$0xff]  ;;  %v331_v7 = vld [vmem:[%s283_s30 + $0x30] sm:$0xff]  ;;  %vm480_vm4 = vcmask 1046528   ;;  %v11573_v50 = vmov 1983009808  }
  0x3a   : > { %v332_v6 = vld [vmem:[%s283_s30 + $0x38] sm:$0xff]  ;;  %v640_v51 = vunpack.c.l.s4 %v11573_v50  ;;  %s11574_s12 = smov 126   ;;  %vm557_vm5 = vcmask 1045504   ;;  %s11576_s15 = smov 16   ;;  %vm1923_vm6 = vcmask 130048   ;;  %vm1929_vm7 = vcmask 261120  }
  0x3b   : > { %s11577_s22 = smov 32   ;;  %s11578_s17 = smov 48   ;;  %vm1935_vm8 = vcmask 392192   ;;  %vm1941_vm9 = vcmask 523264   ;;  %vm1947_vm10 = vcmask 654336   ;;  %vm1953_vm11 = vcmask 785408  }
  0x3c   : > { %s11579_s19 = smov 64   ;;  %s11580_s11 = smov 96   ;;  %vm2011_vm12 = vcmask 1043456   ;;  %vm1959_vm13 = vcmask 916480   ;;  %vm2007_vm14 = vcmask 293888  }
  0x3d   : > { %s11581_s18 = smov 80   ;;  %s11582_s20 = smov 112  }
  0x3e   : > { %s9780_s23 = scalar_lea.sflag [#allocation6], %s11727_s9 }
  0x40   : > { %351 = vrot.lane.b32.xlu2 %v330_v3, %s11571_s5  ;;  %347 = vrot.lane.b32.xlu1 %v328_v4, %s11571_s5 }
  0x41   : > { %343 = vrot.lane.b32.xlu0 %v326_v5, %s11571_s5 }
  0x48   : > { %355 = vrot.lane.b32.xlu1 %v332_v6, %s11571_s5 }
  0x49   : > { %353 = vrot.lane.b32.xlu0 %v331_v7, %s11571_s5 }
  0x92   : > { %v350_v8 = vpop.permute.xlu2 %349 }
  0x93   : > { %v370_v9 = vsel %vm365_vm0, 0.0, %v350_v8 }
  0x94   : > { %v379_v10 = vsel %vm374_vm1, %v370_v9, 0.0 }
  0x95   : > { %v398_v11 = vrot.slane %v379_v10, 7 }
  0x97   : > { %v11752_v15 = vsel %vm391_vm2, 0.0, %v398_v11 }
  0x98   : > { %v634_v22 = vrot.slane %v11752_v15, 4  ;;  %v491_v42 = vrot.slane %v11752_v15, 1 }
  0x9a   : > { %v352_v12 = vpop.permute.xlu2 %351 }
  0x9b   : > { %v371_v13 = vsel %vm365_vm0, 0.0, %v352_v12 }
  0x9c   : > { %v380_v14 = vsel %vm374_vm1, %v371_v13, 0.0 }
  0x9d   : > { %v399_v16 = vrot.slane %v380_v14, 7 }
  0x9f   : > { %v11755_v17 = vsel %vm391_vm2, %v398_v11, %v399_v16  ;;  %v11784_v37 = vsel %vm391_vm2, %v399_v16, 0.0 }
  0xa0   : > { %v11759_v18 = vpack.i.bf16 %v11755_v17, %v11752_v15  ;;  %v492_v43 = vrot.slane %v11755_v17, 1  ;;  %v494_v44 = vrot.slane %v11784_v37, 1 }
  0xa2   : > { %10103 = vrot.lane.b32.xlu1 %v11759_v18, %s11572_s10  ;;  %v11815_v59 = vsel %vm480_vm4, %v491_v42, %v492_v43  ;;  %v11823_v63 = vsel %vm480_vm4, %v492_v43, %v494_v44 }
  0xaa   : > { %v346_v19 = vpop.permute.xlu1 %345 }
  0xab   : > { %v342_v20 = vpop.permute.xlu0 %341  ;;  %v368_v24 = vsel %vm365_vm0, 0.0, %v346_v19 }
  0xac   : > { %v366_v21 = vsel %vm365_vm0, 0.0, %v342_v20  ;;  %v377_v27 = vsel %vm374_vm1, %v368_v24, 0.0 }
  0xad   : > { %v375_v23 = vsel %vm374_vm1, %v366_v21, 0.0  ;;  %v395_v34 = vrot.slane %v377_v27, 7 }
  0xae   : > { %v392_v25 = vrot.slane %v375_v23, 7 }
  0xaf   : > { %v11794_v45 = vsel %vm391_vm2, 0.0, %v395_v34 }
  0xb0   : > { %v11768_v26 = vsel %vm391_vm2, 0.0, %v392_v25  ;;  %v649_v60 = vrot.slane %v11794_v45, 4  ;;  %v486_v6 = vrot.slane %v11794_v45, 1 }
  0xb1   : > { %v11773_v28 = vsel %vm635_vm3, %v634_v22, %v11768_v26  ;;  %v637_v29 = vrot.slane %v11768_v26, 4  ;;  %v481_v49 = vrot.slane %v11768_v26, 1 }
  0xb2   : > { %v348_v30 = vpop.permute.xlu1 %347 }
  0xb3   : > { %v369_v31 = vsel %vm365_vm0, 0.0, %v348_v30  ;;  %v344_v32 = vpop.permute.xlu0 %343  ;;  %v11779_v33 = vsel %vm635_vm3, %v11752_v15, %v637_v29 }
  0xb4   : > { %v378_v35 = vsel %vm374_vm1, %v369_v31, 0.0  ;;  %v367_v36 = vsel %vm365_vm0, 0.0, %v344_v32  ;;  %v11869_v32 = vunpack.c.0.s8 %v640_v51 }
  0xb5   : > { %v396_v38 = vrot.slane %v378_v35, 7  ;;  %v376_v39 = vsel %vm374_vm1, %v367_v36, 0.0 }
  0xb6   : > { %v393_v40 = vrot.slane %v376_v39, 7  ;;  %v642_v51 = vperm.slane %v11773_v28, %v11869_v32 }
  0xb7   : > { %v11788_v41 = vsel %vm391_vm2, %v395_v34, %v396_v38  ;;  %v11809_v55 = vsel %vm391_vm2, %v396_v38, 0.0  ;;  %v568_v34 = vrot.slane %v11752_v15, 2  ;;  %v569_v15 = vrot.slane %v11755_v17, 2 }
  0xb8   : > { %v11797_v46 = vsel %vm391_vm2, %v392_v25, %v393_v40  ;;  %v11800_v47 = vsel %vm391_vm2, %v393_v40, 0.0  ;;  %v10117_v48 = vpack.i.bf16 %v11788_v41, %v11794_v45  ;;  %v489_v4 = vrot.slane %v11809_v55, 1 }
  0xb9   : > { %v484_v52 = vrot.slane %v11800_v47, 1  ;;  %v10092_v54 = vpack.i.bf16 %v11797_v46, %v11768_v26  ;;  %v482_v58 = vrot.slane %v11797_v46, 1  ;;  %v487_v7 = vrot.slane %v11788_v41, 1 }
  0xba   : > { %v356_v53 = vpop.permute.xlu1 %355  ;;  %10118 = vrot.lane.b32.xlu1 %v10117_v48, %s11574_s12  ;;  %10098 = vrot.lane.b32.xlu0 %v10117_v48, %s11572_s10  ;;  %v1153_v8 = vrot.slane %v11788_v41, 4  ;;  %v566_v40 = vrot.slane %v11809_v55, 2  ;;  %v564_v44 = vrot.slane %v11788_v41, 2  ;;  %v563_v55 = vrot.slane %v11794_v45, 2 }
  0xbb   : > { %v373_v56 = vsel %vm365_vm0, 0.0, %v356_v53  ;;  %v354_v57 = vpop.permute.xlu0 %353  ;;  %10093 = vrot.lane.b32.xlu2 %v10092_v54, %s11572_s10  ;;  %v11827_v2 = vsel %vm480_vm4, %v481_v49, %v482_v58  ;;  %v11830_v3 = vsel %vm480_vm4, %v482_v58, %v484_v52  ;;  %v488_v24 = vsel %vm480_vm4, %v486_v6, %v487_v7 }
  0xbc   : > { %v382_v61 = vsel %vm374_vm1, %v373_v56, 0.0  ;;  %v372_v62 = vsel %vm365_vm0, 0.0, %v354_v57  ;;  %v1277_v10 = vrot.slane %v11830_v3, 4  ;;  %v773_v11 = vrot.slane %v11827_v2, 4 }
  0xbd   : > { %v402_v0 = vrot.slane %v382_v61, 7  ;;  %v381_v1 = vsel %vm374_vm1, %v372_v62, 0.0  ;;  %v11847_v14 = vpack.i.bf16 %v11830_v3, %v11827_v2  ;;  %v490_v25 = vsel %vm480_vm4, %v487_v7, %v489_v4 }
  0xbe   : > { %v401_v5 = vrot.slane %v381_v1, 7  ;;  %v774_v30 = vsel %vm635_vm3, %v11815_v59, %v773_v11  ;;  %v11867_v31 = vsel %vm635_vm3, %v11823_v63, %v1277_v10  ;;  %v1289_v38 = vrot.slane %v490_v25, 4 }
  0xbf   : > { %v11837_v9 = vsel %vm391_vm2, %v402_v0, 0.0  ;;  %v785_v39 = vrot.slane %v488_v24, 4  ;;  %v10142_v57 = vpack.i.bf16 %v11823_v63, %v11815_v59  ;;  %v11897_v58 = vsel %vm557_vm5, %v564_v44, %v566_v40 }
  0xc0   : > { %v11842_v12 = vsel %vm391_vm2, %v401_v5, %v402_v0  ;;  %v419_v13 = vsel %vm391_vm2, 0.0, %v401_v5  ;;  %v499_v16 = vrot.slane %v11837_v9, 1  ;;  %v576_v56 = vrot.slane %v11837_v9, 2 }
  0xc1   : > { %v647_v19 = vrot.slane %v419_v13, 4  ;;  %v650_v20 = vsel %vm635_vm3, %v419_v13, %v649_v60  ;;  %v11853_v21 = vsel %vm635_vm3, %v11842_v12, %v1153_v8  ;;  %v10107_v22 = vpack.i.bf16 %v11842_v12, %v419_v13 }
  0xc2   : > { %v496_v23 = vrot.slane %v419_v13, 1  ;;  %10133 = vrot.lane.b32.xlu1 %v11847_v14, %s11572_s10  ;;  %v497_v29 = vrot.slane %v11842_v12, 1  ;;  %10113 = vrot.lane.b32.xlu0 %v10092_v54, %s11574_s12  ;;  %v771_v54 = vrot.slane %v11815_v59, 4  ;;  %v11902_v28 = vsel %vm557_vm5, %v563_v55, %v564_v44 }
  0xc3   : > { %v648_v27 = vsel %vm635_vm3, %v647_v19, %v11794_v45  ;;  %10108 = vrot.lane.b32.xlu2 %v10107_v22, %s11572_s10  ;;  %v558_v60 = vrot.slane %v11768_v26, 2  ;;  %v11908_v45 = vsel %vm557_vm5, %v568_v34, %v569_v15  ;;  %v573_v59 = vrot.slane %v419_v13, 2 }
  0xc4   : > { %v498_v35 = vsel %vm480_vm4, %v496_v23, %v497_v29  ;;  %v500_v36 = vsel %vm480_vm4, %v497_v29, %v499_v16  ;;  %v574_v61 = vrot.slane %v11842_v12, 2  ;;  %v685_v62 = vrot.slane %v642_v51, 4 }
  0xc5   : > { %v1287_v42 = vrot.slane %v500_v36, 4  ;;  %v783_v43 = vrot.slane %v498_v35, 4  ;;  %v11878_v48 = vpack.i.bf16 %v500_v36, %v498_v35  ;;  %v786_v49 = vsel %vm635_vm3, %v498_v35, %v785_v39 }
  0xc6   : > { %v11882_v50 = vsel %vm635_vm3, %v500_v36, %v1289_v38  ;;  %v646_v0 = vperm.slane %v11779_v33, %v11869_v32  ;;  %v1489_v26 = vrot.slane %v11897_v58, 4  ;;  %v654_v4 = vperm.slane %v648_v27, %v11869_v32 }
  0xc7   : > { %v784_v52 = vsel %vm635_vm3, %v783_v43, %v488_v24  ;;  %v11889_v53 = vsel %vm635_vm3, %v1287_v42, %v490_v25  ;;  %v772_v5 = vsel %vm635_vm3, %v771_v54, %v11827_v2  ;;  %v985_v6 = vrot.slane %v11902_v28, 4 }
  0xc8   : > { %v790_v1 = vperm.slane %v784_v52, %v11869_v32  ;;  %v11924_v7 = vsel %vm557_vm5, %v573_v59, %v574_v61  ;;  %v11927_v8 = vsel %vm557_vm5, %v574_v61, %v576_v56  ;;  %v658_v33 = vperm.slane %v650_v20, %v11869_v32 }
  0xc9   : > { %v1487_v9 = vrot.slane %v11927_v8, 4  ;;  %v11933_v10 = vsel %vm635_vm3, %v11927_v8, %v1489_v26  ;;  %v983_v2 = vrot.slane %v11924_v7, 4  ;;  %v794_v11 = vperm.slane %v786_v49, %v11869_v32 }
  0xca   : > { %10148 = vrot.lane.b32.xlu1 %v11878_v48, %s11572_s10  ;;  %10128 = vrot.lane.b32.xlu0 %v10107_v22, %s11574_s12  ;;  %v11939_v13 = vsel %vm635_vm3, %v11924_v7, %v985_v6  ;;  %v683_v16 = vrot.slane %v654_v4, 4  ;;  %v778_v19 = vperm.slane %v772_v5, %v11869_v32  ;;  %v782_v22 = vperm.slane %v774_v30, %v11869_v32 }
  0xcb   : > { %10123 = vrot.lane.b32.xlu2 %v11759_v18, %s11574_s12  ;;  %v559_v18 = vrot.slane %v11797_v46, 2  ;;  %v11945_v20 = vsel %vm635_vm3, %v1487_v9, %v11897_v58  ;;  %v984_v23 = vsel %vm635_vm3, %v983_v2, %v11902_v28  ;;  %v819_v27 = vrot.slane %v790_v1, 4 }
  0xcc   : > { %v10137_v29 = vpack.i.bf16 %v490_v25, %v488_v24  ;;  %v971_v34 = vrot.slane %v11908_v45, 4  ;;  %v11951_v35 = vsel %vm635_vm3, %v683_v16, %v642_v51  ;;  %v11954_v36 = vsel %vm635_vm3, %v654_v4, %v685_v62 }
  0xcd   : > { %v560_v30 = vsel %vm557_vm5, %v558_v60, %v559_v18  ;;  %v11959_v38 = vsel %vm635_vm3, %v819_v27, %v778_v19  ;;  %v821_v39 = vrot.slane %v778_v19, 4  ;;  %v1139_v40 = vrot.slane %v11755_v17, 4 }
  0xce   : > { %v695_v24 = vrot.slane %v658_v33, 4  ;;  %v831_v25 = vrot.slane %v794_v11, 4  ;;  %v833_v42 = vrot.slane %v782_v22, 4  ;;  %v990_v43 = vperm.slane %v984_v23, %v11869_v32 }
  0xcf   : > { %v11966_v44 = vsel %vm635_vm3, %v790_v1, %v821_v39  ;;  %v697_v49 = vrot.slane %v646_v0, 4  ;;  %v1151_v51 = vrot.slane %v11842_v12, 4  ;;  %v972_v52 = vsel %vm635_vm3, %v971_v34, %v560_v30 }
  0xd0   : > { %v11971_v54 = vsel %vm635_vm3, %v695_v24, %v646_v0  ;;  %v11974_v55 = vsel %vm635_vm3, %v831_v25, %v782_v22  ;;  %v1275_v56 = vrot.slane %v11823_v63, 4  ;;  %v11981_v60 = vsel %vm635_vm3, %v794_v11, %v833_v42 }
  0xd1   : > { %v10177_v59 = vpack.i.bf16 %v11897_v58, %v11902_v28  ;;  %v978_v12 = vperm.slane %v972_v52, %v11869_v32  ;;  %v1019_v61 = vrot.slane %v990_v43, 4  ;;  %v1140_v62 = vsel %vm635_vm3, %v1139_v40, %v11797_v46 }
  0xd2   : > { %10163 = vrot.lane.b32.xlu1 %v10142_v57, %s11574_s12  ;;  %10143 = vrot.lane.b32.xlu0 %v10142_v57, %s11572_s10  ;;  %v11978_v57 = vsel %vm635_vm3, %v658_v33, %v697_v49  ;;  %v1152_v0 = vsel %vm635_vm3, %v1151_v51, %v11788_v41  ;;  %v561_v63 = vrot.slane %v11800_v47, 2  ;;  %v1276_v4 = vsel %vm635_vm3, %v1275_v56, %v11830_v3 }
  0xd3   : > { %10138 = vrot.lane.b32.xlu2 %v10137_v29, %s11572_s10  ;;  %v11993_v1 = vsel %vm635_vm3, %v1019_v61, %v978_v12  ;;  %v1158_v26 = vperm.slane %v1152_v0, %v11869_v32  ;;  %v1021_v5 = vrot.slane %v978_v12, 4  ;;  %v1146_v41 = vperm.slane %v1140_v62, %v11869_v32 }
  0xd4   : > { %v562_v47 = vsel %vm557_vm5, %v559_v18, %v561_v63  ;;  %v1141_v2 = vrot.slane %v11797_v46, 4  ;;  %v973_v11 = vrot.slane %v560_v30, 4  ;;  %v1294_v19 = vperm.slane %v11889_v53, %v11869_v32 }
  0xd5   : > { %v1187_v6 = vrot.slane %v1158_v26, 4  ;;  %v12004_v33 = vsel %vm635_vm3, %v990_v43, %v1021_v5  ;;  %v10172_v3 = vpack.i.bf16 %v562_v47, %v560_v30  ;;  %v1189_v16 = vrot.slane %v1146_v41, 4 }
  0xd6   : > { %v974_v46 = vsel %vm635_vm3, %v11908_v45, %v973_v11  ;;  %v1142_v22 = vsel %vm635_vm3, %v11755_v17, %v1141_v2  ;;  %v1282_v53 = vperm.slane %v1276_v4, %v11869_v32  ;;  %v1323_v23 = vrot.slane %v1294_v19, 4 }
  0xd7   : > { %v12007_v9 = vsel %vm635_vm3, %v1187_v6, %v1146_v41  ;;  %v12018_v18 = vsel %vm635_vm3, %v1158_v26, %v1189_v16  ;;  %v10187_v34 = vpack.i.bf16 %v11927_v8, %v11924_v7  ;;  %v1162_v17 = vperm.slane %v11853_v21, %v11869_v32 }
  0xd8   : > { %v12036_v39 = vsel %vm635_vm3, %v1323_v23, %v1282_v53  ;;  %v1477_v40 = vrot.slane %v562_v47, 4  ;;  %v1286_v43 = vperm.slane %v11867_v31, %v11869_v32  ;;  %v1325_v49 = vrot.slane %v1282_v53, 4 }
  0xd9   : > { %v1199_v24 = vrot.slane %v1162_v17, 4  ;;  %v1498_v0 = vperm.slane %v11933_v10, %v11869_v32  ;;  %v1494_v4 = vperm.slane %v11945_v20, %v11869_v32 }
  0xda   : > { %10178 = vrot.lane.b32.xlu1 %v10177_v59, %s11572_s10  ;;  %10158 = vrot.lane.b32.xlu0 %v10137_v29, %s11574_s12  ;;  %v1150_v29 = vperm.slane %v1142_v22, %v11869_v32  ;;  %v12059_v59 = vsel %vm635_vm3, %v1294_v19, %v1325_v49  ;;  %v1337_v26 = vrot.slane %v1286_v43, 4  ;;  %v11575_v22 = vmov 1934713408  }
  0xdb   : > { %10153 = vrot.lane.b32.xlu2 %v11847_v14, %s11574_s12  ;;  %v571_v14 = vrot.slane %v11784_v37, 2  ;;  %v1523_v10 = vrot.slane %v1494_v4, 4  ;;  %v1535_v20 = vrot.slane %v1498_v0, 4 }
  0xdc   : > { %v1201_v42 = vrot.slane %v1150_v29, 4  ;;  %v12049_v51 = vsel %vm635_vm3, %v1199_v24, %v1150_v29 }
  0xdd   : > { %v572_v37 = vsel %vm557_vm5, %v569_v15, %v571_v14  ;;  %v1298_v15 = vperm.slane %v11882_v50, %v11869_v32 }
  0xde   : > { %v10182_v27 = vpack.i.bf16 %v572_v37, %v11908_v45  ;;  %v1475_v25 = vrot.slane %v572_v37, 4  ;;  %v1478_v50 = vsel %vm635_vm3, %v572_v37, %v1477_v40  ;;  %v12056_v56 = vsel %vm635_vm3, %v1162_v17, %v1201_v42 }
  0xdf   : > { %v1335_v52 = vrot.slane %v1298_v15, 4  ;;  %v1486_v62 = vperm.slane %v1478_v50, %v11869_v32  ;;  %v12080_v41 = vsel %vm635_vm3, %v1298_v15, %v1337_v26 }
  0xe0   : > { %v1476_v31 = vsel %vm635_vm3, %v1475_v25, %v562_v47 }
  0xe1   : > { %v12066_v61 = vsel %vm635_vm3, %v1335_v52, %v1286_v43  ;;  %v1482_v63 = vperm.slane %v1476_v31, %v11869_v32  ;;  %v1537_v5 = vrot.slane %v1486_v62, 4 }
  0xe2   : > { %610 = vrot.lane.b32.xlu1 %v560_v30, %s11574_s12  ;;  %10173 = vrot.lane.b32.xlu0 %v10172_v3, %s11572_s10  ;;  %v994_v30 = vperm.slane %v11939_v13, %v11869_v32 }
  0xe3   : > { %10168 = vrot.lane.b32.xlu2 %v11878_v48, %s11574_s12  ;;  %v982_v48 = vperm.slane %v974_v46, %v11869_v32  ;;  %v1525_v6 = vrot.slane %v1482_v63, 4 }
  0xe4   : > { %v1031_v21 = vrot.slane %v994_v30, 4 }
  0xe5   : > { %v1033_v13 = vrot.slane %v982_v48, 4  ;;  %v12086_v2 = vsel %vm635_vm3, %v1494_v4, %v1525_v6 }
  0xe6   : > { %v12062_v12 = vsel %vm635_vm3, %v1031_v21, %v982_v48  ;;  %20073 = vst [vmem:[#allocation22_spill] sm:$0xff] %v12086_v2 }
  0xe7   : > { %20071 = vst [vmem:[#allocation20_spill] sm:$0xff] %v12062_v12 }
  0xea   : > { %616 = vrot.lane.b32.xlu1 %v11897_v58, %s11574_s12  ;;  %10188 = vrot.lane.b32.xlu0 %v10187_v34, %s11572_s10  ;;  %v12053_v58 = vsel %vm635_vm3, %v994_v30, %v1033_v13 }
  0xeb   : > { %10183 = vrot.lane.b32.xlu2 %v10182_v27, %s11572_s10  ;;  %20070 = vst [vmem:[#allocation19_spill] sm:$0xff] %v12053_v58 }
  0xf2   : > { %622 = vrot.lane.b32.xlu1 %v11924_v7, %s11574_s12  ;;  %614 = vrot.lane.b32.xlu0 %v11902_v28, %s11574_s12  ;;  %v12083_v7 = vsel %vm635_vm3, %v1498_v0, %v1537_v5  ;;  %v12092_v28 = vsel %vm635_vm3, %v1523_v10, %v1482_v63 }
  0xf3   : > { %612 = vrot.lane.b32.xlu2 %v562_v47, %s11574_s12  ;;  %20072 = vst [vmem:[#allocation21_spill] sm:$0xff] %v12083_v7  ;;  %v12095_v47 = vsel %vm635_vm3, %v1535_v20, %v1486_v62 }
  0xf4   : > { %20074 = vst [vmem:[#allocation23_spill] sm:$0xff] %v12092_v28 }
  0xf5   : > { %20075 = vst [vmem:[#allocation24_spill] sm:$0xff] %v12095_v47 }
  0xfa   : > { %620 = vrot.lane.b32.xlu0 %v572_v37, %s11574_s12  ;;  %v688_v37 = vunpack.c.l.s4 %v11575_v22 }
  0xfb   : > { %618 = vrot.lane.b32.xlu2 %v11908_v45, %s11574_s12 }
  0xfc   : > { %v12109_v53 = vunpack.c.0.s8 %v688_v37 }
  0xfe   : > { %20077 = vst [vmem:[#allocation26_spill] sm:$0xff] %v12109_v53  ;;  %v12119_v48 = vperm.slane %v11951_v35, %v12109_v53  ;;  %v12123_v29 = vperm.slane %v11954_v36, %v12109_v53  ;;  %v12127_v34 = vperm.slane %v11966_v44, %v12109_v53  ;;  %v12131_v30 = vperm.slane %v11971_v54, %v12109_v53 }
  0xff   : > { %v12135_v17 = vperm.slane %v11974_v55, %v12109_v53  ;;  %v12139_v35 = vperm.slane %v11981_v60, %v12109_v53  ;;  %v12143_v36 = vperm.slane %v11959_v38, %v12109_v53  ;;  %v12147_v44 = vperm.slane %v11978_v57, %v12109_v53 }
 0x100   : > { %20079 = vst [vmem:[#allocation28_spill] sm:$0xff] %v12119_v48  ;;  %v12151_v54 = vperm.slane %v11993_v1, %v12109_v53  ;;  %v12160_v57 = vperm.slane %v12004_v33, %v12109_v53  ;;  %v12165_v49 = vperm.slane %v12018_v18, %v12109_v53  ;;  %v12169_v21 = vperm.slane %v12049_v51, %v12109_v53 }
 0x101   : > { %20080 = vst [vmem:[#allocation29_spill] sm:$0xff] %v12143_v36  ;;  %v12182_v18 = vperm.slane %v12007_v9, %v12109_v53  ;;  %v12186_v51 = vperm.slane %v12059_v59, %v12109_v53  ;;  %v12191_v6 = vperm.slane %v12036_v39, %v12109_v53  ;;  %v12196_v20 = vperm.slane %v12066_v61, %v12109_v53 }
 0x102   : > { %20081 = vst [vmem:[#allocation30_spill] sm:$0xff] %v12151_v54 }
 0x103   : > { %624 = vrot.lane.b32.xlu2 %v11927_v8, %s11574_s12  ;;  %20082 = vst [vmem:[#allocation31_spill] sm:$0xff] %v12169_v21 }
 0x104   : > { %20084 = vst [vmem:[#allocation33_spill] sm:$0xff] %v12182_v18  ;;  %v20098_v18 = vrot.slane %v12119_v48, 4 }
 0x105   : > { %20085 = vst [vmem:[#allocation34_spill] sm:$0xff] %v12191_v6 }
 0x106   : > { %20086 = vst [vmem:[#allocation35_spill] sm:$0xff] %v12196_v20 }
 0x114   : > { %v10104_v16 = vpop.permute.xlu1 %10103 }
 0x115   : > { %v10094_v3 = vpop.permute.xlu2 %10093  ;;  %v10105_v15 = vunpack.i.l.bf16 %v10104_v16  ;;  %v10106_v40 = vunpack.i.h.bf16 %v10104_v16 }
 0x116   : > { %v10096_v55 = vunpack.i.h.bf16 %v10094_v3  ;;  %v10095_v24 = vunpack.i.l.bf16 %v10094_v3 }
 0x117   : > { %v659_v43 = vrot.slane %v10105_v15, 4  ;;  %v1163_v50 = vrot.slane %v10106_v40, 4 }
 0x118   : > { %v1165_v0 = vrot.slane %v10096_v55, 4  ;;  %v661_v63 = vrot.slane %v10095_v24, 4 }
 0x119   : > { %v660_v3 = vsel %vm635_vm3, %v659_v43, %v10095_v24  ;;  %v1164_v22 = vsel %vm635_vm3, %v1163_v50, %v10096_v55 }
 0x11a   : > { %v1166_v10 = vsel %vm635_vm3, %v10106_v40, %v1165_v0  ;;  %v662_v61 = vsel %vm635_vm3, %v10105_v15, %v661_v63  ;;  %v666_v24 = vperm.slane %v660_v3, %v11869_v32  ;;  %v12217_v50 = vperm.slane %v1164_v22, %v11869_v32 }
 0x11b   : > { %v12222_v0 = vperm.slane %v12080_v41, %v12109_v53  ;;  %v12228_v63 = vperm.slane %v662_v61, %v11869_v32 }
 0x11d   : > { %v12099_v11 = vpop.permute.xlu2 %10108  ;;  %20088 = vst [vmem:[#allocation37_spill] sm:$0xff] %v12222_v0 }
 0x11e   : > { %v10110_v52 = vunpack.i.l.bf16 %v12099_v11  ;;  %v10111_v37 = vunpack.i.h.bf16 %v12099_v11 }
 0x120   : > { %v671_v39 = vrot.slane %v10110_v52, 4  ;;  %v1175_v3 = vrot.slane %v10111_v37, 4 }
 0x125   : > { %v12101_v14 = vpop.permute.xlu2 %10123 }
 0x126   : > { %v19793_v62 = vunpack.i.l.bf16 %v12101_v14  ;;  %v10126_v61 = vunpack.i.h.bf16 %v12101_v14 }
 0x12c   : > { %v12103_v19 = vpop.permute.xlu1 %10118  ;;  %v12107_v45 = vpop.permute.xlu0 %10098 }
 0x12d   : > { %v12105_v46 = vpop.permute.xlu2 %10138  ;;  %v10100_v5 = vunpack.i.l.bf16 %v12107_v45  ;;  %v10101_v9 = vunpack.i.h.bf16 %v12107_v45  ;;  %v12210_v45 = vperm.slane %v12056_v56, %v12109_v53  ;;  %v12225_v56 = vperm.slane %v1166_v10, %v11869_v32 }
 0x12e   : > { %20076 = vst [vmem:[#allocation25_spill] sm:$0xff] %v12105_v46  ;;  %v10120_v22 = vunpack.i.l.bf16 %v12103_v19  ;;  %v709_v10 = vrot.slane %v666_v24, 4  ;;  %v20090_v1 = vunpack.i.h.bf16 %v12103_v19 }
 0x12f   : > { %20087 = vst [vmem:[#allocation36_spill] sm:$0xff] %v12210_v45  ;;  %v672_v43 = vsel %vm635_vm3, %v671_v39, %v10100_v5  ;;  %v1177_v40 = vrot.slane %v10101_v9, 4  ;;  %v747_v39 = vrot.slane %v19793_v62, 4  ;;  %v673_v11 = vrot.slane %v10100_v5, 4 }
 0x130   : > { %v678_v16 = vperm.slane %v672_v43, %v11869_v32  ;;  %v1176_v60 = vsel %vm635_vm3, %v1175_v3, %v10101_v9  ;;  %v19794_v62 = vunpack.i.l.bf16 %v12105_v46  ;;  %v1265_v13 = vrot.slane %v20090_v1, 4 }
 0x131   : > { %v1178_v5 = vsel %vm635_vm3, %v10111_v37, %v1177_v40  ;;  %v12259_v40 = vperm.slane %v1176_v60, %v11869_v32  ;;  %v20099_v45 = vrot.slane %v12123_v29, 4 }
 0x132   : > { %v710_v37 = vsel %vm635_vm3, %v678_v16, %v709_v10  ;;  %v12262_v3 = vperm.slane %v1178_v5, %v11869_v32 }
 0x133   : > { %v718_v5 = vperm.slane %v710_v37, %v12109_v53 }
 0x134   : > { %v12111_v23 = vpop.permute.xlu1 %10133  ;;  %v12115_v8 = vpop.permute.xlu0 %10113 }
 0x135   : > { %v12113_v27 = vpop.permute.xlu2 %10153  ;;  %v10115_v55 = vunpack.i.l.bf16 %v12115_v8  ;;  %v10116_v43 = vunpack.i.h.bf16 %v12115_v8 }
 0x136   : > { %20078 = vst [vmem:[#allocation27_spill] sm:$0xff] %v12113_v27 }
 0x137   : > { %v748_v38 = vsel %vm635_vm3, %v747_v39, %v10115_v55  ;;  %v674_v39 = vsel %vm635_vm3, %v10110_v52, %v673_v11  ;;  %v761_v11 = vrot.slane %v10120_v22, 4  ;;  %v749_v8 = vrot.slane %v10115_v55, 4 }
 0x138   : > { %v754_v47 = vperm.slane %v748_v38, %v11869_v32  ;;  %v1253_v38 = vrot.slane %v10116_v43, 4  ;;  %v12270_v10 = vperm.slane %v674_v39, %v11869_v32 }
 0x13a   : > { %v797_v7 = vrot.slane %v754_v47, 4  ;;  %v1254_v58 = vsel %vm635_vm3, %v10126_v61, %v1253_v38 }
 0x13c   : > { %v12172_v31 = vpop.permute.xlu1 %10148  ;;  %v12178_v4 = vpop.permute.xlu0 %10128 }
 0x13d   : > { %20083 = vst [vmem:[#allocation32_spill] sm:$0xff] %v12172_v31  ;;  %v12176_v26 = vpop.permute.xlu2 %10168  ;;  %v19792_v15 = vunpack.i.l.bf16 %v12178_v4  ;;  %v10150_v37 = vunpack.i.l.bf16 %v12172_v31  ;;  %v20100_v0 = vunpack.i.h.bf16 %v12172_v31 }
 0x13f   : > { %v759_v41 = vrot.slane %v19792_v15, 4  ;;  %v1251_v15 = vrot.slane %v10126_v61, 4  ;;  %v10131_v61 = vunpack.i.h.bf16 %v12178_v4  ;;  %v1375_v20 = vrot.slane %v20100_v0, 4 }
 0x141   : > { %v760_v25 = vsel %vm635_vm3, %v759_v41, %v10120_v22  ;;  %v707_v41 = vrot.slane %v678_v16, 4  ;;  %v1252_v16 = vsel %vm635_vm3, %v1251_v15, %v10116_v43  ;;  %v719_v15 = vrot.slane %v12270_v10, 4 }
 0x142   : > { %v766_v9 = vperm.slane %v760_v25, %v11869_v32  ;;  %v873_v25 = vrot.slane %v19794_v62, 4  ;;  %v12289_v52 = vperm.slane %v1252_v16, %v11869_v32  ;;  %v735_v62 = vrot.slane %v718_v5, 4 }
 0x143   : > { %v708_v39 = vsel %vm635_vm3, %v707_v41, %v666_v24  ;;  %v20091_v24 = vunpack.i.l.bf16 %v12101_v14  ;;  %v20093_v16 = vunpack.i.l.bf16 %v12178_v4  ;;  %v1266_v0 = vsel %vm635_vm3, %v10131_v61, %v1265_v13 }
 0x144   : > { %v12232_v59 = vpop.permute.xlu1 %10163  ;;  %v12238_v33 = vpop.permute.xlu0 %10143  ;;  %v795_v2 = vrot.slane %v766_v9, 4  ;;  %v798_v55 = vsel %vm635_vm3, %v766_v9, %v797_v7  ;;  %v12298_v38 = vperm.slane %v708_v39, %v12109_v53  ;;  %v12302_v9 = vperm.slane %v1254_v58, %v11869_v32 }
 0x145   : > { %20089 = vst [vmem:[#allocation38_spill] sm:$0xff] %v12232_v59  ;;  %v12243_v42 = vpop.permute.xlu2 %10183  ;;  %v750_v41 = vsel %vm635_vm3, %v20091_v24, %v749_v8  ;;  %v762_v43 = vsel %vm635_vm3, %v20093_v16, %v761_v11  ;;  %v806_v14 = vperm.slane %v798_v55, %v12109_v53  ;;  %v20095_v8 = vunpack.i.l.bf16 %v12111_v23 }
 0x146   : > { %20092 = vst [vmem:[#allocation39_spill] sm:$0xff] %v12298_v38  ;;  %v796_v7 = vsel %vm635_vm3, %v795_v2, %v754_v47  ;;  %v871_v47 = vrot.slane %v10150_v37, 4  ;;  %v12318_v58 = vperm.slane %v750_v41, %v11869_v32  ;;  %v20096_v55 = vrot.slane %v12127_v34, 4 }
 0x147   : > { %v12308_v28 = vperm.slane %v796_v7, %v12109_v53  ;;  %v12313_v24 = vrot.slane %v20095_v8, 4  ;;  %v12325_v7 = vsel %vm635_vm3, %v735_v62, %v12123_v29  ;;  %v20097_v8 = vunpack.i.l.bf16 %v12113_v27 }
 0x148   : > { %v848_v16 = vsel %vm635_vm3, %v20096_v55, %v806_v14  ;;  %v1263_v2 = vrot.slane %v10131_v61, 4  ;;  %v12333_v12 = vperm.slane %v762_v43, %v11869_v32  ;;  %v734_v55 = vsel %vm635_vm3, %v12298_v38, %v20098_v18 }
 0x149   : > { %20094 = vst [vmem:[#allocation40_spill] sm:$0xff] %v12308_v28  ;;  %v845_v4 = vrot.slane %v12308_v28, 4  ;;  %v885_v39 = vrot.slane %v20097_v8, 4  ;;  %v10197_v28 = vpack.i.bf16 %v848_v16, %v12325_v7  ;;  %v12347_v8 = vsel %vm635_vm3, %v718_v5, %v20099_v45 }
 0x14a   : > { %v20101_v7 = vunpack.i.l.bf16 %v12105_v46  ;;  %v19804_v18 = vunpack.i.l.bf16 %v12176_v26  ;;  %v720_v45 = vsel %vm635_vm3, %v719_v15, %v12228_v63  ;;  %v20102_v5 = vunpack.i.h.bf16 %v12103_v19 }
 0x14b   : > { %v846_v62 = vsel %vm635_vm3, %v12143_v36, %v845_v4  ;;  %v807_v48 = vrot.slane %v12333_v12, 4  ;;  %v874_v4 = vsel %vm635_vm3, %v10150_v37, %v873_v25  ;;  %v849_v19 = vrot.slane %v806_v14, 4 }
 0x14c   : > { %v12272_v60 = vpop.permute.xlu1 %10178  ;;  %v12276_v1 = vpop.permute.xlu0 %10158  ;;  %v872_v16 = vsel %vm635_vm3, %v871_v47, %v20101_v7  ;;  %v10192_v29 = vpack.i.bf16 %v846_v62, %v734_v55  ;;  %v1264_v43 = vsel %vm635_vm3, %v1263_v2, %v20102_v5  ;;  %v19805_v47 = vunpack.i.h.bf16 %v12232_v59 }
 0x14d   : > { %v12291_v22 = vpop.permute.xlu2 %612  ;;  %v12369_v7 = vperm.slane %v872_v16, %v11869_v32  ;;  %v10165_v62 = vunpack.i.l.bf16 %v12232_v59  ;;  %v20103_v2 = vunpack.i.h.bf16 %v12176_v26  ;;  %v20104_v61 = vunpack.i.h.bf16 %v12105_v46 }
 0x14e   : > { %10193 = vrot.lane.b32.xlu0 %v10192_v29, %s11576_s15  ;;  %v726_v37 = vperm.slane %v720_v45, %v12109_v53  ;;  %v895_v16 = vrot.slane %v19804_v18, 4  ;;  %v12387_v29 = vperm.slane %v1264_v43, %v11869_v32  ;;  %v12390_v14 = vperm.slane %v1266_v0, %v11869_v32 }
 0x14f   : > { %v12377_v13 = vrot.slane %v20103_v2, 4  ;;  %v1376_v55 = vsel %vm635_vm3, %v1375_v20, %v20104_v61  ;;  %v1387_v20 = vrot.slane %v19805_v47, 4  ;;  %v850_v45 = vsel %vm635_vm3, %v12127_v34, %v849_v19 }
 0x150   : > { %v808_v43 = vsel %vm635_vm3, %v807_v48, %v12318_v58  ;;  %v12405_v0 = vperm.slane %v1376_v55, %v11869_v32  ;;  %v12408_v18 = vperm.slane %v874_v4, %v11869_v32  ;;  %v883_v25 = vrot.slane %v10165_v62, 4 }
 0x151   : > { %v20107_v47 = vunpack.i.l.bf16 %v12238_v33  ;;  %v10202_v31 = vpack.i.bf16 %v850_v45, %v12347_v8  ;;  %v739_v34 = vrot.slane %v726_v37, 4  ;;  %v19812_v48 = vunpack.i.l.bf16 %v12276_v1 }
 0x152   : > { %20105 = vst [vmem:[#allocation41_spill] sm:$0xff] %v12405_v0  ;;  %v814_v55 = vperm.slane %v808_v43, %v12109_v53  ;;  %v20108_v4 = vrot.slane %v12228_v63, 4  ;;  %v20110_v38 = vunpack.i.h.bf16 %v12113_v27  ;;  %v12431_v19 = vsel %vm635_vm3, %v10165_v62, %v885_v39 }
 0x153   : > { %20106 = vst [vmem:[#allocation42_spill] sm:$0xff] %v12408_v18  ;;  %v859_v36 = vrot.slane %v20107_v47, 4  ;;  %v20109_v47 = vunpack.i.l.bf16 %v12243_v42  ;;  %v20114_v39 = vunpack.i.l.bf16 %v12111_v23  ;;  %v20118_v0 = vrot.slane %v12318_v58, 4 }
 0x154   : > { %v12321_v11 = vpop.permute.xlu1 %610  ;;  %v12335_v41 = vpop.permute.xlu0 %10173  ;;  %v722_v5 = vsel %vm635_vm3, %v12270_v10, %v20108_v4  ;;  %v1388_v8 = vsel %vm635_vm3, %v1387_v20, %v20110_v38  ;;  %v20112_v4 = vrot.slane %v12135_v17, 4  ;;  %v20113_v38 = vunpack.i.l.bf16 %v12113_v27 }
 0x155   : > { %v12373_v15 = vpop.permute.xlu2 %618  ;;  %v995_v59 = vrot.slane %v20109_v47, 4  ;;  %v860_v62 = vsel %vm635_vm3, %v859_v36, %v20114_v39  ;;  %v20116_v27 = vunpack.i.l.bf16 %v12272_v60 }
 0x156   : > { %v1083_v61 = vrot.slane %v12373_v15, 4  ;;  %10198 = vrot.lane.b32.xlu0 %v10197_v28, %s11577_s22  ;;  %v12440_v47 = vsel %vm635_vm3, %v20112_v4, %v814_v55  ;;  %v884_v20 = vsel %vm635_vm3, %v883_v25, %v20113_v38  ;;  %v12451_v28 = vsel %vm635_vm3, %v739_v34, %v12131_v30 }
 0x157   : > { %v1085_v4 = vrot.slane %v12321_v11, 4  ;;  %v730_v34 = vperm.slane %v722_v5, %v12109_v53  ;;  %v810_v38 = vsel %vm635_vm3, %v12333_v12, %v20118_v0 }
 0x158   : > { %v1084_v45 = vsel %vm635_vm3, %v1083_v61, %v12321_v11  ;;  %v853_v61 = vrot.slane %v814_v55, 4  ;;  %v20117_v11 = vrot.slane %v12131_v30, 4 }
 0x159   : > { %v12458_v46 = vperm.slane %v1084_v45, %v11869_v32  ;;  %v743_v55 = vrot.slane %v730_v34, 4 }
 0x15a   : > { %v12470_v45 = vsel %vm635_vm3, %v726_v37, %v20117_v11  ;;  %v12479_v5 = vsel %vm635_vm3, %v12135_v17, %v853_v61 }
 0x15b   : > { %20115 = vst [vmem:[#allocation43_spill] sm:$0xff] %v12458_v46  ;;  %v12495_v17 = vsel %vm635_vm3, %v743_v55, %v12147_v44  ;;  %v1086_v55 = vsel %vm635_vm3, %v12373_v15, %v1085_v4  ;;  %v12529_v15 = vperm.slane %v860_v62, %v11869_v32  ;;  %v20124_v62 = vunpack.i.l.bf16 %v12276_v1 }
 0x15c   : > { %v12393_v2 = vpop.permute.xlu1 %616  ;;  %v12398_v6 = vpop.permute.xlu0 %10188 }
 0x15d   : > { %v20111_v10 = vunpack.i.l.bf16 %v12398_v6  ;;  %v1601_v12 = vrot.slane %v12393_v2, 4 }
 0x15e   : > { %10203 = vrot.lane.b32.xlu0 %v10202_v31, %s11578_s17  ;;  %v1589_v31 = vrot.slane %v12291_v22, 4 }
 0x15f   : > { %v1007_v43 = vrot.slane %v20111_v10, 4  ;;  %v896_v10 = vsel %vm635_vm3, %v895_v16, %v19812_v48 }
 0x160   : > { %v902_v11 = vperm.slane %v896_v10, %v11869_v32  ;;  %v20123_v10 = vunpack.i.h.bf16 %v12238_v33 }
 0x161   : > { %v1008_v16 = vsel %vm635_vm3, %v1007_v43, %v20116_v27  ;;  %v818_v27 = vperm.slane %v810_v38, %v12109_v53  ;;  %v1109_v43 = vrot.slane %v12458_v46, 4 }
 0x162   : > { %v1363_v58 = vrot.slane %v20123_v10, 4  ;;  %v931_v46 = vrot.slane %v902_v11, 4 }
 0x164   : > { %v623_v25 = vpop.permute.xlu1 %622  ;;  %v615_v63 = vpop.permute.xlu0 %614 }
 0x165   : > { %v1095_v39 = vrot.slane %v623_v25, 4  ;;  %v1097_v48 = vrot.slane %v615_v63, 4 }
 0x167   : > { %v1096_v36 = vsel %vm635_vm3, %v1095_v39, %v615_v63  ;;  %v1098_v30 = vsel %vm635_vm3, %v623_v25, %v1097_v48  ;;  %v20119_v63 = vrot.slane %v12139_v35, 4  ;;  %v19820_v48 = vunpack.i.h.bf16 %v12276_v1 }
 0x168   : > { %v12485_v37 = vperm.slane %v1096_v36, %v11869_v32  ;;  %v12491_v0 = vperm.slane %v1098_v30, %v11869_v32  ;;  %v1014_v25 = vperm.slane %v1008_v16, %v11869_v32  ;;  %v12510_v39 = vperm.slane %v1388_v8, %v11869_v32  ;;  %v12523_v36 = vpop.permute.xlu2 %624 }
 0x169   : > { %v12500_v61 = vsel %vm635_vm3, %v20119_v63, %v818_v27  ;;  %v890_v16 = vperm.slane %v884_v20, %v11869_v32  ;;  %v1602_v4 = vsel %vm635_vm3, %v12523_v36, %v1601_v12 }
 0x16a   : > { %v1110_v38 = vsel %vm635_vm3, %v12485_v37, %v1109_v43  ;;  %20120 = vst [vmem:[#allocation44_spill] sm:$0xff] %v12510_v39  ;;  %v20122_v43 = vunpack.i.l.bf16 %v12335_v41  ;;  %v1119_v8 = vrot.slane %v12491_v0, 4  ;;  %v1043_v18 = vrot.slane %v1014_v25, 4 }
 0x16b   : > { %v12516_v30 = vperm.slane %v1110_v38, %v12109_v53  ;;  %v857_v38 = vrot.slane %v818_v27, 4  ;;  %v897_v39 = vrot.slane %v20124_v62, 4  ;;  %v12548_v27 = vperm.slane %v1602_v4, %v11869_v32 }
 0x16c   : > { %v996_v63 = vsel %vm635_vm3, %v995_v59, %v20122_v43  ;;  %v621_v20 = vpop.permute.xlu0 %620  ;;  %v1400_v59 = vsel %vm635_vm3, %v12377_v13, %v19820_v48  ;;  %v1094_v43 = vperm.slane %v1086_v55, %v11869_v32  ;;  %v20125_v13 = vrot.slane %v12147_v44, 4 }
 0x16d   : > { %20121 = vst [vmem:[#allocation45_spill] sm:$0xff] %v12516_v30  ;;  %1676 = vrot.lane.b32.xlu2 %v12516_v30, %s11577_s22  ;;  %v1590_v10 = vsel %vm635_vm3, %v621_v20, %v1589_v31  ;;  %v1002_v12 = vperm.slane %v996_v63, %v11869_v32  ;;  %v12558_v31 = vsel %vm635_vm3, %v12139_v35, %v857_v38  ;;  %v1587_v62 = vrot.slane %v621_v20, 4 }
 0x16e   : > { %v12545_v21 = vperm.slane %v1590_v10, %v11869_v32  ;;  %v1120_v30 = vsel %vm635_vm3, %v1119_v8, %v1094_v43  ;;  %v12554_v55 = vsel %vm635_vm3, %v730_v34, %v20125_v13  ;;  %v20126_v10 = vrot.slane %v12369_v7, 4 }
 0x16f   : > { %v12569_v44 = vperm.slane %v12431_v19, %v11869_v32  ;;  %v933_v34 = vrot.slane %v890_v16, 4  ;;  %v20127_v35 = vunpack.i.l.bf16 %v12238_v33  ;;  %v20128_v38 = vpack.i.bf16 %v12440_v47, %v12451_v28 }
 0x170   : > { %v1625_v63 = vrot.slane %v12545_v21, 4  ;;  %v908_v4 = vsel %vm635_vm3, %v20126_v10, %v12529_v15  ;;  %v1044_v13 = vsel %vm635_vm3, %v1043_v18, %v1002_v12  ;;  %v20129_v10 = vunpack.i.h.bf16 %v12111_v23 }
 0x171   : > { %v12575_v20 = vsel %vm635_vm3, %v20127_v35, %v12313_v24  ;;  %10208 = vrot.lane.b32.xlu0 %v20128_v38, %s11579_s19  ;;  %v12588_v48 = vperm.slane %v1400_v59, %v11869_v32  ;;  %v12591_v8 = vperm.slane %v1120_v30, %v12109_v53  ;;  %v1045_v35 = vrot.slane %v1002_v12, 4 }
 0x172   : > { %v12585_v19 = vsel %vm635_vm3, %v1363_v58, %v20129_v10  ;;  %v1626_v24 = vsel %vm635_vm3, %v12548_v27, %v1625_v63  ;;  %v12599_v18 = vperm.slane %v908_v4, %v12109_v53  ;;  %v932_v28 = vsel %vm635_vm3, %v931_v46, %v890_v16 }
 0x173   : > { %v12596_v47 = vperm.slane %v1626_v24, %v12109_v53  ;;  %v909_v58 = vrot.slane %v12529_v15, 4  ;;  %v20130_v59 = vunpack.i.l.bf16 %v12176_v26  ;;  %v1588_v30 = vsel %vm635_vm3, %v1587_v62, %v12291_v22 }
 0x174   : > { %v12611_v12 = vperm.slane %v1044_v13, %v12109_v53  ;;  %v20132_v63 = vunpack.i.l.bf16 %v12272_v60  ;;  %v1599_v46 = vrot.slane %v12523_v36, 4  ;;  %v1121_v16 = vrot.slane %v1094_v43, 4 }
 0x175   : > { %v898_v38 = vsel %vm635_vm3, %v20130_v59, %v897_v39  ;;  %1716 = vrot.lane.b32.xlu2 %v12591_v8, %s11579_s19  ;;  %1896 = vrot.lane.b32.xlu1 %v12596_v47, %s11580_s11  ;;  %v1046_v39 = vsel %vm635_vm3, %v1014_v25, %v1045_v35  ;;  %v20133_v15 = vunpack.i.l.bf16 %v12335_v41  ;;  %v12623_v13 = vperm.slane %v932_v28, %v12109_v53 }
 0x176   : > { %20131 = vst [vmem:[#allocation46_spill] sm:$0xff] %v12611_v12  ;;  %v1009_v4 = vrot.slane %v20132_v63, 4  ;;  %v934_v10 = vsel %vm635_vm3, %v902_v11, %v933_v34  ;;  %v12627_v24 = vperm.slane %v898_v38, %v11869_v32  ;;  %v12630_v36 = vperm.slane %v1588_v30, %v11869_v32 }
 0x177   : > { %v997_v62 = vrot.slane %v20133_v15, 4  ;;  %v1122_v43 = vsel %vm635_vm3, %v12491_v0, %v1121_v16  ;;  %v957_v25 = vrot.slane %v12599_v18, 4  ;;  %v20134_v35 = vrot.slane %v12151_v54, 4 }
 0x178   : > { %v12640_v28 = vperm.slane %v1046_v39, %v12109_v53  ;;  %v20135_v11 = vrot.slane %v12217_v50, 4  ;;  %v20136_v38 = vrot.slane %v12289_v52, 4  ;;  %v1600_v30 = vsel %vm635_vm3, %v1599_v46, %v12393_v2 }
 0x179   : > { %v1070_v59 = vsel %vm635_vm3, %v12611_v12, %v20134_v35  ;;  %v20137_v63 = vpack.i.bf16 %v12479_v5, %v12470_v45  ;;  %v12657_v16 = vperm.slane %v934_v10, %v12109_v53  ;;  %v20138_v35 = vunpack.i.l.bf16 %v12243_v42 }
 0x17a   : > { %v1214_v34 = vsel %vm635_vm3, %v12259_v40, %v20135_v11  ;;  %v1302_v0 = vsel %vm635_vm3, %v12387_v29, %v20136_v38  ;;  %v20139_v38 = vunpack.i.l.bf16 %v12398_v6  ;;  %v12668_v46 = vperm.slane %v1122_v43, %v12109_v53 }
 0x17b   : > { %10213 = vrot.lane.b32.xlu0 %v20137_v63, %s11581_s18  ;;  %v1222_v39 = vperm.slane %v1214_v34, %v12109_v53  ;;  %v1310_v15 = vperm.slane %v1302_v0, %v12109_v53  ;;  %v998_v11 = vsel %vm635_vm3, %v20138_v35, %v997_v62  ;;  %v958_v45 = vsel %vm635_vm3, %v12623_v13, %v957_v25 }
 0x17c   : > { %v1010_v2 = vsel %vm635_vm3, %v20139_v38, %v1009_v4  ;;  %v10257_v5 = vpack.i.bf16 %v1070_v59, %v958_v45  ;;  %v1613_v10 = vrot.slane %v12630_v36, 4  ;;  %v20140_v0 = vrot.slane %v12186_v51, 4 }
 0x17d   : > { %v1239_v34 = vrot.slane %v1222_v39, 4  ;;  %v12679_v62 = vperm.slane %v1600_v30, %v11869_v32  ;;  %1756 = vrot.lane.b32.xlu2 %v12668_v46, %s11580_s11  ;;  %v910_v4 = vsel %vm635_vm3, %v12369_v7, %v909_v58  ;;  %v1071_v43 = vrot.slane %v12640_v28, 4 }
 0x17e   : > { %v12676_v63 = vsel %vm635_vm3, %v20140_v0, %v1310_v15  ;;  %v1353_v25 = vrot.slane %v1310_v15, 4  ;;  %v12687_v59 = vperm.slane %v1010_v2, %v11869_v32  ;;  %10258 = vrot.lane.b32.xlu1 %v10257_v5, %s11576_s15  ;;  %v959_v35 = vrot.slane %v12657_v16, 4 }
 0x17f   : > { %v12693_v30 = vsel %vm635_vm3, %v1239_v34, %v12165_v49  ;;  %v20141_v38 = vrot.slane %v12262_v3, 4  ;;  %v20142_v58 = vrot.slane %v12165_v49, 4  ;;  %v1614_v34 = vsel %vm635_vm3, %v12679_v62, %v1613_v10 }
 0x180   : > { %v12708_v2 = vsel %vm635_vm3, %v12186_v51, %v1353_v25  ;;  %v918_v0 = vperm.slane %v910_v4, %v12109_v53  ;;  %v20143_v49 = vrot.slane %v12390_v14, 4  ;;  %v20144_v51 = vrot.slane %v12387_v29, 4 }
 0x181   : > { %v1224_v45 = vsel %vm635_vm3, %v20141_v38, %v12225_v56  ;;  %v12704_v15 = vsel %vm635_vm3, %v1222_v39, %v20142_v58  ;;  %v1072_v58 = vsel %vm635_vm3, %v1071_v43, %v12160_v57  ;;  %v943_v4 = vrot.slane %v12627_v24, 4 }
 0x182   : > { %v1230_v5 = vperm.slane %v1224_v45, %v12109_v53  ;;  %v1312_v39 = vsel %vm635_vm3, %v20143_v49, %v12302_v9  ;;  %v1300_v25 = vsel %vm635_vm3, %v20144_v51, %v12289_v52  ;;  %v12729_v38 = vperm.slane %v998_v11, %v11869_v32  ;;  %v20147_v11 = vld [vmem:[#allocation35_spill] sm:$0xff] }
 0x183   : > { %v1318_v10 = vperm.slane %v1312_v39, %v12109_v53  ;;  %v1055_v7 = vrot.slane %v12687_v59, 4  ;;  %v1107_v49 = vrot.slane %v12485_v37, 4  ;;  %v20145_v43 = vpack.i.bf16 %v12500_v61, %v12495_v17  ;;  %v20146_v39 = vld [vmem:[#allocation31_spill] sm:$0xff] }
 0x184   : > { %v1243_v45 = vrot.slane %v1230_v5, 4  ;;  %v12738_v29 = vperm.slane %v1614_v34, %v12109_v53  ;;  %v960_v52 = vsel %vm635_vm3, %v959_v35, %v918_v0  ;;  %v20148_v22 = vrot.slane %v20147_v11, 4 }
 0x185   : > { %10218 = vrot.lane.b32.xlu0 %v20145_v43, %s11580_s11  ;;  %v10262_v37 = vpack.i.bf16 %v1072_v58, %v960_v52  ;;  %v20149_v12 = vrot.slane %v12259_v40, 4  ;;  %v12755_v61 = vperm.slane %v1300_v25, %v12109_v53  ;;  %v1623_v34 = vrot.slane %v12548_v27, 4 }
 0x186   : > { %v12743_v51 = vsel %vm635_vm3, %v1243_v45, %v20146_v39  ;;  %v12748_v54 = vsel %vm635_vm3, %v20148_v22, %v1318_v10  ;;  %1816 = vrot.lane.b32.xlu2 %v12738_v29, %s11577_s22  ;;  %v1357_v45 = vrot.slane %v1318_v10, 4  ;;  %v20151_v22 = vrot.slane %v12225_v56, 4  ;;  %v20153_v10 = vld [vmem:[#allocation43_spill] sm:$0xff] }
 0x187   : > { %v1212_v17 = vsel %vm635_vm3, %v20149_v12, %v12217_v50  ;;  %20150 = vst [vmem:[#allocation31_spill] sm:$0xff] %v12755_v61  ;;  %v20152_v40 = vrot.slane %v12302_v9, 4  ;;  %10263 = vrot.lane.b32.xlu1 %v10262_v37, %s11577_s22  ;;  %v961_v12 = vrot.slane %v918_v0, 4  ;;  %v1056_v25 = vsel %vm635_vm3, %v1055_v7, %v12729_v38 }
 0x188   : > { %v1226_v58 = vsel %vm635_vm3, %v12262_v3, %v20151_v22  ;;  %v1624_v56 = vsel %vm635_vm3, %v1623_v34, %v12545_v21  ;;  %v1108_v3 = vsel %vm635_vm3, %v1107_v49, %v20153_v10  ;;  %v20154_v9 = vrot.slane %v20146_v39, 4  ;;  %v20155_v21 = vld [vmem:[#allocation37_spill] sm:$0xff]  ;;  %v20163_v10 = vld [vmem:[#allocation42_spill] sm:$0xff] }
 0x189   : > { %v1314_v50 = vsel %vm635_vm3, %v12390_v14, %v20152_v40  ;;  %v1234_v43 = vperm.slane %v1226_v58, %v12109_v53  ;;  %v12786_v0 = vsel %vm635_vm3, %v20147_v11, %v1357_v45  ;;  %v944_v7 = vsel %vm635_vm3, %v943_v4, %v12569_v44  ;;  %v20160_v40 = vld [vmem:[#allocation36_spill] sm:$0xff] }
 0x18a   : > { %v1322_v27 = vperm.slane %v1314_v50, %v12109_v53  ;;  %v12782_v14 = vsel %vm635_vm3, %v1230_v5, %v20154_v9  ;;  %v20156_v34 = vrot.slane %v20155_v21, 4  ;;  %v12799_v5 = vperm.slane %v12575_v20, %v11869_v32 }
 0x18b   : > { %v1247_v37 = vrot.slane %v1234_v43, 4  ;;  %v1349_v39 = vrot.slane %v12755_v61, 4  ;;  %v20157_v11 = vrot.slane %v12160_v57, 4  ;;  %v1062_v45 = vperm.slane %v1056_v25, %v12109_v53 }
 0x18c   : > { %v12795_v49 = vsel %vm635_vm3, %v20156_v34, %v1322_v27  ;;  %v20158_v22 = vpack.i.bf16 %v12558_v31, %v12554_v55  ;;  %v12812_v58 = vperm.slane %v1212_v17, %v12109_v53  ;;  %v12815_v20 = vperm.slane %v1624_v56, %v12109_v53  ;;  %v20161_v31 = vld [vmem:[#allocation44_spill] sm:$0xff]  ;;  %v20165_v34 = vld [vmem:[#allocation34_spill] sm:$0xff] }
 0x18d   : > { %v1074_v4 = vsel %vm635_vm3, %v12640_v28, %v20157_v11  ;;  %v962_v57 = vsel %vm635_vm3, %v12657_v16, %v961_v12  ;;  %v12821_v28 = vsel %vm635_vm3, %v1247_v37, %v20160_v40  ;;  %v12824_v50 = vperm.slane %v1108_v3, %v12109_v53  ;;  %v20164_v37 = vld [vmem:[#allocation33_spill] sm:$0xff] }
 0x18e   : > { %10223 = vrot.lane.b32.xlu0 %v20158_v22, %s11582_s20  ;;  %20159 = vst [vmem:[#allocation35_spill] sm:$0xff] %v12812_v58  ;;  %v950_v25 = vperm.slane %v944_v7, %v12109_v53  ;;  %v20162_v17 = vrot.slane %v12588_v48, 4  ;;  %v919_v9 = vrot.slane %v20163_v10, 4  ;;  %v10267_v16 = vpack.i.bf16 %v1074_v4, %v962_v57  ;;  %1856 = vrot.lane.b32.xlu2 %v12815_v20, %s11579_s19  ;;  %v20166_v4 = vld [vmem:[#allocation20_spill] sm:$0xff] }
 0x18f   : > { %v12836_v12 = vperm.slane %v12585_v19, %v11869_v32  ;;  %v1237_v3 = vrot.slane %v20164_v37, 4  ;;  %v1350_v7 = vsel %vm635_vm3, %v20165_v34, %v1349_v39  ;;  %v1075_v11 = vrot.slane %v1062_v45, 4 }
 0x190   : > { %v1436_v56 = vsel %vm635_vm3, %v20162_v17, %v20161_v31  ;;  %10268 = vrot.lane.b32.xlu1 %v10267_v16, %s11578_s17  ;;  %v920_v22 = vsel %vm635_vm3, %v919_v9, %v12799_v5  ;;  %v1038_v57 = vperm.slane %v20166_v4, %v12109_v53  ;;  %v20167_v17 = vld [vmem:[#allocation41_spill] sm:$0xff]  ;;  %v1131_v52 = vrot.slane %v12824_v50, 4 }
 0x191   : > { %v12849_v19 = vperm.slane %v1436_v56, %v12109_v53  ;;  %v1411_v55 = vrot.slane %v20167_v17, 4  ;;  %v1238_v39 = vsel %vm635_vm3, %v12812_v58, %v1237_v3  ;;  %v963_v35 = vrot.slane %v950_v25, 4 }
 0x192   : > { %v10227_v61 = vpack.i.bf16 %v1350_v7, %v1238_v39  ;;  %v955_v16 = vrot.slane %v12623_v13, 4  ;;  %v926_v37 = vperm.slane %v920_v22, %v12109_v53  ;;  %v1076_v9 = vsel %vm635_vm3, %v1075_v11, %v1038_v57 }
 0x193   : > { %v1412_v4 = vsel %vm635_vm3, %v1411_v55, %v12836_v12  ;;  %v1459_v56 = vrot.slane %v12849_v19, 4  ;;  %v1249_v34 = vrot.slane %v20160_v40, 4  ;;  %v1361_v3 = vrot.slane %v1322_v27, 4  ;;  %v20168_v55 = vld [vmem:[#allocation45_spill] sm:$0xff] }
 0x194   : > { %v1057_v58 = vrot.slane %v12729_v38, 4  ;;  %v1132_v7 = vsel %vm635_vm3, 0.0, %v1131_v52  ;;  %v964_v13 = vsel %vm635_vm3, %v963_v35, %v926_v37  ;;  %v12867_v22 = vperm.slane %v1412_v4, %v12109_v53 }
 0x195   : > { %v10272_v39 = vpack.i.bf16 %v1076_v9, %v964_v13  ;;  %v12870_v11 = vsel %vm635_vm3, %v1234_v43, %v1249_v34  ;;  %v12881_v27 = vsel %vm635_vm3, %v955_v16, %v12599_v18  ;;  %v945_v35 = vrot.slane %v12569_v44, 4 }
 0x196   : > { %10228 = vrot.lane.b32.xlu0 %v10227_v61, %s11576_s15  ;;  %v12874_v61 = vsel %vm635_vm3, %v20155_v21, %v1361_v3  ;;  %1656 = vrot.lane.b32.xlu2 %v1132_v7, %s11576_s15  ;;  %v1058_v43 = vsel %vm635_vm3, %v12687_v59, %v1057_v58  ;;  %v12889_v52 = vsel %vm635_vm3, %v1459_v56, %v12867_v22  ;;  %v10191_v21 = vunpack.i.h.bf16 %v12398_v6  ;;  %v20170_v3 = vld [vmem:[#allocation19_spill] sm:$0xff] }
 0x197   : > { %v10327_v38 = vpack.i.bf16 %v12870_v11, %v12874_v61  ;;  %v1077_v40 = vrot.slane %v1038_v57, 4  ;;  %v1133_v34 = vrot.slane %v20168_v55, 4  ;;  %v946_v18 = vsel %vm635_vm3, %v12627_v24, %v945_v35 }
 0x198   : > { %10273 = vrot.lane.b32.xlu1 %v10272_v39, %s11579_s19  ;;  %v965_v16 = vrot.slane %v926_v37, 4  ;;  %v1066_v9 = vperm.slane %v1058_v43, %v12109_v53  ;;  %v921_v4 = vrot.slane %v12799_v5, 4  ;;  %v20169_v59 = vpack.i.bf16 %v12676_v63, %v12693_v30 }
 0x199   : > { %v1078_v44 = vsel %vm635_vm3, %v1062_v45, %v1077_v40  ;;  %v1511_v58 = vrot.slane %v10191_v21, 4  ;;  %v954_v57 = vperm.slane %v946_v18, %v12109_v53  ;;  %v1134_v56 = vsel %vm635_vm3, 0.0, %v1133_v34 }
 0x19a   : > { %v966_v6 = vsel %vm635_vm3, %v950_v25, %v965_v16  ;;  %v10181_v37 = vunpack.i.h.bf16 %v12272_v60  ;;  %v1079_v45 = vrot.slane %v1066_v9, 4  ;;  %v922_v5 = vsel %vm635_vm3, %v20163_v10, %v921_v4  ;;  %v20172_v16 = vld [vmem:[#allocation27_spill] sm:$0xff] }
 0x19b   : > { %v10277_v24 = vpack.i.bf16 %v1078_v44, %v966_v6  ;;  %v10186_v63 = vunpack.i.h.bf16 %v12243_v42  ;;  %v967_v25 = vrot.slane %v954_v57, 4  ;;  %v1042_v7 = vperm.slane %v20170_v3, %v12109_v53  ;;  %v20177_v3 = vld [vmem:[#allocation38_spill] sm:$0xff] }
 0x19c   : > { %v1512_v30 = vsel %vm635_vm3, %v1511_v58, %v10181_v37  ;;  %v10176_v13 = vunpack.i.h.bf16 %v12335_v41  ;;  %v1135_v60 = vrot.slane %v12591_v8, 4  ;;  %v930_v39 = vperm.slane %v922_v5, %v12109_v53 }
 0x19d   : > { %v1080_v35 = vsel %vm635_vm3, %v1079_v45, %v1042_v7  ;;  %v1518_v43 = vperm.slane %v1512_v30, %v11869_v32  ;;  %v20171_v42 = vpack.i.bf16 %v12708_v2, %v12704_v15  ;;  %v1499_v10 = vrot.slane %v10186_v63, 4 }
 0x19e   : > { %10233 = vrot.lane.b32.xlu0 %v20169_v59, %s11577_s22  ;;  %1696 = vrot.lane.b32.xlu2 %v1134_v56, %s11578_s17  ;;  %v968_v40 = vsel %vm635_vm3, %v967_v25, %v930_v39  ;;  %v1501_v55 = vrot.slane %v10176_v13, 4  ;;  %v1136_v34 = vsel %vm635_vm3, 0.0, %v1135_v60  ;;  %v20173_v44 = vunpack.i.h.bf16 %v20172_v16 }
 0x19f   : > { %v10282_v41 = vpack.i.bf16 %v1080_v35, %v968_v40  ;;  %v1500_v8 = vsel %vm635_vm3, %v1499_v10, %v10176_v13  ;;  %v1547_v18 = vrot.slane %v1518_v43, 4  ;;  %v1611_v15 = vrot.slane %v12679_v62, 4 }
 0x1a0   : > { %10278 = vrot.lane.b32.xlu1 %v10277_v24, %s11581_s18  ;;  %v1389_v4 = vrot.slane %v20173_v44, 4  ;;  %v1081_v2 = vrot.slane %v1042_v7, 4  ;;  %v1513_v59 = vrot.slane %v10181_v37, 4  ;;  %v1502_v58 = vsel %vm635_vm3, %v10186_v63, %v1501_v55  ;;  %v20176_v37 = vld [vmem:[#allocation23_spill] sm:$0xff] }
 0x1a1   : > { %v1506_v6 = vperm.slane %v1500_v8, %v11869_v32  ;;  %v1137_v56 = vrot.slane %v12668_v46, 4  ;;  %v20174_v24 = vunpack.i.h.bf16 %v12276_v1  ;;  %v969_v5 = vrot.slane %v930_v39, 4 }
 0x1a2   : > { %v1082_v30 = vsel %vm635_vm3, %v1066_v9, %v1081_v2  ;;  %v1612_v25 = vsel %vm635_vm3, %v1611_v15, %v12630_v36  ;;  %v20175_v62 = vpack.i.bf16 %v12748_v54, %v12743_v51  ;;  %v12945_v63 = vperm.slane %v20176_v37, %v12109_v53 }
 0x1a3   : > { %v1401_v45 = vrot.slane %v20174_v24, 4  ;;  %v1548_v46 = vsel %vm635_vm3, %v1547_v18, %v1506_v6  ;;  %v20178_v1 = vunpack.i.h.bf16 %v20177_v3  ;;  %v12952_v9 = vperm.slane %v1502_v58, %v11869_v32 }
 0x1a4   : > { %v1514_v36 = vsel %vm635_vm3, %v10191_v21, %v1513_v59  ;;  %v970_v13 = vsel %vm635_vm3, %v954_v57, %v969_v5  ;;  %v1549_v60 = vrot.slane %v1506_v6, 4  ;;  %v1138_v54 = vsel %vm635_vm3, 0.0, %v1137_v56 }
 0x1a5   : > { %v1390_v7 = vsel %vm635_vm3, %v20178_v1, %v1389_v4  ;;  %v10287_v51 = vpack.i.bf16 %v1082_v30, %v970_v13  ;;  %v12958_v39 = vperm.slane %v1612_v25, %v12109_v53  ;;  %v20179_v35 = vunpack.i.h.bf16 %v12111_v23  ;;  %v20185_v25 = vld [vmem:[#allocation32_spill] sm:$0xff] }
 0x1a6   : > { %10238 = vrot.lane.b32.xlu0 %v20171_v42, %s11578_s17  ;;  %1736 = vrot.lane.b32.xlu2 %v1136_v34, %s11581_s18  ;;  %v20180_v10 = vunpack.i.h.bf16 %v12176_v26  ;;  %v12967_v21 = vperm.slane %v1548_v46, %v12109_v53  ;;  %v1398_v57 = vperm.slane %v1390_v7, %v11869_v32  ;;  %v1437_v55 = vrot.slane %v20161_v31, 4  ;;  %v20187_v7 = vld [vmem:[#allocation22_spill] sm:$0xff] }
 0x1a7   : > { %v1365_v42 = vrot.slane %v20179_v35, 4  ;;  %v1522_v34 = vperm.slane %v1514_v36, %v11869_v32  ;;  %v1550_v23 = vsel %vm635_vm3, %v1518_v43, %v1549_v60  ;;  %v1573_v8 = vrot.slane %v12945_v63, 4 }
 0x1a8   : > { %10283 = vrot.lane.b32.xlu1 %v10282_v41, %s11580_s11  ;;  %v1402_v40 = vsel %vm635_vm3, %v20180_v10, %v1401_v45  ;;  %v20181_v41 = vunpack.i.h.bf16 %v12238_v33  ;;  %v1561_v16 = vrot.slane %v12952_v9, 4  ;;  %v1635_v44 = vrot.slane %v12958_v39, 4 }
 0x1a9   : > { %v1410_v18 = vperm.slane %v1402_v40, %v11869_v32  ;;  %v1438_v31 = vsel %vm635_vm3, %v12588_v48, %v1437_v55  ;;  %v1461_v4 = vrot.slane %v12867_v22, 4  ;;  %v1574_v43 = vsel %vm635_vm3, %v12967_v21, %v1573_v8  ;;  %v20183_v48 = vld [vmem:[#allocation25_spill] sm:$0xff] }
 0x1aa   : > { %v1366_v26 = vsel %vm635_vm3, %v20181_v41, %v1365_v42  ;;  %v1558_v33 = vperm.slane %v1550_v23, %v12109_v53  ;;  %v1449_v15 = vrot.slane %v1398_v57, 4  ;;  %v1413_v59 = vrot.slane %v12836_v12, 4  ;;  %v20189_v55 = vld [vmem:[#allocation21_spill] sm:$0xff] }
 0x1ab   : > { %v1374_v2 = vperm.slane %v1366_v26, %v11869_v32  ;;  %v20182_v58 = vpack.i.bf16 %v12786_v0, %v12782_v14  ;;  %v1562_v6 = vsel %vm635_vm3, %v1522_v34, %v1561_v16  ;;  %v20184_v56 = vunpack.i.h.bf16 %v20183_v48 }
 0x1ac   : > { %v1462_v24 = vsel %vm635_vm3, %v12849_v19, %v1461_v4  ;;  %v1446_v45 = vperm.slane %v1438_v31, %v12109_v53  ;;  %v1636_v5 = vsel %vm635_vm3, 0.0, %v1635_v44  ;;  %v1450_v12 = vsel %vm635_vm3, %v1410_v18, %v1449_v15 }
 0x1ad   : > { %v1377_v22 = vrot.slane %v20184_v56, 4  ;;  %v10292_v30 = vpack.i.bf16 %v1574_v43, %v1462_v24  ;;  %v13006_v0 = vperm.slane %v1562_v6, %v12109_v53  ;;  %v1575_v37 = vrot.slane %v1558_v33, 4  ;;  %v20190_v24 = vld [vmem:[#allocation24_spill] sm:$0xff] }
 0x1ae   : > { %10243 = vrot.lane.b32.xlu0 %v20175_v62, %s11579_s19  ;;  %1776 = vrot.lane.b32.xlu2 %v1138_v54, %s11582_s20  ;;  %v20186_v62 = vunpack.i.h.bf16 %v20185_v25  ;;  %v1425_v46 = vrot.slane %v1374_v2, 4  ;;  %v1414_v19 = vsel %vm635_vm3, %v20167_v17, %v1413_v59  ;;  %v13012_v3 = vperm.slane %v1450_v12, %v12109_v53 }
 0x1af   : > { %v1463_v1 = vrot.slane %v1446_v45, 4  ;;  %v1534_v36 = vperm.slane %v20187_v7, %v12109_v53  ;;  %v1637_v60 = vrot.slane %v12738_v29, 4  ;;  %v1583_v54 = vrot.slane %v13006_v0, 4 }
 0x1b0   : > { %10288 = vrot.lane.b32.xlu1 %v10287_v51, %s11582_s20  ;;  %v1378_v14 = vsel %vm635_vm3, %v20186_v62, %v1377_v22  ;;  %v1422_v51 = vperm.slane %v1414_v19, %v12109_v53  ;;  %v1559_v42 = vrot.slane %v1522_v34, 4  ;;  %v20188_v17 = vpack.i.bf16 %v12795_v49, %v12821_v28 }
 0x1b1   : > { %v1386_v13 = vperm.slane %v1378_v14, %v11869_v32  ;;  %v1576_v35 = vsel %vm635_vm3, %v1575_v37, %v1534_v36  ;;  %v1471_v40 = vrot.slane %v13012_v3, 4  ;;  %v1546_v23 = vperm.slane %v20189_v55, %v12109_v53 }
 0x1b2   : > { %v1464_v29 = vsel %vm635_vm3, %v1463_v1, %v1422_v51  ;;  %v1447_v41 = vrot.slane %v1410_v18, 4  ;;  %v1638_v26 = vsel %vm635_vm3, 0.0, %v1637_v60  ;;  %v1560_v49 = vsel %vm635_vm3, %v1559_v42, %v12952_v9 }
 0x1b3   : > { %v1426_v10 = vsel %vm635_vm3, %v1386_v13, %v1425_v46  ;;  %v10297_v8 = vpack.i.bf16 %v1576_v35, %v1464_v29  ;;  %v1584_v16 = vsel %vm635_vm3, %v1583_v54, %v1546_v23  ;;  %v1577_v44 = vrot.slane %v1534_v36, 4 }
 0x1b4   : > { %v1434_v34 = vperm.slane %v1426_v10, %v12109_v53  ;;  %v1639_v18 = vrot.slane %v12815_v20, 4  ;;  %v1448_v4 = vsel %vm635_vm3, %v1447_v41, %v1398_v57  ;;  %v1465_v43 = vrot.slane %v1422_v51, 4 }
 0x1b5   : > { %v1578_v15 = vsel %vm635_vm3, %v1558_v33, %v1577_v44  ;;  %v1566_v59 = vperm.slane %v1560_v49, %v12109_v53  ;;  %v1454_v6 = vperm.slane %v1448_v4, %v12109_v53  ;;  %v1423_v9 = vrot.slane %v1386_v13, 4 }
 0x1b6   : > { %10248 = vrot.lane.b32.xlu0 %v20182_v58, %s11581_s18  ;;  %1796 = vrot.lane.b32.xlu2 %v1636_v5, %s11576_s15  ;;  %v1472_v28 = vsel %vm635_vm3, %v1471_v40, %v1434_v34  ;;  %v1466_v58 = vsel %vm635_vm3, %v1446_v45, %v1465_v43  ;;  %v1640_v48 = vsel %vm635_vm3, 0.0, %v1639_v18  ;;  %v1542_v5 = vperm.slane %v20190_v24, %v12109_v53 }
 0x1b7   : > { %v10317_v31 = vpack.i.bf16 %v1472_v28, %v1584_v16  ;;  %v10302_v56 = vpack.i.bf16 %v1578_v15, %v1466_v58  ;;  %v1579_v20 = vrot.slane %v1566_v59, 4  ;;  %v1424_v57 = vsel %vm635_vm3, %v1423_v9, %v1374_v2  ;;  %v20191_v58 = vld [vmem:[#allocation39_spill] sm:$0xff] }
 0x1b8   : > { %10293 = vrot.lane.b32.xlu1 %v10292_v30, %s11576_s15  ;;  %v1467_v22 = vrot.slane %v1454_v6, 4  ;;  %v1641_v45 = vrot.slane %v12596_v47, 4  ;;  %v1430_v30 = vperm.slane %v1424_v57, %v12109_v53  ;;  %v1581_v46 = vrot.slane %v1542_v5, 4  ;;  %v20193_v57 = vld [vmem:[#allocation46_spill] sm:$0xff] }
 0x1b9   : > { %v1580_v12 = vsel %vm635_vm3, %v1579_v20, %v1542_v5  ;;  %v1585_v60 = vrot.slane %v1546_v23, 4  ;;  %v1473_v54 = vrot.slane %v1434_v34, 4 }
 0x1ba   : > { %v1468_v25 = vsel %vm635_vm3, %v1467_v22, %v1430_v30  ;;  %v1642_v14 = vsel %vm635_vm3, 0.0, %v1641_v45  ;;  %v1469_v19 = vrot.slane %v1430_v30, 4  ;;  %v1582_v47 = vsel %vm635_vm3, %v1566_v59, %v1581_v46  ;;  %v20194_v30 = vld [vmem:[#allocation40_spill] sm:$0xff] }
 0x1bb   : > { %v10307_v37 = vpack.i.bf16 %v1580_v12, %v1468_v25  ;;  %v1586_v51 = vsel %vm635_vm3, %v13006_v0, %v1585_v60  ;;  %v1474_v35 = vsel %vm635_vm3, %v13012_v3, %v1473_v54  ;;  %v20195_v25 = vld [vmem:[#allocation28_spill] sm:$0xff] }
 0x1bc   : > { %v1470_v1 = vsel %vm635_vm3, %v1454_v6, %v1469_v19  ;;  %v10322_v42 = vpack.i.bf16 %v1474_v35, %v1586_v51  ;;  %v731_v6 = vrot.slane %v20191_v58, 4 }
 0x1bd   : > { %v10312_v7 = vpack.i.bf16 %v1582_v47, %v1470_v1  ;;  %v20196_v1 = vld [vmem:[#allocation30_spill] sm:$0xff] }
 0x1be   : > { %10253 = vrot.lane.b32.xlu0 %v20188_v17, %s11580_s11  ;;  %1836 = vrot.lane.b32.xlu2 %v1638_v26, %s11578_s17 }
 0x1c0   : > { %10298 = vrot.lane.b32.xlu1 %v10297_v8, %s11577_s22  ;;  %v13055_v62 = vpop.permute.xlu0 %10193 }
 0x1c1   : > { %v10196_v9 = vunpack.i.h.bf16 %v13055_v62 }
 0x1c6   : > { %10318 = vrot.lane.b32.xlu0 %v10317_v31, %s11580_s11  ;;  %1876 = vrot.lane.b32.xlu2 %v1640_v48, %s11581_s18  ;;  %v10195_v48 = vunpack.i.l.bf16 %v13055_v62 }
 0x1c7   : > { %v1677_v33 = vpop.permute.xlu2 %1676 }
 0x1c8   : > { %10303 = vrot.lane.b32.xlu1 %v10302_v56, %s11578_s17  ;;  %v13062_v36 = vpop.permute.xlu0 %10198  ;;  %v20192_v56 = vld [vmem:[#allocation29_spill] sm:$0xff] }
 0x1c9   : > { %v843_v20 = vrot.slane %v20192_v56, 4  ;;  %v10201_v22 = vunpack.i.h.bf16 %v13062_v36  ;;  %v10200_v24 = vunpack.i.l.bf16 %v13062_v36 }
 0x1cb   : > { %v844_v12 = vsel %vm635_vm3, %v843_v20, %v20194_v30 }
 0x1cc   : > { %v1925_v62 = vsel %vm1923_vm6, %v844_v12, %v10196_v9 }
 0x1cd   : > { %v1931_v47 = vsel %vm1929_vm7, %v1925_v62, %v10201_v22 }
 0x1ce   : > { %1916 = vrot.lane.b32.xlu2 %v1642_v14, %s11582_s20  ;;  %v732_v14 = vsel %vm635_vm3, %v731_v6, %v20195_v25 }
 0x1cf   : > { %v1717_v2 = vpop.permute.xlu2 %1716 }
 0x1d0   : > { %10308 = vrot.lane.b32.xlu1 %v10307_v37, %s11579_s19  ;;  %v13074_v17 = vpop.permute.xlu0 %10203 }
 0x1d1   : > { %v10206_v5 = vunpack.i.h.bf16 %v13074_v17 }
 0x1d3   : > { %v1937_v60 = vsel %vm1935_vm8, %v1931_v47, %v10206_v5 }
 0x1d6   : > { %10328 = vrot.lane.b32.xlu2 %v10327_v38, %s11582_s20 }
 0x1d7   : > { %v1757_v13 = vpop.permute.xlu2 %1756 }
 0x1d8   : > { %10313 = vrot.lane.b32.xlu1 %v10312_v7, %s11581_s18 }
 0x1e0   : > { %10323 = vrot.lane.b32.xlu1 %v10322_v42, %s11582_s20  ;;  %v13076_v10 = vpop.permute.xlu2 %1816 }
 0x1e3   : > { %v13082_v38 = vpop.permute.xlu0 %10208 }
 0x1e4   : > { %v10211_v42 = vunpack.i.h.bf16 %v13082_v38 }
 0x1e6   : > { %v1943_v12 = vsel %vm1941_vm9, %v1937_v60, %v10211_v42 }
 0x1e7   : > { %v13080_v61 = vpop.permute.xlu1 %1896 }
 0x1e8   : > { %v13078_v11 = vpop.permute.xlu2 %1856 }
 0x1ed   : > { %v13086_v0 = vpop.permute.xlu0 %10213 }
 0x1f0   : > { %v1657_v40 = vpop.permute.xlu2 %1656  ;;  %v13084_v55 = vpop.permute.xlu1 %10258 }
 0x1f1   : > { %v1928_v29 = vsel %vm1923_vm6, %v12824_v50, %v1657_v40  ;;  %v10261_v46 = vunpack.i.h.bf16 %v13084_v55  ;;  %v10260_v54 = vunpack.i.l.bf16 %v13084_v55  ;;  %v10216_v55 = vunpack.i.h.bf16 %v13086_v0 }
 0x1f2   : > { %v1934_v26 = vsel %vm1929_vm7, %v1928_v29, %v1677_v33  ;;  %v1067_v33 = vrot.slane %v20193_v57, 4 }
 0x1f3   : > { %v1949_v62 = vsel %vm1947_vm10, %v1943_v12, %v10216_v55 }
 0x1f4   : > { %v1068_v7 = vsel %vm635_vm3, %v1067_v33, %v20196_v1 }
 0x1f7   : > { %v13092_v41 = vpop.permute.xlu0 %10218 }
 0x1f8   : > { %v1697_v23 = vpop.permute.xlu2 %1696  ;;  %v10221_v20 = vunpack.i.h.bf16 %v13092_v41 }
 0x1f9   : > { %v13088_v3 = vpop.permute.xlu1 %10263  ;;  %v1940_v34 = vsel %vm1935_vm8, %v1934_v26, %v1697_v23  ;;  %v10210_v26 = vunpack.i.l.bf16 %v13082_v38 }
 0x1fa   : > { %v1946_v49 = vsel %vm1941_vm9, %v1940_v34, %v1717_v2  ;;  %v1924_v2 = vsel %vm1923_vm6, %v732_v14, %v10195_v48  ;;  %v10266_v36 = vunpack.i.h.bf16 %v13088_v3  ;;  %v10265_v40 = vunpack.i.l.bf16 %v13088_v3 }
 0x1fb   : > { %v1930_v19 = vsel %vm1929_vm7, %v1924_v2, %v10200_v24  ;;  %v1926_v3 = vsel %vm1923_vm6, %v12881_v27, %v10260_v54 }
 0x200   : > { %v1737_v8 = vpop.permute.xlu2 %1736  ;;  %v13100_v50 = vpop.permute.xlu0 %10223 }
 0x201   : > { %v1952_v28 = vsel %vm1947_vm10, %v1946_v49, %v1737_v8  ;;  %v10226_v33 = vunpack.i.h.bf16 %v13100_v50  ;;  %v10225_v14 = vunpack.i.l.bf16 %v13100_v50 }
 0x202   : > { %v13096_v16 = vpop.permute.xlu1 %10268  ;;  %v1958_v31 = vsel %vm1953_vm11, %v1952_v28, %v1757_v13  ;;  %v10205_v13 = vunpack.i.l.bf16 %v13074_v17  ;;  %v1927_v17 = vsel %vm1923_vm6, %v1068_v7, %v10261_v46 }
 0x203   : > { %v10271_v51 = vunpack.i.h.bf16 %v13096_v16  ;;  %v10270_v8 = vunpack.i.l.bf16 %v13096_v16  ;;  %v1933_v49 = vsel %vm1929_vm7, %v1927_v17, %v10266_v36  ;;  %v1571_v17 = vrot.slane %v12967_v21, 4 }
 0x204   : > { %v1936_v25 = vsel %vm1935_vm8, %v1930_v19, %v10205_v13 }
 0x205   : > { %v1942_v2 = vsel %vm1941_vm9, %v1936_v25, %v10210_v26 }
 0x208   : > { %v1777_v44 = vpop.permute.xlu2 %1776  ;;  %v13105_v59 = vpop.permute.xlu0 %10228 }
 0x209   : > { %v1964_v4 = vsel %vm1959_vm13, %v1958_v31, %v1777_v44  ;;  %v1939_v31 = vsel %vm1935_vm8, %v1933_v49, %v10271_v51  ;;  %v13186_v51 = vld [vmem:[%s19782_s1] sm:$0xff] }
 0x20a   : > { %v10274_v18 = vpop.permute.xlu1 %10273  ;;  %9940 = vmatpush.msk.msra.mxu3 %vm2011_vm12, %v1964_v4 }
 0x20b   : > { %v10276_v23 = vunpack.i.h.bf16 %v10274_v18  ;;  %v10275_v28 = vunpack.i.l.bf16 %v10274_v18 }
 0x20d   : > { %v1945_v9 = vsel %vm1941_vm9, %v1939_v31, %v10276_v23  ;;  %v11583_v23 = vmov 0   ;;  %v10231_v31 = vunpack.i.h.bf16 %v13105_v59 }
 0x20e   : > { %10332 = vset.pattern.permute.xlu0 %v11583_v23  ;;  %10963 = vset.pattern.permute.xlu2 %v11583_v23 }
 0x210   : > { %v1797_v43 = vpop.permute.xlu2 %1796  ;;  %v13131_v35 = vpop.permute.xlu0 %10233 }
 0x211   : > { %v1969_v29 = vsel %vm1923_vm6, %v12958_v39, %v1797_v43  ;;  %v1932_v43 = vsel %vm1929_vm7, %v1926_v3, %v10265_v40  ;;  %v2001_v40 = vld [vmem:[%s19783_s2] sm:$0xff]  ;;  %v10236_v21 = vunpack.i.h.bf16 %v13131_v35 }
 0x212   : > { %v10279_v15 = vpop.permute.xlu1 %10278  ;;  %v1974_v39 = vsel %vm1929_vm7, %v1969_v29, %v13076_v10  ;;  %v1938_v18 = vsel %vm1935_vm8, %v1932_v43, %v10270_v8  ;;  %2004 = vperm.xlu0 %10332, %v2001_v40   ;;  %v1572_v43 = vsel %vm635_vm3, %v1571_v17, %v12945_v63 }
 0x213   : > { %v10281_v34 = vunpack.i.h.bf16 %v10279_v15  ;;  %v10280_v4 = vunpack.i.l.bf16 %v10279_v15  ;;  %v10215_v15 = vunpack.i.l.bf16 %v13086_v0  ;;  %v1944_v57 = vsel %vm1941_vm9, %v1938_v18, %v10275_v28 }
 0x215   : > { %v1951_v27 = vsel %vm1947_vm10, %v1945_v9, %v10281_v34  ;;  %v1950_v5 = vsel %vm1947_vm10, %v1944_v57, %v10280_v4  ;;  %v1948_v1 = vsel %vm1947_vm10, %v1942_v2, %v10215_v15  ;;  %v20197_v34 = vld [vmem:[#allocation35_spill] sm:$0xff] }
 0x216   : > { %v1235_v55 = vrot.slane %v20197_v34, 4 }
 0x218   : > { %v1837_v45 = vpop.permute.xlu2 %1836 }
 0x219   : > { %v1979_v16 = vsel %vm1935_vm8, %v1974_v39, %v1837_v45  ;;  %v10220_v45 = vunpack.i.l.bf16 %v13092_v41  ;;  %v1955_v41 = vsel %vm1953_vm11, %v1949_v62, %v10221_v20 }
 0x21a   : > { %v10284_v37 = vpop.permute.xlu1 %10283  ;;  %v1984_v22 = vsel %vm1941_vm9, %v1979_v16, %v13078_v11  ;;  %v1961_v47 = vsel %vm1959_vm13, %v1955_v41, %v10226_v33 }
 0x21b   : > { %v10286_v44 = vunpack.i.h.bf16 %v10284_v37  ;;  %v10285_v58 = vunpack.i.l.bf16 %v10284_v37  ;;  %v13167_v37 = vpop.permute.xlu0 %10238  ;;  %v1954_v7 = vsel %vm1953_vm11, %v1948_v1, %v10220_v45 }
 0x21c   : > { %v1960_v13 = vsel %vm1959_vm13, %v1954_v7, %v10225_v14  ;;  %v10241_v12 = vunpack.i.h.bf16 %v13167_v37  ;;  %v10240_v14 = vunpack.i.l.bf16 %v13167_v37 }
 0x21d   : > { %v1957_v10 = vsel %vm1953_vm11, %v1951_v27, %v10286_v44  ;;  %v1956_v0 = vsel %vm1953_vm11, %v1950_v5, %v10285_v58  ;;  %v20198_v44 = vld [vmem:[#allocation34_spill] sm:$0xff]  ;;  %v20200_v27 = vld [vmem:[#allocation31_spill] sm:$0xff]  ;;  %v10235_v5 = vunpack.i.l.bf16 %v13131_v35 }
 0x21e   : > { %v1347_v3 = vrot.slane %v20198_v44, 4 }
 0x220   : > { %v1877_v38 = vpop.permute.xlu2 %1876  ;;  %v1348_v15 = vsel %vm635_vm3, %v1347_v3, %v20200_v27 }
 0x221   : > { %v1989_v30 = vsel %vm1947_vm10, %v1984_v22, %v1877_v38  ;;  %v10230_v38 = vunpack.i.l.bf16 %v13105_v59 }
 0x222   : > { %v10289_v6 = vpop.permute.xlu1 %10288  ;;  %v1994_v19 = vsel %vm1953_vm11, %v1989_v30, %v13080_v61 }
 0x223   : > { %v10291_v48 = vunpack.i.h.bf16 %v10289_v6  ;;  %v10290_v56 = vunpack.i.l.bf16 %v10289_v6  ;;  %v13181_v60 = vpop.permute.xlu0 %10243 }
 0x225   : > { %v1963_v24 = vsel %vm1959_vm13, %v1957_v10, %v10291_v48  ;;  %v1962_v11 = vsel %vm1959_vm13, %v1956_v0, %v10290_v56  ;;  %v20199_v48 = vld [vmem:[#allocation33_spill] sm:$0xff]  ;;  %v1966_v10 = vsel %vm1923_vm6, %v1348_v15, %v10231_v31 }
 0x226   : > { %2030 = vmatpush.msra.mxu3 %v1963_v24  ;;  %v1236_v56 = vsel %vm635_vm3, %v1235_v55, %v20199_v48  ;;  %v1971_v0 = vsel %vm1929_vm7, %v1966_v10, %v10236_v21 }
 0x227   : > { %v1965_v24 = vsel %vm1923_vm6, %v1236_v56, %v10230_v38 }
 0x228   : > { %2031 = vmatpush.msra.mxu3 %v1962_v11  ;;  %v1917_v46 = vpop.permute.xlu2 %1916  ;;  %v10246_v11 = vunpack.i.h.bf16 %v13181_v60  ;;  %v1970_v23 = vsel %vm1929_vm7, %v1965_v24, %v10235_v5 }
 0x229   : > { %v1999_v36 = vsel %vm1959_vm13, %v1994_v19, %v1917_v46 }
 0x22a   : > { %v10294_v50 = vpop.permute.xlu1 %10293  ;;  %2032 = vmatpush.msra.mxu3 %v1961_v47  ;;  %9942 = vmatpush.msk.msra.mxu1 %vm2011_vm12, %v1999_v36 }
 0x22b   : > { %v13190_v42 = vpop.permute.xlu0 %10248  ;;  %v10296_v8 = vunpack.i.h.bf16 %v10294_v50  ;;  %v10295_v4 = vunpack.i.l.bf16 %v10294_v50  ;;  %v10245_v50 = vunpack.i.l.bf16 %v13181_v60 }
 0x22c   : > { %2033 = vmatpush.msra.mxu3 %v1960_v13  ;;  %v10251_v46 = vunpack.i.h.bf16 %v13190_v42  ;;  %v1976_v13 = vsel %vm1935_vm8, %v1971_v0, %v10241_v12 }
 0x22d   : > { %9941 = vmatmul.msk.f32.vlgmr.msra.gmra.mxu3 %vm2007_vm14, %v13186_v51  ;;  %v1968_v6 = vsel %vm1923_vm6, %v1572_v43, %v10296_v8  ;;  %v1967_v63 = vsel %vm1923_vm6, %v12889_v52, %v10295_v4  ;;  %v1981_v60 = vsel %vm1941_vm9, %v1976_v13, %v10246_v11  ;;  %v1975_v8 = vsel %vm1935_vm8, %v1970_v23, %v10240_v14 }
 0x230   : > { %v10329_v41 = vpop.permute.xlu2 %10328 }
 0x231   : > { %v10331_v34 = vunpack.i.h.bf16 %v10329_v41 }
 0x232   : > { %v10299_v54 = vpop.permute.xlu1 %10298 }
 0x233   : > { %v13195_v26 = vpop.permute.xlu0 %10253  ;;  %v10301_v49 = vunpack.i.h.bf16 %v10299_v54  ;;  %v10300_v16 = vunpack.i.l.bf16 %v10299_v54  ;;  %v10250_v54 = vunpack.i.l.bf16 %v13190_v42 }
 0x234   : > { %v10256_v7 = vunpack.i.h.bf16 %v13195_v26 }
 0x235   : > { %v1973_v20 = vsel %vm1929_vm7, %v1968_v6, %v10301_v49  ;;  %v1972_v45 = vsel %vm1929_vm7, %v1967_v63, %v10300_v16  ;;  %v1986_v49 = vsel %vm1947_vm10, %v1981_v60, %v10251_v46 }
 0x236   : > { %v1991_v42 = vsel %vm1953_vm11, %v1986_v49, %v10256_v7 }
 0x23a   : > { %v10304_v61 = vpop.permute.xlu1 %10303 }
 0x23b   : > { %v10306_v39 = vunpack.i.h.bf16 %v10304_v61  ;;  %v10305_v9 = vunpack.i.l.bf16 %v10304_v61  ;;  %v10319_v57 = vpop.permute.xlu0 %10318  ;;  %v10330_v61 = vunpack.i.l.bf16 %v10329_v41 }
 0x23c   : > { %v10320_v62 = vunpack.i.l.bf16 %v10319_v57  ;;  %v10321_v36 = vunpack.i.h.bf16 %v10319_v57 }
 0x23d   : > { %v1978_v33 = vsel %vm1935_vm8, %v1973_v20, %v10306_v39  ;;  %v1977_v25 = vsel %vm1935_vm8, %v1972_v45, %v10305_v9  ;;  %v1996_v44 = vsel %vm1959_vm13, %v1991_v42, %v10330_v61 }
 0x242   : > { %v10309_v29 = vpop.permute.xlu1 %10308 }
 0x243   : > { %v10311_v58 = vunpack.i.h.bf16 %v10309_v29  ;;  %v10310_v59 = vunpack.i.l.bf16 %v10309_v29  ;;  %v10255_v29 = vunpack.i.l.bf16 %v13195_v26 }
 0x245   : > { %v1983_v30 = vsel %vm1941_vm9, %v1978_v33, %v10311_v58  ;;  %v1982_v35 = vsel %vm1941_vm9, %v1977_v25, %v10310_v59 }
 0x24a   : > { %v10314_v28 = vpop.permute.xlu1 %10313 }
 0x24b   : > { %v10316_v18 = vunpack.i.h.bf16 %v10314_v28  ;;  %v10315_v22 = vunpack.i.l.bf16 %v10314_v28  ;;  %v1980_v28 = vsel %vm1941_vm9, %v1975_v8, %v10245_v50 }
 0x24c   : > { %v1985_v26 = vsel %vm1947_vm10, %v1980_v28, %v10250_v54 }
 0x24d   : > { %v1988_v52 = vsel %vm1947_vm10, %v1983_v30, %v10316_v18  ;;  %v1987_v19 = vsel %vm1947_vm10, %v1982_v35, %v10315_v22  ;;  %v1990_v3 = vsel %vm1953_vm11, %v1985_v26, %v10255_v29 }
 0x24e   : > { %v1993_v37 = vsel %vm1953_vm11, %v1988_v52, %v10320_v62  ;;  %v1992_v17 = vsel %vm1953_vm11, %v1987_v19, %v10321_v36  ;;  %v1995_v31 = vsel %vm1959_vm13, %v1990_v3, %v10331_v34 }
 0x252   : > { %v10324_v2 = vpop.permute.xlu1 %10323 }
 0x253   : > { %v10326_v47 = vunpack.i.h.bf16 %v10324_v2  ;;  %v10325_v1 = vunpack.i.l.bf16 %v10324_v2 }
 0x255   : > { %v1998_v40 = vsel %vm1959_vm13, %v1993_v37, %v10325_v1  ;;  %v1997_v55 = vsel %vm1959_vm13, %v1992_v17, %v10326_v47 }
 0x256   : > { %2050 = vmatpush.msra.mxu1 %v1998_v40 }
 0x258   : > { %2051 = vmatpush.msra.mxu1 %v1997_v55 }
 0x25a   : > { %2052 = vmatpush.msra.mxu1 %v1996_v44 }
 0x25c   : > { %2053 = vmatpush.msra.mxu1 %v1995_v31 }
 0x25d   : > { %9943 = vmatmul.msk.f32.vlgmr.msra.gmra.mxu1 %vm2007_vm14, %v13186_v51 }
 0x284   : > { %v2005_v4 = vpop.permute.xlu0 %2004 }
 0x2b0   : > { %v2035_v39 = vpop.f32.mrf.mxu3 }
 0x2b1   : > { %v2036_v38 = vadd.f32 %v2035_v39, %v2005_v4 }
 0x2b3   : > { %v2060_v16 = vmul.f32 0.2, %v2036_v38  ;;  %vm2058_vm15 = vcmp.ge.f32.partialorder %v2036_v38, 0.0 }
 0x2b5   : > { %v2062_v6 = vsel %vm2058_vm15, %v2036_v38, %v2060_v16 }
 0x2b6   : > { %v2110_v59 = vrot.slane %v2062_v6, 4 }
 0x2da   : > { %v2055_v43 = vpop.f32.mrf.mxu1 }
 0x2db   : > { %v2056_v58 = vadd.f32 %v2055_v43, %v2005_v4 }
 0x2dd   : > { %vm2059_vm12 = vcmp.ge.f32.partialorder %v2056_v58, 0.0  ;;  %v2061_v21 = vmul.f32 0.2, %v2056_v58 }
 0x2df   : > { %v2063_v9 = vsel %vm2059_vm12, %v2056_v58, %v2061_v21  ;;  %vm6252_vm12 = vcmask 146432  }
 0x2e0   : > { %v10353_v18 = vpack.i.bf16 %v2063_v9, %v2062_v6  ;;  %v2222_v15 = vrot.slane %v2063_v9, 4 }
 0x2e2   : > { %10354 = vrot.lane.b32.xlu0 %v10353_v18, %s11578_s17  ;;  %10339 = vrot.lane.b32.xlu2 %v10353_v18, %s11580_s11 }
 0x2e3   : > { %10334 = vrot.lane.b32.xlu1 %v10353_v18, %s11582_s20 }
 0x2ea   : > { %10349 = vrot.lane.b32.xlu2 %v10353_v18, %s11579_s19 }
 0x2eb   : > { %10344 = vrot.lane.b32.xlu1 %v10353_v18, %s11581_s18 }
 0x2f2   : > { %10364 = vrot.lane.b32.xlu2 %v10353_v18, %s11576_s15 }
 0x2f3   : > { %10359 = vrot.lane.b32.xlu1 %v10353_v18, %s11577_s22 }
 0x33c   : > { %v10340_v51 = vpop.permute.xlu2 %10339 }
 0x33d   : > { %v10342_v56 = vunpack.i.h.bf16 %v10340_v51  ;;  %v10341_v27 = vunpack.i.l.bf16 %v10340_v51 }
 0x33f   : > { %v2220_v63 = vrot.slane %v10342_v56, 4  ;;  %v2223_v57 = vsel %vm635_vm3, %v10342_v56, %v2222_v15  ;;  %v2108_v22 = vrot.slane %v10341_v27, 4  ;;  %v2111_v24 = vsel %vm635_vm3, %v10341_v27, %v2110_v59 }
 0x340   : > { %v13261_v0 = vperm.slane %v2223_v57, %v11869_v32  ;;  %v13265_v25 = vperm.slane %v2111_v24, %v11869_v32 }
 0x341   : > { %v2221_v12 = vsel %vm635_vm3, %v2220_v63, %v2063_v9  ;;  %v2109_v14 = vsel %vm635_vm3, %v2108_v22, %v2062_v6 }
 0x342   : > { %v2227_v46 = vperm.slane %v2221_v12, %v11869_v32  ;;  %v2282_v47 = vrot.slane %v13261_v0, 4  ;;  %v2115_v19 = vperm.slane %v2109_v14, %v11869_v32  ;;  %v2170_v50 = vrot.slane %v13265_v25, 4 }
 0x344   : > { %v13256_v48 = vpop.permute.xlu2 %10349  ;;  %v2270_v42 = vrot.slane %v2227_v46, 4  ;;  %v2158_v38 = vrot.slane %v2115_v19, 4 }
 0x345   : > { %v10352_v23 = vunpack.i.h.bf16 %v13256_v48  ;;  %v10351_v29 = vunpack.i.l.bf16 %v13256_v48 }
 0x347   : > { %v2246_v43 = vrot.slane %v10352_v23, 4  ;;  %v2134_v21 = vrot.slane %v10351_v29, 4 }
 0x34c   : > { %v10365_v20 = vpop.permute.xlu2 %10364 }
 0x34d   : > { %v10366_v5 = vunpack.i.l.bf16 %v10365_v20  ;;  %v10367_v45 = vunpack.i.h.bf16 %v10365_v20 }
 0x34f   : > { %v2144_v11 = vrot.slane %v10366_v5, 4  ;;  %v2256_v2 = vrot.slane %v10367_v45, 4 }
 0x354   : > { %v10355_v10 = vpop.permute.xlu0 %10354 }
 0x355   : > { %v10335_v33 = vpop.permute.xlu1 %10334  ;;  %v10356_v30 = vunpack.i.l.bf16 %v10355_v10  ;;  %v10357_v52 = vunpack.i.h.bf16 %v10355_v10 }
 0x356   : > { %v10337_v62 = vunpack.i.h.bf16 %v10335_v33  ;;  %v10336_v41 = vunpack.i.l.bf16 %v10335_v33 }
 0x357   : > { %v2146_v35 = vrot.slane %v10356_v30, 4  ;;  %v2145_v1 = vsel %vm635_vm3, %v2144_v11, %v10356_v30  ;;  %v2258_v7 = vrot.slane %v10357_v52, 4  ;;  %v2257_v36 = vsel %vm635_vm3, %v2256_v2, %v10357_v52 }
 0x358   : > { %v2234_v13 = vrot.slane %v10337_v62, 4  ;;  %v2122_v54 = vrot.slane %v10336_v41, 4  ;;  %v13278_v60 = vperm.slane %v2145_v1, %v11869_v32  ;;  %v2263_v28 = vperm.slane %v2257_v36, %v11869_v32 }
 0x359   : > { %v2147_v17 = vsel %vm635_vm3, %v10366_v5, %v2146_v35  ;;  %v2259_v31 = vsel %vm635_vm3, %v10367_v45, %v2258_v7 }
 0x35a   : > { %v13290_v3 = vperm.slane %v2147_v17, %v11869_v32  ;;  %v2180_v6 = vrot.slane %v13278_v60, 4  ;;  %v13303_v51 = vperm.slane %v2259_v31, %v11869_v32  ;;  %v2292_v48 = vrot.slane %v2263_v28, 4 }
 0x35c   : > { %v2192_v20 = vrot.slane %v13290_v3, 4 }
 0x35d   : > { %v10345_v37 = vpop.permute.xlu1 %10344 }
 0x35e   : > { %v10347_v61 = vunpack.i.h.bf16 %v10345_v37  ;;  %v10346_v40 = vunpack.i.l.bf16 %v10345_v37 }
 0x360   : > { %v2232_v8 = vrot.slane %v10347_v61, 4  ;;  %v2120_v34 = vrot.slane %v10346_v40, 4  ;;  %v2123_v55 = vsel %vm635_vm3, %v10346_v40, %v2122_v54  ;;  %v2235_v49 = vsel %vm635_vm3, %v10347_v61, %v2234_v13 }
 0x361   : > { %v13284_v44 = vperm.slane %v2123_v55, %v11869_v32  ;;  %v13287_v26 = vperm.slane %v2235_v49, %v11869_v32 }
 0x362   : > { %v2121_v4 = vsel %vm635_vm3, %v2120_v34, %v10336_v41  ;;  %v2233_v39 = vsel %vm635_vm3, %v2232_v8, %v10337_v62 }
 0x363   : > { %v2127_v16 = vperm.slane %v2121_v4, %v11869_v32  ;;  %v2239_v58 = vperm.slane %v2233_v39, %v11869_v32  ;;  %v2171_v9 = vsel %vm635_vm3, %v13284_v44, %v2170_v50  ;;  %v2283_v18 = vsel %vm635_vm3, %v13287_v26, %v2282_v47 }
 0x364   : > { %v13307_v63 = vperm.slane %v2171_v9, %v12109_v53  ;;  %v2168_v57 = vrot.slane %v13284_v44, 4  ;;  %v2280_v33 = vrot.slane %v13287_v26, 4  ;;  %v13312_v22 = vperm.slane %v2283_v18, %v12109_v53 }
 0x365   : > { %v2156_v56 = vrot.slane %v2127_v16, 4  ;;  %v2268_v27 = vrot.slane %v2239_v58, 4  ;;  %v10360_v15 = vpop.permute.xlu1 %10359  ;;  %v2159_v24 = vsel %vm635_vm3, %v2127_v16, %v2158_v38  ;;  %v2271_v47 = vsel %vm635_vm3, %v2239_v58, %v2270_v42 }
 0x366   : > { %v10362_v59 = vunpack.i.h.bf16 %v10360_v15  ;;  %v10361_v10 = vunpack.i.l.bf16 %v10360_v15  ;;  %v2218_v35 = vrot.slane %v13307_v63, 4  ;;  %v2330_v37 = vrot.slane %v13312_v22, 4 }
 0x367   : > { %v2157_v11 = vsel %vm635_vm3, %v2156_v56, %v2115_v19  ;;  %v2269_v62 = vsel %vm635_vm3, %v2268_v27, %v2227_v46  ;;  %v2167_v13 = vperm.slane %v2159_v24, %v12109_v53 }
 0x368   : > { %v2244_v5 = vrot.slane %v10362_v59, 4  ;;  %v2247_v45 = vsel %vm635_vm3, %v10362_v59, %v2246_v43  ;;  %v2132_v30 = vrot.slane %v10361_v10, 4  ;;  %v2135_v12 = vsel %vm635_vm3, %v10361_v10, %v2134_v21 }
 0x369   : > { %v2255_v52 = vperm.slane %v2247_v45, %v11869_v32  ;;  %v2143_v14 = vperm.slane %v2135_v12, %v11869_v32  ;;  %v2163_v19 = vperm.slane %v2157_v11, %v12109_v53  ;;  %v2275_v46 = vperm.slane %v2269_v62, %v12109_v53 }
 0x36a   : > { %v2245_v41 = vsel %vm635_vm3, %v2244_v5, %v10352_v23  ;;  %v2133_v2 = vsel %vm635_vm3, %v2132_v30, %v10351_v29  ;;  %v2169_v5 = vsel %vm635_vm3, %v2168_v57, %v13265_v25  ;;  %v2281_v45 = vsel %vm635_vm3, %v2280_v33, %v13261_v0 }
 0x36b   : > { %v2251_v1 = vperm.slane %v2245_v41, %v11869_v32  ;;  %v2306_v50 = vrot.slane %v2255_v52, 4  ;;  %v2139_v7 = vperm.slane %v2133_v2, %v11869_v32  ;;  %v2194_v36 = vrot.slane %v2143_v14, 4 }
 0x36c   : > { %v2206_v58 = vrot.slane %v2163_v19, 4  ;;  %v2318_v9 = vrot.slane %v2275_v46, 4  ;;  %v2175_v30 = vperm.slane %v2169_v5, %v12109_v53  ;;  %v2287_v11 = vperm.slane %v2281_v45, %v12109_v53 }
 0x36d   : > { %v2294_v54 = vrot.slane %v2251_v1, 4  ;;  %v2182_v61 = vrot.slane %v2139_v7, 4  ;;  %v2195_v40 = vsel %vm635_vm3, %v13290_v3, %v2194_v36  ;;  %v2307_v23 = vsel %vm635_vm3, %v13303_v51, %v2306_v50 }
 0x36e   : > { %v13336_v29 = vperm.slane %v2195_v40, %v12109_v53  ;;  %v13339_v17 = vperm.slane %v2307_v23, %v12109_v53  ;;  %v2181_v8 = vsel %vm635_vm3, %v2180_v6, %v2139_v7  ;;  %v2293_v34 = vsel %vm635_vm3, %v2292_v48, %v2251_v1 }
 0x36f   : > { %v2187_v55 = vperm.slane %v2181_v8, %v12109_v53  ;;  %v2299_v49 = vperm.slane %v2293_v34, %v12109_v53  ;;  %v2183_v42 = vsel %vm635_vm3, %v13278_v60, %v2182_v61  ;;  %v2295_v44 = vsel %vm635_vm3, %v2263_v28, %v2294_v54 }
 0x370   : > { %v2219_v26 = vsel %vm635_vm3, %v13336_v29, %v2218_v35  ;;  %v2331_v31 = vsel %vm635_vm3, %v13339_v17, %v2330_v37  ;;  %v2191_v4 = vperm.slane %v2183_v42, %v12109_v53  ;;  %v2303_v39 = vperm.slane %v2295_v44, %v12109_v53 }
 0x371   : > { %v10368_v38 = vpack.i.bf16 %v2331_v31, %v2219_v26  ;;  %v2204_v43 = vrot.slane %v2187_v55, 4  ;;  %v2316_v16 = vrot.slane %v2299_v49, 4  ;;  %v2279_v6 = vperm.slane %v2271_v47, %v12109_v53 }
 0x372   : > { %v2208_v21 = vrot.slane %v2191_v4, 4  ;;  %v2320_v60 = vrot.slane %v2303_v39, 4  ;;  %v2304_v28 = vrot.slane %v13303_v51, 4  ;;  %v2207_v56 = vsel %vm635_vm3, %v2187_v55, %v2206_v58 }
 0x373   : > { %10369 = vrot.lane.b32.xlu1 %v10368_v38, %s11571_s5  ;;  %v2205_v18 = vsel %vm635_vm3, %v2204_v43, %v2163_v19  ;;  %v2317_v48 = vsel %vm635_vm3, %v2316_v16, %v2275_v46  ;;  %v2319_v10 = vsel %vm635_vm3, %v2299_v49, %v2318_v9  ;;  %v2193_v51 = vsel %vm635_vm3, %v2192_v20, %v2143_v14 }
 0x374   : > { %v10373_v27 = vpack.i.bf16 %v2317_v48, %v2205_v18  ;;  %v2209_v15 = vsel %vm635_vm3, %v2208_v21, %v2167_v13  ;;  %v2321_v59 = vsel %vm635_vm3, %v2320_v60, %v2279_v6  ;;  %v2199_v12 = vperm.slane %v2193_v51, %v12109_v53 }
 0x375   : > { %v10383_v24 = vpack.i.bf16 %v2321_v59, %v2209_v15  ;;  %v2305_v62 = vsel %vm635_vm3, %v2304_v28, %v2255_v52  ;;  %v2210_v25 = vrot.slane %v2167_v13, 4  ;;  %v2322_v57 = vrot.slane %v2279_v6, 4 }
 0x376   : > { %10374 = vrot.lane.b32.xlu0 %v10373_v27, %s11571_s5  ;;  %v2311_v3 = vperm.slane %v2305_v62, %v12109_v53  ;;  %v2214_v20 = vrot.slane %v2175_v30, 4  ;;  %v2326_v14 = vrot.slane %v2287_v11, 4  ;;  %v10378_v41 = vpack.i.bf16 %v2319_v10, %v2207_v56 }
 0x377   : > { %10384 = vrot.lane.b32.xlu2 %v10383_v24, %s11571_s5  ;;  %v2211_v0 = vsel %vm635_vm3, %v2191_v4, %v2210_v25  ;;  %v2323_v33 = vsel %vm635_vm3, %v2303_v39, %v2322_v57  ;;  %v2212_v47 = vrot.slane %v2199_v12, 4  ;;  %v2216_v7 = vrot.slane %v13336_v29, 4 }
 0x378   : > { %v2215_v2 = vsel %vm635_vm3, %v2199_v12, %v2214_v20  ;;  %v2327_v35 = vsel %vm635_vm3, %v2311_v3, %v2326_v14  ;;  %v2324_v1 = vrot.slane %v2311_v3, 4  ;;  %v10388_v52 = vpack.i.bf16 %v2323_v33, %v2211_v0 }
 0x379   : > { %v10398_v50 = vpack.i.bf16 %v2327_v35, %v2215_v2  ;;  %v2328_v36 = vrot.slane %v13339_v17, 4  ;;  %v2213_v37 = vsel %vm635_vm3, %v2212_v47, %v2175_v30  ;;  %v2217_v13 = vsel %vm635_vm3, %v2216_v7, %v13307_v63 }
 0x37a   : > { %v2325_v19 = vsel %vm635_vm3, %v2324_v1, %v2287_v11 }
 0x37b   : > { %10379 = vrot.lane.b32.xlu1 %v10378_v41, %s11571_s5  ;;  %v10393_v46 = vpack.i.bf16 %v2325_v19, %v2213_v37  ;;  %v2329_v54 = vsel %vm635_vm3, %v2328_v36, %v13312_v22 }
 0x37c   : > { %v10403_v61 = vpack.i.bf16 %v2329_v54, %v2217_v13 }
 0x37e   : > { %10389 = vrot.lane.b32.xlu0 %v10388_v52, %s11571_s5 }
 0x37f   : > { %10399 = vrot.lane.b32.xlu2 %v10398_v50, %s11571_s5 }
 0x383   : > { %10394 = vrot.lane.b32.xlu1 %v10393_v46, %s11571_s5 }
 0x386   : > { %10404 = vrot.lane.b32.xlu0 %v10403_v61, %s11571_s5 }
 0x3d1   : > { %v10385_v40 = vpop.permute.xlu2 %10384 }
 0x3d2   : > { %v10387_v23 = vunpack.i.h.bf16 %v10385_v40  ;;  %v10386_v29 = vunpack.i.l.bf16 %v10385_v40 }
 0x3d4   : > { %v2401_v17 = vsel %vm365_vm0, 0.0, %v10387_v23  ;;  %v2400_v8 = vsel %vm365_vm0, 0.0, %v10386_v29 }
 0x3d5   : > { %v13397_v34 = vsel %vm374_vm1, %v2401_v17, 0.0  ;;  %v2416_v63 = vsel %vm374_vm1, %v2400_v8, 0.0 }
 0x3d6   : > { %v2451_v55 = vrot.slane %v13397_v34, 7  ;;  %v2450_v22 = vrot.slane %v2416_v63, 7 }
 0x3d8   : > { %v13404_v49 = vsel %vm391_vm2, %v2450_v22, %v2451_v55  ;;  %v13407_v42 = vsel %vm391_vm2, 0.0, %v2450_v22 }
 0x3d9   : > { %20201 = vst [vmem:[#allocation43_spill] sm:$0xff] %v13404_v49  ;;  %v10400_v44 = vpop.permute.xlu2 %10399  ;;  %v13411_v4 = vpack.i.bf16 %v13404_v49, %v13407_v42 }
 0x3da   : > { %20202 = vst [vmem:[#allocation37_spill] sm:$0xff] %v13407_v42  ;;  %v10402_v26 = vunpack.i.h.bf16 %v10400_v44  ;;  %v10401_v31 = vunpack.i.l.bf16 %v10400_v44 }
 0x3db   : > { %10429 = vrot.lane.b32.xlu1 %v13411_v4, %s11572_s10 }
 0x3dc   : > { %v2407_v39 = vsel %vm365_vm0, 0.0, %v10402_v26  ;;  %v2406_v38 = vsel %vm365_vm0, 0.0, %v10401_v31 }
 0x3dd   : > { %v13418_v43 = vsel %vm374_vm1, %v2407_v39, 0.0  ;;  %v2422_v16 = vsel %vm374_vm1, %v2406_v38, 0.0 }
 0x3de   : > { %v2460_v58 = vrot.slane %v13418_v43, 7  ;;  %v2459_v21 = vrot.slane %v2422_v16, 7 }
 0x3e0   : > { %v13425_v6 = vsel %vm391_vm2, %v2459_v21, %v2460_v58  ;;  %v13428_v60 = vsel %vm391_vm2, 0.0, %v2459_v21 }
 0x3e1   : > { %20203 = vst [vmem:[#allocation36_spill] sm:$0xff] %v13428_v60  ;;  %v13432_v9 = vpack.i.bf16 %v13425_v6, %v13428_v60 }
 0x3e3   : > { %10444 = vrot.lane.b32.xlu1 %v13432_v9, %s11572_s10 }
 0x3e5   : > { %v10370_v28 = vpop.permute.xlu1 %10369 }
 0x3e6   : > { %v10372_v18 = vunpack.i.h.bf16 %v10370_v28  ;;  %v10371_v48 = vunpack.i.l.bf16 %v10370_v28 }
 0x3e8   : > { %v2411_v56 = vsel %vm365_vm0, 0.0, %v10372_v18  ;;  %v2410_v27 = vsel %vm365_vm0, 0.0, %v10371_v48  ;;  %v10375_v15 = vpop.permute.xlu0 %10374 }
 0x3e9   : > { %v13439_v59 = vsel %vm374_vm1, %v2411_v56, 0.0  ;;  %v2426_v10 = vsel %vm374_vm1, %v2410_v27, 0.0  ;;  %v10377_v24 = vunpack.i.h.bf16 %v10375_v15  ;;  %v10376_v5 = vunpack.i.l.bf16 %v10375_v15 }
 0x3ea   : > { %v2466_v51 = vrot.slane %v13439_v59, 7  ;;  %v2465_v45 = vrot.slane %v2426_v10, 7  ;;  %v13554_v59 = vsel %vm391_vm2, %v2451_v55, 0.0 }
 0x3eb   : > { %v2397_v30 = vsel %vm365_vm0, 0.0, %v10377_v24  ;;  %v2396_v11 = vsel %vm365_vm0, 0.0, %v10376_v5  ;;  %v2633_v55 = vrot.slane %v13554_v59, 1 }
 0x3ec   : > { %v13445_v12 = vsel %vm374_vm1, %v2397_v30, 0.0  ;;  %v13451_v62 = vsel %vm391_vm2, %v2465_v45, %v2466_v51  ;;  %v13454_v25 = vsel %vm391_vm2, 0.0, %v2465_v45  ;;  %v2412_v20 = vsel %vm374_vm1, %v2396_v11, 0.0 }
 0x3ed   : > { %20204 = vst [vmem:[#allocation44_spill] sm:$0xff] %v13454_v25  ;;  %v10380_v57 = vpop.permute.xlu1 %10379  ;;  %v2445_v3 = vrot.slane %v13445_v12, 7  ;;  %v2444_v0 = vrot.slane %v2412_v20, 7  ;;  %v10408_v2 = vpack.i.bf16 %v13451_v62, %v13454_v25 }
 0x3ee   : > { %v10382_v14 = vunpack.i.h.bf16 %v10380_v57  ;;  %v10381_v41 = vunpack.i.l.bf16 %v10380_v57 }
 0x3ef   : > { %v13463_v1 = vsel %vm391_vm2, %v2444_v0, %v2445_v3  ;;  %v13466_v52 = vsel %vm391_vm2, 0.0, %v2444_v0  ;;  %10409 = vrot.lane.b32.xlu0 %v10408_v2, %s11572_s10  ;;  %10414 = vrot.lane.b32.xlu2 %v10408_v2, %s11574_s12  ;;  %v13531_v2 = vsel %vm391_vm2, %v2466_v51, 0.0 }
 0x3f0   : > { %v10390_v33 = vpop.permute.xlu0 %10389  ;;  %v2399_v35 = vsel %vm365_vm0, 0.0, %v10382_v14  ;;  %v2398_v47 = vsel %vm365_vm0, 0.0, %v10381_v41  ;;  %20205 = vst [vmem:[#allocation42_spill] sm:$0xff] %v13466_v52  ;;  %v10453_v13 = vpack.i.bf16 %v13463_v1, %v13466_v52  ;;  %v2658_v51 = vrot.slane %v13531_v2, 1 }
 0x3f1   : > { %v2415_v50 = vsel %vm374_vm1, %v2399_v35, 0.0  ;;  %v2414_v7 = vsel %vm374_vm1, %v2398_v47, 0.0  ;;  %v10392_v19 = vunpack.i.h.bf16 %v10390_v33  ;;  %v10391_v46 = vunpack.i.l.bf16 %v10390_v33 }
 0x3f2   : > { %v2448_v36 = vrot.slane %v2415_v50, 7  ;;  %v2447_v37 = vrot.slane %v2414_v7, 7  ;;  %10454 = vrot.lane.b32.xlu1 %v10453_v13, %s11574_s12  ;;  %v13538_v50 = vsel %vm391_vm2, %v2445_v3, 0.0 }
 0x3f3   : > { %v2403_v23 = vsel %vm365_vm0, 0.0, %v10392_v19  ;;  %v2402_v8 = vsel %vm365_vm0, 0.0, %v10391_v46  ;;  %v2655_v46 = vrot.slane %v13454_v25, 1 }
 0x3f4   : > { %v13475_v61 = vsel %vm391_vm2, %v2447_v37, %v2448_v36  ;;  %v13478_v40 = vsel %vm391_vm2, 0.0, %v2447_v37  ;;  %v2419_v17 = vsel %vm374_vm1, %v2403_v23, 0.0  ;;  %v2418_v31 = vsel %vm374_vm1, %v2402_v8, 0.0 }
 0x3f5   : > { %v10395_v54 = vpop.permute.xlu1 %10394  ;;  %v2938_v29 = vrot.slane %v13478_v40, 4  ;;  %v2454_v26 = vrot.slane %v2419_v17, 7  ;;  %v13488_v39 = vpack.i.bf16 %v13475_v61, %v13478_v40  ;;  %v2453_v16 = vrot.slane %v2418_v31, 7 }
 0x3f6   : > { %v10397_v63 = vunpack.i.h.bf16 %v10395_v54  ;;  %v10396_v22 = vunpack.i.l.bf16 %v10395_v54  ;;  %v13558_v3 = vsel %vm391_vm2, %v2448_v36, 0.0  ;;  %v2623_v54 = vrot.slane %v13538_v50, 1 }
 0x3f7   : > { %10419 = vrot.lane.b32.xlu2 %v10453_v13, %s11572_s10  ;;  %10424 = vrot.lane.b32.xlu0 %v13488_v39, %s11572_s10  ;;  %v13499_v15 = vsel %vm391_vm2, %v2453_v16, %v2454_v26  ;;  %v13502_v10 = vsel %vm391_vm2, 0.0, %v2453_v16  ;;  %v2656_v13 = vrot.slane %v13451_v62, 1  ;;  %v2625_v23 = vrot.slane %v13478_v40, 1 }
 0x3f8   : > { %v10405_v44 = vpop.permute.xlu0 %10404  ;;  %v2405_v21 = vsel %vm365_vm0, 0.0, %v10397_v63  ;;  %v2404_v28 = vsel %vm365_vm0, 0.0, %v10396_v22  ;;  %v2936_v24 = vrot.slane %v13502_v10, 4  ;;  %v13507_v5 = vsel %vm635_vm3, %v13502_v10, %v2938_v29 }
 0x3f9   : > { %v10407_v38 = vunpack.i.h.bf16 %v10405_v44  ;;  %v2421_v18 = vsel %vm374_vm1, %v2405_v21, 0.0  ;;  %v2420_v48 = vsel %vm374_vm1, %v2404_v28, 0.0  ;;  %v10406_v27 = vunpack.i.l.bf16 %v10405_v44  ;;  %20206 = vst [vmem:[#allocation20_spill] sm:$0xff] %v13507_v5 }
 0x3fa   : > { %v2457_v45 = vrot.slane %v2421_v18, 7  ;;  %v2456_v30 = vrot.slane %v2420_v48, 7  ;;  %v13514_v11 = vsel %vm635_vm3, %v2936_v24, %v13478_v40  ;;  %v10468_v20 = vpack.i.bf16 %v13499_v15, %v13502_v10 }
 0x3fb   : > { %v2409_v56 = vsel %vm365_vm0, 0.0, %v10407_v38  ;;  %20207 = vst [vmem:[#allocation41_spill] sm:$0xff] %v13514_v11  ;;  %v2408_v57 = vsel %vm365_vm0, 0.0, %v10406_v27  ;;  %v2626_v34 = vrot.slane %v13475_v61, 1  ;;  %v13571_v36 = vsel %vm391_vm2, %v2460_v58, 0.0 }
 0x3fc   : > { %v13510_v12 = vsel %vm374_vm1, %v2409_v56, 0.0  ;;  %v13520_v14 = vsel %vm391_vm2, %v2456_v30, %v2457_v45  ;;  %v13523_v41 = vsel %vm391_vm2, 0.0, %v2456_v30  ;;  %v2424_v33 = vsel %vm374_vm1, %v2408_v57, 0.0  ;;  %10469 = vrot.lane.b32.xlu1 %v10468_v20, %s11574_s12 }
 0x3fd   : > { %20208 = vst [vmem:[#allocation45_spill] sm:$0xff] %v13523_v41  ;;  %v2463_v0 = vrot.slane %v13510_v12, 7  ;;  %v2462_v35 = vrot.slane %v2424_v33, 7  ;;  %v13535_v47 = vpack.i.bf16 %v13520_v14, %v13523_v41  ;;  %v2620_v29 = vrot.slane %v13466_v52, 1 }
 0x3fe   : > { %v2628_v17 = vrot.slane %v13558_v3, 1  ;;  %v13576_v8 = vsel %vm391_vm2, %v2454_v26, 0.0  ;;  %v13579_v63 = vsel %vm391_vm2, %v2457_v45, 0.0  ;;  %v2621_v22 = vrot.slane %v13463_v1, 1 }
 0x3ff   : > { %v13543_v7 = vsel %vm391_vm2, %v2462_v35, %v2463_v0  ;;  %v13546_v37 = vsel %vm391_vm2, 0.0, %v2462_v35  ;;  %10434 = vrot.lane.b32.xlu2 %v10468_v20, %s11572_s10  ;;  %10439 = vrot.lane.b32.xlu0 %v13535_v47, %s11572_s10  ;;  %v13584_v44 = vsel %vm480_vm4, %v2655_v46, %v2656_v13  ;;  %v13587_v43 = vsel %vm480_vm4, %v2656_v13, %v2658_v51 }
 0x400   : > { %20209 = vst [vmem:[#allocation19_spill] sm:$0xff] %v13546_v37  ;;  %v10483_v19 = vpack.i.bf16 %v13543_v7, %v13546_v37  ;;  %v2627_v58 = vsel %vm480_vm4, %v2625_v23, %v2626_v34  ;;  %v2622_v31 = vsel %vm480_vm4, %v2620_v29, %v2621_v22  ;;  %v2624_v26 = vsel %vm480_vm4, %v2621_v22, %v2623_v54 }
 0x401   : > { %v2630_v38 = vrot.slane %v13407_v42, 1  ;;  %v2631_v16 = vrot.slane %v13404_v49, 1  ;;  %v2648_v21 = vrot.slane %v13571_v36, 1  ;;  %v2638_v28 = vrot.slane %v13576_v8, 1 }
 0x402   : > { %v4270_v18 = vrot.slane %v2624_v26, 4  ;;  %v3262_v48 = vrot.slane %v2622_v31, 4  ;;  %v2643_v56 = vrot.slane %v13579_v63, 1  ;;  %v2629_v27 = vsel %vm480_vm4, %v2626_v34, %v2628_v17 }
 0x403   : > { %v13602_v24 = vsel %vm480_vm4, %v2630_v38, %v2631_v16  ;;  %v13605_v45 = vsel %vm480_vm4, %v2631_v16, %v2633_v55  ;;  %v10488_v30 = vpack.i.bf16 %v13587_v43, %v13584_v44  ;;  %v3296_v57 = vrot.slane %v13584_v44, 4 }
 0x404   : > { %10484 = vrot.lane.b32.xlu1 %v10483_v19, %s11574_s12  ;;  %v3274_v20 = vrot.slane %v2627_v58, 4  ;;  %v3260_v33 = vrot.slane %v13602_v24, 4  ;;  %v13614_v35 = vsel %vm635_vm3, %v13602_v24, %v3262_v48  ;;  %v13618_v51 = vsel %vm635_vm3, %v13605_v45, %v4270_v18 }
 0x405   : > { %20210 = vst [vmem:[#allocation27_spill] sm:$0xff] %v13614_v35  ;;  %v4282_v46 = vrot.slane %v2629_v27, 4  ;;  %v2640_v13 = vrot.slane %v13523_v41, 1  ;;  %v2636_v23 = vrot.slane %v13499_v15, 1  ;;  %v2641_v34 = vrot.slane %v13520_v14, 1 }
 0x406   : > { %v13629_v55 = vsel %vm635_vm3, %v3260_v33, %v2622_v31  ;;  %v2645_v29 = vrot.slane %v13428_v60, 1  ;;  %v2646_v17 = vrot.slane %v13425_v6, 1  ;;  %v4304_v22 = vrot.slane %v13587_v43, 4 }
 0x407   : > { %10449 = vrot.lane.b32.xlu2 %v10483_v19, %s11572_s10  ;;  %10464 = vrot.lane.b32.xlu0 %v13411_v4, %s11574_s12  ;;  %v4268_v4 = vrot.slane %v13605_v45, 4  ;;  %v2635_v19 = vrot.slane %v13502_v10, 1  ;;  %20211 = vst [vmem:[#allocation23_spill] sm:$0xff] %v13629_v55  ;;  %v13638_v16 = vsel %vm480_vm4, %v2636_v23, %v2638_v28  ;;  %v13663_v12 = vsel %vm480_vm4, %v2640_v13, %v2641_v34 }
 0x408   : > { %20212 = vst [vmem:[#allocation38_spill] sm:$0xff] %v13638_v16  ;;  %v4280_v28 = vrot.slane %v13638_v16, 4  ;;  %v13676_v33 = vsel %vm480_vm4, %v2641_v34, %v2643_v56  ;;  %v3932_v5 = vrot.slane %v13404_v49, 4 }
 0x409   : > { %v13623_v54 = vsel %vm635_vm3, %v4268_v4, %v2624_v26  ;;  %v13635_v38 = vsel %vm480_vm4, %v2635_v19, %v2636_v23  ;;  %v13657_v4 = vsel %vm635_vm3, %v13638_v16, %v4282_v46  ;;  %v13686_v23 = vpack.i.bf16 %v2629_v27, %v2627_v58 }
 0x40a   : > { %v3272_v18 = vrot.slane %v13635_v38, 4  ;;  %v13643_v48 = vsel %vm635_vm3, %v13635_v38, %v3274_v20  ;;  %v13660_v20 = vsel %vm480_vm4, %v2645_v29, %v2646_v17  ;;  %v13679_v19 = vsel %vm635_vm3, %v4280_v28, %v2629_v27 }
 0x40b   : > { %20213 = vst [vmem:[#allocation25_spill] sm:$0xff] %v13643_v48  ;;  %v3286_v29 = vrot.slane %v13663_v12, 4  ;;  %v4294_v56 = vrot.slane %v13676_v33, 4  ;;  %v13700_v27 = vpack.i.bf16 %v2624_v26, %v2622_v31  ;;  %v19825_v28 = vrot.slane %v13475_v61, 2 }
 0x40c   : > { %10489 = vrot.lane.b32.xlu1 %v10488_v30, %s11572_s10  ;;  %v13648_v30 = vsel %vm391_vm2, %v2463_v0, 0.0  ;;  %v13666_v0 = vsel %vm635_vm3, %v3272_v18, %v2627_v58  ;;  %v2651_v58 = vrot.slane %v13543_v7, 1  ;;  %v2777_v18 = vrot.slane %v13478_v40, 2 }
 0x40d   : > { %20214 = vst [vmem:[#allocation32_spill] sm:$0xff] %v13666_v0  ;;  %v2653_v13 = vrot.slane %v13648_v30, 1 }
 0x40f   : > { %10459 = vrot.lane.b32.xlu2 %v13488_v39, %s11574_s12  ;;  %10479 = vrot.lane.b32.xlu0 %v13432_v9, %s11574_s12  ;;  %v13669_v39 = vsel %vm480_vm4, %v2646_v17, %v2648_v21  ;;  %v13673_v9 = vsel %vm635_vm3, %v3296_v57, %v13660_v20  ;;  %v3298_v57 = vrot.slane %v13660_v20, 4  ;;  %v2650_v17 = vrot.slane %v13546_v37, 1 }
 0x410   : > { %20215 = vst [vmem:[#allocation22_spill] sm:$0xff] %v13673_v9  ;;  %v13683_v46 = vsel %vm635_vm3, %v4304_v22, %v13669_v39  ;;  %v4306_v21 = vrot.slane %v13669_v39, 4 }
 0x411   : > { %v13704_v22 = vsel %vm635_vm3, %v13584_v44, %v3298_v57  ;;  %v13709_v11 = vsel %vm480_vm4, %v2650_v17, %v2651_v58  ;;  %v2782_v57 = vrot.slane %v13407_v42, 2  ;;  %v19826_v17 = vrot.slane %v13404_v49, 2 }
 0x412   : > { %v13696_v34 = vsel %vm635_vm3, %v13587_v43, %v4306_v21  ;;  %20216 = vst [vmem:[#allocation21_spill] sm:$0xff] %v13704_v22  ;;  %v13712_v21 = vsel %vm480_vm4, %v2651_v58, %v2653_v13  ;;  %v3284_v31 = vrot.slane %v13709_v11, 4  ;;  %v13721_v26 = vsel %vm635_vm3, %v13709_v11, %v3286_v29 }
 0x413   : > { %20217 = vst [vmem:[#allocation24_spill] sm:$0xff] %v13721_v26  ;;  %v13725_v40 = vsel %vm635_vm3, %v13712_v21, %v4294_v56  ;;  %v10513_v29 = vpack.i.bf16 %v13676_v33, %v13663_v12  ;;  %v2787_v56 = vrot.slane %v13502_v10, 2  ;;  %v10508_v26 = vpack.i.bf16 %v13638_v16, %v13635_v38 }
 0x414   : > { %10499 = vrot.lane.b32.xlu1 %v13686_v23, %s11572_s10  ;;  %v13730_v13 = vsel %vm635_vm3, %v3284_v31, %v13663_v12  ;;  %v10503_v31 = vpack.i.bf16 %v13605_v45, %v13602_v24  ;;  %v19829_v58 = vrot.slane %v13499_v15, 2  ;;  %v2802_v10 = vrot.slane %v13546_v37, 2 }
 0x415   : > { %20218 = vst [vmem:[#allocation39_spill] sm:$0xff] %v13730_v13  ;;  %v2803_v22 = vrot.slane %v13543_v7, 2  ;;  %v2773_v13 = vrot.slane %v13463_v1, 2  ;;  %v2797_v24 = vrot.slane %v13428_v60, 2  ;;  %v2798_v45 = vrot.slane %v13425_v6, 2 }
 0x416   : > { %v13765_v9 = vsel %vm557_vm5, %v2787_v56, %v19829_v58  ;;  %v2793_v37 = vrot.slane %v13520_v14, 2  ;;  %v2780_v16 = vrot.slane %v13558_v3, 2  ;;  %v10523_v3 = vpack.i.bf16 %v13712_v21, %v13709_v11 }
 0x417   : > { %10474 = vrot.lane.b32.xlu2 %v13535_v47, %s11574_s12  ;;  %10494 = vrot.lane.b32.xlu0 %v13700_v27, %s11572_s10  ;;  %v13735_v47 = vsel %vm557_vm5, %v2777_v18, %v19825_v28  ;;  %v2784_v18 = vsel %vm557_vm5, %v2782_v57, %v19826_v17  ;;  %v2800_v57 = vrot.slane %v13571_v36, 2  ;;  %v13768_v48 = vsel %vm557_vm5, %v2802_v10, %v2803_v22 }
 0x418   : > { %v3610_v28 = vrot.slane %v13735_v47, 4  ;;  %v3596_v17 = vrot.slane %v2784_v18, 4  ;;  %v3608_v55 = vrot.slane %v13765_v9, 4  ;;  %v2792_v36 = vrot.slane %v13523_v41, 2 }
 0x419   : > { %v3620_v0 = vrot.slane %v13768_v48, 4  ;;  %v13787_v58 = vsel %vm557_vm5, %v2797_v24, %v2798_v45  ;;  %vm5577_vm4 = vcmask 588800  }
 0x41a   : > { %v13773_v35 = vsel %vm635_vm3, %v13765_v9, %v3610_v28  ;;  %v13784_v10 = vsel %vm635_vm3, %v3608_v55, %v13735_v47  ;;  %v13803_v24 = vsel %vm557_vm5, %v2792_v36, %v2793_v37 }
 0x41b   : > { %20219 = vst [vmem:[#allocation29_spill] sm:$0xff] %v13773_v35  ;;  %v2805_v35 = vrot.slane %v13648_v30, 2  ;;  %v13814_v30 = vsel %vm635_vm3, %v3620_v0, %v13803_v24 }
 0x41c   : > { %10514 = vrot.lane.b32.xlu1 %v10513_v29, %s11572_s10  ;;  %v2772_v29 = vrot.slane %v13466_v52, 2  ;;  %v2808_v52 = vrot.slane %v13451_v62, 2  ;;  %20222 = vst [vmem:[#allocation28_spill] sm:$0xff] %v13814_v30 }
 0x41e   : > { %v13780_v56 = vsel %vm557_vm5, %v2772_v29, %v2773_v13  ;;  %v2795_v29 = vrot.slane %v13579_v63, 2  ;;  %v3634_v63 = vrot.slane %v13787_v58, 4 }
 0x41f   : > { %10504 = vrot.lane.b32.xlu2 %v10503_v31, %s11572_s10  ;;  %10509 = vrot.lane.b32.xlu0 %v10508_v26, %s11572_s10  ;;  %v13791_v28 = vsel %vm635_vm3, %v3596_v17, %v13780_v56  ;;  %v3598_v41 = vrot.slane %v13780_v56, 4  ;;  %v2775_v26 = vrot.slane %v13538_v50, 2  ;;  %v2807_v17 = vrot.slane %v13454_v25, 2 }
 0x420   : > { %20220 = vst [vmem:[#allocation46_spill] sm:$0xff] %v13791_v28  ;;  %v10518_v50 = vpack.i.bf16 %v13669_v39, %v13660_v20 }
 0x421   : > { %v13800_v55 = vsel %vm635_vm3, %v2784_v18, %v3598_v41  ;;  %v13818_v41 = vperm.slane %v13618_v51, %v11869_v32  ;;  %v13825_v36 = vsel %vm557_vm5, %v2807_v17, %v2808_v52  ;;  %v20224_v51 = vrot.slane %v13475_v61, 2 }
 0x422   : > { %20221 = vst [vmem:[#allocation40_spill] sm:$0xff] %v13800_v55  ;;  %v3622_v55 = vrot.slane %v13803_v24, 4  ;;  %v3632_v0 = vrot.slane %v13825_v36, 4  ;;  %v13833_v30 = vsel %vm635_vm3, %v13825_v36, %v3634_v63  ;;  %v13841_v17 = vsel %vm557_vm5, %v2803_v22, %v2805_v35 }
 0x423   : > { %20223 = vst [vmem:[#allocation30_spill] sm:$0xff] %v13833_v30  ;;  %v4628_v22 = vrot.slane %v13841_v17, 4  ;;  %v13876_v30 = vsel %vm557_vm5, %v2773_v13, %v2775_v26  ;;  %v20227_v13 = vrot.slane %v13554_v59, 2  ;;  %v20228_v26 = vrot.slane %v13404_v49, 2 }
 0x424   : > { %10539 = vrot.lane.b32.xlu1 %v10503_v31, %s11574_s12  ;;  %v13822_v31 = vperm.slane %v13657_v4, %v11869_v32  ;;  %v13838_v4 = vsel %vm557_vm5, %v20224_v51, %v2780_v16  ;;  %v13851_v63 = vsel %vm635_vm3, %v13768_v48, %v3622_v55  ;;  %v13857_v35 = vsel %vm635_vm3, %v3632_v0, %v13787_v58 }
 0x425   : > { %20225 = vst [vmem:[#allocation35_spill] sm:$0xff] %v13851_v63  ;;  %v4618_v55 = vrot.slane %v13838_v4, 4  ;;  %v13870_v16 = vperm.slane %v13683_v46, %v11869_v32  ;;  %v13873_v0 = vsel %vm557_vm5, %v2793_v37, %v2795_v29  ;;  %v20226_v51 = vrot.slane %v13499_v15, 2 }
 0x426   : > { %v4606_v37 = vrot.slane %v13876_v30, 4  ;;  %v13896_v29 = vsel %vm557_vm5, %v20228_v26, %v20227_v13  ;;  %v20230_v26 = vrot.slane %v13531_v2, 2 }
 0x427   : > { %10519 = vrot.lane.b32.xlu2 %v10518_v50, %s11572_s10  ;;  %10524 = vrot.lane.b32.xlu0 %v10523_v3, %s11572_s10  ;;  %v13846_v50 = vsel %vm635_vm3, %v3932_v5, %v13463_v1  ;;  %v2790_v3 = vrot.slane %v13576_v8, 2  ;;  %v13863_v5 = vperm.slane %v13679_v19, %v11869_v32  ;;  %v10553_v8 = vpack.i.bf16 %v2784_v18, %v13735_v47 }
 0x428   : > { %v4629_v19 = vsel %vm635_vm3, %v4628_v22, %v13873_v0  ;;  %v4630_v47 = vrot.slane %v13873_v0, 4  ;;  %v13883_v18 = vsel %vm557_vm5, %v2798_v45, %v2800_v57  ;;  %20229 = vst [vmem:[#allocation34_spill] sm:$0xff] %v13896_v29  ;;  %v13900_v22 = vperm.slane %v13696_v34, %v11869_v32 }
 0x429   : > { %v13888_v46 = vsel %vm557_vm5, %v20226_v51, %v2790_v3  ;;  %v4292_v51 = vrot.slane %v13712_v21, 4  ;;  %v4604_v34 = vrot.slane %v13896_v29, 4  ;;  %v4642_v13 = vrot.slane %v13883_v18, 4 }
 0x42a   : > { %v4631_v45 = vsel %vm635_vm3, %v13841_v17, %v4630_v47  ;;  %v4616_v57 = vrot.slane %v13888_v46, 4  ;;  %v4619_v3 = vsel %vm635_vm3, %v13888_v46, %v4618_v55  ;;  %v13920_v55 = vsel %vm557_vm5, %v2808_v52, %v20230_v26 }
 0x42b   : > { %v4627_v59 = vperm.slane %v4619_v3, %v11869_v32  ;;  %20231 = vst [vmem:[#allocation33_spill] sm:$0xff] %v13920_v55  ;;  %v4640_v49 = vrot.slane %v13920_v55, 4  ;;  %v4643_v2 = vsel %vm635_vm3, %v13920_v55, %v4642_v13  ;;  %v13950_v55 = vperm.slane %v13725_v40, %v11869_v32 }
 0x42c   : > { %10554 = vrot.lane.b32.xlu1 %v10553_v8, %s11574_s12  ;;  %v4617_v47 = vsel %vm635_vm3, %v4616_v57, %v13838_v4  ;;  %v4651_v26 = vperm.slane %v4643_v2, %v11869_v32  ;;  %v10583_v40 = vpack.i.bf16 %v13709_v11, %v13635_v38  ;;  %v4275_v38 = vperm.slane %v13623_v54, %v11869_v32 }
 0x42f   : > { %10529 = vrot.lane.b32.xlu2 %v13700_v27, %s11574_s12  ;;  %10534 = vrot.lane.b32.xlu0 %v13686_v23, %s11574_s12  ;;  %v4607_v27 = vsel %vm635_vm3, %v13896_v29, %v4606_v37  ;;  %v4605_v23 = vsel %vm635_vm3, %v4604_v34, %v13876_v30  ;;  %v4623_v37 = vperm.slane %v4617_v47, %v11869_v32 }
 0x430   : > { %v4615_v3 = vperm.slane %v4607_v27, %v11869_v32  ;;  %v4611_v57 = vperm.slane %v4605_v23, %v11869_v32  ;;  %v4641_v34 = vsel %vm635_vm3, %v4640_v49, %v13883_v18  ;;  %v4664_v27 = vrot.slane %v4627_v59, 4 }
 0x431   : > { %v10543_v23 = vpack.i.bf16 %v13768_v48, %v13765_v9  ;;  %v4647_v28 = vperm.slane %v4641_v34, %v11869_v32  ;;  %v4652_v29 = vrot.slane %v4623_v37, 4  ;;  %v4352_v49 = vrot.slane %v13900_v22, 4 }
 0x432   : > { %v4666_v63 = vrot.slane %v4615_v3, 4  ;;  %v4654_v52 = vrot.slane %v4611_v57, 4  ;;  %v4665_v47 = vsel %vm635_vm3, %v4664_v27, %v4615_v3  ;;  %v4688_v3 = vrot.slane %v4651_v26, 4 }
 0x433   : > { %v10563_v34 = vpack.i.bf16 %v13780_v56, %v13787_v58  ;;  %v4676_v27 = vrot.slane %v4647_v28, 4  ;;  %v4318_v48 = vrot.slane %v4275_v38, 4 }
 0x434   : > { %10569 = vrot.lane.b32.xlu1 %v10553_v8, %s11572_s10  ;;  %v4667_v2 = vsel %vm635_vm3, %v4627_v59, %v4666_v63  ;;  %v4655_v9 = vsel %vm635_vm3, %v4623_v37, %v4654_v52  ;;  %v4635_v8 = vperm.slane %v4629_v19, %v11869_v32  ;;  %v13959_v63 = vsel %vm635_vm3, %v4652_v29, %v4611_v57 }
 0x435   : > { %v4639_v59 = vperm.slane %v4631_v45, %v11869_v32  ;;  %v4316_v52 = vrot.slane %v13863_v5, 4  ;;  %v4293_v29 = vsel %vm635_vm3, %v4292_v51, %v13676_v33  ;;  %v4663_v57 = vperm.slane %v4655_v9, %v12109_v53 }
 0x436   : > { %v4671_v45 = vperm.slane %v4665_v47, %v12109_v53  ;;  %v4678_v58 = vrot.slane %v4635_v8, 4  ;;  %v13977_v56 = vsel %vm635_vm3, %v4676_v27, %v4635_v8  ;;  %v10558_v51 = vpack.i.bf16 %v13803_v24, %v13825_v36 }
 0x437   : > { %10544 = vrot.lane.b32.xlu2 %v10543_v23, %s11574_s12  ;;  %10549 = vrot.lane.b32.xlu0 %v10543_v23, %s11572_s10  ;;  %v4689_v37 = vsel %vm635_vm3, %v4688_v3, %v4639_v59  ;;  %v4675_v23 = vperm.slane %v4667_v2, %v12109_v53  ;;  %v4690_v19 = vrot.slane %v4639_v59, 4  ;;  %v4299_v2 = vperm.slane %v4293_v29, %v11869_v32 }
 0x438   : > { %v4695_v11 = vperm.slane %v4689_v37, %v12109_v53  ;;  %v13986_v59 = vsel %vm635_vm3, %v4316_v52, %v4275_v38  ;;  %v4679_v54 = vsel %vm635_vm3, %v4647_v28, %v4678_v58  ;;  %v4340_v8 = vrot.slane %v13870_v16, 4 }
 0x439   : > { %v4691_v3 = vsel %vm635_vm3, %v4651_v26, %v4690_v19  ;;  %v4714_v37 = vrot.slane %v4675_v23, 4  ;;  %v4342_v27 = vrot.slane %v4299_v2, 4  ;;  %v4687_v26 = vperm.slane %v4679_v54, %v12109_v53 }
 0x43a   : > { %v4708_v9 = vrot.slane %v4695_v11, 4  ;;  %v4699_v47 = vperm.slane %v4691_v3, %v12109_v53  ;;  %v4706_v19 = vrot.slane %v4663_v57, 4  ;;  %v4710_v29 = vrot.slane %v4671_v45, 4 }
 0x43b   : > { %v4354_v24 = vrot.slane %v13950_v55, 4  ;;  %v13998_v28 = vsel %vm635_vm3, %v4340_v8, %v4299_v2  ;;  %v10598_v58 = vpack.i.bf16 %v13838_v4, %v13841_v17  ;;  %v4343_v2 = vsel %vm635_vm3, %v13870_v16, %v4342_v27 }
 0x43c   : > { %10584 = vrot.lane.b32.xlu1 %v10583_v40, %s11574_s12  ;;  %v13992_v40 = vsel %vm635_vm3, %v4708_v9, %v4671_v45  ;;  %v4712_v36 = vrot.slane %v4699_v47, 4  ;;  %v14001_v52 = vsel %vm635_vm3, %v4699_v47, %v4714_v37  ;;  %v14006_v3 = vsel %vm635_vm3, %v4687_v26, %v4706_v19 }
 0x43d   : > { %v4704_v45 = vrot.slane %v4687_v26, 4  ;;  %v14009_v9 = vsel %vm635_vm3, %v4695_v11, %v4710_v29  ;;  %v20232_v47 = vrot.slane %v13822_v31, 4  ;;  %v4351_v26 = vperm.slane %v4343_v2, %v12109_v53 }
 0x43e   : > { %v14012_v54 = vsel %vm635_vm3, %v4712_v36, %v4675_v23  ;;  %v4319_v11 = vsel %vm635_vm3, %v13863_v5, %v4318_v48  ;;  %v4353_v38 = vsel %vm635_vm3, %v4352_v49, %v13950_v55  ;;  %v3939_v16 = vperm.slane %v13846_v50, %v11869_v32 }
 0x43f   : > { %10564 = vrot.lane.b32.xlu0 %v10563_v34, %s11574_s12  ;;  %10559 = vrot.lane.b32.xlu2 %v10558_v51, %s11574_s12  ;;  %v4329_v37 = vsel %vm635_vm3, %v20232_v47, %v13818_v41  ;;  %v14021_v8 = vsel %vm635_vm3, %v4704_v45, %v4663_v57  ;;  %v4327_v27 = vperm.slane %v4319_v11, %v12109_v53  ;;  %v4368_v19 = vrot.slane %v4351_v26, 4 }
 0x440   : > { %v4335_v23 = vperm.slane %v4329_v37, %v12109_v53  ;;  %v4359_v57 = vperm.slane %v4353_v38, %v12109_v53  ;;  %v20233_v29 = vrot.slane %v13499_v15, 4  ;;  %v20234_v55 = vrot.slane %v13543_v7, 4 }
 0x441   : > { %v20235_v50 = vrot.slane %v13451_v62, 4  ;;  %v14048_v45 = vsel %vm635_vm3, %v4368_v19, %v4327_v27  ;;  %v4370_v38 = vrot.slane %v4327_v27, 4 }
 0x442   : > { %v3945_v5 = vsel %vm635_vm3, %v20233_v29, %v13475_v61  ;;  %v3957_v49 = vsel %vm635_vm3, %v20234_v55, %v13520_v14  ;;  %20236 = vst [vmem:[#allocation31_spill] sm:$0xff] %v14048_v45  ;;  %v4372_v2 = vrot.slane %v4359_v57, 4  ;;  %v14063_v55 = vperm.slane %v13784_v10, %v11869_v32 }
 0x443   : > { %v3951_v48 = vperm.slane %v3945_v5, %v11869_v32  ;;  %v3969_v36 = vsel %vm635_vm3, %v20235_v50, %v13425_v6  ;;  %v3963_v47 = vperm.slane %v3957_v49, %v11869_v32  ;;  %v20238_v5 = vrot.slane %v13818_v41, 4 }
 0x444   : > { %10599 = vrot.lane.b32.xlu1 %v10598_v58, %s11574_s12  ;;  %v4374_v58 = vrot.slane %v4335_v23, 4  ;;  %v3975_v37 = vperm.slane %v3969_v36, %v11869_v32  ;;  %v14066_v49 = vsel %vm635_vm3, %v4372_v2, %v4335_v23  ;;  %v14072_v27 = vsel %vm635_vm3, %v4351_v26, %v4370_v38 }
 0x445   : > { %v3980_v11 = vrot.slane %v3951_v48, 4  ;;  %v4331_v19 = vsel %vm635_vm3, %v13822_v31, %v20238_v5  ;;  %20239 = vst [vmem:[#allocation48_spill] sm:$0xff] %v14066_v49  ;;  %v4355_v41 = vsel %vm635_vm3, %v13900_v22, %v4354_v24  ;;  %v10613_v31 = vpack.i.bf16 %v13883_v18, %v13873_v0 }
 0x446   : > { %v14055_v29 = vsel %vm635_vm3, %v4359_v57, %v4374_v58  ;;  %20240 = vst [vmem:[#allocation49_spill] sm:$0xff] %v14072_v27  ;;  %v2924_v57 = vrot.slane %v13407_v42, 4  ;;  %v4363_v50 = vperm.slane %v4355_v41, %v12109_v53  ;;  %v3982_v36 = vrot.slane %v3939_v16, 4 }
 0x447   : > { %10579 = vrot.lane.b32.xlu0 %v10563_v34, %s11572_s10  ;;  %10574 = vrot.lane.b32.xlu2 %v10558_v51, %s11572_s10  ;;  %20237 = vst [vmem:[#allocation47_spill] sm:$0xff] %v14055_v29  ;;  %v14069_v34 = vsel %vm635_vm3, %v3980_v11, %v3939_v16  ;;  %v4004_v51 = vrot.slane %v3975_v37, 4  ;;  %v2962_v58 = vrot.slane %v13428_v60, 4  ;;  %v3644_v26 = vrot.slane %v14063_v55, 4  ;;  %v20257_v60 = vld [vmem:[#allocation40_spill] sm:$0xff] }
 0x448   : > { %v10588_v22 = vpack.i.bf16 %v13888_v46, %v13584_v44  ;;  %v4006_v24 = vrot.slane %v3963_v47, 4  ;;  %v10593_v2 = vpack.i.bf16 %v13660_v20, %v13663_v12  ;;  %v4339_v11 = vperm.slane %v4331_v19, %v12109_v53  ;;  %v20241_v44 = vld [vmem:[#allocation46_spill] sm:$0xff] }
 0x449   : > { %v14079_v10 = vpop.permute.xlu2 %10414  ;;  %v14082_v23 = vsel %vm635_vm3, %v4004_v51, %v3963_v47  ;;  %v4376_v38 = vrot.slane %v4363_v50, 4  ;;  %v3983_v5 = vsel %vm635_vm3, %v3951_v48, %v3982_v36  ;;  %v3970_v16 = vrot.slane %v13425_v6, 4  ;;  %v20243_v48 = vld [vmem:[#allocation42_spill] sm:$0xff] }
 0x44a   : > { %v2963_v51 = vsel %vm635_vm3, %v13454_v25, %v2962_v58  ;;  %v3991_v41 = vperm.slane %v3983_v5, %v12109_v53  ;;  %v3603_v47 = vperm.slane %v20241_v44, %v11869_v32  ;;  %v2925_v19 = vsel %vm635_vm3, %v2924_v57, %v20243_v48  ;;  %v20245_v58 = vld [vmem:[#allocation28_spill] sm:$0xff] }
 0x44b   : > { %v14104_v20 = vsel %vm635_vm3, %v4376_v38, %v4339_v11  ;;  %v3971_v6 = vsel %vm635_vm3, %v13451_v62, %v3970_v16  ;;  %v14122_v5 = vperm.slane %v2963_v51, %v11869_v32  ;;  %v20247_v62 = vld [vmem:[#allocation38_spill] sm:$0xff]  ;;  %v3639_v51 = vperm.slane %v13857_v35, %v11869_v32  ;;  %v20253_v44 = vld [vmem:[#allocation32_spill] sm:$0xff] }
 0x44c   : > { %10614 = vrot.lane.b32.xlu1 %v10613_v31, %s11574_s12  ;;  %v4007_v31 = vsel %vm635_vm3, %v3975_v37, %v4006_v24  ;;  %20242 = vst [vmem:[#allocation46_spill] sm:$0xff] %v14104_v20  ;;  %v20244_v37 = vld [vmem:[#allocation29_spill] sm:$0xff]  ;;  %v10628_v16 = vpack.i.bf16 %v20247_v62, %v13876_v30  ;;  %v4034_v57 = vrot.slane %v3991_v41, 4  ;;  %v14146_v38 = vperm.slane %v20253_v44, %v11869_v32 }
 0x44d   : > { %v4015_v12 = vperm.slane %v4007_v31, %v12109_v53  ;;  %v14113_v36 = vperm.slane %v20244_v37, %v11869_v32  ;;  %20246 = vst [vmem:[#allocation29_spill] sm:$0xff] %v14122_v5  ;;  %v14127_v31 = vperm.slane %v3971_v6, %v11869_v32  ;;  %v10603_v35 = vpack.i.bf16 %v13841_v17, %v13888_v46  ;;  %v20258_v17 = vld [vmem:[#allocation33_spill] sm:$0xff]  ;;  %v20259_v46 = vld [vmem:[#allocation34_spill] sm:$0xff] }
 0x44e   : > { %v3646_v42 = vrot.slane %v3603_v47, 4  ;;  %v3946_v48 = vrot.slane %v13475_v61, 4  ;;  %v3958_v44 = vrot.slane %v13520_v14, 4  ;;  %v3668_v14 = vrot.slane %v3639_v51, 4 }
 0x44f   : > { %10589 = vrot.lane.b32.xlu2 %v10588_v22, %s11574_s12  ;;  %10594 = vrot.lane.b32.xlu0 %v10593_v2, %s11574_s12  ;;  %v3627_v22 = vperm.slane %v20245_v58, %v11869_v32  ;;  %v4032_v24 = vrot.slane %v4015_v12, 4  ;;  %v14118_v2 = vsel %vm635_vm3, %v3644_v26, %v3603_v47  ;;  %20248 = vst [vmem:[#allocation28_spill] sm:$0xff] %v14127_v31  ;;  %v20249_v58 = vld [vmem:[#allocation45_spill] sm:$0xff]  ;;  %v3656_v37 = vrot.slane %v14113_v36, 4 }
 0x450   : > { %v2950_v13 = vrot.slane %v20249_v58, 4  ;;  %v14133_v26 = vperm.slane %v2925_v19, %v11869_v32  ;;  %v14142_v6 = vsel %vm635_vm3, %v4015_v12, %v4034_v57  ;;  %v4378_v57 = vrot.slane %v4339_v11, 4 }
 0x451   : > { %v14139_v62 = vsel %vm635_vm3, %v4032_v24, %v3991_v41  ;;  %20252 = vst [vmem:[#allocation51_spill] sm:$0xff] %v14142_v6  ;;  %v3670_v5 = vrot.slane %v3627_v22, 4  ;;  %v14149_v19 = vpop.permute.xlu2 %10419  ;;  %v20255_v24 = vld [vmem:[#allocation35_spill] sm:$0xff]  ;;  %v3607_v58 = vperm.slane %v20257_v60, %v11869_v32  ;;  %v20260_v47 = vpack.i.bf16 %v20258_v17, %v20259_v46 }
 0x452   : > { %20250 = vst [vmem:[#allocation38_spill] sm:$0xff] %v14133_v26  ;;  %v3631_v12 = vperm.slane %v20255_v24, %v11869_v32  ;;  %v20256_v26 = vld [vmem:[#allocation19_spill] sm:$0xff]  ;;  %v14173_v61 = vsel %vm635_vm3, %v4363_v50, %v4378_v57  ;;  %v14185_v50 = vpop.permute.xlu1 %10429  ;;  %v14188_v57 = vsel %vm635_vm3, %v3668_v14, %v3627_v22  ;;  %v20269_v22 = vpack.i.bf16 %v13669_v39, %v13676_v33 }
 0x453   : > { %20251 = vst [vmem:[#allocation50_spill] sm:$0xff] %v14139_v62  ;;  %v2951_v25 = vsel %vm635_vm3, %v20256_v26, %v2950_v13  ;;  %v3647_v13 = vsel %vm635_vm3, %v14063_v55, %v3646_v42  ;;  %v20264_v60 = vld [vmem:[#allocation23_spill] sm:$0xff]  ;;  %v3671_v6 = vsel %vm635_vm3, %v3639_v51, %v3670_v5  ;;  %v20265_v42 = vld [vmem:[#allocation25_spill] sm:$0xff]  ;;  %v10618_v14 = vpack.i.bf16 %v20259_v46, %v13838_v4 }
 0x454   : > { %10629 = vrot.lane.b32.xlu1 %v10628_v16, %s11574_s12  ;;  %v20254_v16 = vld [vmem:[#allocation30_spill] sm:$0xff]  ;;  %v14179_v24 = vperm.slane %v20264_v60, %v11869_v32  ;;  %v3682_v20 = vrot.slane %v3631_v12, 4  ;;  %v14192_v55 = vperm.slane %v20265_v42, %v11869_v32  ;;  %v3679_v5 = vperm.slane %v3671_v6, %v12109_v53  ;;  %v20268_v51 = vld [vmem:[#allocation39_spill] sm:$0xff] }
 0x455   : > { %v3643_v41 = vperm.slane %v20254_v16, %v11869_v32  ;;  %v20261_v16 = vld [vmem:[#allocation27_spill] sm:$0xff]  ;;  %20263 = vst [vmem:[#allocation30_spill] sm:$0xff] %v14173_v61  ;;  %v20267_v60 = vld [vmem:[#allocation22_spill] sm:$0xff]  ;;  %v14201_v61 = vperm.slane %v20268_v51, %v11869_v32  ;;  %v10623_v6 = vpack.i.bf16 %v13873_v0, %v20258_v17  ;;  %v3658_v45 = vrot.slane %v3607_v58, 4 }
 0x456   : > { %v14170_v11 = vperm.slane %v20261_v16, %v11869_v32  ;;  %v3308_v16 = vrot.slane %v14146_v38, 4  ;;  %20266 = vst [vmem:[#allocation35_spill] sm:$0xff] %v14192_v55  ;;  %v3696_v29 = vrot.slane %v3679_v5, 4  ;;  %v14239_v46 = vperm.slane %v13959_v63, %v12109_v53 }
 0x457   : > { %10604 = vrot.lane.b32.xlu2 %v10603_v35, %s11572_s10  ;;  %10609 = vrot.lane.b32.xlu0 %v20260_v47, %s11574_s12  ;;  %v3655_v35 = vperm.slane %v3647_v13, %v12109_v53  ;;  %v3657_v47 = vsel %vm635_vm3, %v3656_v37, %v3607_v58  ;;  %v3680_v62 = vrot.slane %v3643_v41, 4  ;;  %v14196_v13 = vperm.slane %v20267_v60, %v11869_v32 }
 0x458   : > { %20262 = vst [vmem:[#allocation32_spill] sm:$0xff] %v14170_v11  ;;  %v3663_v42 = vperm.slane %v3657_v47, %v12109_v53  ;;  %v3683_v39 = vsel %vm635_vm3, %v3643_v41, %v3682_v20  ;;  %v14220_v33 = vsel %vm635_vm3, %v3308_v16, %v14179_v24  ;;  %v20270_v41 = vld [vmem:[#allocation21_spill] sm:$0xff]  ;;  %v3659_v16 = vsel %vm635_vm3, %v14113_v36, %v3658_v45 }
 0x459   : > { %v3698_v37 = vrot.slane %v3655_v35, 4  ;;  %v3681_v60 = vsel %vm635_vm3, %v3680_v62, %v3631_v12  ;;  %v3332_v4 = vrot.slane %v14196_v13, 4  ;;  %v14223_v62 = vpop.permute.xlu2 %10434  ;;  %v14230_v12 = vsel %vm635_vm3, %v3696_v29, %v3655_v35  ;;  %20272 = vst [vmem:[#allocation33_spill] sm:$0xff] %v14239_v46  ;;  %v20274_v29 = vld [vmem:[#allocation24_spill] sm:$0xff] }
 0x45a   : > { %v3687_v51 = vperm.slane %v3681_v60, %v12109_v53  ;;  %v3702_v49 = vrot.slane %v3663_v42, 4  ;;  %v3691_v20 = vperm.slane %v3683_v39, %v12109_v53  ;;  %v14235_v17 = vperm.slane %v20270_v41, %v11869_v32 }
 0x45b   : > { %v14214_v27 = vsel %vm635_vm3, %v3679_v5, %v3698_v37  ;;  %v14248_v35 = vperm.slane %v20274_v29, %v11869_v32  ;;  %v3947_v63 = vsel %vm635_vm3, %v13499_v15, %v3946_v48  ;;  %v14265_v45 = vperm.slane %v13986_v59, %v12109_v53  ;;  %v14280_v59 = vpop.permute.xlu1 %10444 }
 0x45c   : > { %10644 = vrot.lane.b32.xlu1 %v20269_v22, %s11574_s12  ;;  %v3700_v58 = vrot.slane %v3687_v51, 4  ;;  %20271 = vst [vmem:[#allocation40_spill] sm:$0xff] %v14235_v17  ;;  %v14242_v47 = vsel %vm635_vm3, %v3687_v51, %v3702_v49  ;;  %v3704_v37 = vrot.slane %v3691_v20, 4  ;;  %v14255_v22 = vsel %vm635_vm3, %v3332_v4, %v14201_v61 }
 0x45d   : > { %20273 = vst [vmem:[#allocation34_spill] sm:$0xff] %v14242_v47  ;;  %v14261_v49 = vperm.slane %v13977_v56, %v12109_v53  ;;  %v3667_v36 = vperm.slane %v3659_v16, %v12109_v53  ;;  %v3959_v15 = vsel %vm635_vm3, %v13543_v7, %v3958_v44  ;;  %v10431_v48 = vunpack.i.l.bf16 %v14185_v50 }
 0x45e   : > { %20275 = vst [vmem:[#allocation27_spill] sm:$0xff] %v14248_v35  ;;  %v14251_v5 = vsel %vm635_vm3, %v3700_v58, %v3663_v42  ;;  %v4702_v51 = vrot.slane %v14239_v46, 4  ;;  %v10421_v41 = vunpack.i.l.bf16 %v14149_v19  ;;  %v3334_v7 = vrot.slane %v14201_v61, 4 }
 0x45f   : > { %10619 = vrot.lane.b32.xlu2 %v10618_v14, %s11572_s10  ;;  %10624 = vrot.lane.b32.xlu0 %v10623_v6, %s11572_s10  ;;  %20276 = vst [vmem:[#allocation23_spill] sm:$0xff] %v14251_v5  ;;  %v20279_v14 = vld [vmem:[#allocation20_spill] sm:$0xff]  ;;  %v14274_v6 = vperm.slane %v2951_v25, %v11869_v32  ;;  %v14284_v39 = vsel %vm635_vm3, %v3704_v37, %v3667_v36  ;;  %v10432_v44 = vunpack.i.h.bf16 %v14185_v50  ;;  %v4366_v29 = vrot.slane %v14265_v45, 4 }
 0x460   : > { %20277 = vst [vmem:[#allocation25_spill] sm:$0xff] %v14261_v49  ;;  %v14270_v42 = vperm.slane %v20279_v14, %v11869_v32  ;;  %v14294_v16 = vsel %vm635_vm3, %v14261_v49, %v4702_v51  ;;  %v19846_v37 = vunpack.i.h.bf16 %v14079_v10  ;;  %v20283_v14 = vpack.i.bf16 %v13876_v30, %v13883_v18 }
 0x461   : > { %v14227_v0 = vpop.permute.xlu0 %10409  ;;  %20278 = vst [vmem:[#allocation22_spill] sm:$0xff] %v14265_v45  ;;  %v20284_v60 = vpack.i.bf16 %v13587_v43, %v13712_v21  ;;  %v14308_v61 = vperm.slane %v13998_v28, %v12109_v53  ;;  %v14311_v50 = vperm.slane %v3959_v15, %v11869_v32  ;;  %v3706_v51 = vrot.slane %v3667_v36, 4  ;;  %v14320_v21 = vpop.permute.xlu2 %10449 }
 0x462   : > { %20280 = vst [vmem:[#allocation39_spill] sm:$0xff] %v14270_v42  ;;  %v3036_v25 = vrot.slane %v10431_v48, 4  ;;  %v10422_v56 = vunpack.i.h.bf16 %v14149_v19  ;;  %v14317_v30 = vperm.slane %v3947_v63, %v11869_v32  ;;  %v3310_v18 = vrot.slane %v14179_v24, 4 }
 0x463   : > { %20281 = vst [vmem:[#allocation21_spill] sm:$0xff] %v14274_v6  ;;  %v3038_v43 = vrot.slane %v10421_v41, 4  ;;  %v14324_v28 = vperm.slane %v14069_v34, %v12109_v53  ;;  %v14328_v36 = vsel %vm635_vm3, %v3691_v20, %v3706_v51  ;;  %v4044_v19 = vrot.slane %v10432_v44, 4 }
 0x464   : > { %20282 = vst [vmem:[#allocation24_spill] sm:$0xff] %v14284_v39  ;;  %v3037_v15 = vsel %vm635_vm3, %v3036_v25, %v10421_v41  ;;  %v3311_v63 = vsel %vm635_vm3, %v14146_v38, %v3310_v18  ;;  %v3335_v24 = vsel %vm635_vm3, %v14196_v13, %v3334_v7  ;;  %v14338_v34 = vsel %vm635_vm3, %v14308_v61, %v4366_v29  ;;  %v14347_v38 = vpop.permute.xlu1 %10454  ;;  %v20292_v7 = vld [vmem:[#allocation43_spill] sm:$0xff] }
 0x465   : > { %20285 = vst [vmem:[#allocation20_spill] sm:$0xff] %v14308_v61  ;;  %v14342_v4 = vperm.slane %v14082_v23, %v12109_v53  ;;  %v4046_v25 = vrot.slane %v10422_v56, 4  ;;  %v4045_v41 = vsel %vm635_vm3, %v4044_v19, %v10422_v56  ;;  %v20291_v13 = vrot.slane %v13463_v1, 4 }
 0x466   : > { %20286 = vst [vmem:[#allocation52_spill] sm:$0xff] %v14311_v50  ;;  %v3992_v29 = vrot.slane %v14317_v30, 4  ;;  %v3039_v18 = vsel %vm635_vm3, %v10431_v48, %v3038_v43  ;;  %v14356_v23 = vperm.slane %v3037_v15, %v11869_v32  ;;  %v14362_v56 = vrot.slane %v19846_v37, 4 }
 0x467   : > { %10634 = vrot.lane.b32.xlu2 %v20283_v14, %s11572_s10  ;;  %10639 = vrot.lane.b32.xlu0 %v20284_v60, %s11574_s12  ;;  %20287 = vst [vmem:[#allocation53_spill] sm:$0xff] %v14317_v30  ;;  %v4016_v60 = vrot.slane %v14127_v31, 4  ;;  %v3935_v51 = vsel %vm635_vm3, %v20292_v7, %v20291_v13  ;;  %v10447_v14 = vunpack.i.h.bf16 %v14280_v59  ;;  %v10411_v1 = vunpack.i.l.bf16 %v14227_v0 }
 0x468   : > { %20288 = vst [vmem:[#allocation54_spill] sm:$0xff] %v14324_v28  ;;  %v4030_v19 = vrot.slane %v14324_v28, 4  ;;  %v20294_v48 = vunpack.i.l.bf16 %v14079_v10  ;;  %v10412_v15 = vunpack.i.h.bf16 %v14227_v0  ;;  %v14375_v7 = vperm.slane %v3935_v51, %v11869_v32 }
 0x469   : > { %v14314_v58 = vpop.permute.xlu0 %10424  ;;  %20289 = vst [vmem:[#allocation55_spill] sm:$0xff] %v14328_v36  ;;  %v4017_v20 = vsel %vm635_vm3, %v4016_v60, %v14311_v50  ;;  %v10446_v60 = vunpack.i.l.bf16 %v14280_v59  ;;  %v14378_v59 = vperm.slane %v3335_v24, %v12109_v53  ;;  %v14381_v37 = vperm.slane %v3039_v18, %v11869_v32 }
 0x46a   : > { %20290 = vst [vmem:[#allocation56_spill] sm:$0xff] %v14342_v4  ;;  %v14367_v13 = vperm.slane %v4017_v20, %v12109_v53  ;;  %v14371_v43 = vrot.slane %v20294_v48, 4  ;;  %v4047_v28 = vsel %vm635_vm3, %v10432_v44, %v4046_v25  ;;  %v14385_v20 = vperm.slane %v4045_v41, %v11869_v32 }
 0x46b   : > { %20295 = vst [vmem:[#allocation57_spill] sm:$0xff] %v14375_v7  ;;  %v14389_v48 = vsel %vm635_vm3, %v14342_v4, %v4030_v19  ;;  %v4082_v45 = vrot.slane %v10447_v14, 4  ;;  %v3074_v51 = vrot.slane %v10446_v60, 4  ;;  %v3993_v24 = vsel %vm635_vm3, %v3992_v29, %v14375_v7  ;;  %v14404_v4 = vpop.permute.xlu2 %10459 }
 0x46c   : > { %20293 = vst [vmem:[#allocation43_spill] sm:$0xff] %v14367_v13  ;;  %v10437_v18 = vunpack.i.h.bf16 %v14223_v62  ;;  %v3072_v46 = vrot.slane %v10411_v1, 4  ;;  %v4036_v44 = vrot.slane %v14367_v13, 4  ;;  %v14400_v25 = vperm.slane %v14118_v2, %v12109_v53 }
 0x46d   : > { %20296 = vst [vmem:[#allocation58_spill] sm:$0xff] %v14378_v59  ;;  %v10436_v41 = vunpack.i.l.bf16 %v14223_v62  ;;  %v4080_v19 = vrot.slane %v10412_v15, 4  ;;  %v3075_v0 = vsel %vm635_vm3, %v10411_v1, %v3074_v51  ;;  %v3360_v49 = vrot.slane %v14378_v59, 4 }
 0x46e   : > { %20297 = vst [vmem:[#allocation59_spill] sm:$0xff] %v14381_v37  ;;  %v14408_v29 = vperm.slane %v4047_v28, %v11869_v32  ;;  %v4094_v30 = vrot.slane %v14385_v20, 4  ;;  %v14412_v13 = vperm.slane %v3993_v24, %v12109_v53  ;;  %v14416_v2 = vperm.slane %v14188_v57, %v12109_v53  ;;  %v14428_v24 = vpop.permute.xlu1 %10469 }
 0x46f   : > { %20298 = vst [vmem:[#allocation60_spill] sm:$0xff] %v14400_v25  ;;  %v4083_v62 = vsel %vm635_vm3, %v10412_v15, %v4082_v45  ;;  %v10427_v1 = vunpack.i.h.bf16 %v14314_v58  ;;  %v10426_v51 = vunpack.i.l.bf16 %v14314_v58  ;;  %v14422_v7 = vperm.slane %v3311_v63, %v12109_v53 }
 0x470   : > { %20299 = vst [vmem:[#allocation61_spill] sm:$0xff] %v14408_v29  ;;  %v3073_v28 = vsel %vm635_vm3, %v3072_v46, %v10446_v60  ;;  %v14426_v31 = vperm.slane %v3075_v0, %v11869_v32  ;;  %v14432_v57 = vsel %vm635_vm3, %v4036_v44, %v14412_v13  ;;  %v3694_v45 = vrot.slane %v14400_v25, 4 }
 0x471   : > { %v14392_v61 = vpop.permute.xlu0 %10439  ;;  %20300 = vst [vmem:[#allocation62_spill] sm:$0xff] %v14412_v13  ;;  %v4056_v15 = vrot.slane %v10437_v18, 4  ;;  %v3048_v50 = vrot.slane %v10436_v41, 4  ;;  %v4081_v58 = vsel %vm635_vm3, %v4080_v19, %v10447_v14  ;;  %v14438_v63 = vsel %vm635_vm3, %v3360_v49, %v14422_v7 }
 0x472   : > { %20301 = vst [vmem:[#allocation63_spill] sm:$0xff] %v14416_v2  ;;  %v14441_v46 = vperm.slane %v4083_v62, %v11869_v32  ;;  %v14447_v44 = vsel %vm635_vm3, %v14416_v2, %v3694_v45  ;;  %v14450_v25 = vperm.slane %v3073_v28, %v11869_v32  ;;  %v4058_v13 = vrot.slane %v10427_v1, 4 }
 0x473   : > { %20302 = vst [vmem:[#allocation64_spill] sm:$0xff] %v14422_v7  ;;  %v3049_v14 = vsel %vm635_vm3, %v3048_v50, %v10426_v51  ;;  %v3050_v19 = vrot.slane %v10426_v51, 4  ;;  %v14455_v62 = vperm.slane %v4081_v58, %v11869_v32  ;;  %v14459_v60 = vperm.slane %v14220_v33, %v12109_v53  ;;  %v14481_v26 = vpop.permute.xlu2 %10474 }
 0x474   : > { %20303 = vst [vmem:[#allocation65_spill] sm:$0xff] %v14426_v31  ;;  %v14463_v45 = vperm.slane %v14255_v22, %v12109_v53  ;;  %v4057_v50 = vsel %vm635_vm3, %v4056_v15, %v10427_v1  ;;  %v10462_v51 = vunpack.i.h.bf16 %v14404_v4  ;;  %v20308_v2 = vunpack.i.h.bf16 %v14320_v21 }
 0x475   : > { %20304 = vst [vmem:[#allocation66_spill] sm:$0xff] %v14438_v63  ;;  %v20309_v6 = vunpack.i.l.bf16 %v14320_v21  ;;  %v3055_v22 = vperm.slane %v3049_v14, %v11869_v32  ;;  %v3051_v0 = vsel %vm635_vm3, %v10436_v41, %v3050_v19  ;;  %v4059_v1 = vsel %vm635_vm3, %v10437_v18, %v4058_v13 }
 0x476   : > { %20305 = vst [vmem:[#allocation67_spill] sm:$0xff] %v14441_v46  ;;  %v4068_v33 = vrot.slane %v20308_v2, 4  ;;  %v10461_v15 = vunpack.i.l.bf16 %v14404_v4  ;;  %v4063_v37 = vperm.slane %v4057_v50, %v11869_v32  ;;  %v10472_v2 = vunpack.i.h.bf16 %v14428_v24  ;;  %v14502_v58 = vpop.permute.xlu1 %10484 }
 0x477   : > { %20306 = vst [vmem:[#allocation68_spill] sm:$0xff] %v14459_v60  ;;  %v3060_v42 = vrot.slane %v20309_v6, 4  ;;  %v3358_v6 = vrot.slane %v14459_v60, 4  ;;  %v20310_v14 = vunpack.i.h.bf16 %v14347_v38  ;;  %v20311_v41 = vunpack.i.l.bf16 %v14347_v38 }
 0x478   : > { %20307 = vst [vmem:[#allocation69_spill] sm:$0xff] %v14463_v45  ;;  %v4170_v13 = vrot.slane %v10462_v51, 4  ;;  %v10471_v4 = vunpack.i.l.bf16 %v14428_v24  ;;  %v14497_v18 = vperm.slane %v3051_v0, %v11869_v32  ;;  %v3084_v28 = vrot.slane %v3055_v22, 4 }
 0x479   : > { %v14469_v49 = vpop.permute.xlu0 %10464  ;;  %v14489_v17 = vrot.slane %v20310_v14, 4  ;;  %v14493_v19 = vrot.slane %v20311_v41, 4  ;;  %v14500_v50 = vperm.slane %v4059_v1, %v11869_v32  ;;  %v14506_v14 = vsel %vm635_vm3, %v14463_v45, %v3358_v6 }
 0x47a   : > { %20312 = vst [vmem:[#allocation70_spill] sm:$0xff] %v14497_v18  ;;  %v20315_v60 = vrot.slane %v14356_v23, 4  ;;  %v3162_v35 = vrot.slane %v10461_v15, 4  ;;  %v10442_v24 = vunpack.i.h.bf16 %v14392_v61  ;;  %v4092_v55 = vrot.slane %v4063_v37, 4 }
 0x47b   : > { %20313 = vst [vmem:[#allocation71_spill] sm:$0xff] %v14500_v50  ;;  %v14516_v1 = vsel %vm635_vm3, %v4063_v37, %v4094_v30  ;;  %v4168_v11 = vrot.slane %v10472_v2, 4  ;;  %v10441_v63 = vunpack.i.l.bf16 %v14392_v61  ;;  %v4171_v6 = vsel %vm635_vm3, %v10472_v2, %v4170_v13 }
 0x47c   : > { %20314 = vst [vmem:[#allocation72_spill] sm:$0xff] %v14506_v14  ;;  %v14511_v41 = vsel %vm635_vm3, %v3055_v22, %v20315_v60  ;;  %v3160_v45 = vrot.slane %v10471_v4, 4  ;;  %v10476_v59 = vunpack.i.l.bf16 %v14481_v26  ;;  %v10486_v60 = vunpack.i.l.bf16 %v14502_v58 }
 0x47d   : > { %20316 = vst [vmem:[#allocation73_spill] sm:$0xff] %v14511_v41  ;;  %v14524_v22 = vsel %vm635_vm3, %v3084_v28, %v14356_v23  ;;  %v10487_v37 = vunpack.i.h.bf16 %v14502_v58  ;;  %v3163_v30 = vsel %vm635_vm3, %v10471_v4, %v3162_v35  ;;  %v4069_v61 = vsel %vm635_vm3, %v4068_v33, %v10442_v24 }
 0x47e   : > { %20317 = vst [vmem:[#allocation74_spill] sm:$0xff] %v14524_v22  ;;  %v4070_v2 = vrot.slane %v10442_v24, 4  ;;  %v20318_v13 = vunpack.i.l.bf16 %v14469_v49  ;;  %v4169_v14 = vsel %vm635_vm3, %v4168_v11, %v10462_v51  ;;  %v14537_v23 = vperm.slane %v4171_v6, %v11869_v32  ;;  %v14542_v24 = vpop.permute.xlu2 %10504 }
 0x47f   : > { %v3061_v28 = vsel %vm635_vm3, %v3060_v42, %v10441_v63  ;;  %v3062_v0 = vrot.slane %v10441_v63, 4  ;;  %v3161_v58 = vsel %vm635_vm3, %v3160_v45, %v10461_v15  ;;  %v10477_v35 = vunpack.i.h.bf16 %v14481_v26  ;;  %20319 = vst [vmem:[#allocation75_spill] sm:$0xff] %v14542_v24 }
 0x480   : > { %v3148_v36 = vrot.slane %v20318_v13, 4  ;;  %v3174_v4 = vrot.slane %v10476_v59, 4  ;;  %v3172_v33 = vrot.slane %v10486_v60, 4  ;;  %v14545_v13 = vperm.slane %v3163_v30, %v11869_v32 }
 0x481   : > { %v14533_v7 = vpop.permute.xlu0 %10479  ;;  %v4075_v41 = vperm.slane %v4069_v61, %v11869_v32  ;;  %v4180_v11 = vrot.slane %v10487_v37, 4  ;;  %v14550_v6 = vperm.slane %v4169_v14, %v11869_v32  ;;  %v20320_v42 = vunpack.i.h.bf16 %v14320_v21 }
 0x482   : > { %v10481_v51 = vunpack.i.l.bf16 %v14533_v7  ;;  %v3067_v26 = vperm.slane %v3061_v28, %v11869_v32  ;;  %v20321_v45 = vunpack.i.l.bf16 %v14347_v38  ;;  %v14561_v30 = vsel %vm635_vm3, %v4092_v55, %v14385_v20 }
 0x483   : > { %v4071_v63 = vsel %vm635_vm3, %v20320_v42, %v4070_v2  ;;  %v3167_v18 = vperm.slane %v3161_v58, %v11869_v32  ;;  %v20322_v14 = vunpack.i.l.bf16 %v14320_v21  ;;  %v4182_v39 = vrot.slane %v10477_v35, 4  ;;  %v14570_v42 = vpop.permute.xlu1 %10489 }
 0x484   : > { %v3149_v15 = vsel %vm635_vm3, %v3148_v36, %v20321_v45  ;;  %v3173_v2 = vsel %vm635_vm3, %v3172_v33, %v10476_v59  ;;  %v3175_v28 = vsel %vm635_vm3, %v10486_v60, %v3174_v4  ;;  %v3185_v36 = vsel %vm635_vm3, %v14371_v43, %v10481_v51 }
 0x485   : > { %v3063_v22 = vsel %vm635_vm3, %v20322_v14, %v3062_v0  ;;  %v14575_v55 = vperm.slane %v4071_v63, %v11869_v32  ;;  %v4118_v20 = vrot.slane %v4075_v41, 4  ;;  %v4181_v58 = vsel %vm635_vm3, %v4180_v11, %v10477_v35 }
 0x486   : > { %v3155_v21 = vperm.slane %v3149_v15, %v11869_v32  ;;  %v14582_v59 = vperm.slane %v3063_v22, %v11869_v32  ;;  %v3110_v60 = vrot.slane %v3067_v26, 4  ;;  %v3179_v4 = vperm.slane %v3173_v2, %v11869_v32  ;;  %v10520_v45 = vpop.permute.xlu2 %10519 }
 0x487   : > { %20323 = vst [vmem:[#allocation76_spill] sm:$0xff] %v14575_v55  ;;  %v14586_v43 = vperm.slane %v3175_v28, %v11869_v32  ;;  %v3186_v33 = vrot.slane %v10481_v51, 4  ;;  %v3191_v63 = vperm.slane %v3185_v36, %v11869_v32  ;;  %v3196_v14 = vrot.slane %v3167_v18, 4 }
 0x488   : > { %20324 = vst [vmem:[#allocation77_spill] sm:$0xff] %v14582_v59  ;;  %v20325_v35 = vrot.slane %v14455_v62, 4  ;;  %v14595_v15 = vperm.slane %v4181_v58, %v11869_v32  ;;  %v19883_v22 = vunpack.i.h.bf16 %v14542_v24  ;;  %v14600_v2 = vsel %vm635_vm3, %v14455_v62, %v4118_v20 }
 0x489   : > { %v20326_v51 = vrot.slane %v14441_v46, 4  ;;  %v4183_v36 = vsel %vm635_vm3, %v10487_v37, %v4182_v39  ;;  %v3198_v0 = vrot.slane %v3155_v21, 4  ;;  %v20330_v62 = vrot.slane %v14426_v31, 4 }
 0x48a   : > { %v14592_v11 = vsel %vm635_vm3, %v20325_v35, %v4075_v41  ;;  %v20327_v41 = vrot.slane %v14450_v25, 4  ;;  %v14616_v35 = vsel %vm635_vm3, %v14450_v25, %v3110_v60  ;;  %v3222_v39 = vrot.slane %v3179_v4, 4 }
 0x48b   : > { %v14606_v28 = vsel %vm635_vm3, %v20326_v51, %v14575_v55  ;;  %20329 = vst [vmem:[#allocation79_spill] sm:$0xff] %v14616_v35  ;;  %v14622_v20 = vsel %vm635_vm3, %v20330_v62, %v14582_v59  ;;  %v10467_v51 = vunpack.i.h.bf16 %v14469_v49  ;;  %v20332_v61 = vunpack.i.l.bf16 %v14079_v10 }
 0x48c   : > { %v14612_v58 = vsel %vm635_vm3, %v20327_v41, %v3067_v26  ;;  %20331 = vst [vmem:[#allocation80_spill] sm:$0xff] %v14622_v20  ;;  %v3220_v41 = vrot.slane %v3191_v63, 4  ;;  %v14630_v25 = vperm.slane %v4183_v36, %v11869_v32  ;;  %v14635_v62 = vrot.slane %v19883_v22, 4  ;;  %v14644_v20 = vpop.permute.xlu1 %10499  ;;  %v14646_v22 = vpop.permute.xlu0 %10494 }
 0x48d   : > { %20328 = vst [vmem:[#allocation78_spill] sm:$0xff] %v14612_v58  ;;  %v3187_v26 = vsel %vm635_vm3, %v20332_v61, %v3186_v33  ;;  %v10492_v46 = vunpack.i.h.bf16 %v14570_v42  ;;  %v10491_v55 = vunpack.i.l.bf16 %v14570_v42  ;;  %v10522_v31 = vunpack.i.h.bf16 %v10520_v45 }
 0x48e   : > { %v3199_v37 = vsel %vm635_vm3, %v3167_v18, %v3198_v0  ;;  %v3223_v59 = vsel %vm635_vm3, %v3191_v63, %v3222_v39  ;;  %v4156_v61 = vrot.slane %v10467_v51, 4  ;;  %v4159_v33 = vsel %vm635_vm3, %v10467_v51, %v14489_v17 }
 0x48f   : > { %v10521_v36 = vunpack.i.l.bf16 %v10520_v45  ;;  %v3195_v60 = vperm.slane %v3187_v26, %v11869_v32  ;;  %v14649_v35 = vperm.slane %v3199_v37, %v12109_v53  ;;  %v14652_v42 = vperm.slane %v3223_v59, %v12109_v53 }
 0x490   : > { %v3197_v18 = vsel %vm635_vm3, %v3196_v14, %v3155_v21  ;;  %v3221_v0 = vsel %vm635_vm3, %v3220_v41, %v3179_v4  ;;  %v20333_v17 = vunpack.i.l.bf16 %v14469_v49  ;;  %v14668_v59 = vperm.slane %v4159_v33, %v11869_v32 }
 0x491   : > { %v14662_v51 = vperm.slane %v3197_v18, %v12109_v53  ;;  %v14665_v39 = vperm.slane %v3221_v0, %v12109_v53  ;;  %v4416_v37 = vrot.slane %v10492_v46, 4  ;;  %v4418_v21 = vrot.slane %v10522_v31, 4 }
 0x492   : > { %v3151_v45 = vsel %vm635_vm3, %v20333_v17, %v14493_v19  ;;  %v3250_v4 = vrot.slane %v14649_v35, 4  ;;  %v20336_v14 = vunpack.i.h.bf16 %v14347_v38  ;;  %v3408_v49 = vrot.slane %v10491_v55, 4 }
 0x493   : > { %20334 = vst [vmem:[#allocation81_spill] sm:$0xff] %v14662_v51  ;;  %v3232_v41 = vrot.slane %v3195_v60, 4  ;;  %v3246_v19 = vrot.slane %v14662_v51, 4  ;;  %v4417_v18 = vsel %vm635_vm3, %v4416_v37, %v10522_v31  ;;  %v3410_v17 = vrot.slane %v10521_v36, 4 }
 0x494   : > { %20335 = vst [vmem:[#allocation82_spill] sm:$0xff] %v14665_v39  ;;  %v4157_v26 = vsel %vm635_vm3, %v4156_v61, %v20336_v14  ;;  %v10482_v0 = vunpack.i.h.bf16 %v14533_v7  ;;  %v3251_v33 = vsel %vm635_vm3, %v14652_v42, %v3250_v4  ;;  %v3159_v58 = vperm.slane %v3151_v45, %v11869_v32  ;;  %v14689_v7 = vpop.permute.xlu2 %10529 }
 0x495   : > { %v10658_v38 = vpack.i.bf16 %v14006_v3, %v3251_v33  ;;  %v3247_v61 = vsel %vm635_vm3, %v14665_v39, %v3246_v19  ;;  %v14685_v14 = vperm.slane %v4157_v26, %v11869_v32  ;;  %v4419_v31 = vsel %vm635_vm3, %v10492_v46, %v4418_v21  ;;  %v14718_v33 = vpop.permute.xlu1 %10514 }
 0x496   : > { %v3409_v37 = vsel %vm635_vm3, %v3408_v49, %v10521_v36  ;;  %v10648_v4 = vpack.i.bf16 %v14294_v16, %v3247_v61  ;;  %v20337_v63 = vunpack.i.l.bf16 %v14542_v24  ;;  %v20338_v3 = vrot.slane %v14537_v23, 4  ;;  %20342 = vst [vmem:[#allocation86_spill] sm:$0xff] %v14718_v33  ;;  %v14725_v61 = vpop.permute.xlu0 %10509 }
 0x497   : > { %v14701_v26 = vperm.slane %v4417_v18, %v11869_v32  ;;  %10659 = vrot.lane.b32.xlu2 %v10658_v38, %s11578_s17  ;;  %v3233_v46 = vsel %vm635_vm3, %v3232_v41, %v14586_v43  ;;  %v3411_v16 = vsel %vm635_vm3, %v10491_v55, %v3410_v17  ;;  %v10496_v21 = vunpack.i.l.bf16 %v14646_v22 }
 0x498   : > { %v3372_v51 = vrot.slane %v20337_v63, 4  ;;  %v14698_v45 = vsel %vm635_vm3, %v20338_v3, %v14668_v59  ;;  %v4193_v63 = vsel %vm635_vm3, %v14362_v56, %v10482_v0  ;;  %10649 = vrot.lane.b32.xlu1 %v10648_v4, %s11576_s15  ;;  %v14713_v49 = vperm.slane %v4419_v31, %v11869_v32 }
 0x499   : > { %20339 = vst [vmem:[#allocation83_spill] sm:$0xff] %v14701_v26  ;;  %v14716_v19 = vperm.slane %v3409_v37, %v11869_v32  ;;  %v4194_v18 = vrot.slane %v10482_v0, 4  ;;  %v20343_v41 = vrot.slane %v14545_v13, 4  ;;  %v3210_v56 = vrot.slane %v3159_v58, 4 }
 0x49a   : > { %20340 = vst [vmem:[#allocation84_spill] sm:$0xff] %v14713_v49  ;;  %v3248_v38 = vrot.slane %v14652_v42, 4  ;;  %v14728_v31 = vperm.slane %v3233_v46, %v12109_v53  ;;  %v14732_v0 = vperm.slane %v3411_v16, %v11869_v32  ;;  %v14735_v4 = vperm.slane %v4193_v63, %v11869_v32 }
 0x49b   : > { %20341 = vst [vmem:[#allocation85_spill] sm:$0xff] %v14716_v19  ;;  %v3209_v55 = vsel %vm635_vm3, %v20343_v41, %v3159_v58  ;;  %v3374_v41 = vrot.slane %v10496_v21, 4  ;;  %v20345_v36 = vrot.slane %v14586_v43, 4  ;;  %v20346_v17 = vunpack.i.h.bf16 %v14079_v10 }
 0x49c   : > { %20344 = vst [vmem:[#allocation87_spill] sm:$0xff] %v14732_v0  ;;  %v14739_v58 = vperm.slane %v3209_v55, %v12109_v53  ;;  %v3252_v42 = vrot.slane %v14728_v31, 4  ;;  %v10501_v3 = vunpack.i.l.bf16 %v14644_v20  ;;  %v3211_v39 = vsel %vm635_vm3, %v14545_v13, %v3210_v56 }
 0x49d   : > { %v3235_v46 = vsel %vm635_vm3, %v3195_v60, %v20345_v36  ;;  %v4195_v63 = vsel %vm635_vm3, %v20346_v17, %v4194_v18  ;;  %v3249_v60 = vsel %vm635_vm3, %v3248_v38, %v14649_v35  ;;  %v20347_v37 = vunpack.i.h.bf16 %v14644_v20 }
 0x49e   : > { %v3253_v55 = vsel %vm635_vm3, %v3252_v42, %v14739_v58  ;;  %v3243_v43 = vperm.slane %v3235_v46, %v12109_v53  ;;  %v10497_v18 = vunpack.i.h.bf16 %v14646_v22  ;;  %v14764_v16 = vperm.slane %v4195_v63, %v11869_v32  ;;  %v14770_v46 = vpop.permute.xlu2 %10544 }
 0x49f   : > { %v4394_v10 = vrot.slane %v20347_v37, 4  ;;  %v10663_v17 = vpack.i.bf16 %v13992_v40, %v3253_v55  ;;  %v4228_v42 = vrot.slane %v14735_v4, 4  ;;  %v20348_v13 = vunpack.i.l.bf16 %v14542_v24 }
 0x4a0   : > { %v10511_v35 = vunpack.i.l.bf16 %v14725_v61  ;;  %v20349_v38 = vrot.slane %v14595_v15, 4  ;;  %v3219_v40 = vperm.slane %v3211_v39, %v12109_v53  ;;  %v3256_v37 = vrot.slane %v3243_v43, 4 }
 0x4a1   : > { %v3375_v56 = vsel %vm635_vm3, %v20348_v13, %v3374_v41  ;;  %10664 = vrot.lane.b32.xlu0 %v10663_v17, %s11579_s19  ;;  %v10653_v63 = vpack.i.bf16 %v14021_v8, %v3249_v60  ;;  %v3386_v55 = vrot.slane %v10501_v3, 4  ;;  %v19889_v36 = vunpack.i.h.bf16 %v14689_v7  ;;  %v14789_v17 = vpop.permute.xlu1 %10539  ;;  %v14796_v41 = vpop.permute.xlu0 %10524 }
 0x4a2   : > { %v4231_v22 = vsel %vm635_vm3, %v14735_v4, %v20349_v38  ;;  %v4381_v49 = vsel %vm635_vm3, %v14635_v62, %v10497_v18  ;;  %v14786_v24 = vperm.slane %v3375_v56, %v11869_v32  ;;  %v3257_v39 = vsel %vm635_vm3, %v3256_v37, %v3219_v40  ;;  %20351 = vst [vmem:[#allocation89_spill] sm:$0xff] %v14796_v41 }
 0x4a3   : > { %10654 = vrot.lane.b32.xlu1 %v10653_v63, %s11577_s22  ;;  %v3373_v8 = vsel %vm635_vm3, %v3372_v51, %v10496_v21  ;;  %v10512_v60 = vunpack.i.h.bf16 %v14725_v61  ;;  %v3384_v38 = vrot.slane %v10511_v35, 4  ;;  %v10673_v13 = vpack.i.bf16 %v14012_v54, %v3257_v39 }
 0x4a4   : > { %20350 = vst [vmem:[#allocation88_spill] sm:$0xff] %v14786_v24  ;;  %v14799_v62 = vperm.slane %v4231_v22, %v12109_v53  ;;  %v20352_v4 = vrot.slane %v14630_v25, 4  ;;  %v3387_v51 = vsel %vm635_vm3, %v10511_v35, %v3386_v55  ;;  %v14811_v21 = vrot.slane %v19889_v36, 4 }
 0x4a5   : > { %v20353_v54 = vunpack.i.l.bf16 %v14689_v7  ;;  %v14815_v63 = vrot.slane %v10497_v18, 4  ;;  %v14818_v22 = vperm.slane %v4381_v49, %v11869_v32  ;;  %10674 = vrot.lane.b32.xlu2 %v10673_v13, %s11580_s11  ;;  %v14822_v39 = vperm.slane %v3373_v8, %v11869_v32 }
 0x4a6   : > { %v14806_v37 = vsel %vm635_vm3, %v14764_v16, %v20352_v4  ;;  %v3434_v4 = vrot.slane %v14786_v24, 4  ;;  %v20356_v35 = vunpack.i.h.bf16 %v14718_v33  ;;  %v20358_v56 = vunpack.i.l.bf16 %v14718_v33 }
 0x4a7   : > { %v3486_v61 = vrot.slane %v20353_v54, 4  ;;  %20354 = vst [vmem:[#allocation90_spill] sm:$0xff] %v14815_v63  ;;  %v4392_v54 = vrot.slane %v10512_v60, 4  ;;  %v3385_v49 = vsel %vm635_vm3, %v3384_v38, %v10501_v3  ;;  %v14834_v63 = vperm.slane %v3387_v51, %v11869_v32 }
 0x4a8   : > { %20355 = vst [vmem:[#allocation91_spill] sm:$0xff] %v14818_v22  ;;  %v14827_v55 = vrot.slane %v20356_v35, 4  ;;  %v3398_v36 = vrot.slane %v20358_v56, 4  ;;  %v3254_v13 = vrot.slane %v14739_v58, 4  ;;  %v3258_v8 = vrot.slane %v3219_v40, 4 }
 0x4a9   : > { %20359 = vst [vmem:[#allocation93_spill] sm:$0xff] %v14834_v63  ;;  %v20360_v26 = vrot.slane %v14550_v6, 4  ;;  %v4229_v22 = vsel %vm635_vm3, %v4228_v42, %v14595_v15  ;;  %v10542_v56 = vunpack.i.h.bf16 %v14789_v17  ;;  %v10541_v18 = vunpack.i.l.bf16 %v14789_v17 }
 0x4aa   : > { %20357 = vst [vmem:[#allocation92_spill] sm:$0xff] %v14827_v55  ;;  %v14845_v55 = vpop.permute.xlu2 %10559  ;;  %v14851_v58 = vperm.slane %v4229_v22, %v12109_v53  ;;  %v4395_v38 = vsel %vm635_vm3, %v10512_v60, %v4394_v10  ;;  %v3255_v15 = vsel %vm635_vm3, %v14728_v31, %v3254_v13  ;;  %v20363_v42 = vunpack.i.h.bf16 %v14644_v20  ;;  %v14870_v10 = vpop.permute.xlu1 %10554 }
 0x4ab   : > { %v4205_v35 = vsel %vm635_vm3, %v20360_v26, %v14685_v14  ;;  %v3259_v26 = vsel %vm635_vm3, %v3243_v43, %v3258_v8  ;;  %v10526_v51 = vunpack.i.l.bf16 %v14796_v41  ;;  %v14866_v40 = vperm.slane %v3385_v49, %v11869_v32  ;;  %v14878_v8 = vpop.permute.xlu0 %10534 }
 0x4ac   : > { %v14848_v3 = vperm.slane %v4205_v35, %v12109_v53  ;;  %20362 = vst [vmem:[#allocation95_spill] sm:$0xff] %v14851_v58  ;;  %v4393_v17 = vsel %vm635_vm3, %v4392_v54, %v20363_v42  ;;  %v10678_v22 = vpack.i.bf16 %v14001_v52, %v3259_v26  ;;  %v3435_v43 = vsel %vm635_vm3, %v14834_v63, %v3434_v4 }
 0x4ad   : > { %v10668_v20 = vpack.i.bf16 %v14009_v9, %v3255_v15  ;;  %v20364_v31 = vunpack.i.h.bf16 %v14770_v46  ;;  %v4492_v54 = vrot.slane %v10542_v56, 4  ;;  %v3484_v13 = vrot.slane %v10541_v18, 4 }
 0x4ae   : > { %20361 = vst [vmem:[#allocation94_spill] sm:$0xff] %v14848_v3  ;;  %v4254_v35 = vrot.slane %v14848_v3, 4  ;;  %10679 = vrot.lane.b32.xlu2 %v10678_v22, %s11582_s20  ;;  %v20365_v49 = vunpack.i.l.bf16 %v14770_v46  ;;  %v14885_v4 = vperm.slane %v4393_v17, %v11869_v32  ;;  %v14888_v9 = vperm.slane %v4395_v38, %v11869_v32 }
 0x4af   : > { %v3844_v60 = vrot.slane %v20364_v31, 4  ;;  %10669 = vrot.lane.b32.xlu1 %v10668_v20, %s11581_s18  ;;  %v3487_v22 = vsel %vm635_vm3, %v10541_v18, %v3486_v61  ;;  %v3396_v31 = vrot.slane %v10526_v51, 4  ;;  %v3399_v17 = vsel %vm635_vm3, %v10526_v51, %v3398_v36 }
 0x4b0   : > { %v4255_v52 = vsel %vm635_vm3, %v14851_v58, %v4254_v35  ;;  %v14882_v26 = vrot.slane %v20365_v49, 4  ;;  %20366 = vst [vmem:[#allocation96_spill] sm:$0xff] %v14885_v4  ;;  %v14894_v35 = vperm.slane %v3435_v43, %v12109_v53  ;;  %v20369_v38 = vrot.slane %v14685_v14, 4  ;;  %v20400_v4 = vld [vmem:[#allocation50_spill] sm:$0xff] }
 0x4b1   : > { %20367 = vst [vmem:[#allocation97_spill] sm:$0xff] %v14888_v9  ;;  %v10683_v15 = vpack.i.bf16 %v4255_v52, %v14338_v34  ;;  %v4256_v20 = vrot.slane %v14799_v62, 4  ;;  %v20370_v52 = vunpack.i.h.bf16 %v14689_v7  ;;  %v20371_v61 = vunpack.i.l.bf16 %v14689_v7 }
 0x4b2   : > { %20368 = vst [vmem:[#allocation98_spill] sm:$0xff] %v14894_v35  ;;  %v4207_v34 = vsel %vm635_vm3, %v14550_v6, %v20369_v38  ;;  %v10562_v42 = vunpack.i.h.bf16 %v14845_v55  ;;  %v14914_v51 = vperm.slane %v3487_v22, %v11869_v32  ;;  %v20372_v6 = vrot.slane %v14764_v16, 4  ;;  %v14934_v38 = vpop.permute.xlu2 %10574 }
 0x4b3   : > { %10684 = vrot.lane.b32.xlu0 %v10683_v15, %s11576_s15  ;;  %v4493_v43 = vsel %vm635_vm3, %v4492_v54, %v20370_v52  ;;  %v3485_v18 = vsel %vm635_vm3, %v3484_v13, %v20371_v61  ;;  %v4215_v36 = vperm.slane %v4207_v34, %v12109_v53  ;;  %v14922_v15 = vperm.slane %v14561_v30, %v12109_v53 }
 0x4b4   : > { %v4241_v14 = vsel %vm635_vm3, %v20372_v6, %v14630_v25  ;;  %v14926_v7 = vperm.slane %v14592_v11, %v12109_v53  ;;  %v20375_v54 = vunpack.i.l.bf16 %v14718_v33  ;;  %v14932_v22 = vperm.slane %v3399_v17, %v11869_v32 }
 0x4b5   : > { %20373 = vst [vmem:[#allocation99_spill] sm:$0xff] %v14922_v15  ;;  %v4257_v16 = vsel %vm635_vm3, %v4256_v20, %v4215_v36  ;;  %v4247_v25 = vperm.slane %v4241_v14, %v12109_v53  ;;  %v14939_v30 = vperm.slane %v4493_v43, %v11869_v32  ;;  %v14942_v34 = vperm.slane %v3485_v18, %v11869_v32  ;;  %v20379_v18 = vld [vmem:[#allocation31_spill] sm:$0xff] }
 0x4b6   : > { %20374 = vst [vmem:[#allocation100_spill] sm:$0xff] %v14926_v7  ;;  %v3397_v13 = vsel %vm635_vm3, %v3396_v31, %v20375_v54  ;;  %v4142_v52 = vrot.slane %v14922_v15, 4  ;;  %v3846_v31 = vrot.slane %v10562_v42, 4  ;;  %v10556_v17 = vunpack.i.l.bf16 %v14870_v10  ;;  %v14957_v54 = vpop.permute.xlu1 %10569 }
 0x4b7   : > { %20376 = vst [vmem:[#allocation101_spill] sm:$0xff] %v14932_v22  ;;  %v4223_v61 = vperm.slane %v14698_v45, %v12109_v53  ;;  %v4260_v6 = vrot.slane %v4247_v25, 4  ;;  %v14951_v20 = vsel %vm635_vm3, %v10542_v56, %v14811_v21  ;;  %v14954_v43 = vperm.slane %v3397_v13, %v11869_v32  ;;  %v10550_v13 = vpop.permute.xlu0 %10549 }
 0x4b8   : > { %20377 = vst [vmem:[#allocation102_spill] sm:$0xff] %v14939_v30  ;;  %v10688_v14 = vpack.i.bf16 %v4257_v16, %v20379_v18  ;;  %v4143_v24 = vsel %vm635_vm3, %v14926_v7, %v4142_v52  ;;  %v20380_v45 = vrot.slane %v14732_v0, 4  ;;  %v3845_v18 = vsel %vm635_vm3, %v3844_v60, %v10562_v42  ;;  %v20381_v52 = vld [vmem:[#allocation48_spill] sm:$0xff]  ;;  %v20388_v60 = vld [vmem:[#allocation49_spill] sm:$0xff] }
 0x4b9   : > { %20378 = vst [vmem:[#allocation103_spill] sm:$0xff] %v14951_v20  ;;  %v4261_v21 = vsel %vm635_vm3, %v4260_v6, %v4223_v61  ;;  %v10703_v56 = vpack.i.bf16 %v14389_v48, %v4143_v24  ;;  %v20382_v7 = vunpack.i.h.bf16 %v14796_v41  ;;  %v3834_v24 = vrot.slane %v10556_v17, 4 }
 0x4ba   : > { %v3457_v11 = vsel %vm635_vm3, %v20380_v45, %v14932_v22  ;;  %v10698_v49 = vpack.i.bf16 %v4261_v21, %v20381_v52  ;;  %v20384_v45 = vunpack.i.h.bf16 %v14770_v46  ;;  %v4262_v21 = vrot.slane %v4223_v61, 4 }
 0x4bb   : > { %10689 = vrot.lane.b32.xlu0 %v10688_v14, %s11577_s22  ;;  %v14975_v3 = vrot.slane %v20382_v7, 4  ;;  %10704 = vrot.lane.b32.xlu1 %v10703_v56, %s11576_s15  ;;  %v14985_v42 = vperm.slane %v3457_v11, %v12109_v53  ;;  %v4258_v7 = vrot.slane %v4215_v36, 4  ;;  %v14989_v14 = vperm.slane %v3845_v18, %v11869_v32  ;;  %v15012_v18 = vpop.permute.xlu2 %10589 }
 0x4bc   : > { %v3847_v6 = vsel %vm635_vm3, %v20384_v45, %v3846_v31  ;;  %10699 = vrot.lane.b32.xlu2 %v10698_v49, %s11579_s19  ;;  %v20386_v31 = vrot.slane %v14668_v59, 4  ;;  %v14997_v56 = vperm.slane %v14806_v37, %v12109_v53  ;;  %v3833_v49 = vsel %vm635_vm3, %v14882_v26, %v10556_v17  ;;  %v20390_v59 = vld [vmem:[#allocation46_spill] sm:$0xff] }
 0x4bd   : > { %20383 = vst [vmem:[#allocation31_spill] sm:$0xff] %v14975_v3  ;;  %v15000_v45 = vperm.slane %v3847_v6, %v11869_v32  ;;  %v10577_v36 = vunpack.i.h.bf16 %v14934_v38  ;;  %v4259_v11 = vsel %vm635_vm3, %v14799_v62, %v4258_v7  ;;  %v20387_v61 = vunpack.i.l.bf16 %v14770_v46 }
 0x4be   : > { %20385 = vst [vmem:[#allocation48_spill] sm:$0xff] %v14985_v42  ;;  %v4219_v52 = vsel %vm635_vm3, %v14537_v23, %v20386_v31  ;;  %v10571_v37 = vunpack.i.l.bf16 %v14957_v54  ;;  %v4263_v6 = vsel %vm635_vm3, %v4247_v25, %v4262_v21  ;;  %v10552_v31 = vunpack.i.h.bf16 %v10550_v13  ;;  %v15027_v25 = vpop.permute.xlu1 %10584  ;;  %v20409_v42 = vld [vmem:[#allocation30_spill] sm:$0xff] }
 0x4bf   : > { %v3835_v23 = vsel %vm635_vm3, %v20387_v61, %v3834_v24  ;;  %v10693_v26 = vpack.i.bf16 %v4259_v11, %v20388_v60  ;;  %v15017_v17 = vperm.slane %v4219_v52, %v12109_v53  ;;  %v4264_v62 = vrot.slane %v14997_v56, 4  ;;  %v20389_v60 = vld [vmem:[#allocation47_spill] sm:$0xff]  ;;  %v15037_v48 = vpop.permute.xlu0 %10564 }
 0x4c0   : > { %v15021_v7 = vperm.slane %v3833_v49, %v11869_v32  ;;  %v10536_v24 = vunpack.i.l.bf16 %v14878_v8  ;;  %v10551_v61 = vunpack.i.l.bf16 %v10550_v13  ;;  %v3734_v15 = vrot.slane %v10577_v36, 4 }
 0x4c1   : > { %v10708_v21 = vpack.i.bf16 %v4263_v6, %v20389_v60  ;;  %v4265_v52 = vsel %vm635_vm3, %v4264_v62, %v15017_v17  ;;  %v15033_v49 = vperm.slane %v3835_v23, %v11869_v32  ;;  %v3722_v46 = vrot.slane %v10571_v37, 4 }
 0x4c2   : > { %v10718_v13 = vpack.i.bf16 %v4265_v52, %v20390_v59  ;;  %v3732_v6 = vrot.slane %v10552_v31, 4  ;;  %v3735_v60 = vsel %vm635_vm3, %v10552_v31, %v3734_v15  ;;  %v3720_v62 = vrot.slane %v10551_v61, 4 }
 0x4c3   : > { %10694 = vrot.lane.b32.xlu0 %v10693_v26, %s11578_s17  ;;  %v20391_v26 = vunpack.i.l.bf16 %v14845_v55  ;;  %v3723_v11 = vsel %vm635_vm3, %v10551_v61, %v3722_v46  ;;  %v10586_v59 = vunpack.i.l.bf16 %v15027_v25  ;;  %v20392_v52 = vunpack.i.h.bf16 %v14870_v10  ;;  %v15074_v3 = vpop.permute.xlu2 %10604 }
 0x4c4   : > { %10709 = vrot.lane.b32.xlu2 %v10708_v21, %s11581_s18  ;;  %10719 = vrot.lane.b32.xlu1 %v10718_v13, %s11580_s11  ;;  %v20393_v9 = vunpack.i.h.bf16 %v14878_v8  ;;  %v3498_v15 = vrot.slane %v10536_v24, 4  ;;  %v20394_v21 = vunpack.i.l.bf16 %v14934_v38  ;;  %v20395_v46 = vunpack.i.h.bf16 %v14957_v54  ;;  %20396 = vst [vmem:[#allocation49_spill] sm:$0xff] %v15074_v3 }
 0x4c5   : > { %v15042_v58 = vrot.slane %v20391_v26, 4  ;;  %v3820_v16 = vrot.slane %v20392_v52, 4  ;;  %v15063_v13 = vperm.slane %v3735_v60, %v11869_v32  ;;  %v15066_v52 = vperm.slane %v3723_v11, %v11869_v32 }
 0x4c6   : > { %v15055_v20 = vrot.slane %v20393_v9, 4  ;;  %v3744_v23 = vrot.slane %v20394_v21, 4  ;;  %v3708_v61 = vrot.slane %v20395_v46, 4  ;;  %v3733_v26 = vsel %vm635_vm3, %v3732_v6, %v10577_v36 }
 0x4c7   : > { %v4103_v9 = vperm.slane %v14516_v1, %v12109_v53  ;;  %v4127_v31 = vperm.slane %v14600_v2, %v12109_v53  ;;  %v3721_v41 = vsel %vm635_vm3, %v3720_v62, %v10571_v37  ;;  %v3496_v21 = vrot.slane %v10586_v59, 4  ;;  %v15103_v62 = vpop.permute.xlu1 %10599  ;;  %v10580_v0 = vpop.permute.xlu0 %10579 }
 0x4c8   : > { %v20397_v60 = vrot.slane %v14500_v50, 4  ;;  %v15082_v11 = vperm.slane %v14606_v28, %v12109_v53  ;;  %v10567_v2 = vunpack.i.h.bf16 %v15037_v48  ;;  %v15088_v37 = vperm.slane %v3733_v26, %v11869_v32 }
 0x4c9   : > { %v4144_v6 = vrot.slane %v4127_v31, 4  ;;  %v4146_v33 = vrot.slane %v4103_v9, 4  ;;  %v3499_v28 = vsel %vm635_vm3, %v10586_v59, %v3498_v15  ;;  %v3497_v26 = vsel %vm635_vm3, %v3496_v21, %v10536_v24  ;;  %v20401_v59 = vld [vmem:[#allocation51_spill] sm:$0xff] }
 0x4ca   : > { %v4105_v46 = vsel %vm635_vm3, %v20397_v60, %v14408_v29  ;;  %20398 = vst [vmem:[#allocation47_spill] sm:$0xff] %v15082_v11  ;;  %v4148_v50 = vrot.slane %v15082_v11, 4  ;;  %v15093_v60 = vperm.slane %v3721_v41, %v11869_v32  ;;  %v3822_v41 = vrot.slane %v10567_v2, 4 }
 0x4cb   : > { %v4145_v36 = vsel %vm635_vm3, %v4144_v6, %v4103_v9  ;;  %v15098_v1 = vperm.slane %v4105_v46, %v12109_v53  ;;  %v4147_v11 = vsel %vm635_vm3, %v4127_v31, %v4146_v33  ;;  %v10566_v22 = vunpack.i.l.bf16 %v15037_v48 }
 0x4cc   : > { %v10713_v35 = vpack.i.bf16 %v20400_v4, %v4145_v36  ;;  %v10723_v15 = vpack.i.bf16 %v20401_v59, %v4147_v11  ;;  %v19908_v46 = vunpack.i.h.bf16 %v15027_v25  ;;  %v15112_v6 = vperm.slane %v3499_v28, %v11869_v32 }
 0x4cd   : > { %20399 = vst [vmem:[#allocation46_spill] sm:$0xff] %v15098_v1  ;;  %v4149_v9 = vsel %vm635_vm3, %v4148_v50, %v15098_v1  ;;  %v3821_v4 = vsel %vm635_vm3, %v3820_v16, %v10567_v2  ;;  %v20402_v24 = vunpack.i.h.bf16 %v15012_v18  ;;  %v10602_v48 = vunpack.i.h.bf16 %v15103_v62 }
 0x4ce   : > { %10714 = vrot.lane.b32.xlu0 %v10713_v35, %s11577_s22  ;;  %v10733_v33 = vpack.i.bf16 %v14432_v57, %v4149_v9  ;;  %10724 = vrot.lane.b32.xlu2 %v10723_v15, %s11578_s17  ;;  %v10582_v21 = vunpack.i.h.bf16 %v10580_v0  ;;  %v10581_v50 = vunpack.i.l.bf16 %v10580_v0  ;;  %v3782_v11 = vrot.slane %v15088_v37, 4 }
 0x4cf   : > { %v4840_v31 = vrot.slane %v20402_v24, 4  ;;  %v20403_v36 = vunpack.i.l.bf16 %v15012_v18  ;;  %v15127_v16 = vperm.slane %v3497_v26, %v11869_v32  ;;  %v19910_v57 = vunpack.i.h.bf16 %v15074_v3  ;;  %v15234_v30 = vpop.permute.xlu0 %10594 }
 0x4d0   : > { %10734 = vrot.lane.b32.xlu1 %v10733_v33, %s11579_s19  ;;  %v20404_v35 = vunpack.i.h.bf16 %v14870_v10  ;;  %v15135_v59 = vperm.slane %v3821_v4, %v11869_v32  ;;  %v3857_v0 = vsel %vm635_vm3, %v15042_v58, %v10566_v22  ;;  %v3858_v15 = vrot.slane %v10566_v22, 4 }
 0x4d1   : > { %v15124_v28 = vrot.slane %v20403_v36, 4  ;;  %v3756_v9 = vrot.slane %v15093_v60, 4  ;;  %v15142_v26 = vrot.slane %v19908_v46, 4  ;;  %v20405_v33 = vrot.slane %v14914_v51, 4 }
 0x4d2   : > { %v3823_v2 = vsel %vm635_vm3, %v20404_v35, %v3822_v41  ;;  %v15151_v41 = vpop.permute.xlu2 %10619  ;;  %v4842_v4 = vrot.slane %v10602_v48, 4  ;;  %v3709_v58 = vsel %vm635_vm3, %v3708_v61, %v10582_v21  ;;  %v3745_v22 = vsel %vm635_vm3, %v3744_v23, %v10581_v50 }
 0x4d3   : > { %v15149_v10 = vsel %vm635_vm3, %v15112_v6, %v20405_v33  ;;  %v4266_v36 = vrot.slane %v15017_v17, 4  ;;  %v15158_v46 = vperm.slane %v3823_v2, %v11869_v32  ;;  %v15161_v24 = vperm.slane %v3857_v0, %v11869_v32 }
 0x4d4   : > { %20406 = vst [vmem:[#allocation50_spill] sm:$0xff] %v15149_v10  ;;  %v15165_v33 = vrot.slane %v19910_v57, 4  ;;  %v20407_v29 = vunpack.i.l.bf16 %v14845_v55  ;;  %v20408_v23 = vrot.slane %v15021_v7, 4  ;;  %v3710_v35 = vrot.slane %v10582_v21, 4 }
 0x4d5   : > { %v4267_v2 = vsel %vm635_vm3, %v14997_v56, %v4266_v36  ;;  %v10606_v0 = vunpack.i.l.bf16 %v15074_v3  ;;  %v3715_v1 = vperm.slane %v3709_v58, %v11869_v32  ;;  %v15179_v57 = vperm.slane %v3745_v22, %v11869_v32 }
 0x4d6   : > { %v3859_v61 = vsel %vm635_vm3, %v20407_v29, %v3858_v15  ;;  %v3869_v17 = vsel %vm635_vm3, %v20408_v23, %v15135_v59  ;;  %v10728_v55 = vpack.i.bf16 %v4267_v2, %v20409_v42  ;;  %v4841_v29 = vsel %vm635_vm3, %v4840_v31, %v10602_v48 }
 0x4d7   : > { %v20410_v15 = vunpack.i.h.bf16 %v15012_v18  ;;  %v3746_v23 = vrot.slane %v10581_v50, 4  ;;  %v10621_v21 = vunpack.i.l.bf16 %v15151_v41  ;;  %v15188_v56 = vperm.slane %v3859_v61, %v11869_v32  ;;  %v15205_v61 = vpop.permute.xlu1 %10614 }
 0x4d8   : > { %v3870_v36 = vrot.slane %v15135_v59, 4  ;;  %v15192_v58 = vperm.slane %v3869_v17, %v12109_v53  ;;  %v20412_v22 = vrot.slane %v14989_v14, 4  ;;  %10729 = vrot.lane.b32.xlu0 %v10728_v55, %s11582_s20  ;;  %v3892_v48 = vrot.slane %v15161_v24, 4 }
 0x4d9   : > { %v4843_v63 = vsel %vm635_vm3, %v20410_v15, %v4842_v4  ;;  %v10601_v50 = vunpack.i.l.bf16 %v15103_v62  ;;  %v20413_v4 = vunpack.i.h.bf16 %v14957_v54  ;;  %v15208_v17 = vperm.slane %v4841_v29, %v11869_v32 }
 0x4da   : > { %20411 = vst [vmem:[#allocation51_spill] sm:$0xff] %v15192_v58  ;;  %v3895_v42 = vsel %vm635_vm3, %v15161_v24, %v20412_v22  ;;  %v15211_v2 = vperm.slane %v4843_v63, %v11869_v32  ;;  %v3758_v15 = vrot.slane %v3715_v1, 4  ;;  %v3783_v55 = vsel %vm635_vm3, %v15179_v57, %v3782_v11 }
 0x4db   : > { %v3711_v59 = vsel %vm635_vm3, %v20413_v4, %v3710_v35  ;;  %v15216_v24 = vperm.slane %v3895_v42, %v12109_v53  ;;  %v4728_v62 = vrot.slane %v10606_v0, 4  ;;  %v20415_v54 = vunpack.i.l.bf16 %v14934_v38  ;;  %v15232_v42 = vpop.permute.xlu2 %10634 }
 0x4dc   : > { %20414 = vst [vmem:[#allocation30_spill] sm:$0xff] %v15211_v2  ;;  %v4730_v22 = vrot.slane %v10621_v21, 4  ;;  %v20416_v29 = vrot.slane %v15000_v45, 4  ;;  %v15229_v31 = vperm.slane %v3711_v59, %v11869_v32  ;;  %v10616_v11 = vunpack.i.l.bf16 %v15205_v61 }
 0x4dd   : > { %v3747_v35 = vsel %vm635_vm3, %v20415_v54, %v3746_v23  ;;  %v4852_v38 = vrot.slane %v10601_v50, 4  ;;  %v3757_v23 = vsel %vm635_vm3, %v3756_v9, %v3715_v1  ;;  %v15238_v54 = vperm.slane %v3783_v55, %v12109_v53 }
 0x4de   : > { %v15226_v63 = vsel %vm635_vm3, %v15188_v56, %v20416_v29  ;;  %v10622_v4 = vunpack.i.h.bf16 %v15151_v41  ;;  %v15244_v59 = vperm.slane %v3747_v35, %v11869_v32  ;;  %v3759_v10 = vsel %vm635_vm3, %v15093_v60, %v3758_v15 }
 0x4df   : > { %v4729_v47 = vsel %vm635_vm3, %v4728_v62, %v10621_v21  ;;  %v4731_v5 = vsel %vm635_vm3, %v10606_v0, %v4730_v22  ;;  %v10637_v1 = vunpack.i.h.bf16 %v15232_v42  ;;  %v10597_v9 = vunpack.i.h.bf16 %v15234_v30 }
 0x4e0   : > { %v15253_v41 = vperm.slane %v3757_v23, %v12109_v53  ;;  %v3780_v3 = vrot.slane %v15179_v57, 4  ;;  %v4854_v35 = vrot.slane %v10616_v11, 4  ;;  %v4716_v29 = vrot.slane %v10622_v4, 4 }
 0x4e1   : > { %v3767_v60 = vperm.slane %v3759_v10, %v12109_v53  ;;  %v3808_v21 = vrot.slane %v15238_v54, 4  ;;  %v3792_v0 = vrot.slane %v15244_v59, 4  ;;  %v15262_v15 = vperm.slane %v4729_v47, %v11869_v32 }
 0x4e2   : > { %v15265_v62 = vperm.slane %v4731_v5, %v11869_v32  ;;  %v4853_v22 = vsel %vm635_vm3, %v4852_v38, %v10616_v11  ;;  %v4718_v23 = vrot.slane %v10637_v1, 4  ;;  %v4717_v57 = vsel %vm635_vm3, %v4716_v29, %v10637_v1 }
 0x4e3   : > { %v3521_v55 = vsel %vm635_vm3, %v15124_v28, %v10597_v9  ;;  %v10596_v10 = vunpack.i.l.bf16 %v15234_v30  ;;  %v4855_v2 = vsel %vm635_vm3, %v10601_v50, %v4854_v35  ;;  %v3871_v19 = vsel %vm635_vm3, %v15021_v7, %v3870_v36 }
 0x4e4   : > { %v3920_v47 = vrot.slane %v15216_v24, 4  ;;  %v3781_v5 = vsel %vm635_vm3, %v3780_v3, %v15088_v37  ;;  %v3809_v11 = vsel %vm635_vm3, %v3808_v21, %v3767_v60  ;;  %v3879_v38 = vperm.slane %v3871_v19, %v12109_v53 }
 0x4e5   : > { %v15281_v29 = vperm.slane %v3781_v5, %v12109_v53  ;;  %v3806_v28 = vrot.slane %v15253_v41, 4  ;;  %v15285_v30 = vperm.slane %v4717_v57, %v11869_v32  ;;  %v3527_v50 = vperm.slane %v3521_v55, %v11869_v32 }
 0x4e6   : > { %v3893_v7 = vsel %vm635_vm3, %v3892_v48, %v14989_v14  ;;  %v3918_v36 = vrot.slane %v15192_v58, 4  ;;  %v3509_v3 = vsel %vm635_vm3, %v15142_v26, %v10596_v10  ;;  %v3921_v19 = vsel %vm635_vm3, %v3920_v47, %v3879_v38 }
 0x4e7   : > { %v3807_v37 = vsel %vm635_vm3, %v15281_v29, %v3806_v28  ;;  %v15297_v1 = vperm.slane %v3893_v7, %v12109_v53  ;;  %v4764_v35 = vrot.slane %v15262_v15, 4  ;;  %v15301_v55 = vperm.slane %v4853_v22, %v11869_v32 }
 0x4e8   : > { %v10743_v21 = vpack.i.bf16 %v3809_v11, %v3921_v19  ;;  %v3810_v14 = vrot.slane %v3767_v60, 4  ;;  %v15304_v48 = vperm.slane %v4855_v2, %v11869_v32  ;;  %v19920_v26 = vunpack.i.l.bf16 %v15232_v42  ;;  %v15314_v60 = vpop.permute.xlu0 %10609 }
 0x4e9   : > { %v4719_v57 = vsel %vm635_vm3, %v10622_v4, %v4718_v23  ;;  %v3919_v47 = vsel %vm635_vm3, %v15297_v1, %v3918_v36  ;;  %v4765_v5 = vsel %vm635_vm3, %v4764_v35, %v15285_v30  ;;  %v3522_v28 = vrot.slane %v10597_v9, 4 }
 0x4ea   : > { %v3515_v7 = vperm.slane %v3509_v3, %v11869_v32  ;;  %10744 = vrot.lane.b32.xlu0 %v10743_v21, %s11577_s22  ;;  %v10738_v22 = vpack.i.bf16 %v3807_v37, %v3919_v47  ;;  %v20417_v2 = vrot.slane %v15063_v13, 4  ;;  %v20418_v23 = vunpack.i.h.bf16 %v15205_v61  ;;  %v10630_v3 = vpop.permute.xlu1 %10629 }
 0x4eb   : > { %v3556_v9 = vrot.slane %v3527_v50, 4  ;;  %v15329_v19 = vperm.slane %v4719_v57, %v11869_v32  ;;  %v3811_v37 = vsel %vm635_vm3, %v15238_v54, %v3810_v14  ;;  %v3922_v35 = vrot.slane %v3879_v38, 4 }
 0x4ec   : > { %v15320_v11 = vsel %vm635_vm3, %v15244_v59, %v20417_v2  ;;  %v15325_v36 = vrot.slane %v20418_v23, 4  ;;  %10739 = vrot.lane.b32.xlu2 %v10738_v22, %s11576_s15  ;;  %v15337_v21 = vrot.slane %v19920_v26, 4  ;;  %v15341_v2 = vperm.slane %v4765_v5, %v12109_v53 }
 0x4ed   : > { %v20419_v57 = vunpack.i.l.bf16 %v15012_v18  ;;  %v3510_v22 = vrot.slane %v10596_v10, 4  ;;  %v3558_v4 = vrot.slane %v3515_v7, 4  ;;  %v3923_v54 = vsel %vm635_vm3, %v15216_v24, %v3922_v35 }
 0x4ee   : > { %v3557_v38 = vsel %vm635_vm3, %v3556_v9, %v3515_v7  ;;  %v10748_v14 = vpack.i.bf16 %v3811_v37, %v3923_v54  ;;  %v20420_v59 = vrot.slane %v15066_v52, 4  ;;  %v3793_v5 = vsel %vm635_vm3, %v3792_v0, %v15063_v13 }
 0x4ef   : > { %v3523_v23 = vsel %vm635_vm3, %v20419_v57, %v3522_v28  ;;  %v3799_v10 = vperm.slane %v3793_v5, %v12109_v53  ;;  %v20421_v28 = vrot.slane %v15033_v49, 4  ;;  %v20422_v7 = vrot.slane %v15188_v56, 4 }
 0x4f0   : > { %v3769_v47 = vsel %vm635_vm3, %v20420_v59, %v15229_v31  ;;  %v15366_v37 = vperm.slane %v3523_v23, %v11869_v32  ;;  %10749 = vrot.lane.b32.xlu1 %v10748_v14, %s11578_s17  ;;  %v20423_v35 = vrot.slane %v15127_v16, 4  ;;  %v20425_v23 = vunpack.i.h.bf16 %v15027_v25 }
 0x4f1   : > { %v3775_v18 = vperm.slane %v3769_v47, %v12109_v53  ;;  %v3881_v24 = vsel %vm635_vm3, %v20421_v28, %v15158_v46  ;;  %v3905_v9 = vsel %vm635_vm3, %v20422_v7, %v15000_v45  ;;  %v3559_v47 = vsel %vm635_vm3, %v3527_v50, %v3558_v4  ;;  %v15388_v50 = vpop.permute.xlu0 %10624 }
 0x4f2   : > { %v3887_v13 = vperm.slane %v3881_v24, %v12109_v53  ;;  %v3911_v0 = vperm.slane %v3905_v9, %v12109_v53  ;;  %v3533_v59 = vsel %vm635_vm3, %v20423_v35, %v14942_v34  ;;  %v3812_v57 = vrot.slane %v3799_v10, 4 }
 0x4f3   : > { %v15377_v56 = vperm.slane %v3533_v59, %v12109_v53  ;;  %v15380_v45 = vperm.slane %v3557_v38, %v12109_v53  ;;  %v3511_v54 = vsel %vm635_vm3, %v20425_v23, %v3510_v22  ;;  %v10632_v14 = vunpack.i.h.bf16 %v10630_v3 }
 0x4f4   : > { %v10611_v5 = vunpack.i.l.bf16 %v15314_v60  ;;  %v3924_v28 = vrot.slane %v3911_v0, 4  ;;  %v3813_v24 = vsel %vm635_vm3, %v3812_v57, %v3775_v18  ;;  %v3814_v4 = vrot.slane %v3775_v18, 4 }
 0x4f5   : > { %20424 = vst [vmem:[#allocation104_spill] sm:$0xff] %v15377_v56  ;;  %v3582_v7 = vrot.slane %v15377_v56, 4  ;;  %v3926_v9 = vrot.slane %v3887_v13, 4  ;;  %v3567_v38 = vperm.slane %v3559_v47, %v12109_v53  ;;  %v10612_v25 = vunpack.i.h.bf16 %v15314_v60 }
 0x4f6   : > { %v3925_v22 = vsel %vm635_vm3, %v3924_v28, %v3887_v13  ;;  %v3519_v59 = vperm.slane %v3511_v54, %v11869_v32  ;;  %v10631_v23 = vunpack.i.l.bf16 %v10630_v3  ;;  %v3568_v56 = vrot.slane %v15366_v37, 4 }
 0x4f7   : > { %v10753_v26 = vpack.i.bf16 %v3813_v24, %v3925_v22  ;;  %v3583_v57 = vsel %vm635_vm3, %v15380_v45, %v3582_v7  ;;  %v4507_v18 = vsel %vm635_vm3, %v10632_v14, %v15055_v20  ;;  %v10626_v47 = vunpack.i.l.bf16 %v15388_v50 }
 0x4f8   : > { %v10758_v35 = vpack.i.bf16 %v3583_v57, %v14447_v44  ;;  %v4504_v58 = vrot.slane %v10632_v14, 4  ;;  %v4828_v60 = vrot.slane %v10611_v5, 4  ;;  %v3815_v13 = vsel %vm635_vm3, %v3799_v10, %v3814_v4 }
 0x4f9   : > { %10754 = vrot.lane.b32.xlu2 %v10753_v26, %s11579_s19  ;;  %v3927_v3 = vsel %vm635_vm3, %v3911_v0, %v3926_v9  ;;  %v4864_v54 = vrot.slane %v10612_v25, 4  ;;  %v20426_v24 = vrot.slane %v14942_v34, 4  ;;  %v3584_v44 = vrot.slane %v3567_v38, 4 }
 0x4fa   : > { %10759 = vrot.lane.b32.xlu0 %v10758_v35, %s11576_s15  ;;  %v10763_v28 = vpack.i.bf16 %v3815_v13, %v3927_v3  ;;  %v3570_v7 = vrot.slane %v3519_v59, 4  ;;  %v15411_v14 = vperm.slane %v4507_v18, %v11869_v32  ;;  %v4830_v22 = vrot.slane %v10631_v23, 4 }
 0x4fb   : > { %v3535_v20 = vsel %vm635_vm3, %v15127_v16, %v20426_v24  ;;  %v4752_v10 = vrot.slane %v10626_v47, 4  ;;  %v20427_v0 = vrot.slane %v15229_v31, 4  ;;  %v3803_v16 = vperm.slane %v15320_v11, %v12109_v53 }
 0x4fc   : > { %v3543_v26 = vperm.slane %v3535_v20, %v12109_v53  ;;  %10764 = vrot.lane.b32.xlu1 %v10763_v28, %s11581_s18  ;;  %v20428_v4 = vrot.slane %v15158_v46, 4  ;;  %v4829_v35 = vsel %vm635_vm3, %v4828_v60, %v10631_v23  ;;  %v4867_v57 = vsel %vm635_vm3, %v10612_v25, %v15325_v36 }
 0x4fd   : > { %v3771_v34 = vsel %vm635_vm3, %v15066_v52, %v20427_v0  ;;  %v20429_v13 = vunpack.i.h.bf16 %v15205_v61  ;;  %v3816_v3 = vrot.slane %v3803_v16, 4  ;;  %v3915_v46 = vperm.slane %v15226_v63, %v12109_v53 }
 0x4fe   : > { %v3883_v9 = vsel %vm635_vm3, %v15033_v49, %v20428_v4  ;;  %v3585_v18 = vsel %vm635_vm3, %v3584_v44, %v3543_v26  ;;  %v3779_v31 = vperm.slane %v3771_v34, %v12109_v53  ;;  %v20430_v49 = vunpack.i.h.bf16 %v14878_v8 }
 0x4ff   : > { %v4865_v52 = vsel %vm635_vm3, %v4864_v54, %v20429_v13  ;;  %v3891_v11 = vperm.slane %v3883_v9, %v12109_v53  ;;  %v4831_v36 = vsel %vm635_vm3, %v10611_v5, %v4830_v22  ;;  %v10627_v25 = vunpack.i.h.bf16 %v15388_v50 }
 0x500   : > { %v4505_v23 = vsel %vm635_vm3, %v4504_v58, %v20430_v49  ;;  %v10768_v60 = vpack.i.bf16 %v3585_v18, %v14230_v12  ;;  %v20431_v61 = vunpack.i.l.bf16 %v15232_v42  ;;  %v3817_v28 = vsel %vm635_vm3, %v3816_v3, %v3779_v31 }
 0x501   : > { %v3928_v24 = vrot.slane %v3915_v46, 4  ;;  %v3586_v20 = vrot.slane %v3543_v26, 4  ;;  %v4835_v63 = vperm.slane %v4829_v35, %v11869_v32  ;;  %v4871_v8 = vperm.slane %v4865_v52, %v11869_v32 }
 0x502   : > { %v4753_v54 = vsel %vm635_vm3, %v4752_v10, %v20431_v61  ;;  %v15451_v58 = vperm.slane %v4867_v57, %v11869_v32  ;;  %10769 = vrot.lane.b32.xlu2 %v10768_v60, %s11577_s22  ;;  %v3818_v5 = vrot.slane %v3779_v31, 4  ;;  %v3569_v12 = vsel %vm635_vm3, %v3568_v56, %v3519_v59  ;;  %v15457_v10 = vpop.permute.xlu1 %10644  ;;  %v20435_v60 = vld [vmem:[#allocation85_spill] sm:$0xff] }
 0x503   : > { %v3929_v42 = vsel %vm635_vm3, %v3928_v24, %v3891_v11  ;;  %v3587_v44 = vsel %vm635_vm3, %v3567_v38, %v3586_v20  ;;  %v3930_v22 = vrot.slane %v3891_v11, 4  ;;  %v15460_v26 = vperm.slane %v4753_v54, %v11869_v32 }
 0x504   : > { %v10773_v0 = vpack.i.bf16 %v3817_v28, %v3929_v42  ;;  %v10778_v34 = vpack.i.bf16 %v3587_v44, %v14214_v27  ;;  %v20432_v4 = vrot.slane %v15112_v6, 4  ;;  %v3571_v56 = vsel %vm635_vm3, %v15366_v37, %v3570_v7  ;;  %v15484_v37 = vpop.permute.xlu0 %10639 }
 0x505   : > { %v15470_v59 = vperm.slane %v4505_v23, %v11869_v32  ;;  %v15473_v38 = vperm.slane %v4831_v36, %v11869_v32  ;;  %v4741_v35 = vsel %vm635_vm3, %v15165_v33, %v10627_v25  ;;  %v20433_v27 = vrot.slane %v15208_v17, 4 }
 0x506   : > { %v3545_v9 = vsel %vm635_vm3, %v20432_v4, %v14914_v51  ;;  %v4900_v57 = vrot.slane %v4871_v8, 4  ;;  %v4912_v51 = vrot.slane %v15451_v58, 4  ;;  %10774 = vrot.lane.b32.xlu0 %v10773_v0, %s11580_s11  ;;  %10779 = vrot.lane.b32.xlu1 %v10778_v34, %s11578_s17  ;;  %v3819_v7 = vsel %vm635_vm3, %v3803_v16, %v3818_v5 }
 0x507   : > { %v4877_v6 = vsel %vm635_vm3, %v20433_v27, %v4835_v63  ;;  %v4878_v18 = vrot.slane %v4835_v63, 4  ;;  %v10647_v31 = vunpack.i.h.bf16 %v15457_v10  ;;  %v3931_v33 = vsel %vm635_vm3, %v3915_v46, %v3930_v22 }
 0x508   : > { %v3551_v13 = vperm.slane %v3545_v9, %v12109_v53  ;;  %v4747_v52 = vperm.slane %v4741_v35, %v11869_v32  ;;  %v4788_v3 = vrot.slane %v15460_v26, 4  ;;  %v10783_v11 = vpack.i.bf16 %v3819_v7, %v3931_v33 }
 0x509   : > { %v3575_v49 = vperm.slane %v3569_v12, %v12109_v53  ;;  %v10642_v23 = vunpack.i.h.bf16 %v15484_v37  ;;  %v20434_v36 = vrot.slane %v14866_v40, 4  ;;  %v20436_v61 = vrot.slane %v20435_v60, 4 }
 0x50a   : > { %v15504_v54 = vperm.slane %v4877_v6, %v12109_v53  ;;  %10784 = vrot.lane.b32.xlu2 %v10783_v11, %s11582_s20  ;;  %v4901_v63 = vsel %vm635_vm3, %v4900_v57, %v15301_v55  ;;  %v20439_v5 = vrot.slane %v15301_v55, 4  ;;  %v3590_v22 = vrot.slane %v3551_v13, 4 }
 0x50b   : > { %v3421_v16 = vsel %vm635_vm3, %v20434_v36, %v14822_v39  ;;  %v3445_v46 = vsel %vm635_vm3, %v20436_v61, %v14954_v43  ;;  %v3588_v28 = vrot.slane %v3575_v49, 4  ;;  %v15519_v42 = vperm.slane %v4901_v63, %v12109_v53  ;;  %v15550_v61 = vpop.permute.xlu2 %10659 }
 0x50c   : > { %20437 = vst [vmem:[#allocation85_spill] sm:$0xff] %v15504_v54  ;;  %v15508_v24 = vperm.slane %v3421_v16, %v12109_v53  ;;  %v15511_v20 = vperm.slane %v3445_v46, %v12109_v53  ;;  %v4903_v12 = vsel %vm635_vm3, %v4871_v8, %v20439_v5  ;;  %v4926_v44 = vrot.slane %v15504_v54, 4  ;;  %v20441_v8 = vld [vmem:[#allocation23_spill] sm:$0xff]  ;;  %v20443_v46 = vld [vmem:[#allocation34_spill] sm:$0xff] }
 0x50d   : > { %v4789_v0 = vsel %vm635_vm3, %v4788_v3, %v4747_v52  ;;  %v3589_v34 = vsel %vm635_vm3, %v3588_v28, %v3551_v13  ;;  %v20440_v9 = vrot.slane %v14954_v43, 4  ;;  %v4528_v55 = vrot.slane %v10642_v23, 4 }
 0x50e   : > { %20438 = vst [vmem:[#allocation105_spill] sm:$0xff] %v15508_v24  ;;  %v3470_v4 = vrot.slane %v15508_v24, 4  ;;  %v10788_v27 = vpack.i.bf16 %v3589_v34, %v20441_v8  ;;  %v4927_v6 = vsel %vm635_vm3, %v15519_v42, %v4926_v44  ;;  %v3591_v57 = vsel %vm635_vm3, %v3575_v49, %v3590_v22 }
 0x50f   : > { %v3447_v35 = vsel %vm635_vm3, %v20435_v60, %v20440_v9  ;;  %v10641_v7 = vunpack.i.l.bf16 %v15484_v37  ;;  %v4879_v13 = vsel %vm635_vm3, %v15208_v17, %v4878_v18  ;;  %v20442_v11 = vrot.slane %v14822_v39, 4 }
 0x510   : > { %v3471_v33 = vsel %vm635_vm3, %v15511_v20, %v3470_v4  ;;  %v15539_v43 = vperm.slane %v3447_v35, %v12109_v53  ;;  %10789 = vrot.lane.b32.xlu0 %v10788_v27, %s11579_s19  ;;  %v4887_v49 = vperm.slane %v4879_v13, %v12109_v53  ;;  %v4911_v16 = vperm.slane %v4903_v12, %v12109_v53  ;;  %v20444_v12 = vld [vmem:[#allocation50_spill] sm:$0xff] }
 0x511   : > { %v10793_v3 = vpack.i.bf16 %v4927_v6, %v3471_v33  ;;  %v3423_v36 = vsel %vm635_vm3, %v14866_v40, %v20442_v11  ;;  %v4790_v60 = vrot.slane %v4747_v52, 4  ;;  %v10798_v28 = vpack.i.bf16 %v3591_v57, %v20443_v46  ;;  %v20445_v6 = vld [vmem:[#allocation49_spill] sm:$0xff]  ;;  %v20447_v33 = vld [vmem:[#allocation30_spill] sm:$0xff] }
 0x512   : > { %v3472_v63 = vrot.slane %v15539_v43, 4  ;;  %v3579_v17 = vperm.slane %v3571_v56, %v12109_v53  ;;  %v4742_v18 = vrot.slane %v10627_v25, 4  ;;  %v4529_v39 = vsel %vm635_vm3, %v4528_v55, %v10647_v31 }
 0x513   : > { %10794 = vrot.lane.b32.xlu1 %v10793_v3, %s11576_s15  ;;  %v4928_v40 = vrot.slane %v4911_v16, 4  ;;  %v15562_v52 = vperm.slane %v4789_v0, %v12109_v53  ;;  %v4516_v5 = vrot.slane %v10641_v7, 4  ;;  %10799 = vrot.lane.b32.xlu2 %v10798_v28, %s11581_s18  ;;  %v3431_v56 = vperm.slane %v3423_v36, %v12109_v53  ;;  %v20449_v28 = vld [vmem:[#allocation24_spill] sm:$0xff] }
 0x514   : > { %v3555_v25 = vperm.slane %v20444_v12, %v12109_v53  ;;  %v3592_v44 = vrot.slane %v3579_v17, 4  ;;  %v10646_v22 = vunpack.i.l.bf16 %v15457_v10  ;;  %v4755_v34 = vsel %vm635_vm3, %v10626_v47, %v15337_v21  ;;  %v20455_v10 = vld [vmem:[#allocation64_spill] sm:$0xff] }
 0x515   : > { %v4929_v0 = vsel %vm635_vm3, %v4928_v40, %v4887_v49  ;;  %v4814_v4 = vrot.slane %v15341_v2, 4  ;;  %v4791_v9 = vsel %vm635_vm3, %v15460_v26, %v4790_v60  ;;  %v15580_v35 = vperm.slane %v4529_v39, %v11869_v32  ;;  %v20450_v40 = vld [vmem:[#allocation72_spill] sm:$0xff] }
 0x516   : > { %v3473_v55 = vsel %vm635_vm3, %v3472_v63, %v3431_v56  ;;  %v3593_v8 = vsel %vm635_vm3, %v3592_v44, %v3555_v25  ;;  %v4540_v27 = vrot.slane %v15470_v59, 4  ;;  %v20446_v50 = vunpack.i.h.bf16 %v20445_v6 }
 0x517   : > { %v10803_v47 = vpack.i.bf16 %v4929_v0, %v3473_v55  ;;  %v4815_v57 = vsel %vm635_vm3, %v15562_v52, %v4814_v4  ;;  %v20448_v26 = vrot.slane %v20447_v33, 4  ;;  %v4890_v3 = vrot.slane %v15473_v38, 4 }
 0x518   : > { %v4743_v21 = vsel %vm635_vm3, %v20446_v50, %v4742_v18  ;;  %v4517_v11 = vsel %vm635_vm3, %v4516_v5, %v10646_v22  ;;  %v4930_v36 = vrot.slane %v4887_v49, 4  ;;  %v4913_v60 = vsel %vm635_vm3, %v4912_v51, %v15304_v48 }
 0x519   : > { %v4889_v13 = vsel %vm635_vm3, %v20448_v26, %v15473_v38  ;;  %v4763_v46 = vperm.slane %v4755_v34, %v11869_v32  ;;  %10804 = vrot.lane.b32.xlu0 %v10803_v47, %s11577_s22  ;;  %v10808_v63 = vpack.i.bf16 %v3593_v8, %v20449_v28  ;;  %v4799_v18 = vperm.slane %v4791_v9, %v12109_v53  ;;  %v15621_v9 = vpop.permute.xlu2 %10674 }
 0x51a   : > { %v4751_v39 = vperm.slane %v4743_v21, %v11869_v32  ;;  %v4564_v38 = vrot.slane %v15580_v35, 4  ;;  %v10813_v5 = vpack.i.bf16 %v4815_v57, %v20450_v40  ;;  %v20451_v49 = vrot.slane %v15285_v30, 4 }
 0x51b   : > { %v20452_v51 = vrot.slane %v15304_v48, 4  ;;  %v15618_v34 = vperm.slane %v4517_v11, %v11869_v32  ;;  %10809 = vrot.lane.b32.xlu1 %v10808_v63, %s11580_s11  ;;  %v3594_v0 = vrot.slane %v3555_v25, 4  ;;  %v4816_v4 = vrot.slane %v4799_v18, 4  ;;  %v20453_v48 = vld [vmem:[#allocation102_spill] sm:$0xff] }
 0x51c   : > { %v4767_v12 = vsel %vm635_vm3, %v15262_v15, %v20451_v49  ;;  %v3474_v55 = vrot.slane %v3431_v56, 4  ;;  %v4931_v30 = vsel %vm635_vm3, %v4911_v16, %v4930_v36  ;;  %10814 = vrot.lane.b32.xlu2 %v10813_v5, %s11576_s15  ;;  %v4919_v15 = vperm.slane %v4913_v60, %v12109_v53  ;;  %v20458_v60 = vld [vmem:[#allocation93_spill] sm:$0xff] }
 0x51d   : > { %v15615_v44 = vsel %vm635_vm3, %v15451_v58, %v20452_v51  ;;  %v4541_v58 = vsel %vm635_vm3, %v4540_v27, %v20453_v48  ;;  %v4891_v8 = vsel %vm635_vm3, %v20447_v33, %v4890_v3  ;;  %v4530_v6 = vrot.slane %v10647_v31, 4  ;;  %v20464_v51 = vld [vmem:[#allocation48_spill] sm:$0xff] }
 0x51e   : > { %v3595_v25 = vsel %vm635_vm3, %v3579_v17, %v3594_v0  ;;  %v4775_v50 = vperm.slane %v4767_v12, %v12109_v53  ;;  %v4802_v56 = vrot.slane %v4751_v39, 4  ;;  %v4800_v21 = vrot.slane %v4763_v46, 4  ;;  %v20456_v17 = vld [vmem:[#allocation55_spill] sm:$0xff] }
 0x51f   : > { %v3475_v16 = vsel %vm635_vm3, %v15539_v43, %v3474_v55  ;;  %v4565_v47 = vsel %vm635_vm3, %v4564_v38, %v15618_v34  ;;  %v15640_v33 = vperm.slane %v4541_v58, %v12109_v53  ;;  %v3362_v31 = vrot.slane %v20455_v10, 4  ;;  %v20457_v43 = vld [vmem:[#allocation88_spill] sm:$0xff]  ;;  %v20460_v38 = vld [vmem:[#allocation74_spill] sm:$0xff] }
 0x520   : > { %v10818_v57 = vpack.i.bf16 %v4931_v30, %v3475_v16  ;;  %v4817_v27 = vsel %vm635_vm3, %v4816_v4, %v4775_v50  ;;  %v4518_v26 = vrot.slane %v10646_v22, 4  ;;  %v10823_v3 = vpack.i.bf16 %v3595_v25, %v20456_v17  ;;  %v20463_v22 = vld [vmem:[#allocation58_spill] sm:$0xff]  ;;  %v20469_v10 = vld [vmem:[#allocation32_spill] sm:$0xff] }
 0x521   : > { %20454 = vst [vmem:[#allocation23_spill] sm:$0xff] %v15640_v33  ;;  %v4895_v11 = vperm.slane %v4889_v13, %v12109_v53  ;;  %v4932_v36 = vrot.slane %v4919_v15, 4  ;;  %v20459_v28 = vrot.slane %v20458_v60, 4  ;;  %v15652_v40 = vperm.slane %v20460_v38, %v12109_v53  ;;  %v20465_v4 = vld [vmem:[#allocation66_spill] sm:$0xff]  ;;  %v15685_v37 = vpop.permute.xlu2 %10679 }
 0x522   : > { %10819 = vrot.lane.b32.xlu0 %v10818_v57, %s11578_s17  ;;  %v15655_v5 = vperm.slane %v4565_v47, %v12109_v53  ;;  %v3363_v49 = vsel %vm635_vm3, %v20463_v22, %v3362_v31  ;;  %v4801_v13 = vsel %vm635_vm3, %v4800_v21, %v4751_v39  ;;  %v4531_v12 = vsel %vm635_vm3, %v10642_v23, %v4530_v6  ;;  %v20466_v58 = vld [vmem:[#allocation78_spill] sm:$0xff]  ;;  %v20470_v31 = vld [vmem:[#allocation35_spill] sm:$0xff] }
 0x523   : > { %v3433_v63 = vsel %vm635_vm3, %v20459_v28, %v20457_v43  ;;  %20461 = vst [vmem:[#allocation34_spill] sm:$0xff] %v15652_v40  ;;  %v3476_v0 = vrot.slane %v20464_v51, 4  ;;  %v10828_v55 = vpack.i.bf16 %v4817_v27, %v20465_v4  ;;  %v4803_v30 = vsel %vm635_vm3, %v4763_v46, %v4802_v56  ;;  %10824 = vrot.lane.b32.xlu1 %v10823_v3, %s11582_s20  ;;  %v20472_v3 = vld [vmem:[#allocation27_spill] sm:$0xff] }
 0x524   : > { %20462 = vst [vmem:[#allocation50_spill] sm:$0xff] %v15655_v5  ;;  %v15669_v25 = vperm.slane %v20466_v58, %v12109_v53  ;;  %v4590_v16 = vrot.slane %v15640_v33, 4  ;;  %v4818_v47 = vrot.slane %v4775_v50, 4  ;;  %v4519_v39 = vsel %vm635_vm3, %v10641_v7, %v4518_v26 }
 0x525   : > { %v3439_v23 = vperm.slane %v3433_v63, %v12109_v53  ;;  %v4933_v6 = vsel %vm635_vm3, %v4932_v36, %v4895_v11  ;;  %10829 = vrot.lane.b32.xlu2 %v10828_v55, %s11577_s22  ;;  %v4934_v46 = vrot.slane %v4895_v11, 4  ;;  %v15679_v56 = vperm.slane %v4531_v12, %v11869_v32  ;;  %20468 = vst [vmem:[#allocation30_spill] sm:$0xff] %v15685_v37  ;;  %v20473_v11 = vld [vmem:[#allocation40_spill] sm:$0xff]  ;;  %v20477_v55 = vld [vmem:[#allocation87_spill] sm:$0xff] }
 0x526   : > { %20467 = vst [vmem:[#allocation49_spill] sm:$0xff] %v15669_v25  ;;  %v3134_v21 = vrot.slane %v15652_v40, 4  ;;  %v4591_v57 = vsel %vm635_vm3, %v15655_v5, %v4590_v16  ;;  %v4819_v50 = vsel %vm635_vm3, %v4799_v18, %v4818_v47  ;;  %v15689_v27 = vperm.slane %v4891_v8, %v12109_v53 }
 0x527   : > { %v3477_v7 = vsel %vm635_vm3, %v3476_v0, %v3439_v23  ;;  %v20471_v26 = vrot.slane %v20470_v31, 4  ;;  %v20474_v36 = vrot.slane %v20473_v11, 4  ;;  %v4566_v60 = vrot.slane %v15618_v34, 4  ;;  %v20475_v0 = vld [vmem:[#allocation101_spill] sm:$0xff] }
 0x528   : > { %v10833_v18 = vpack.i.bf16 %v4933_v6, %v3477_v7  ;;  %v3135_v28 = vsel %vm635_vm3, %v15669_v25, %v3134_v21  ;;  %v3478_v38 = vrot.slane %v3439_v23, 4  ;;  %v4935_v22 = vsel %vm635_vm3, %v4919_v15, %v4934_v46 }
 0x529   : > { %v3321_v17 = vsel %vm635_vm3, %v20471_v26, %v20469_v10  ;;  %v3345_v43 = vsel %vm635_vm3, %v20474_v36, %v20472_v3  ;;  %v10858_v8 = vpack.i.bf16 %v4591_v57, %v3135_v28  ;;  %v10838_v12 = vpack.i.bf16 %v4819_v50, %v3363_v49 }
 0x52a   : > { %v3351_v63 = vperm.slane %v3345_v43, %v12109_v53  ;;  %10834 = vrot.lane.b32.xlu0 %v10833_v18, %s11579_s19  ;;  %v20476_v4 = vrot.slane %v20475_v0, 4  ;;  %v3327_v34 = vperm.slane %v3321_v17, %v12109_v53  ;;  %v15711_v47 = vperm.slane %v4801_v13, %v12109_v53  ;;  %v15749_v43 = vpop.permute.xlu1 %10649  ;;  %v20482_v18 = vld [vmem:[#allocation98_spill] sm:$0xff] }
 0x52b   : > { %v4938_v6 = vrot.slane %v15689_v27, 4  ;;  %v20478_v23 = vrot.slane %v15265_v62, 4  ;;  %v20479_v49 = vrot.slane %v20469_v10, 4  ;;  %v20480_v21 = vrot.slane %v20472_v3, 4  ;;  %10859 = vrot.lane.b32.xlu1 %v10858_v8, %s11576_s15 }
 0x52c   : > { %v3459_v58 = vsel %vm635_vm3, %v20477_v55, %v20476_v4  ;;  %v3364_v16 = vrot.slane %v3351_v63, 4  ;;  %v15727_v13 = vperm.slane %v4803_v30, %v12109_v53  ;;  %v4923_v50 = vperm.slane %v15615_v44, %v12109_v53  ;;  %v15739_v30 = vpop.permute.xlu0 %10664  ;;  %v15765_v55 = vpop.permute.xlu2 %10699 }
 0x52d   : > { %v4777_v15 = vsel %vm635_vm3, %v20478_v23, %v15329_v19  ;;  %v3323_v46 = vsel %vm635_vm3, %v20470_v31, %v20479_v49  ;;  %v3347_v57 = vsel %vm635_vm3, %v20473_v11, %v20480_v21  ;;  %v4820_v10 = vrot.slane %v15711_v47, 4  ;;  %10839 = vrot.lane.b32.xlu2 %v10838_v12, %s11578_s17  ;;  %20481 = vst [vmem:[#allocation24_spill] sm:$0xff] %v15739_v30  ;;  %v20519_v30 = vld [vmem:[#allocation97_spill] sm:$0xff] }
 0x52e   : > { %v3365_v7 = vsel %vm635_vm3, %v3364_v16, %v3327_v34  ;;  %v4576_v26 = vrot.slane %v15679_v56, 4  ;;  %v3479_v31 = vsel %vm635_vm3, %v20464_v51, %v3478_v38  ;;  %v3467_v17 = vperm.slane %v3459_v58, %v12109_v53  ;;  %20484 = vst [vmem:[#allocation72_spill] sm:$0xff] %v15765_v55 }
 0x52f   : > { %v15742_v3 = vperm.slane %v3347_v57, %v12109_v53  ;;  %v15745_v44 = vperm.slane %v4519_v39, %v11869_v32  ;;  %v4567_v11 = vsel %vm635_vm3, %v15580_v35, %v4566_v60  ;;  %v10843_v36 = vpack.i.bf16 %v4935_v22, %v3479_v31 }
 0x530   : > { %v4783_v51 = vperm.slane %v4777_v15, %v12109_v53  ;;  %v3482_v28 = vrot.slane %v20482_v18, 4  ;;  %v4939_v8 = vsel %vm635_vm3, %v4923_v50, %v4938_v6  ;;  %v15755_v38 = vperm.slane %v3323_v46, %v12109_v53 }
 0x531   : > { %v3368_v12 = vrot.slane %v15742_v3, 4  ;;  %v4936_v0 = vrot.slane %v4923_v50, 4  ;;  %v20483_v4 = vrot.slane %v15329_v19, 4  ;;  %v3366_v60 = vrot.slane %v3327_v34, 4 }
 0x532   : > { %v4821_v39 = vsel %vm635_vm3, %v4820_v10, %v4783_v51  ;;  %v4577_v22 = vsel %vm635_vm3, %v4576_v26, %v15745_v44  ;;  %v3483_v58 = vsel %vm635_vm3, %v3467_v17, %v3482_v28  ;;  %v4824_v6 = vrot.slane %v15727_v13, 4  ;;  %10844 = vrot.lane.b32.xlu0 %v10843_v36, %s11581_s18  ;;  %v20487_v10 = vld [vmem:[#allocation96_spill] sm:$0xff] }
 0x533   : > { %v4779_v35 = vsel %vm635_vm3, %v15265_v62, %v20483_v4  ;;  %v3369_v16 = vsel %vm635_vm3, %v3368_v12, %v15755_v38  ;;  %v10868_v23 = vpack.i.bf16 %v4939_v8, %v3483_v58  ;;  %v3480_v19 = vrot.slane %v3467_v17, 4  ;;  %v20485_v62 = vld [vmem:[#allocation79_spill] sm:$0xff]  ;;  %v20491_v28 = vld [vmem:[#allocation92_spill] sm:$0xff] }
 0x534   : > { %v15773_v15 = vsel %vm635_vm3, %v3351_v63, %v3366_v60  ;;  %v15777_v34 = vperm.slane %v20485_v62, %v12109_v53  ;;  %v10848_v49 = vpack.i.bf16 %v4821_v39, %v3365_v7  ;;  %v15780_v46 = vperm.slane %v4779_v35, %v12109_v53  ;;  %v20488_v63 = vld [vmem:[#allocation86_spill] sm:$0xff]  ;;  %v20490_v17 = vld [vmem:[#allocation31_spill] sm:$0xff]  ;;  %v20492_v7 = vld [vmem:[#allocation89_spill] sm:$0xff] }
 0x535   : > { %v20486_v21 = vrot.slane %v20453_v48, 4  ;;  %v15787_v50 = vperm.slane %v4567_v11, %v12109_v53  ;;  %v4428_v26 = vrot.slane %v20487_v10, 4  ;;  %v20489_v31 = vunpack.i.h.bf16 %v20488_v63  ;;  %10869 = vrot.lane.b32.xlu1 %v10868_v23, %s11582_s20  ;;  %v20494_v48 = vld [vmem:[#allocation103_spill] sm:$0xff] }
 0x536   : > { %v20493_v8 = vunpack.i.h.bf16 %v20492_v7  ;;  %v15803_v11 = vperm.slane %v20494_v48, %v11869_v32  ;;  %v4552_v39 = vrot.slane %v15411_v14, 4  ;;  %10849 = vrot.lane.b32.xlu2 %v10848_v49, %s11579_s19  ;;  %v4825_v4 = vsel %vm635_vm3, %v4824_v6, %v15780_v46  ;;  %v15825_v49 = vpop.permute.xlu0 %10684  ;;  %v20499_v7 = vld [vmem:[#allocation70_spill] sm:$0xff] }
 0x537   : > { %v4543_v57 = vsel %vm635_vm3, %v15470_v59, %v20486_v21  ;;  %v4405_v36 = vsel %vm635_vm3, %v20490_v17, %v20489_v31  ;;  %v4937_v59 = vsel %vm635_vm3, %v4936_v0, %v15689_v27  ;;  %v4592_v35 = vrot.slane %v15787_v50, 4  ;;  %20495 = vst [vmem:[#allocation102_spill] sm:$0xff] %v15825_v49  ;;  %v20497_v31 = vld [vmem:[#allocation80_spill] sm:$0xff] }
 0x538   : > { %v4407_v12 = vsel %vm635_vm3, %v20493_v8, %v20491_v28  ;;  %v15811_v60 = vperm.slane %v4577_v22, %v12109_v53  ;;  %v3481_v58 = vsel %vm635_vm3, %v3480_v19, %v20482_v18  ;;  %v3136_v27 = vrot.slane %v15777_v34, 4  ;;  %v15827_v22 = vpop.permute.xlu1 %10654  ;;  %v20496_v18 = vld [vmem:[#allocation73_spill] sm:$0xff]  ;;  %v20498_v28 = vld [vmem:[#allocation59_spill] sm:$0xff] }
 0x539   : > { %v15817_v0 = vperm.slane %v4543_v57, %v12109_v53  ;;  %v15820_v23 = vperm.slane %v4405_v36, %v11869_v32  ;;  %v15823_v62 = vperm.slane %v4407_v12, %v11869_v32  ;;  %v10853_v6 = vpack.i.bf16 %v4937_v59, %v3481_v58  ;;  %v20501_v12 = vld [vmem:[#allocation41_spill] sm:$0xff]  ;;  %v20503_v58 = vld [vmem:[#allocation19_spill] sm:$0xff] }
 0x53a   : > { %v4822_v21 = vrot.slane %v4783_v51, 4  ;;  %v10878_v63 = vpack.i.bf16 %v4825_v4, %v3369_v16  ;;  %v3095_v19 = vperm.slane %v20496_v18, %v12109_v53  ;;  %v15835_v17 = vperm.slane %v20497_v31, %v12109_v53  ;;  %v20505_v18 = vld [vmem:[#allocation36_spill] sm:$0xff] }
 0x53b   : > { %v4593_v57 = vsel %vm635_vm3, %v4592_v35, %v15817_v0  ;;  %v20500_v8 = vrot.slane %v20499_v7, 4  ;;  %v4553_v16 = vsel %vm635_vm3, %v4552_v39, %v15803_v11  ;;  %v2943_v59 = vperm.slane %v20501_v12, %v11869_v32  ;;  %10854 = vrot.lane.b32.xlu0 %v10853_v6, %s11580_s11  ;;  %v20502_v35 = vld [vmem:[#allocation45_spill] sm:$0xff]  ;;  %v20506_v31 = vld [vmem:[#allocation44_spill] sm:$0xff]  ;;  %v15858_v39 = vpop.permute.xlu2 %10709 }
 0x53c   : > { %v4823_v36 = vsel %vm635_vm3, %v15711_v47, %v4822_v21  ;;  %v3137_v48 = vsel %vm635_vm3, %v3136_v27, %v3095_v19  ;;  %v4596_v4 = vrot.slane %v15811_v60, 4  ;;  %v20504_v47 = vrot.slane %v20503_v58, 4  ;;  %20508 = vst [vmem:[#allocation64_spill] sm:$0xff] %v15858_v39  ;;  %v20515_v39 = vld [vmem:[#allocation75_spill] sm:$0xff] }
 0x53d   : > { %v3097_v51 = vsel %vm635_vm3, %v20500_v8, %v20498_v28  ;;  %v20507_v8 = vrot.slane %v20506_v31, 4  ;;  %v10873_v49 = vpack.i.bf16 %v4593_v57, %v3137_v48  ;;  %v2972_v27 = vrot.slane %v2943_v59, 4  ;;  %10879 = vrot.lane.b32.xlu1 %v10878_v63, %s11580_s11  ;;  %v20510_v31 = vld [vmem:[#allocation83_spill] sm:$0xff]  ;;  %v20512_v57 = vld [vmem:[#allocation38_spill] sm:$0xff] }
 0x53e   : > { %v2949_v21 = vsel %vm635_vm3, %v20504_v47, %v20502_v35  ;;  %v3140_v33 = vrot.slane %v15835_v17, 4  ;;  %v4559_v58 = vperm.slane %v4553_v16, %v12109_v53  ;;  %v20509_v35 = vld [vmem:[#allocation91_spill] sm:$0xff]  ;;  %v20514_v16 = vld [vmem:[#allocation90_spill] sm:$0xff] }
 0x53f   : > { %v2961_v55 = vsel %vm635_vm3, %v20507_v8, %v20505_v18  ;;  %v2955_v12 = vperm.slane %v2949_v21, %v11869_v32  ;;  %v4429_v47 = vsel %vm635_vm3, %v4428_v26, %v20509_v35  ;;  %v20511_v18 = vrot.slane %v20510_v31, 4  ;;  %10874 = vrot.lane.b32.xlu2 %v10873_v49, %s11577_s22 }
 0x540   : > { %v2967_v6 = vperm.slane %v2961_v55, %v11869_v32  ;;  %v2973_v55 = vsel %vm635_vm3, %v2972_v27, %v20512_v57  ;;  %v15875_v63 = vperm.slane %v4429_v47, %v12109_v53  ;;  %v20516_v26 = vunpack.i.h.bf16 %v20515_v39 }
 0x541   : > { %v4453_v8 = vsel %vm635_vm3, %v20511_v18, %v15820_v23  ;;  %v4430_v37 = vrot.slane %v20509_v35, 4  ;;  %v20517_v18 = vld [vmem:[#allocation84_spill] sm:$0xff]  ;;  %v15890_v27 = vperm.slane %v2973_v55, %v12109_v53  ;;  %v3103_v47 = vperm.slane %v3097_v51, %v12109_v53 }
 0x542   : > { %v2996_v48 = vrot.slane %v2967_v6, 4  ;;  %20513 = vst [vmem:[#allocation55_spill] sm:$0xff] %v15875_v63  ;;  %v15878_v21 = vperm.slane %v4453_v8, %v12109_v53  ;;  %v4383_v40 = vsel %vm635_vm3, %v20516_v26, %v20514_v16  ;;  %v20518_v49 = vrot.slane %v20517_v18, 4 }
 0x543   : > { %v4597_v8 = vsel %vm635_vm3, %v4596_v4, %v4559_v58  ;;  %v4478_v39 = vrot.slane %v15875_v63, 4  ;;  %v4454_v16 = vrot.slane %v15820_v23, 4  ;;  %v10863_v35 = vpack.i.bf16 %v4823_v36, %v15773_v15  ;;  %v15907_v4 = vpop.permute.xlu0 %10689  ;;  %v15912_v15 = vpop.permute.xlu1 %10669 }
 0x544   : > { %v4465_v5 = vsel %vm635_vm3, %v20518_v49, %v15823_v62  ;;  %v2997_v25 = vsel %vm635_vm3, %v2996_v48, %v2955_v12  ;;  %v3022_v49 = vrot.slane %v15890_v27, 4  ;;  %v4440_v55 = vrot.slane %v20519_v30, 4  ;;  %20520 = vst [vmem:[#allocation88_spill] sm:$0xff] %v15907_v4 }
 0x545   : > { %v15899_v26 = vperm.slane %v2997_v25, %v12109_v53  ;;  %v15904_v24 = vperm.slane %v4465_v5, %v12109_v53  ;;  %v3141_v51 = vsel %vm635_vm3, %v3140_v33, %v3103_v47  ;;  %v4479_v48 = vsel %vm635_vm3, %v15878_v21, %v4478_v39  ;;  %10864 = vrot.lane.b32.xlu0 %v10863_v35, %s11581_s18 }
 0x546   : > { %v10903_v25 = vpack.i.bf16 %v4597_v8, %v3141_v51  ;;  %v4594_v23 = vrot.slane %v15817_v0, 4  ;;  %v2974_v5 = vrot.slane %v20512_v57, 4  ;;  %v4578_v63 = vrot.slane %v15745_v44, 4  ;;  %v15925_v51 = vpop.permute.xlu2 %10724 }
 0x547   : > { %v3023_v36 = vsel %vm635_vm3, %v15899_v26, %v3022_v49  ;;  %v3138_v33 = vrot.slane %v3095_v19, 4  ;;  %v2998_v4 = vrot.slane %v2955_v12, 4  ;;  %v4598_v35 = vrot.slane %v4559_v58, 4 }
 0x548   : > { %v10883_v54 = vpack.i.bf16 %v4479_v48, %v3023_v36  ;;  %10904 = vrot.lane.b32.xlu1 %v10903_v25, %s11579_s19  ;;  %v4595_v39 = vsel %vm635_vm3, %v15787_v50, %v4594_v23  ;;  %v2975_v8 = vsel %vm635_vm3, %v2943_v59, %v2974_v5  ;;  %v4455_v0 = vsel %vm635_vm3, %v20510_v31, %v4454_v16  ;;  %v20523_v48 = vld [vmem:[#allocation37_spill] sm:$0xff] }
 0x549   : > { %v3139_v57 = vsel %vm635_vm3, %v15777_v34, %v3138_v33  ;;  %v3142_v44 = vrot.slane %v3103_v47, 4  ;;  %v2999_v19 = vsel %vm635_vm3, %v2967_v6, %v2998_v4  ;;  %v15932_v12 = vperm.slane %v4455_v0, %v12109_v53  ;;  %v20521_v4 = vld [vmem:[#allocation42_spill] sm:$0xff]  ;;  %v20525_v5 = vld [vmem:[#allocation29_spill] sm:$0xff] }
 0x54a   : > { %10884 = vrot.lane.b32.xlu2 %v10883_v54, %s11576_s15  ;;  %v4599_v50 = vsel %vm635_vm3, %v15811_v60, %v4598_v35  ;;  %v3007_v59 = vperm.slane %v2999_v19, %v12109_v53  ;;  %v3370_v58 = vrot.slane %v15755_v38, 4  ;;  %v4826_v31 = vrot.slane %v15780_v46, 4  ;;  %v20527_v19 = vld [vmem:[#allocation21_spill] sm:$0xff] }
 0x54b   : > { %v10888_v16 = vpack.i.bf16 %v4595_v39, %v3139_v57  ;;  %v3143_v34 = vsel %vm635_vm3, %v15835_v17, %v3142_v44  ;;  %v2983_v54 = vperm.slane %v2975_v8, %v12109_v53  ;;  %v4431_v6 = vsel %vm635_vm3, %v20487_v10, %v4430_v37  ;;  %v15961_v39 = vpop.permute.xlu0 %10694  ;;  %v20526_v8 = vld [vmem:[#allocation77_spill] sm:$0xff]  ;;  %v15967_v57 = vpop.permute.xlu1 %10704 }
 0x54c   : > { %v3024_v47 = vrot.slane %v3007_v59, 4  ;;  %v3371_v49 = vsel %vm635_vm3, %v15742_v3, %v3370_v58  ;;  %v4827_v60 = vsel %vm635_vm3, %v15727_v13, %v4826_v31  ;;  %v20522_v38 = vrot.slane %v20521_v4, 4  ;;  %v20524_v13 = vld [vmem:[#allocation39_spill] sm:$0xff] }
 0x54d   : > { %v4391_v25 = vperm.slane %v4383_v40, %v11869_v32  ;;  %v4579_v17 = vsel %vm635_vm3, %v15679_v56, %v4578_v63  ;;  %v10913_v23 = vpack.i.bf16 %v4599_v50, %v3143_v34  ;;  %v4480_v37 = vrot.slane %v15932_v12, 4  ;;  %10889 = vrot.lane.b32.xlu0 %v10888_v16, %s11578_s17 }
 0x54e   : > { %v2927_v46 = vsel %vm635_vm3, %v20523_v48, %v20522_v38  ;;  %v3025_v3 = vsel %vm635_vm3, %v3024_v47, %v2983_v54  ;;  %v2984_v36 = vrot.slane %v20524_v13, 4  ;;  %v3008_v33 = vrot.slane %v20525_v5, 4 }
 0x54f   : > { %v2935_v10 = vperm.slane %v2927_v46, %v11869_v32  ;;  %v4439_v40 = vperm.slane %v4431_v6, %v12109_v53  ;;  %v10893_v35 = vpack.i.bf16 %v4827_v60, %v3371_v49  ;;  %v4441_v56 = vsel %vm635_vm3, %v4440_v55, %v4391_v25  ;;  %v15976_v55 = vpop.permute.xlu2 %10739 }
 0x550   : > { %v4484_v63 = vrot.slane %v15904_v24, 4  ;;  %v3122_v0 = vrot.slane %v20526_v8, 4  ;;  %10914 = vrot.lane.b32.xlu1 %v10913_v23, %s11581_s18  ;;  %v3009_v50 = vsel %vm635_vm3, %v3008_v33, %v20527_v19  ;;  %v4554_v58 = vrot.slane %v15803_v11, 4 }
 0x551   : > { %v2985_v44 = vsel %vm635_vm3, %v2984_v36, %v2935_v10  ;;  %v4481_v31 = vsel %vm635_vm3, %v4480_v37, %v4439_v40  ;;  %v3015_v16 = vperm.slane %v3009_v50, %v12109_v53  ;;  %v4447_v34 = vperm.slane %v4441_v56, %v12109_v53  ;;  %v20528_v37 = vld [vmem:[#allocation65_spill] sm:$0xff] }
 0x552   : > { %10894 = vrot.lane.b32.xlu2 %v10893_v35, %s11582_s20  ;;  %v3098_v6 = vrot.slane %v20498_v28, 4  ;;  %v4587_v47 = vperm.slane %v4579_v17, %v12109_v53  ;;  %v3026_v49 = vrot.slane %v2983_v54, 4  ;;  %v4555_v60 = vsel %vm635_vm3, %v15411_v14, %v4554_v58 }
 0x553   : > { %v2991_v11 = vperm.slane %v2985_v44, %v12109_v53  ;;  %v3028_v4 = vrot.slane %v3015_v16, 4  ;;  %v4485_v38 = vsel %vm635_vm3, %v4484_v63, %v4447_v34  ;;  %v10898_v48 = vpack.i.bf16 %v4481_v31, %v3025_v3  ;;  %v16003_v44 = vpop.permute.xlu0 %10714 }
 0x554   : > { %v3027_v46 = vsel %vm635_vm3, %v3007_v59, %v3026_v49  ;;  %v3099_v23 = vsel %vm635_vm3, %v20499_v7, %v3098_v6  ;;  %v3123_v28 = vsel %vm635_vm3, %v20528_v37, %v3122_v0  ;;  %v4442_v36 = vrot.slane %v4391_v25, 4  ;;  %v16009_v6 = vpop.permute.xlu1 %10719 }
 0x555   : > { %v4466_v54 = vrot.slane %v15823_v62, 4  ;;  %v3029_v17 = vsel %vm635_vm3, %v3028_v4, %v2991_v11  ;;  %v3131_v14 = vperm.slane %v3123_v28, %v12109_v53  ;;  %10899 = vrot.lane.b32.xlu0 %v10898_v48, %s11577_s22  ;;  %v4482_v35 = vrot.slane %v4439_v40, 4 }
 0x556   : > { %v10918_v33 = vpack.i.bf16 %v4485_v38, %v3029_v17  ;;  %v4563_v3 = vperm.slane %v4555_v60, %v12109_v53  ;;  %v4600_v59 = vrot.slane %v4587_v47, 4  ;;  %v4443_v7 = vsel %vm635_vm3, %v20519_v30, %v4442_v36  ;;  %v20529_v38 = vld [vmem:[#allocation76_spill] sm:$0xff] }
 0x557   : > { %v3107_v56 = vperm.slane %v3099_v23, %v12109_v53  ;;  %v3144_v63 = vrot.slane %v3131_v14, 4  ;;  %v3030_v25 = vrot.slane %v2991_v11, 4  ;;  %v4483_v62 = vsel %vm635_vm3, %v15932_v12, %v4482_v35  ;;  %v16015_v60 = vpop.permute.xlu2 %10754  ;;  %v20530_v36 = vld [vmem:[#allocation52_spill] sm:$0xff]  ;;  %v20531_v35 = vld [vmem:[#allocation61_spill] sm:$0xff] }
 0x558   : > { %10919 = vrot.lane.b32.xlu1 %v10918_v33, %s11579_s19  ;;  %v4601_v8 = vsel %vm635_vm3, %v4600_v59, %v4563_v3  ;;  %v2986_v0 = vrot.slane %v2935_v10, 4  ;;  %v4486_v58 = vrot.slane %v4447_v34, 4  ;;  %v3010_v30 = vrot.slane %v20527_v19, 4 }
 0x559   : > { %v3145_v40 = vsel %vm635_vm3, %v3144_v63, %v3107_v56  ;;  %v3031_v50 = vsel %vm635_vm3, %v3015_v16, %v3030_v25  ;;  %v4451_v31 = vperm.slane %v4443_v7, %v12109_v53  ;;  %v4467_v10 = vsel %vm635_vm3, %v20517_v18, %v4466_v54  ;;  %v20532_v25 = vld [vmem:[#allocation28_spill] sm:$0xff] }
 0x55a   : > { %v10923_v49 = vpack.i.bf16 %v4601_v8, %v3145_v40  ;;  %v2987_v12 = vsel %vm635_vm3, %v20524_v13, %v2986_v0  ;;  %v4487_v11 = vsel %vm635_vm3, %v15904_v24, %v4486_v58  ;;  %v3011_v19 = vsel %vm635_vm3, %v20525_v5, %v3010_v30  ;;  %v20533_v0 = vld [vmem:[#allocation57_spill] sm:$0xff] }
 0x55b   : > { %v2995_v16 = vperm.slane %v2987_v12, %v12109_v53  ;;  %v4475_v34 = vperm.slane %v4467_v10, %v12109_v53  ;;  %v10908_v4 = vpack.i.bf16 %v4483_v62, %v3027_v46  ;;  %v3019_v13 = vperm.slane %v3011_v19, %v12109_v53  ;;  %v16042_v30 = vpop.permute.xlu0 %10729  ;;  %v20536_v19 = vld [vmem:[#allocation53_spill] sm:$0xff] }
 0x55c   : > { %10924 = vrot.lane.b32.xlu2 %v10923_v49, %s11580_s11  ;;  %v4130_v48 = vrot.slane %v20529_v38, 4  ;;  %v4602_v23 = vrot.slane %v4563_v3, 4  ;;  %v10928_v37 = vpack.i.bf16 %v4487_v11, %v3031_v50  ;;  %v4490_v24 = vrot.slane %v4451_v31, 4  ;;  %v20535_v50 = vld [vmem:[#allocation67_spill] sm:$0xff]  ;;  %v16049_v11 = vpop.permute.xlu1 %10734  ;;  %v20537_v38 = vld [vmem:[#allocation46_spill] sm:$0xff] }
 0x55d   : > { %v3034_v18 = vrot.slane %v2995_v16, 4  ;;  %10909 = vrot.lane.b32.xlu0 %v10908_v4, %s11578_s17  ;;  %v3032_v28 = vrot.slane %v3019_v13, 4  ;;  %v4018_v54 = vrot.slane %v20530_v36, 4  ;;  %v3146_v17 = vrot.slane %v3107_v56, 4  ;;  %v20534_v56 = vld [vmem:[#allocation71_spill] sm:$0xff] }
 0x55e   : > { %v4603_v46 = vsel %vm635_vm3, %v4587_v47, %v4602_v23  ;;  %v4488_v33 = vrot.slane %v4475_v34, 4  ;;  %v4106_v59 = vrot.slane %v20531_v35, 4  ;;  %v4491_v3 = vsel %vm635_vm3, %v4475_v34, %v4490_v24 }
 0x55f   : > { %v3035_v5 = vsel %vm635_vm3, %v3019_v13, %v3034_v18  ;;  %v3033_v7 = vsel %vm635_vm3, %v3032_v28, %v2995_v16  ;;  %v3147_v63 = vsel %vm635_vm3, %v3131_v14, %v3146_v17  ;;  %v4019_v62 = vsel %vm635_vm3, %v20532_v25, %v4018_v54  ;;  %v16044_v49 = vpop.permute.xlu2 %10769  ;;  %v20539_v28 = vld [vmem:[#allocation47_spill] sm:$0xff] }
 0x560   : > { %10929 = vrot.lane.b32.xlu1 %v10928_v37, %s11581_s18  ;;  %v10933_v8 = vpack.i.bf16 %v4603_v46, %v3147_v63  ;;  %v3994_v40 = vrot.slane %v20533_v0, 4  ;;  %v4107_v47 = vsel %vm635_vm3, %v20534_v56, %v4106_v59  ;;  %v4131_v58 = vsel %vm635_vm3, %v20535_v50, %v4130_v48  ;;  %v20538_v37 = vld [vmem:[#allocation62_spill] sm:$0xff] }
 0x561   : > { %v4489_v12 = vsel %vm635_vm3, %v4488_v33, %v4451_v31  ;;  %v4027_v14 = vperm.slane %v4019_v62, %v12109_v53  ;;  %v4139_v10 = vperm.slane %v4131_v58, %v12109_v53  ;;  %v10948_v16 = vpack.i.bf16 %v4491_v3, %v3035_v5  ;;  %v20540_v5 = vld [vmem:[#allocation43_spill] sm:$0xff] }
 0x562   : > { %v3995_v34 = vsel %vm635_vm3, %v20536_v19, %v3994_v40  ;;  %v4115_v4 = vperm.slane %v4107_v47, %v12109_v53  ;;  %v4150_v48 = vrot.slane %v20537_v38, 4  ;;  %v10943_v31 = vpack.i.bf16 %v4489_v12, %v3033_v7 }
 0x563   : > { %v4152_v13 = vrot.slane %v4139_v10, 4  ;;  %v4003_v18 = vperm.slane %v3995_v34, %v12109_v53  ;;  %v4040_v23 = vrot.slane %v4027_v14, 4  ;;  %v4038_v24 = vrot.slane %v20538_v37, 4  ;;  %v10745_v7 = vpop.permute.xlu0 %10744  ;;  %v20541_v34 = vld [vmem:[#allocation51_spill] sm:$0xff] }
 0x564   : > { %10934 = vrot.lane.b32.xlu2 %v10933_v8, %s11582_s20  ;;  %v4151_v36 = vsel %vm635_vm3, %v20539_v28, %v4150_v48  ;;  %v4154_v46 = vrot.slane %v4115_v4, 4  ;;  %v3020_v33 = vrot.slane %v15899_v26, 4  ;;  %v10750_v0 = vpop.permute.xlu1 %10749  ;;  %v3804_v47 = vrot.slane %v15281_v29, 4 }
 0x565   : > { %10949 = vrot.lane.b32.xlu0 %v10948_v16, %s11582_s20  ;;  %v4153_v54 = vsel %vm635_vm3, %v4152_v13, %v4115_v4  ;;  %v4039_v17 = vsel %vm635_vm3, %v20540_v5, %v4038_v24  ;;  %v4041_v59 = vsel %vm635_vm3, %v4040_v23, %v4003_v18  ;;  %v4042_v63 = vrot.slane %v4003_v18, 4 }
 0x566   : > { %v10938_v35 = vpack.i.bf16 %v4039_v17, %v4151_v36  ;;  %v4155_v25 = vsel %vm635_vm3, %v4139_v10, %v4154_v46  ;;  %v16070_v62 = vsel %vm635_vm3, %v3020_v33, %v15890_v27  ;;  %v10953_v8 = vpack.i.bf16 %v4041_v59, %v4153_v54 }
 0x567   : > { %v10785_v3 = vpop.permute.xlu2 %10784  ;;  %v4043_v40 = vsel %vm635_vm3, %v4027_v14, %v4042_v63  ;;  %v3916_v50 = vrot.slane %v15297_v1, 4  ;;  %v10742_v27 = vunpack.i.h.bf16 %v15976_v55  ;;  %v10741_v58 = vunpack.i.l.bf16 %v15976_v55 }
 0x568   : > { %10944 = vrot.lane.b32.xlu1 %v10943_v31, %s11580_s11  ;;  %v10958_v26 = vpack.i.bf16 %v4043_v40, %v4155_v25  ;;  %v10747_v10 = vunpack.i.h.bf16 %v10745_v7  ;;  %v10746_v16 = vunpack.i.l.bf16 %v10745_v7  ;;  %v3805_v14 = vsel %vm635_vm3, %v3804_v47, %v15253_v41 }
 0x569   : > { %v3917_v4 = vsel %vm635_vm3, %v3916_v50, %v20541_v34  ;;  %v5451_v13 = vsel %vm1923_vm6, %v3805_v14, %v10742_v27  ;;  %v10752_v38 = vunpack.i.h.bf16 %v10750_v0  ;;  %v10751_v1 = vunpack.i.l.bf16 %v10750_v0  ;;  %v20542_v27 = vld [vmem:[#allocation63_spill] sm:$0xff]  ;;  %v20543_v14 = vld [vmem:[#allocation60_spill] sm:$0xff] }
 0x56a   : > { %v5452_v29 = vsel %vm1923_vm6, %v3917_v4, %v10741_v58  ;;  %v5460_v48 = vsel %vm1929_vm7, %v5451_v13, %v10747_v10  ;;  %v10757_v24 = vunpack.i.h.bf16 %v16015_v60  ;;  %v10756_v28 = vunpack.i.l.bf16 %v16015_v60 }
 0x56b   : > { %v5461_v55 = vsel %vm1929_vm7, %v5452_v29, %v10746_v16  ;;  %v5469_v18 = vsel %vm1935_vm8, %v5460_v48, %v10752_v38  ;;  %v3692_v58 = vrot.slane %v20542_v27, 4  ;;  %v3580_v16 = vrot.slane %v15380_v45, 4  ;;  %v20544_v48 = vld [vmem:[#allocation104_spill] sm:$0xff] }
 0x56c   : > { %10939 = vrot.lane.b32.xlu2 %v10938_v35, %s11581_s18  ;;  %v10760_v12 = vpop.permute.xlu0 %10759  ;;  %v5470_v23 = vsel %vm1935_vm8, %v5461_v55, %v10751_v1  ;;  %v5478_v33 = vsel %vm1941_vm9, %v5469_v18, %v10757_v24  ;;  %v10786_v35 = vunpack.i.l.bf16 %v10785_v3  ;;  %v10771_v1 = vunpack.i.l.bf16 %v16044_v49 }
 0x56d   : > { %10954 = vrot.lane.b32.xlu0 %v10953_v8, %s11580_s11  ;;  %v5479_v46 = vsel %vm1941_vm9, %v5470_v23, %v10756_v28  ;;  %v10787_v8 = vunpack.i.h.bf16 %v10785_v3  ;;  %v10761_v10 = vunpack.i.l.bf16 %v10760_v12  ;;  %v10762_v3 = vunpack.i.h.bf16 %v10760_v12 }
 0x56e   : > { %v10765_v19 = vpop.permute.xlu1 %10764  ;;  %v3693_v34 = vsel %vm635_vm3, %v3692_v58, %v20543_v14  ;;  %v3581_v55 = vsel %vm635_vm3, %v3580_v16, %v20544_v48  ;;  %v10772_v12 = vunpack.i.h.bf16 %v16044_v49  ;;  %v20545_v16 = vld [vmem:[#allocation82_spill] sm:$0xff]  ;;  %v20546_v14 = vld [vmem:[#allocation25_spill] sm:$0xff]  ;;  %v10656_v48 = vunpack.i.l.bf16 %v15827_v22 }
 0x56f   : > { %v16076_v56 = vpop.permute.xlu2 %10799  ;;  %v10767_v41 = vunpack.i.h.bf16 %v10765_v19  ;;  %v10766_v37 = vunpack.i.l.bf16 %v10765_v19  ;;  %v5450_v13 = vsel %vm1923_vm6, %v3693_v34, %v10761_v10  ;;  %v5449_v45 = vsel %vm1923_vm6, %v3581_v55, %v10762_v3 }
 0x570   : > { %10959 = vrot.lane.b32.xlu1 %v10958_v26, %s11582_s20  ;;  %v5458_v28 = vsel %vm1929_vm7, %v5449_v45, %v10772_v12  ;;  %v3244_v3 = vrot.slane %v20545_v16, 4  ;;  %v4700_v34 = vrot.slane %v20546_v14, 4  ;;  %v10662_v55 = vunpack.i.h.bf16 %v15550_v61  ;;  %v20547_v12 = vld [vmem:[#allocation81_spill] sm:$0xff] }
 0x571   : > { %v5488_v59 = vsel %vm1947_vm10, %v5479_v46, %v10766_v37  ;;  %v5487_v7 = vsel %vm1947_vm10, %v5478_v33, %v10767_v41  ;;  %v5459_v41 = vsel %vm1929_vm7, %v5450_v13, %v10771_v1  ;;  %v10801_v46 = vunpack.i.l.bf16 %v16076_v56 }
 0x572   : > { %v10652_v13 = vunpack.i.h.bf16 %v15749_v43  ;;  %v10657_v1 = vunpack.i.h.bf16 %v15827_v22  ;;  %v10677_v45 = vunpack.i.h.bf16 %v15621_v9 }
 0x577   : > { %v16090_v31 = vpop.permute.xlu2 %10814 }
 0x578   : > { %v10775_v36 = vpop.permute.xlu0 %10774  ;;  %v10780_v17 = vpop.permute.xlu1 %10779 }
 0x579   : > { %v10777_v54 = vunpack.i.h.bf16 %v10775_v36  ;;  %v10776_v5 = vunpack.i.l.bf16 %v10775_v36  ;;  %v10781_v29 = vunpack.i.l.bf16 %v10780_v17  ;;  %v10782_v23 = vunpack.i.h.bf16 %v10780_v17 }
 0x57b   : > { %v5497_v63 = vsel %vm1953_vm11, %v5488_v59, %v10776_v5  ;;  %v5496_v25 = vsel %vm1953_vm11, %v5487_v7, %v10777_v54  ;;  %v5468_v24 = vsel %vm1935_vm8, %v5459_v41, %v10781_v29  ;;  %v5467_v33 = vsel %vm1935_vm8, %v5458_v28, %v10782_v23  ;;  %v20549_v28 = vld [vmem:[#allocation69_spill] sm:$0xff] }
 0x57c   : > { %v5506_v60 = vsel %vm1959_vm13, %v5497_v63, %v10786_v35  ;;  %v5505_v40 = vsel %vm1959_vm13, %v5496_v25, %v10787_v8  ;;  %v10802_v59 = vunpack.i.h.bf16 %v16076_v56  ;;  %v10651_v29 = vunpack.i.l.bf16 %v15749_v43 }
 0x57d   : > { %5588 = vmatpush.msra.mxu2 %v5506_v60  ;;  %v10676_v23 = vunpack.i.l.bf16 %v15621_v9  ;;  %v3245_v41 = vsel %vm635_vm3, %v3244_v3, %v20547_v12  ;;  %v4812_v43 = vrot.slane %v15562_v52, 4  ;;  %v20552_v3 = vld [vmem:[#allocation105_spill] sm:$0xff] }
 0x57f   : > { %v16103_v0 = vpop.permute.xlu2 %10829  ;;  %5589 = vmatpush.msra.mxu2 %v5505_v40 }
 0x582   : > { %v10790_v26 = vpop.permute.xlu0 %10789 }
 0x583   : > { %v10791_v18 = vunpack.i.l.bf16 %v10790_v26  ;;  %v10792_v37 = vunpack.i.h.bf16 %v10790_v26 }
 0x585   : > { %v16106_v47 = vpop.permute.xlu1 %10794  ;;  %v5477_v5 = vsel %vm1941_vm9, %v5468_v24, %v10791_v18  ;;  %v5476_v49 = vsel %vm1941_vm9, %v5467_v33, %v10792_v37  ;;  %v10661_v18 = vunpack.i.l.bf16 %v15550_v61  ;;  %v20548_v37 = vld [vmem:[#allocation33_spill] sm:$0xff]  ;;  %v4924_v33 = vrot.slane %v15519_v42, 4  ;;  %v20550_v42 = vld [vmem:[#allocation68_spill] sm:$0xff] }
 0x586   : > { %v5486_v25 = vsel %vm1947_vm10, %v5477_v5, %v10801_v46  ;;  %v5485_v26 = vsel %vm1947_vm10, %v5476_v49, %v10802_v59  ;;  %v4701_v24 = vsel %vm635_vm3, %v4700_v34, %v20548_v37  ;;  %v5446_v46 = vsel %vm1923_vm6, %v3245_v41, %v10651_v29 }
 0x587   : > { %v16108_v50 = vpop.permute.xlu2 %10839  ;;  %v5513_v22 = vsel %vm1923_vm6, %v4701_v24, %v10652_v13  ;;  %v10797_v59 = vunpack.i.h.bf16 %v16106_v47  ;;  %v10832_v24 = vunpack.i.h.bf16 %v16103_v0 }
 0x588   : > { %v5522_v49 = vsel %vm1929_vm7, %v5513_v22, %v10657_v1 }
 0x58b   : > { %v16112_v19 = vpop.permute.xlu0 %10804 }
 0x58d   : > { %v10810_v4 = vpop.permute.xlu1 %10809 }
 0x58e   : > { %v10811_v36 = vunpack.i.l.bf16 %v10810_v4  ;;  %v10812_v35 = vunpack.i.h.bf16 %v10810_v4 }
 0x590   : > { %v16117_v38 = vpop.permute.xlu2 %10849  ;;  %v5495_v60 = vsel %vm1953_vm11, %v5486_v25, %v10811_v36  ;;  %v5494_v27 = vsel %vm1953_vm11, %v5485_v26, %v10812_v35  ;;  %v3356_v36 = vrot.slane %v20549_v28, 4  ;;  %v3468_v35 = vrot.slane %v15511_v20, 4 }
 0x591   : > { %v10817_v25 = vunpack.i.h.bf16 %v16090_v31  ;;  %v4813_v20 = vsel %vm635_vm3, %v4812_v43, %v15341_v2 }
 0x592   : > { %v3357_v26 = vsel %vm635_vm3, %v3356_v36, %v20550_v42  ;;  %v3469_v14 = vsel %vm635_vm3, %v3468_v35, %v20552_v3  ;;  %v10852_v42 = vunpack.i.h.bf16 %v16117_v38  ;;  %v5531_v3 = vsel %vm1935_vm8, %v5522_v49, %v10662_v55 }
 0x593   : > { %v5514_v12 = vsel %vm1923_vm6, %v4813_v20, %v10817_v25 }
 0x594   : > { %v16127_v54 = vpop.permute.xlu0 %10819 }
 0x595   : > { %v10825_v17 = vpop.permute.xlu1 %10824 }
 0x596   : > { %v10827_v7 = vunpack.i.h.bf16 %v10825_v17  ;;  %v10826_v63 = vunpack.i.l.bf16 %v10825_v17  ;;  %v5455_v17 = vsel %vm1929_vm7, %v5446_v46, %v10656_v48 }
 0x598   : > { %v5504_v40 = vsel %vm1959_vm13, %v5495_v60, %v10826_v63  ;;  %v5503_v58 = vsel %vm1959_vm13, %v5494_v27, %v10827_v7  ;;  %v10796_v7 = vunpack.i.l.bf16 %v16106_v47  ;;  %v10672_v63 = vunpack.i.h.bf16 %v15912_v15  ;;  %v20551_v47 = vld [vmem:[#allocation85_spill] sm:$0xff] }
 0x599   : > { %v16135_v8 = vpop.permute.xlu2 %10874  ;;  %5590 = vmatpush.msra.mxu2 %v5504_v40  ;;  %v10807_v60 = vunpack.i.h.bf16 %v16112_v19  ;;  %v10806_v40 = vunpack.i.l.bf16 %v16112_v19  ;;  %v10822_v27 = vunpack.i.h.bf16 %v16127_v54  ;;  %v4925_v16 = vsel %vm635_vm3, %v4924_v33, %v20551_v47 }
 0x59a   : > { %v5515_v19 = vsel %vm1923_vm6, %v4925_v16, %v10797_v59  ;;  %v5448_v29 = vsel %vm1923_vm6, %v3469_v14, %v10796_v7  ;;  %v10671_v47 = vunpack.i.l.bf16 %v15912_v15  ;;  %v20553_v14 = vld [vmem:[#allocation24_spill] sm:$0xff] }
 0x59b   : > { %5591 = vmatpush.msra.mxu2 %v5503_v58  ;;  %v10821_v58 = vunpack.i.l.bf16 %v16127_v54  ;;  %v10816_v54 = vunpack.i.l.bf16 %v16090_v31  ;;  %v5457_v41 = vsel %vm1929_vm7, %v5448_v29, %v10806_v40  ;;  %v5524_v37 = vsel %vm1929_vm7, %v5515_v19, %v10807_v60 }
 0x59c   : > { %v10835_v10 = vpop.permute.xlu0 %10834  ;;  %v5533_v28 = vsel %vm1935_vm8, %v5524_v37, %v10822_v27  ;;  %v10841_v60 = vunpack.i.l.bf16 %v16108_v50  ;;  %v10851_v27 = vunpack.i.l.bf16 %v16117_v38  ;;  %v10667_v38 = vunpack.i.h.bf16 %v20553_v14 }
 0x59d   : > { %v16142_v56 = vpop.permute.xlu1 %10859  ;;  %v10837_v34 = vunpack.i.h.bf16 %v10835_v10  ;;  %v10836_v13 = vunpack.i.l.bf16 %v10835_v10  ;;  %v10831_v10 = vunpack.i.l.bf16 %v16103_v0  ;;  %v5466_v43 = vsel %vm1935_vm8, %v5457_v41, %v10821_v58 }
 0x59e   : > { %v10842_v0 = vunpack.i.h.bf16 %v16108_v50  ;;  %v5447_v16 = vsel %vm1923_vm6, %v3357_v26, %v10816_v54  ;;  %v5464_v50 = vsel %vm1935_vm8, %v5455_v17, %v10661_v18  ;;  %v5523_v19 = vsel %vm1929_vm7, %v5514_v12, %v10832_v24  ;;  %v20555_v54 = vld [vmem:[#allocation50_spill] sm:$0xff] }
 0x59f   : > { %v5542_v22 = vsel %vm1941_vm9, %v5533_v28, %v10837_v34  ;;  %v10666_v34 = vunpack.i.l.bf16 %v20553_v14  ;;  %v4588_v18 = vrot.slane %v20555_v54, 4  ;;  %v5540_v37 = vsel %vm1941_vm9, %v5531_v3, %v10667_v38 }
 0x5a0   : > { %v5532_v29 = vsel %vm1935_vm8, %v5523_v19, %v10842_v0  ;;  %v10862_v28 = vunpack.i.h.bf16 %v16142_v56 }
 0x5a1   : > { %v5541_v55 = vsel %vm1941_vm9, %v5532_v29, %v10852_v42  ;;  %v5473_v41 = vsel %vm1941_vm9, %v5464_v50, %v10666_v34 }
 0x5a2   : > { %v5482_v24 = vsel %vm1947_vm10, %v5473_v41, %v10671_v47  ;;  %v10877_v47 = vunpack.i.h.bf16 %v16135_v8 }
 0x5a4   : > { %v16146_v4 = vpop.permute.xlu2 %10884  ;;  %v10845_v5 = vpop.permute.xlu0 %10844 }
 0x5a5   : > { %v10847_v2 = vunpack.i.h.bf16 %v10845_v5  ;;  %v10846_v1 = vunpack.i.l.bf16 %v10845_v5  ;;  %v5475_v5 = vsel %vm1941_vm9, %v5466_v43, %v10836_v13  ;;  %v5456_v13 = vsel %vm1929_vm7, %v5447_v16, %v10831_v10 }
 0x5a6   : > { %v5465_v26 = vsel %vm1935_vm8, %v5456_v13, %v10841_v60  ;;  %v5549_v43 = vsel %vm1947_vm10, %v5540_v37, %v10672_v63  ;;  %v5491_v63 = vsel %vm1953_vm11, %v5482_v24, %v10676_v23  ;;  %v10876_v16 = vunpack.i.l.bf16 %v16135_v8 }
 0x5a7   : > { %v10870_v52 = vpop.permute.xlu1 %10869  ;;  %v5484_v7 = vsel %vm1947_vm10, %v5475_v5, %v10846_v1  ;;  %v5551_v25 = vsel %vm1947_vm10, %v5542_v22, %v10847_v2  ;;  %v20554_v2 = vld [vmem:[#allocation49_spill] sm:$0xff]  ;;  %v5474_v61 = vsel %vm1941_vm9, %v5465_v26, %v10851_v27  ;;  %v20558_v27 = vld [vmem:[#allocation23_spill] sm:$0xff] }
 0x5a8   : > { %v10872_v31 = vunpack.i.h.bf16 %v10870_v52  ;;  %v10871_v35 = vunpack.i.l.bf16 %v10870_v52  ;;  %v3132_v1 = vrot.slane %v20554_v2, 4 }
 0x5ac   : > { %v16186_v48 = vpop.permute.xlu2 %10894 }
 0x5ad   : > { %v10855_v36 = vpop.permute.xlu0 %10854 }
 0x5ae   : > { %v10857_v46 = vunpack.i.h.bf16 %v10855_v36  ;;  %v10856_v33 = vunpack.i.l.bf16 %v10855_v36  ;;  %v10861_v36 = vunpack.i.l.bf16 %v16142_v56  ;;  %v5558_v56 = vsel %vm1953_vm11, %v5549_v43, %v10677_v45 }
 0x5af   : > { %v10880_v59 = vpop.permute.xlu1 %10879 }
 0x5b0   : > { %v5493_v40 = vsel %vm1953_vm11, %v5484_v7, %v10856_v33  ;;  %v5560_v20 = vsel %vm1953_vm11, %v5551_v25, %v10857_v46  ;;  %v10882_v5 = vunpack.i.h.bf16 %v10880_v59  ;;  %v10881_v22 = vunpack.i.l.bf16 %v10880_v59  ;;  %v20556_v59 = vld [vmem:[#allocation30_spill] sm:$0xff] }
 0x5b1   : > { %v5502_v58 = vsel %vm1959_vm13, %v5493_v40, %v10871_v35  ;;  %v5569_v52 = vsel %vm1959_vm13, %v5560_v20, %v10872_v31  ;;  %v10897_v33 = vunpack.i.h.bf16 %v16186_v48  ;;  %v10896_v31 = vunpack.i.l.bf16 %v16186_v48  ;;  %v20557_v20 = vld [vmem:[#allocation34_spill] sm:$0xff] }
 0x5b2   : > { %5592 = vmatpush.msra.mxu2 %v5502_v58  ;;  %5608 = vmatpush.msrb.mxu3 %v5569_v52  ;;  %v10682_v0 = vunpack.i.h.bf16 %v20556_v59  ;;  %v10681_v48 = vunpack.i.l.bf16 %v20556_v59  ;;  %v3133_v42 = vsel %vm635_vm3, %v3132_v1, %v20557_v20  ;;  %v4589_v58 = vsel %vm635_vm3, %v4588_v18, %v20558_v27  ;;  %v20563_v59 = vld [vmem:[#allocation64_spill] sm:$0xff] }
 0x5b3   : > { %v5512_v9 = vsel %vm1923_vm6, %v4589_v58, %v10862_v28  ;;  %v5445_v45 = vsel %vm1923_vm6, %v3133_v42, %v10861_v36  ;;  %v20565_v42 = vld [vmem:[#allocation22_spill] sm:$0xff]  ;;  %v20566_v58 = vld [vmem:[#allocation88_spill] sm:$0xff] }
 0x5b4   : > { %v5500_v23 = vsel %vm1959_vm13, %v5491_v63, %v10681_v48  ;;  %v5567_v52 = vsel %vm1959_vm13, %v5558_v56, %v10682_v0  ;;  %v5454_v13 = vsel %vm1929_vm7, %v5445_v45, %v10876_v16  ;;  %v5521_v19 = vsel %vm1929_vm7, %v5512_v9, %v10877_v47  ;;  %v20567_v16 = vld [vmem:[#allocation56_spill] sm:$0xff] }
 0x5b5   : > { %v10712_v0 = vunpack.i.h.bf16 %v20563_v59  ;;  %v10692_v9 = vunpack.i.h.bf16 %v20566_v58  ;;  %v4476_v47 = vrot.slane %v15878_v21, 4 }
 0x5b6   : > { %v10925_v49 = vpop.permute.xlu2 %10924 }
 0x5b7   : > { %v10865_v17 = vpop.permute.xlu0 %10864  ;;  %v10927_v8 = vunpack.i.h.bf16 %v10925_v49 }
 0x5b8   : > { %v10867_v10 = vunpack.i.h.bf16 %v10865_v17  ;;  %v10866_v12 = vunpack.i.l.bf16 %v10865_v17 }
 0x5ba   : > { %v10905_v46 = vpop.permute.xlu1 %10904  ;;  %v5483_v35 = vsel %vm1947_vm10, %v5474_v61, %v10866_v12  ;;  %v5550_v7 = vsel %vm1947_vm10, %v5541_v55, %v10867_v10  ;;  %v10926_v61 = vunpack.i.l.bf16 %v10925_v49  ;;  %v5571_v49 = vld [vmem:[%s19785_s4] sm:$0xff] }
 0x5bb   : > { %v5492_v25 = vsel %vm1953_vm11, %v5483_v35, %v10881_v22  ;;  %v5559_v15 = vsel %vm1953_vm11, %v5550_v7, %v10882_v5  ;;  %v10907_v38 = vunpack.i.h.bf16 %v10905_v46  ;;  %v10906_v34 = vunpack.i.l.bf16 %v10905_v46  ;;  %v20559_v22 = vld [vmem:[#allocation95_spill] sm:$0xff]  ;;  %5574 = vperm.xlu2 %10963, %v5571_v49   ;;  %v20561_v7 = vld [vmem:[#allocation102_spill] sm:$0xff] }
 0x5bc   : > { %v5501_v60 = vsel %vm1959_vm13, %v5492_v25, %v10896_v31  ;;  %v5568_v40 = vsel %vm1959_vm13, %v5559_v15, %v10897_v33  ;;  %v4252_v46 = vrot.slane %v20559_v22, 4  ;;  %v20560_v33 = vld [vmem:[#allocation20_spill] sm:$0xff]  ;;  %v10687_v25 = vunpack.i.h.bf16 %v20561_v7 }
 0x5bd   : > { %5593 = vmatpush.msra.mxu2 %v5501_v60  ;;  %5609 = vmatpush.msrb.mxu3 %v5568_v40  ;;  %v4364_v31 = vrot.slane %v20560_v33, 4  ;;  %v20562_v15 = vld [vmem:[#allocation72_spill] sm:$0xff]  ;;  %v10686_v48 = vunpack.i.l.bf16 %v20561_v7  ;;  %v10711_v60 = vunpack.i.l.bf16 %v20563_v59  ;;  %v20564_v40 = vld [vmem:[#allocation94_spill] sm:$0xff]  ;;  %v10716_v22 = vunpack.i.l.bf16 %v16003_v44 }
 0x5be   : > { %v10935_v26 = vpop.permute.xlu2 %10934  ;;  %v10702_v63 = vunpack.i.h.bf16 %v20562_v15  ;;  %v10701_v56 = vunpack.i.l.bf16 %v20562_v15  ;;  %v4253_v20 = vsel %vm635_vm3, %v4252_v46, %v20564_v40  ;;  %v10722_v15 = vunpack.i.h.bf16 %v16009_v6 }
 0x5bf   : > { %v10890_v50 = vpop.permute.xlu0 %10889  ;;  %5594 = vmatpush.msra.mxu2 %v5500_v23  ;;  %5610 = vmatpush.msrb.mxu3 %v5567_v52  ;;  %v10937_v41 = vunpack.i.h.bf16 %v10935_v26  ;;  %v10936_v37 = vunpack.i.l.bf16 %v10935_v26  ;;  %v4365_v27 = vsel %vm635_vm3, %v4364_v31, %v20565_v42  ;;  %v5509_v45 = vsel %vm1923_vm6, %v4253_v20, %v10687_v25 }
 0x5c0   : > { %v10892_v3 = vunpack.i.h.bf16 %v10890_v50  ;;  %v10891_v14 = vunpack.i.l.bf16 %v10890_v50  ;;  %v10726_v23 = vunpack.i.l.bf16 %v15925_v51  ;;  %v10691_v52 = vunpack.i.l.bf16 %v20566_v58 }
 0x5c1   : > { %v4028_v50 = vrot.slane %v20567_v16, 4  ;;  %v10696_v26 = vunpack.i.l.bf16 %v15961_v39 }
 0x5c2   : > { %v10915_v29 = vpop.permute.xlu1 %10914  ;;  %v5463_v2 = vsel %vm1935_vm8, %v5454_v13, %v10891_v14  ;;  %v5530_v1 = vsel %vm1935_vm8, %v5521_v19, %v10892_v3  ;;  %v20568_v3 = vld [vmem:[#allocation100_spill] sm:$0xff]  ;;  %v5510_v19 = vsel %vm1923_vm6, %v4365_v27, %v10686_v48  ;;  %v10721_v27 = vunpack.i.l.bf16 %v16009_v6 }
 0x5c3   : > { %v10917_v54 = vunpack.i.h.bf16 %v10915_v29  ;;  %v10916_v18 = vunpack.i.l.bf16 %v10915_v29  ;;  %v5472_v55 = vsel %vm1941_vm9, %v5463_v2, %v10906_v34  ;;  %v5539_v17 = vsel %vm1941_vm9, %v5530_v1, %v10907_v38 }
 0x5c4   : > { %v4140_v14 = vrot.slane %v20568_v3, 4  ;;  %v10887_v38 = vunpack.i.h.bf16 %v16146_v4  ;;  %v10886_v34 = vunpack.i.l.bf16 %v16146_v4  ;;  %v5518_v1 = vsel %vm1929_vm7, %v5509_v45, %v10692_v9 }
 0x5c5   : > { %v5481_v10 = vsel %vm1947_vm10, %v5472_v55, %v10916_v18  ;;  %v5548_v12 = vsel %vm1947_vm10, %v5539_v17, %v10917_v54  ;;  %v10707_v54 = vunpack.i.h.bf16 %v15967_v57  ;;  %v10706_v55 = vunpack.i.l.bf16 %v15967_v57  ;;  %v20569_v17 = vld [vmem:[#allocation55_spill] sm:$0xff] }
 0x5c6   : > { %v5490_v24 = vsel %vm1953_vm11, %v5481_v10, %v10926_v61  ;;  %v5557_v43 = vsel %vm1953_vm11, %v5548_v12, %v10927_v8  ;;  %v5519_v61 = vsel %vm1929_vm7, %v5510_v19, %v10691_v52  ;;  %v10697_v4 = vunpack.i.h.bf16 %v15961_v39  ;;  %v20571_v12 = vld [vmem:[#allocation99_spill] sm:$0xff] }
 0x5c7   : > { %v5499_v28 = vsel %vm1959_vm13, %v5490_v24, %v10936_v37  ;;  %v5566_v36 = vsel %vm1959_vm13, %v5557_v43, %v10937_v41  ;;  %v10900_v5 = vpop.permute.xlu0 %10899  ;;  %v4477_v41 = vsel %vm635_vm3, %v4476_v47, %v20569_v17  ;;  %v20570_v37 = vld [vmem:[#allocation54_spill] sm:$0xff]  ;;  %v4141_v24 = vsel %vm635_vm3, %v4140_v14, %v20571_v12 }
 0x5c8   : > { %5595 = vmatpush.msra.mxu2 %v5499_v28  ;;  %5611 = vmatpush.msrb.mxu3 %v5566_v36  ;;  %v10902_v29 = vunpack.i.h.bf16 %v10900_v5  ;;  %v10901_v2 = vunpack.i.l.bf16 %v10900_v5  ;;  %v4029_v10 = vsel %vm635_vm3, %v4028_v50, %v20570_v37  ;;  %v5511_v43 = vsel %vm1923_vm6, %v4477_v41, %v10887_v38 }
 0x5c9   : > { %v5444_v28 = vsel %vm1923_vm6, %v16070_v62, %v10886_v34  ;;  %v5528_v36 = vsel %vm1935_vm8, %v5519_v61, %v10696_v26  ;;  %v10717_v57 = vunpack.i.h.bf16 %v16003_v44  ;;  %v5507_v49 = vsel %vm1923_vm6, %v4029_v10, %v10707_v54 }
 0x5ca   : > { %v10920_v35 = vpop.permute.xlu1 %10919  ;;  %v5453_v39 = vsel %vm1929_vm7, %v5444_v28, %v10901_v2  ;;  %v5520_v5 = vsel %vm1929_vm7, %v5511_v43, %v10902_v29  ;;  %v5508_v31 = vsel %vm1923_vm6, %v4141_v24, %v10706_v55  ;;  %v5527_v62 = vsel %vm1935_vm8, %v5518_v1, %v10697_v4 }
 0x5cb   : > { %v10922_v7 = vunpack.i.h.bf16 %v10920_v35  ;;  %v10921_v25 = vunpack.i.l.bf16 %v10920_v35  ;;  %v5537_v42 = vsel %vm1941_vm9, %v5528_v36, %v10701_v56  ;;  %v5516_v44 = vsel %vm1929_vm7, %v5507_v49, %v10717_v57  ;;  %v10940_v56 = vpop.permute.xlu2 %10939 }
 0x5cc   : > { %v5517_v45 = vsel %vm1929_vm7, %v5508_v31, %v10716_v22  ;;  %v10737_v52 = vunpack.i.h.bf16 %v16049_v11  ;;  %v10736_v35 = vunpack.i.l.bf16 %v16049_v11  ;;  %v5536_v16 = vsel %vm1941_vm9, %v5527_v62, %v10702_v63  ;;  %v5570_v63 = vld [vmem:[%s19784_s3] sm:$0xff] }
 0x5cd   : > { %v10731_v50 = vunpack.i.l.bf16 %v16042_v30  ;;  %v5546_v14 = vsel %vm1947_vm10, %v5537_v42, %v10711_v60  ;;  %v5545_v29 = vsel %vm1947_vm10, %v5536_v16, %v10712_v0  ;;  %v10732_v60 = vunpack.i.h.bf16 %v16042_v30 }
 0x5ce   : > { %v10941_v2 = vunpack.i.l.bf16 %v10940_v56  ;;  %v5554_v0 = vsel %vm1953_vm11, %v5545_v29, %v10722_v15  ;;  %v5526_v30 = vsel %vm1935_vm8, %v5517_v45, %v10726_v23 }
 0x5cf   : > { %v10910_v13 = vpop.permute.xlu0 %10909  ;;  %v5535_v17 = vsel %vm1941_vm9, %v5526_v30, %v10736_v35  ;;  %v5563_v10 = vsel %vm1959_vm13, %v5554_v0, %v10732_v60 }
 0x5d0   : > { %v10912_v21 = vunpack.i.h.bf16 %v10910_v13  ;;  %v10911_v18 = vunpack.i.l.bf16 %v10910_v13  ;;  %v5544_v12 = vsel %vm1947_vm10, %v5535_v17, %v10941_v2 }
 0x5d2   : > { %v10930_v8 = vpop.permute.xlu1 %10929  ;;  %v5462_v46 = vsel %vm1935_vm8, %v5453_v39, %v10911_v18  ;;  %v5529_v33 = vsel %vm1935_vm8, %v5520_v5, %v10912_v21  ;;  %v10727_v21 = vunpack.i.h.bf16 %v15925_v51  ;;  %v10942_v18 = vunpack.i.h.bf16 %v10940_v56 }
 0x5d3   : > { %v10932_v48 = vunpack.i.h.bf16 %v10930_v8  ;;  %v10931_v40 = vunpack.i.l.bf16 %v10930_v8  ;;  %v5471_v58 = vsel %vm1941_vm9, %v5462_v46, %v10921_v25  ;;  %v5538_v9 = vsel %vm1941_vm9, %v5529_v33, %v10922_v7 }
 0x5d4   : > { %v5555_v8 = vsel %vm1953_vm11, %v5546_v14, %v10721_v27  ;;  %v5525_v41 = vsel %vm1935_vm8, %v5516_v44, %v10727_v21 }
 0x5d5   : > { %v5480_v13 = vsel %vm1947_vm10, %v5471_v58, %v10931_v40  ;;  %v5547_v19 = vsel %vm1947_vm10, %v5538_v9, %v10932_v48  ;;  %v5564_v59 = vsel %vm1959_vm13, %v5555_v8, %v10731_v50  ;;  %v5534_v24 = vsel %vm1941_vm9, %v5525_v41, %v10737_v52 }
 0x5d6   : > { %v5543_v23 = vsel %vm1947_vm10, %v5534_v24, %v10942_v18 }
 0x5d7   : > { %v10950_v20 = vpop.permute.xlu0 %10949 }
 0x5d8   : > { %v10952_v38 = vunpack.i.h.bf16 %v10950_v20  ;;  %v10951_v34 = vunpack.i.l.bf16 %v10950_v20 }
 0x5da   : > { %v10945_v47 = vpop.permute.xlu1 %10944 }
 0x5db   : > { %v10947_v3 = vunpack.i.h.bf16 %v10945_v47  ;;  %v10946_v6 = vunpack.i.l.bf16 %v10945_v47 }
 0x5dd   : > { %v5489_v26 = vsel %vm1953_vm11, %v5480_v13, %v10946_v6  ;;  %v5556_v11 = vsel %vm1953_vm11, %v5547_v19, %v10947_v3 }
 0x5de   : > { %v5498_v1 = vsel %vm1959_vm13, %v5489_v26, %v10951_v34  ;;  %v5565_v54 = vsel %vm1959_vm13, %v5556_v11, %v10952_v38 }
 0x5df   : > { %5596 = vmatpush.msra.mxu2 %v5498_v1  ;;  %5612 = vmatpush.msrb.mxu3 %v5565_v54  ;;  %v10955_v61 = vpop.permute.xlu0 %10954 }
 0x5e0   : > { %9944 = vmatmul.msk.f32.vlgmr.msra.gmra.mxu2 %vm5577_vm4, %v5570_v63  ;;  %v10957_v55 = vunpack.i.h.bf16 %v10955_v61  ;;  %v10956_v4 = vunpack.i.l.bf16 %v10955_v61 }
 0x5e1   : > { %5613 = vmatpush.msrb.mxu3 %v5564_v59 }
 0x5e2   : > { %v10960_v37 = vpop.permute.xlu1 %10959  ;;  %v5553_v51 = vsel %vm1953_vm11, %v5544_v12, %v10956_v4  ;;  %v5552_v36 = vsel %vm1953_vm11, %v5543_v23, %v10957_v55  ;;  %vm6289_vm11 = vcmask 1041408  }
 0x5e3   : > { %v10962_v43 = vunpack.i.h.bf16 %v10960_v37  ;;  %v10961_v28 = vunpack.i.l.bf16 %v10960_v37  ;;  %5614 = vmatpush.msrb.mxu3 %v5563_v10 }
 0x5e5   : > { %v5562_v57 = vsel %vm1959_vm13, %v5553_v51, %v10961_v28  ;;  %v5561_v39 = vsel %vm1959_vm13, %v5552_v36, %v10962_v43 }
 0x5e6   : > { %5615 = vmatpush.msrb.mxu3 %v5562_v57 }
 0x5e8   : > { %5616 = vmatpush.msrb.mxu3 %v5561_v39 }
 0x5e9   : > { %9945 = vmatmul.msk.f32.vlgmr.msrb.gmra.mxu3 %vm5577_vm4, %v5570_v63 }
 0x615   : > { %v5575_v5 = vpop.permute.xlu2 %5574 }
 0x663   : > { %v5598_v49 = vpop.f32.mrf.mxu2 }
 0x664   : > { %v5599_v22 = vadd.f32 %v5598_v49, %v5575_v5 }
 0x666   : > { %vm5621_vm5 = vcmp.ge.f32.partialorder %v5599_v22, 0.0  ;;  %v5623_v46 = vmul.f32 0.2, %v5599_v22 }
 0x668   : > { %v16366_v33 = vsel %vm5621_vm5, %v5599_v22, %v5623_v46 }
 0x669   : > { %5642 = vrot.lane.b32.xlu2 %v16366_v33, %s11578_s17  ;;  %5636 = vrot.lane.b32.xlu1 %v16366_v33, %s11581_s18  ;;  %v5675_v37 = vrot.slane %v16366_v33, 4 }
 0x66a   : > { %5648 = vrot.lane.b32.xlu0 %v16366_v33, %s11576_s15 }
 0x66c   : > { %v5618_v31 = vpop.f32.mrf.mxu3 }
 0x66d   : > { %v5619_v62 = vadd.f32 %v5618_v31, %v5575_v5 }
 0x66f   : > { %v5624_v7 = vmul.f32 0.2, %v5619_v62  ;;  %vm5622_vm10 = vcmp.ge.f32.partialorder %v5619_v62, 0.0 }
 0x671   : > { %5633 = vrot.lane.b32.xlu2 %v16366_v33, %s11580_s11  ;;  %5630 = vrot.lane.b32.xlu1 %v16366_v33, %s11582_s20  ;;  %v16380_v25 = vsel %vm5622_vm10, %v5619_v62, %v5624_v7  ;;  %vm9641_vm10 = vcmask 64512  }
 0x672   : > { %5645 = vrot.lane.b32.xlu0 %v16366_v33, %s11577_s22 }
 0x679   : > { %5658 = vrot.lane.b32.xlu2 %v16380_v25, %s11581_s18  ;;  %5670 = vrot.lane.b32.xlu1 %v16380_v25, %s11576_s15  ;;  %s11588_s18 = smov 40  }
 0x67a   : > { %5639 = vrot.lane.b32.xlu0 %v16366_v33, %s11579_s19 }
 0x681   : > { %5652 = vrot.lane.b32.xlu2 %v16380_v25, %s11582_s20  ;;  %5667 = vrot.lane.b32.xlu1 %v16380_v25, %s11577_s22  ;;  %s11589_s20 = smov 8  }
 0x682   : > { %5664 = vrot.lane.b32.xlu0 %v16380_v25, %s11578_s17 }
 0x689   : > { %5661 = vrot.lane.b32.xlu1 %v16380_v25, %s11579_s19  ;;  %s9938_s19 = sshll.u32 %s11727_s9, 4 }
 0x68a   : > { %5655 = vrot.lane.b32.xlu0 %v16380_v25, %s11580_s11  ;;  %s16519_s11 = scalar_lea.vmem [#allocation9], %s9938_s19  ;;  %s11484_s19 = scalar_lea.hbm %s19787_s6, 32 }
 0x68b   : > { %5627 = vst [vmem:[%s16519_s11] sm:$0xff] %v16366_v33  ;;  %s9798_s29 = sshll.u32 %s16519_s11, 4  ;;  %s9799_s29 = int_to_ptr.vmem [resolvable:$true] %s9798_s29 }
 0x68c   : > { %5628 = vst [vmem:[%s16519_s11 + $0x8] sm:$0xff] %v16380_v25 }
 0x6c3   : > { %v5643_v15 = vpop.permute.xlu2 %5642 }
 0x6c4   : > { %v5711_v30 = vrot.slane %v5643_v15, 4 }
 0x6cb   : > { %v5634_v20 = vpop.permute.xlu2 %5633 }
 0x6cc   : > { %v5673_v42 = vrot.slane %v5634_v20, 4  ;;  %v5676_v51 = vsel %vm635_vm3, %v5634_v20, %v5675_v37 }
 0x6ce   : > { %v5674_v52 = vsel %vm635_vm3, %v5673_v42, %v16366_v33 }
 0x6cf   : > { %v16407_v50 = vperm.slane %v5674_v52, %v11869_v32 }
 0x6d1   : > { %v5723_v23 = vrot.slane %v16407_v50, 4 }
 0x6d3   : > { %v16409_v56 = vpop.permute.xlu2 %5658 }
 0x6d4   : > { %v5797_v61 = vrot.slane %v16409_v56, 4 }
 0x6db   : > { %v5637_v48 = vpop.permute.xlu1 %5636  ;;  %v5653_v21 = vpop.permute.xlu2 %5652 }
 0x6dc   : > { %v5649_v40 = vpop.permute.xlu0 %5648  ;;  %v5685_v27 = vrot.slane %v5637_v48, 4  ;;  %v5798_v55 = vsel %vm635_vm3, %v5797_v61, %v5653_v21  ;;  %v5799_v31 = vrot.slane %v5653_v21, 4 }
 0x6dd   : > { %v5709_v44 = vrot.slane %v5649_v40, 4  ;;  %v5712_v17 = vsel %vm635_vm3, %v5649_v40, %v5711_v30  ;;  %v5804_v10 = vperm.slane %v5798_v55, %v11869_v32  ;;  %v5684_v30 = vperm.slane %v5676_v51, %v11869_v32 }
 0x6de   : > { %v16434_v36 = vperm.slane %v5712_v17, %v11869_v32 }
 0x6df   : > { %v5710_v47 = vsel %vm635_vm3, %v5709_v44, %v5643_v15  ;;  %v5833_v62 = vrot.slane %v5804_v10, 4 }
 0x6e0   : > { %v5716_v3 = vperm.slane %v5710_v47, %v11869_v32  ;;  %v5757_v44 = vrot.slane %v16434_v36, 4 }
 0x6e2   : > { %v5745_v26 = vrot.slane %v5716_v3, 4 }
 0x6e3   : > { %v5631_v58 = vpop.permute.xlu1 %5630 }
 0x6e4   : > { %v5686_v9 = vsel %vm635_vm3, %v5685_v27, %v5631_v58  ;;  %v5646_v45 = vpop.permute.xlu0 %5645  ;;  %v5687_v12 = vrot.slane %v5631_v58, 4 }
 0x6e5   : > { %v16402_v35 = vperm.slane %v5686_v9, %v11869_v32  ;;  %v5697_v14 = vrot.slane %v5646_v45, 4  ;;  %v5787_v9 = vrot.slane %v16380_v25, 4 }
 0x6e6   : > { %v5688_v7 = vsel %vm635_vm3, %v5637_v48, %v5687_v12 }
 0x6e7   : > { %v5721_v16 = vrot.slane %v16402_v35, 4  ;;  %v5696_v48 = vperm.slane %v5688_v7, %v11869_v32  ;;  %v5735_v7 = vrot.slane %v5684_v30, 4 }
 0x6e9   : > { %v5722_v6 = vsel %vm635_vm3, %v5721_v16, %v16407_v50 }
 0x6ea   : > { %v5728_v19 = vperm.slane %v5722_v6, %v12109_v53 }
 0x6eb   : > { %v5671_v38 = vpop.permute.xlu1 %5670 }
 0x6ec   : > { %v5640_v34 = vpop.permute.xlu0 %5639  ;;  %v5771_v60 = vrot.slane %v5728_v19, 4  ;;  %v5821_v18 = vrot.slane %v5671_v38, 4 }
 0x6ed   : > { %v5698_v13 = vsel %vm635_vm3, %v5697_v14, %v5640_v34  ;;  %v5699_v4 = vrot.slane %v5640_v34, 4 }
 0x6ee   : > { %v5704_v11 = vperm.slane %v5698_v13, %v11869_v32  ;;  %v5800_v13 = vsel %vm635_vm3, %v16409_v56, %v5799_v31 }
 0x6ef   : > { %v5700_v43 = vsel %vm635_vm3, %v5646_v45, %v5699_v4 }
 0x6f0   : > { %v5746_v63 = vsel %vm635_vm3, %v5745_v26, %v5704_v11  ;;  %v5747_v5 = vrot.slane %v5704_v11, 4  ;;  %v16440_v15 = vperm.slane %v5700_v43, %v11869_v32 }
 0x6f1   : > { %v5752_v29 = vperm.slane %v5746_v63, %v12109_v53 }
 0x6f2   : > { %v5748_v52 = vsel %vm635_vm3, %v5716_v3, %v5747_v5  ;;  %v5758_v11 = vsel %vm635_vm3, %v5757_v44, %v16440_v15 }
 0x6f3   : > { %v5668_v2 = vpop.permute.xlu1 %5667  ;;  %v5772_v1 = vsel %vm635_vm3, %v5752_v29, %v5771_v60  ;;  %v5769_v54 = vrot.slane %v5752_v29, 4  ;;  %v5756_v60 = vperm.slane %v5748_v52, %v12109_v53 }
 0x6f4   : > { %5917 = vrot.lane.b32.xlu1 %v5772_v1, %s11571_s5  ;;  %v5665_v8 = vpop.permute.xlu0 %5664  ;;  %v5809_v24 = vrot.slane %v5668_v2, 4 }
 0x6f5   : > { %v5770_v59 = vsel %vm635_vm3, %v5769_v54, %v5728_v19  ;;  %v5822_v0 = vsel %vm635_vm3, %v5821_v18, %v5665_v8  ;;  %v5823_v40 = vrot.slane %v5665_v8, 4  ;;  %v5724_v18 = vsel %vm635_vm3, %v16402_v35, %v5723_v23 }
 0x6f6   : > { %5913 = vrot.lane.b32.xlu2 %v5770_v59, %s11571_s5  ;;  %v5828_v41 = vperm.slane %v5822_v0, %v11869_v32  ;;  %v5733_v8 = vrot.slane %v5696_v48, 4  ;;  %v5732_v35 = vperm.slane %v5724_v18, %v12109_v53  ;;  %v5773_v17 = vrot.slane %v5756_v60, 4 }
 0x6f7   : > { %v5824_v19 = vsel %vm635_vm3, %v5671_v38, %v5823_v40  ;;  %v5808_v38 = vperm.slane %v5800_v13, %v11869_v32 }
 0x6f8   : > { %v5857_v49 = vrot.slane %v5828_v41, 4  ;;  %v5832_v61 = vperm.slane %v5824_v19, %v11869_v32  ;;  %v5775_v51 = vrot.slane %v5732_v35, 4 }
 0x6fa   : > { %v5869_v37 = vrot.slane %v5832_v61, 4 }
 0x6fb   : > { %v5662_v28 = vpop.permute.xlu1 %5661 }
 0x6fc   : > { %v5810_v57 = vsel %vm635_vm3, %v5809_v24, %v5662_v28  ;;  %v5656_v39 = vpop.permute.xlu0 %5655  ;;  %v5811_v47 = vrot.slane %v5662_v28, 4  ;;  %v5774_v28 = vsel %vm635_vm3, %v5773_v17, %v5732_v35 }
 0x6fd   : > { %v5816_v22 = vperm.slane %v5810_v57, %v11869_v32  ;;  %v5785_v46 = vrot.slane %v5656_v39, 4  ;;  %v5788_v3 = vsel %vm635_vm3, %v5656_v39, %v5787_v9  ;;  %v5776_v57 = vsel %vm635_vm3, %v5756_v60, %v5775_v51 }
 0x6fe   : > { %v5812_v1 = vsel %vm635_vm3, %v5668_v2, %v5811_v47  ;;  %v5764_v2 = vperm.slane %v5758_v11, %v12109_v53  ;;  %v5796_v4 = vperm.slane %v5788_v3, %v11869_v32 }
 0x6ff   : > { %v5858_v20 = vsel %vm635_vm3, %v5857_v49, %v5816_v22  ;;  %v5859_v42 = vrot.slane %v5816_v22, 4  ;;  %v5786_v27 = vsel %vm635_vm3, %v5785_v46, %v16380_v25  ;;  %v5820_v55 = vperm.slane %v5812_v1, %v11869_v32 }
 0x700   : > { %v5864_v58 = vperm.slane %v5858_v20, %v12109_v53  ;;  %v5792_v45 = vperm.slane %v5786_v27, %v11869_v32  ;;  %v5777_v12 = vrot.slane %v5764_v2, 4  ;;  %v5759_v22 = vrot.slane %v16440_v15, 4 }
 0x701   : > { %v5860_v16 = vsel %vm635_vm3, %v5828_v41, %v5859_v42  ;;  %v5845_v41 = vrot.slane %v5808_v38, 4  ;;  %v5870_v43 = vsel %vm635_vm3, %v5869_v37, %v5820_v55  ;;  %v5871_v42 = vrot.slane %v5820_v55, 4 }
 0x702   : > { %v5835_v50 = vrot.slane %v5792_v45, 4  ;;  %v5834_v6 = vsel %vm635_vm3, %v5833_v62, %v5792_v45  ;;  %v5881_v14 = vrot.slane %v5864_v58, 4  ;;  %v5868_v34 = vperm.slane %v5860_v16, %v12109_v53 }
 0x703   : > { %v5840_v26 = vperm.slane %v5834_v6, %v12109_v53  ;;  %v5846_v24 = vsel %vm635_vm3, %v5845_v41, %v5796_v4  ;;  %v5876_v49 = vperm.slane %v5870_v43, %v12109_v53  ;;  %v5760_v40 = vsel %vm635_vm3, %v16434_v36, %v5759_v22 }
 0x704   : > { %v5836_v63 = vsel %vm635_vm3, %v5804_v10, %v5835_v50  ;;  %v5885_v29 = vrot.slane %v5868_v34, 4  ;;  %v5734_v10 = vsel %vm635_vm3, %v5733_v8, %v5684_v30  ;;  %v5852_v5 = vperm.slane %v5846_v24, %v12109_v53 }
 0x705   : > { %v5882_v54 = vsel %vm635_vm3, %v5881_v14, %v5840_v26  ;;  %v5844_v56 = vperm.slane %v5836_v63, %v12109_v53  ;;  %v5883_v21 = vrot.slane %v5840_v26, 4  ;;  %v5740_v23 = vperm.slane %v5734_v10, %v12109_v53 }
 0x706   : > { %5915 = vrot.lane.b32.xlu0 %v5882_v54, %s11571_s5  ;;  %v5889_v31 = vrot.slane %v5876_v49, 4  ;;  %v5891_v62 = vrot.slane %v5852_v5, 4  ;;  %v5736_v27 = vsel %vm635_vm3, %v5696_v48, %v5735_v7  ;;  %v5847_v9 = vrot.slane %v5796_v4, 4 }
 0x707   : > { %v5886_v59 = vsel %vm635_vm3, %v5885_v29, %v5844_v56  ;;  %v5884_v0 = vsel %vm635_vm3, %v5864_v58, %v5883_v21  ;;  %v5778_v39 = vsel %vm635_vm3, %v5777_v12, %v5740_v23  ;;  %v5887_v46 = vrot.slane %v5844_v56, 4 }
 0x708   : > { %5923 = vrot.lane.b32.xlu1 %v5886_v59, %s11571_s5  ;;  %5919 = vrot.lane.b32.xlu2 %v5884_v0, %s11571_s5  ;;  %v5890_v15 = vsel %vm635_vm3, %v5889_v31, %v5852_v5  ;;  %v5892_v44 = vsel %vm635_vm3, %v5876_v49, %v5891_v62  ;;  %v5768_v58 = vperm.slane %v5760_v40, %v12109_v53  ;;  %v5779_v52 = vrot.slane %v5740_v23, 4 }
 0x709   : > { %v5888_v20 = vsel %vm635_vm3, %v5868_v34, %v5887_v46  ;;  %v5744_v36 = vperm.slane %v5736_v27, %v12109_v53  ;;  %v5872_v45 = vsel %vm635_vm3, %v5832_v61, %v5871_v42  ;;  %v5848_v48 = vsel %vm635_vm3, %v5808_v38, %v5847_v9 }
 0x70a   : > { %v5781_v47 = vrot.slane %v5768_v58, 4  ;;  %v5780_v16 = vsel %vm635_vm3, %v5764_v2, %v5779_v52  ;;  %v5880_v6 = vperm.slane %v5872_v45, %v12109_v53  ;;  %v5856_v13 = vperm.slane %v5848_v48, %v12109_v53 }
 0x70b   : > { %v5783_v50 = vrot.slane %v5744_v36, 4  ;;  %v6065_v63 = vlaneseq  ;;  %v19973_v21 = vmov 0.0   ;;  %v19969_v25 = vmov 1.0  }
 0x70c   : > { %v5782_v14 = vsel %vm635_vm3, %v5781_v47, %v5744_v36  ;;  %v5893_v19 = vrot.slane %v5880_v6, 4  ;;  %v5895_v26 = vrot.slane %v5856_v13, 4 }
 0x70d   : > { %v5784_v34 = vsel %vm635_vm3, %v5768_v58, %v5783_v50  ;;  %v16525_v29 = vshrl.u32 %v6065_v63, 7  ;;  %v6070_v60 = vand.u32 127, %v6065_v63 }
 0x70e   : > { %5921 = vrot.lane.b32.xlu0 %v5774_v28, %s11571_s5  ;;  %v5894_v11 = vsel %vm635_vm3, %v5893_v19, %v5856_v13  ;;  %v5896_v3 = vsel %vm635_vm3, %v5880_v6, %v5895_v26 }
 0x70f   : > { %v16528_v1 = vadd.s32 16, %v16525_v29  ;;  %v16530_v54 = vmul.u32 2, %v6070_v60  ;;  %v16533_v56 = vadd.s32 8, %v16525_v29 }
 0x710   : > { %5925 = vrot.lane.b32.xlu2 %v5776_v57, %s11571_s5  ;;  %5929 = vrot.lane.b32.xlu1 %v5778_v39, %s11571_s5 }
 0x711   : > { %vm6074_vm13 = vcmp.eq.s32.totalorder %v16528_v1, %v16530_v54  ;;  %vm6073_vm14 = vcmp.eq.s32.totalorder %v16533_v56, %v16530_v54  ;;  %vm6072_vm15 = vcmp.eq.s32.totalorder %v16525_v29, %v16530_v54 }
 0x712   : > { %v9948_v33 = vsel %vm6074_vm13, 1.0, %v19973_v21  ;;  %vm9707_vm13 = vcmask 326656  }
 0x713   : > { %9952 = vmatpush.msk.msra.mxu0 %vm6289_vm11, %v9948_v33  ;;  %10003 = vmatpush.msk.msra.mxu3 %vm6289_vm11, %v9948_v33 }
 0x715   : > { %9953 = vmatpush.msk.msra.mxu0 %vm6073_vm14, %v19969_v25  ;;  %10004 = vmatpush.msk.msra.mxu3 %vm6073_vm14, %v19969_v25  ;;  %vm9740_vm14 = vcmask 457728  }
 0x716   : > { %5927 = vrot.lane.b32.xlu0 %v5888_v20, %s11571_s5 }
 0x717   : > { %9954 = vmatpush.msk.msra.mxu0 %vm6072_vm15, %v19969_v25  ;;  %10005 = vmatpush.msk.msra.mxu3 %vm6072_vm15, %v19969_v25 }
 0x718   : > { %5931 = vrot.lane.b32.xlu2 %v5890_v15, %s11571_s5  ;;  %5935 = vrot.lane.b32.xlu1 %v5892_v44, %s11571_s5 }
 0x71e   : > { %5933 = vrot.lane.b32.xlu0 %v5780_v16, %s11571_s5 }
 0x720   : > { %5937 = vrot.lane.b32.xlu2 %v5782_v14, %s11571_s5  ;;  %5941 = vrot.lane.b32.xlu1 %v5784_v34, %s11571_s5 }
 0x726   : > { %5939 = vrot.lane.b32.xlu0 %v5894_v11, %s11571_s5 }
 0x728   : > { %5943 = vrot.lane.b32.xlu2 %v5896_v3, %s11571_s5  ;;  %s11586_s5 = smov 56  }
 0x750   : > { %v5914_v38 = vpop.permute.xlu2 %5913 }
 0x751   : > { %v5961_v18 = vsel %vm365_vm0, 0.0, %v5914_v38 }
 0x752   : > { %v5977_v8 = vsel %vm374_vm1, %v5961_v18, 0.0 }
 0x753   : > { %v6009_v61 = vrot.slane %v5977_v8, 7 }
 0x755   : > { %v16551_v59 = vsel %vm391_vm2, 0.0, %v6009_v61 }
 0x756   : > { %v6107_v0 = vrot.slane %v16551_v59, 2  ;;  %v6108_v2 = vrot.slane %v16551_v59, 4  ;;  %v19984_v30 = vrot.slane %v16551_v59, 6  ;;  %6155 = vst [vmem:[#allocation1] ss:$4 sm:$0xff] %v16551_v59 }
 0x758   : > { %6157 = vst [vmem:[#allocation1 + $0x1] ss:$4 sm:$0xff] %v6107_v0 }
 0x759   : > { %6159 = vst [vmem:[#allocation1 + $0x2] ss:$4 sm:$0xff] %v6108_v2 }
 0x75a   : > { %6161 = vst [vmem:[#allocation1 + $0x3] ss:$4 sm:$0xff] %v19984_v30 }
 0x761   : > { %v6170_v55 = vld.sshfl [vmem:[#allocation1] sm:$0xff pattern:$0x73625140] }
 0x762   : > { %9955 = vmatmul.msk.f32.vlgmr.msra.gmra.mxu0 %vm6252_vm12, %v6170_v55  ;;  %v5920_v24 = vpop.permute.xlu2 %5919 }
 0x763   : > { %v5964_v51 = vsel %vm365_vm0, 0.0, %v5920_v24 }
 0x764   : > { %v5980_v39 = vsel %vm374_vm1, %v5964_v51, 0.0 }
 0x765   : > { %v6013_v62 = vrot.slane %v5980_v39, 7 }
 0x766   : > { %v5918_v4 = vpop.permute.xlu1 %5917 }
 0x767   : > { %v5963_v35 = vsel %vm365_vm0, 0.0, %v5918_v4  ;;  %v16607_v9 = vsel %vm391_vm2, %v6013_v62, 0.0 }
 0x768   : > { %v5979_v17 = vsel %vm374_vm1, %v5963_v35, 0.0 }
 0x769   : > { %v6012_v41 = vrot.slane %v5979_v17, 7 }
 0x76a   : > { %v5926_v6 = vpop.permute.xlu2 %5925 }
 0x76b   : > { %v16567_v37 = vsel %vm391_vm2, 0.0, %v6012_v41  ;;  %v16597_v20 = vsel %vm391_vm2, %v6012_v41, %v6013_v62  ;;  %v5967_v34 = vsel %vm365_vm0, 0.0, %v5926_v6 }
 0x76c   : > { %v19980_v10 = vrot.slane %v16567_v37, 2  ;;  %v19979_v12 = vrot.slane %v16567_v37, 4  ;;  %6173 = vst [vmem:[#allocation1 + $0x1] ss:$4 sm:$0xff] %v16567_v37  ;;  %v19975_v15 = vrot.slane %v16597_v20, 6  ;;  %v19978_v36 = vrot.slane %v16567_v37, 6 }
 0x76d   : > { %v19977_v47 = vrot.slane %v16597_v20, 2  ;;  %v19976_v16 = vrot.slane %v16597_v20, 4  ;;  %v5983_v3 = vsel %vm374_vm1, %v5967_v34, 0.0 }
 0x76e   : > { %6175 = vst [vmem:[#allocation1 + $0x3] ss:$4 sm:$0xff] %v19979_v12  ;;  %v6018_v8 = vrot.slane %v5983_v3, 7 }
 0x76f   : > { %6174 = vst [vmem:[#allocation1 + $0x2] ss:$4 sm:$0xff] %v19980_v10 }
 0x770   : > { %v16658_v41 = vsel %vm391_vm2, 0.0, %v6018_v8 }
 0x771   : > { %v19963_v51 = vrot.slane %v16658_v41, 6 }
 0x778   : > { %v5916_v43 = vpop.permute.xlu0 %5915 }
 0x779   : > { %v5962_v28 = vsel %vm365_vm0, 0.0, %v5916_v43 }
 0x77a   : > { %v5978_v23 = vsel %vm374_vm1, %v5962_v28, 0.0  ;;  %v5924_v45 = vpop.permute.xlu1 %5923  ;;  %v19964_v28 = vrot.slane %v16658_v41, 4 }
 0x77b   : > { %v6010_v57 = vrot.slane %v5978_v23, 7  ;;  %v5966_v50 = vsel %vm365_vm0, 0.0, %v5924_v45  ;;  %v5932_v23 = vpop.permute.xlu2 %5931 }
 0x77c   : > { %v5982_v14 = vsel %vm374_vm1, %v5966_v50, 0.0 }
 0x77d   : > { %v16581_v5 = vsel %vm391_vm2, %v6009_v61, %v6010_v57  ;;  %v16584_v49 = vsel %vm391_vm2, %v6010_v57, 0.0  ;;  %v6016_v13 = vrot.slane %v5982_v14, 7 }
 0x77e   : > { %v19983_v22 = vrot.slane %v16581_v5, 2  ;;  %v19982_v46 = vrot.slane %v16581_v5, 4  ;;  %v19981_v31 = vrot.slane %v16581_v5, 6  ;;  %6163 = vst [vmem:[#allocation1 + $0x20] ss:$4 sm:$0xff] %v16581_v5 }
 0x77f   : > { %6172 = vst [vmem:[#allocation1] ss:$4 sm:$0xff] %v16584_v49  ;;  %v16652_v17 = vsel %vm391_vm2, %v6016_v13, 0.0 }
 0x780   : > { %6165 = vst [vmem:[#allocation1 + $0x21] ss:$4 sm:$0xff] %v19983_v22  ;;  %v5922_v7 = vpop.permute.xlu0 %5921 }
 0x781   : > { %6167 = vst [vmem:[#allocation1 + $0x22] ss:$4 sm:$0xff] %v19982_v46  ;;  %v5965_v40 = vsel %vm365_vm0, 0.0, %v5922_v7  ;;  %v19965_v7 = vrot.slane %v16658_v41, 2 }
 0x782   : > { %6169 = vst [vmem:[#allocation1 + $0x23] ss:$4 sm:$0xff] %v19981_v31  ;;  %v5981_v42 = vsel %vm374_vm1, %v5965_v40, 0.0  ;;  %v5930_v35 = vpop.permute.xlu1 %5929  ;;  %v5970_v40 = vsel %vm365_vm0, 0.0, %v5932_v23 }
 0x783   : > { %v6015_v27 = vrot.slane %v5981_v42, 7  ;;  %v5969_v43 = vsel %vm365_vm0, 0.0, %v5930_v35  ;;  %v5986_v50 = vsel %vm374_vm1, %v5970_v40, 0.0 }
 0x784   : > { %v5985_v39 = vsel %vm374_vm1, %v5969_v43, 0.0 }
 0x785   : > { %v16604_v58 = vsel %vm391_vm2, 0.0, %v6015_v27  ;;  %v16632_v26 = vsel %vm391_vm2, %v6015_v27, %v6016_v13  ;;  %v6021_v42 = vrot.slane %v5985_v39, 7  ;;  %v6022_v13 = vrot.slane %v5986_v50, 7 }
 0x786   : > { %v6180_v44 = vld.sshfl [vmem:[#allocation1] sm:$0xff pattern:$0x73625140]  ;;  %v19974_v48 = vrot.slane %v16604_v58, 2  ;;  %v19972_v11 = vrot.slane %v16604_v58, 4  ;;  %v19971_v60 = vrot.slane %v16604_v58, 6 }
 0x787   : > { %6182 = vst [vmem:[#allocation1] ss:$4 sm:$0xff] %v19975_v15  ;;  %v19968_v38 = vrot.slane %v16632_v26, 2  ;;  %v19967_v61 = vrot.slane %v16632_v26, 4  ;;  %v19966_v55 = vrot.slane %v16632_v26, 6  ;;  %v16693_v34 = vsel %vm391_vm2, 0.0, %v6021_v42 }
 0x788   : > { %6183 = vst [vmem:[#allocation1 + $0x1] ss:$4 sm:$0xff] %v16607_v9  ;;  %v5928_v19 = vpop.permute.xlu0 %5927  ;;  %v19944_v3 = vrot.slane %v16693_v34, 2 }
 0x789   : > { %v6171_v52 = vld.sshfl [vmem:[#allocation1 + $0x20] sm:$0xff pattern:$0x73625140]  ;;  %6184 = vst [vmem:[#allocation1 + $0x2] ss:$4 sm:$0xff] %v16604_v58  ;;  %v5968_v33 = vsel %vm365_vm0, 0.0, %v5928_v19 }
 0x78a   : > { %6176 = vst [vmem:[#allocation1 + $0x20] ss:$4 sm:$0xff] %v19978_v36  ;;  %9956 = vmatmul.msk.f32.gmra.mxu0 %vm6252_vm12, %v6171_v52  ;;  %v5984_v4 = vsel %vm374_vm1, %v5968_v33, 0.0  ;;  %v16700_v33 = vsel %vm391_vm2, %v6021_v42, %v6022_v13  ;;  %v5938_v42 = vpop.permute.xlu2 %5937 }
 0x78b   : > { %6177 = vst [vmem:[#allocation1 + $0x21] ss:$4 sm:$0xff] %v16597_v20  ;;  %v6019_v24 = vrot.slane %v5984_v4, 7  ;;  %v5936_v4 = vpop.permute.xlu1 %5935  ;;  %v19937_v23 = vrot.slane %v16700_v33, 6  ;;  %v19939_v40 = vrot.slane %v16700_v33, 2 }
 0x78c   : > { %6178 = vst [vmem:[#allocation1 + $0x22] ss:$4 sm:$0xff] %v19977_v47 }
 0x78d   : > { %6179 = vst [vmem:[#allocation1 + $0x23] ss:$4 sm:$0xff] %v19976_v16  ;;  %v16667_v62 = vsel %vm391_vm2, %v6018_v8, %v6019_v24  ;;  %v16688_v6 = vsel %vm391_vm2, %v6019_v24, 0.0  ;;  %v19938_v8 = vrot.slane %v16693_v34, 6  ;;  %v19936_v24 = vrot.slane %v16700_v33, 4 }
 0x78e   : > { %6185 = vst [vmem:[#allocation1 + $0x3] ss:$4 sm:$0xff] %v19974_v48  ;;  %v19954_v27 = vrot.slane %v16667_v62, 2  ;;  %v19953_v45 = vrot.slane %v16667_v62, 4  ;;  %v19948_v52 = vrot.slane %v16667_v62, 6 }
 0x790   : > { %v5934_v14 = vpop.permute.xlu0 %5933 }
 0x791   : > { %v5971_v19 = vsel %vm365_vm0, 0.0, %v5934_v14 }
 0x792   : > { %9957 = vmatmul.msk.f32.gmra.mxu0 %vm6252_vm12, %v6180_v44  ;;  %v5987_v35 = vsel %vm374_vm1, %v5971_v19, 0.0  ;;  %v16729_v19 = vsel %vm391_vm2, %v6022_v13, 0.0 }
 0x793   : > { %v6024_v39 = vrot.slane %v5987_v35, 7 }
 0x794   : > { %v6181_v63 = vld.sshfl [vmem:[#allocation1 + $0x20] sm:$0xff pattern:$0x73625140] }
 0x795   : > { %6186 = vst [vmem:[#allocation1 + $0x20] ss:$4 sm:$0xff] %v19972_v11  ;;  %v6190_v18 = vld.sshfl [vmem:[#allocation1] sm:$0xff pattern:$0x73625140]  ;;  %v16726_v14 = vsel %vm391_vm2, 0.0, %v6024_v39 }
 0x796   : > { %6187 = vst [vmem:[#allocation1 + $0x21] ss:$4 sm:$0xff] %v19971_v60  ;;  %v19943_v13 = vrot.slane %v16726_v14, 6 }
 0x797   : > { %6188 = vst [vmem:[#allocation1 + $0x22] ss:$4 sm:$0xff] %v16632_v26 }
 0x798   : > { %6189 = vst [vmem:[#allocation1 + $0x23] ss:$4 sm:$0xff] %v19968_v38 }
 0x799   : > { %6192 = vst [vmem:[#allocation1] ss:$4 sm:$0xff] %v19967_v61 }
 0x79a   : > { %6193 = vst [vmem:[#allocation1 + $0x1] ss:$4 sm:$0xff] %v19966_v55  ;;  %9958 = vmatmul.msk.f32.gmra.mxu0 %vm6252_vm12, %v6181_v63 }
 0x79b   : > { %6194 = vst [vmem:[#allocation1 + $0x2] ss:$4 sm:$0xff] %v16652_v17 }
 0x79c   : > { %6195 = vst [vmem:[#allocation1 + $0x3] ss:$4 sm:$0xff] %v16658_v41 }
 0x79f   : > { %v6191_v57 = vld.sshfl [vmem:[#allocation1 + $0x20] sm:$0xff pattern:$0x73625140] }
 0x7a0   : > { %6197 = vst [vmem:[#allocation1 + $0x21] ss:$4 sm:$0xff] %v19964_v28 }
 0x7a1   : > { %6198 = vst [vmem:[#allocation1 + $0x22] ss:$4 sm:$0xff] %v19963_v51 }
 0x7a2   : > { %6196 = vst [vmem:[#allocation1 + $0x20] ss:$4 sm:$0xff] %v19965_v7  ;;  %9959 = vmatmul.msk.f32.gmra.mxu0 %vm6252_vm12, %v6190_v18  ;;  %v19940_v18 = vrot.slane %v16693_v34, 4 }
 0x7a3   : > { %v6200_v44 = vld.sshfl [vmem:[#allocation1] sm:$0xff pattern:$0x73625140]  ;;  %6199 = vst [vmem:[#allocation1 + $0x23] ss:$4 sm:$0xff] %v16667_v62 }
 0x7a4   : > { %6202 = vst [vmem:[#allocation1] ss:$4 sm:$0xff] %v19954_v27 }
 0x7a5   : > { %6203 = vst [vmem:[#allocation1 + $0x1] ss:$4 sm:$0xff] %v19953_v45 }
 0x7a6   : > { %6204 = vst [vmem:[#allocation1 + $0x2] ss:$4 sm:$0xff] %v19948_v52 }
 0x7a7   : > { %6205 = vst [vmem:[#allocation1 + $0x3] ss:$4 sm:$0xff] %v16688_v6 }
 0x7aa   : > { %v6201_v63 = vld.sshfl [vmem:[#allocation1 + $0x20] sm:$0xff pattern:$0x73625140]  ;;  %9960 = vmatmul.msk.f32.gmra.mxu0 %vm6252_vm12, %v6191_v57  ;;  %v5972_v57 = vsel %vm365_vm0, 0.0, %v5936_v4  ;;  %v5973_v4 = vsel %vm365_vm0, 0.0, %v5938_v42 }
 0x7ab   : > { %6206 = vst [vmem:[#allocation1 + $0x20] ss:$4 sm:$0xff] %v16693_v34  ;;  %v5988_v50 = vsel %vm374_vm1, %v5972_v57, 0.0  ;;  %v5989_v57 = vsel %vm374_vm1, %v5973_v4, 0.0 }
 0x7ac   : > { %6207 = vst [vmem:[#allocation1 + $0x21] ss:$4 sm:$0xff] %v19944_v3 }
 0x7ad   : > { %6208 = vst [vmem:[#allocation1 + $0x22] ss:$4 sm:$0xff] %v19940_v18  ;;  %v6027_v18 = vrot.slane %v5989_v57, 7 }
 0x7ae   : > { %6209 = vst [vmem:[#allocation1 + $0x23] ss:$4 sm:$0xff] %v19938_v8  ;;  %v6210_v43 = vld.sshfl [vmem:[#allocation1] sm:$0xff pattern:$0x73625140]  ;;  %v5940_v8 = vpop.permute.xlu0 %5939 }
 0x7af   : > { %6212 = vst [vmem:[#allocation1] ss:$4 sm:$0xff] %v16700_v33 }
 0x7b0   : > { %6214 = vst [vmem:[#allocation1 + $0x2] ss:$4 sm:$0xff] %v19936_v24  ;;  %v6025_v24 = vrot.slane %v5988_v50, 7  ;;  %v5974_v50 = vsel %vm365_vm0, 0.0, %v5940_v8  ;;  %v5942_v8 = vpop.permute.xlu1 %5941 }
 0x7b1   : > { %6215 = vst [vmem:[#allocation1 + $0x3] ss:$4 sm:$0xff] %v19937_v23  ;;  %v19942_v23 = vrot.slane %v16726_v14, 2 }
 0x7b2   : > { %6213 = vst [vmem:[#allocation1 + $0x1] ss:$4 sm:$0xff] %v19939_v40  ;;  %9961 = vmatmul.msk.f32.gmra.mxu0 %vm6252_vm12, %v6200_v44  ;;  %v16735_v40 = vsel %vm391_vm2, %v6024_v39, %v6025_v24  ;;  %v19941_v44 = vrot.slane %v16726_v14, 4  ;;  %v16762_v3 = vsel %vm391_vm2, %v6025_v24, 0.0 }
 0x7b3   : > { %v19945_v39 = vrot.slane %v16735_v40, 2  ;;  %v19946_v4 = vrot.slane %v16735_v40, 4 }
 0x7b5   : > { %v6211_v35 = vld.sshfl [vmem:[#allocation1 + $0x20] sm:$0xff pattern:$0x73625140] }
 0x7b6   : > { %6216 = vst [vmem:[#allocation1 + $0x20] ss:$4 sm:$0xff] %v16729_v19 }
 0x7b7   : > { %6217 = vst [vmem:[#allocation1 + $0x21] ss:$4 sm:$0xff] %v16726_v14 }
 0x7b8   : > { %6218 = vst [vmem:[#allocation1 + $0x22] ss:$4 sm:$0xff] %v19942_v23  ;;  %v16758_v23 = vsel %vm391_vm2, 0.0, %v6027_v18 }
 0x7b9   : > { %6219 = vst [vmem:[#allocation1 + $0x23] ss:$4 sm:$0xff] %v19941_v44  ;;  %v6220_v42 = vld.sshfl [vmem:[#allocation1] sm:$0xff pattern:$0x73625140]  ;;  %v5990_v44 = vsel %vm374_vm1, %v5974_v50, 0.0 }
 0x7ba   : > { %6222 = vst [vmem:[#allocation1] ss:$4 sm:$0xff] %v19943_v13  ;;  %9962 = vmatmul.msk.f32.gmra.mxu0 %vm6252_vm12, %v6201_v63  ;;  %v19947_v13 = vrot.slane %v16735_v40, 6  ;;  %v6028_v63 = vrot.slane %v5990_v44, 7  ;;  %v19951_v50 = vrot.slane %v16758_v23, 2  ;;  %v19950_v44 = vrot.slane %v16758_v23, 6 }
 0x7bb   : > { %6223 = vst [vmem:[#allocation1 + $0x1] ss:$4 sm:$0xff] %v16735_v40 }
 0x7bc   : > { %6224 = vst [vmem:[#allocation1 + $0x2] ss:$4 sm:$0xff] %v19945_v39  ;;  %v5975_v39 = vsel %vm365_vm0, 0.0, %v5942_v8  ;;  %v16775_v24 = vsel %vm391_vm2, %v6027_v18, %v6028_v63 }
 0x7bd   : > { %6225 = vst [vmem:[#allocation1 + $0x3] ss:$4 sm:$0xff] %v19946_v4  ;;  %v19949_v4 = vrot.slane %v16758_v23, 4  ;;  %v5991_v8 = vsel %vm374_vm1, %v5975_v39, 0.0 }
 0x7be   : > { %v6030_v52 = vrot.slane %v5991_v8, 7  ;;  %v19956_v8 = vrot.slane %v16775_v24, 6 }
 0x7c0   : > { %v6221_v57 = vld.sshfl [vmem:[#allocation1 + $0x20] sm:$0xff pattern:$0x73625140] }
 0x7c1   : > { %6226 = vst [vmem:[#allocation1 + $0x20] ss:$4 sm:$0xff] %v19947_v13  ;;  %9966 = vmatmul.msk.f32.vlgmr.msra.gmra.mxu3 %vm6252_vm12, %v6221_v57  ;;  %v5944_v57 = vpop.permute.xlu2 %5943 }
 0x7c2   : > { %6227 = vst [vmem:[#allocation1 + $0x21] ss:$4 sm:$0xff] %v16762_v3  ;;  %9963 = vmatmul.msk.f32.gmra.mxu0 %vm6252_vm12, %v6210_v43  ;;  %v19952_v43 = vrot.slane %v16775_v24, 2  ;;  %v5976_v18 = vsel %vm365_vm0, 0.0, %v5944_v57  ;;  %v16802_v57 = vsel %vm391_vm2, %v6028_v63, 0.0  ;;  %vm6563_vm0 = vcmask 72704  }
 0x7c3   : > { %6228 = vst [vmem:[#allocation1 + $0x22] ss:$4 sm:$0xff] %v16758_v23 }
 0x7c4   : > { %v6230_v13 = vld.sshfl [vmem:[#allocation1] sm:$0xff pattern:$0x73625140]  ;;  %6229 = vst [vmem:[#allocation1 + $0x23] ss:$4 sm:$0xff] %v19951_v50  ;;  %v5992_v50 = vsel %vm374_vm1, %v5976_v18, 0.0 }
 0x7c5   : > { %6232 = vst [vmem:[#allocation1] ss:$4 sm:$0xff] %v19949_v4  ;;  %v16792_v4 = vsel %vm391_vm2, 0.0, %v6030_v52  ;;  %v6031_v45 = vrot.slane %v5992_v50, 7  ;;  %vm6566_vm1 = vcmask 66560  }
 0x7c6   : > { %6233 = vst [vmem:[#allocation1 + $0x1] ss:$4 sm:$0xff] %v19950_v44  ;;  %v19959_v44 = vrot.slane %v16775_v24, 4  ;;  %v19957_v27 = vrot.slane %v16792_v4, 6 }
 0x7c7   : > { %6234 = vst [vmem:[#allocation1 + $0x2] ss:$4 sm:$0xff] %v16775_v24  ;;  %v16815_v63 = vsel %vm391_vm2, %v6030_v52, %v6031_v45  ;;  %v16829_v52 = vsel %vm391_vm2, %v6031_v45, 0.0 }
 0x7c8   : > { %6235 = vst [vmem:[#allocation1 + $0x3] ss:$4 sm:$0xff] %v19952_v43  ;;  %v19962_v50 = vrot.slane %v16815_v63, 2  ;;  %v19961_v18 = vrot.slane %v16815_v63, 4 }
 0x7c9   : > { %9967 = vmatmul.msk.f32.gmra.mxu3 %vm6252_vm12, %v6230_v13  ;;  %v19955_v13 = vrot.slane %v16792_v4, 2 }
 0x7ca   : > { %9964 = vmatmul.msk.f32.gmra.mxu0 %vm6252_vm12, %v6211_v35  ;;  %v19958_v35 = vrot.slane %v16792_v4, 4 }
 0x7cb   : > { %v6231_v39 = vld.sshfl [vmem:[#allocation1 + $0x20] sm:$0xff pattern:$0x73625140] }
 0x7cc   : > { %6239 = vst [vmem:[#allocation1 + $0x23] ss:$4 sm:$0xff] %v16792_v4 }
 0x7cd   : > { %6236 = vst [vmem:[#allocation1 + $0x20] ss:$4 sm:$0xff] %v19959_v44 }
 0x7ce   : > { %6237 = vst [vmem:[#allocation1 + $0x21] ss:$4 sm:$0xff] %v19956_v8  ;;  %v19960_v8 = vrot.slane %v16815_v63, 6 }
 0x7cf   : > { %6238 = vst [vmem:[#allocation1 + $0x22] ss:$4 sm:$0xff] %v16802_v57  ;;  %v6240_v43 = vld.sshfl [vmem:[#allocation1] sm:$0xff pattern:$0x73625140] }
 0x7d0   : > { %6242 = vst [vmem:[#allocation1] ss:$4 sm:$0xff] %v19955_v13 }
 0x7d1   : > { %6243 = vst [vmem:[#allocation1 + $0x1] ss:$4 sm:$0xff] %v19958_v35  ;;  %9968 = vmatmul.msk.f32.gmra.mxu3 %vm6252_vm12, %v6231_v39 }
 0x7d2   : > { %6244 = vst [vmem:[#allocation1 + $0x2] ss:$4 sm:$0xff] %v19957_v27  ;;  %9965 = vmatmul.msk.f32.gmra.mxu0 %vm6252_vm12, %v6220_v42 }
 0x7d3   : > { %6245 = vst [vmem:[#allocation1 + $0x3] ss:$4 sm:$0xff] %v16815_v63 }
 0x7d6   : > { %v6241_v13 = vld.sshfl [vmem:[#allocation1 + $0x20] sm:$0xff pattern:$0x73625140] }
 0x7d7   : > { %6246 = vst [vmem:[#allocation1 + $0x20] ss:$4 sm:$0xff] %v19962_v50 }
 0x7d8   : > { %6247 = vst [vmem:[#allocation1 + $0x21] ss:$4 sm:$0xff] %v19961_v18 }
 0x7d9   : > { %6248 = vst [vmem:[#allocation1 + $0x22] ss:$4 sm:$0xff] %v19960_v8  ;;  %9969 = vmatmul.msk.f32.gmra.mxu3 %vm6252_vm12, %v6240_v43 }
 0x7da   : > { %6249 = vst [vmem:[#allocation1 + $0x23] ss:$4 sm:$0xff] %v16829_v52  ;;  %v6250_v42 = vld.sshfl [vmem:[#allocation1] sm:$0xff pattern:$0x73625140] }
 0x7df   : > { %v6310_v39 = vpop.f32.mrf.mxu0 }
 0x7e0   : > { %v6382_v27 = vrot.slane %v6310_v39, 2  ;;  %v6383_v35 = vrot.slane %v6310_v39, 4  ;;  %v6384_v44 = vrot.slane %v6310_v39, 6  ;;  %6436 = vst [vmem:[#allocation1] ss:$4 sm:$0xff] %v6310_v39 }
 0x7e1   : > { %9970 = vmatmul.msk.f32.gmra.mxu3 %vm6252_vm12, %v6241_v13  ;;  %v6251_v45 = vld.sshfl [vmem:[#allocation1 + $0x20] sm:$0xff pattern:$0x73625140] }
 0x7e2   : > { %6438 = vst [vmem:[#allocation1 + $0x1] ss:$4 sm:$0xff] %v6382_v27 }
 0x7e3   : > { %6440 = vst [vmem:[#allocation1 + $0x2] ss:$4 sm:$0xff] %v6383_v35 }
 0x7e4   : > { %6442 = vst [vmem:[#allocation1 + $0x3] ss:$4 sm:$0xff] %v6384_v44 }
 0x7e9   : > { %9971 = vmatmul.msk.f32.gmra.mxu3 %vm6252_vm12, %v6250_v42 }
 0x7eb   : > { %v6451_v51 = vld.sshfl [vmem:[#allocation1] sm:$0xff pattern:$0x73625140] }
 0x7ec   : > { %6564 = vst.msk [vmem:[#allocation2] sm:$0xff] %vm6563_vm0, %v6451_v51 }
 0x7f1   : > { %9972 = vmatmul.msk.f32.gmra.mxu3 %vm6252_vm12, %v6251_v45 }
 0x807   : > { %v6313_v8 = vpop.f32.mrf.mxu0 }
 0x808   : > { %v6385_v43 = vrot.slane %v6313_v8, 2  ;;  %v6386_v18 = vrot.slane %v6313_v8, 4  ;;  %v6387_v50 = vrot.slane %v6313_v8, 6  ;;  %6444 = vst [vmem:[#allocation1 + $0x20] ss:$4 sm:$0xff] %v6313_v8 }
 0x80a   : > { %6446 = vst [vmem:[#allocation1 + $0x21] ss:$4 sm:$0xff] %v6385_v43 }
 0x80b   : > { %6448 = vst [vmem:[#allocation1 + $0x22] ss:$4 sm:$0xff] %v6386_v18 }
 0x80c   : > { %6450 = vst [vmem:[#allocation1 + $0x23] ss:$4 sm:$0xff] %v6387_v50 }
 0x80f   : > { %v6316_v39 = vpop.f32.mrf.mxu0 }
 0x810   : > { %v6388_v28 = vrot.slane %v6316_v39, 2  ;;  %6453 = vst [vmem:[#allocation1] ss:$4 sm:$0xff] %v6316_v39  ;;  %v6389_v27 = vrot.slane %v6316_v39, 4  ;;  %v6390_v13 = vrot.slane %v6316_v39, 6 }
 0x813   : > { %v6452_v44 = vld.sshfl [vmem:[#allocation1 + $0x20] sm:$0xff pattern:$0x73625140] }
 0x814   : > { %6455 = vst [vmem:[#allocation1 + $0x20] ss:$4 sm:$0xff] %v6388_v28 }
 0x815   : > { %6456 = vst [vmem:[#allocation1 + $0x21] ss:$4 sm:$0xff] %v6389_v27 }
 0x816   : > { %6457 = vst [vmem:[#allocation1 + $0x22] ss:$4 sm:$0xff] %v6390_v13 }
 0x817   : > { %v6319_v35 = vpop.f32.mrf.mxu0  ;;  %v6454_v55 = vld.sshfl [vmem:[#allocation1] sm:$0xff pattern:$0x73625140]  ;;  %6565 = vst.msk [vmem:[#allocation2 + $0x8] sm:$0xff] %vm6563_vm0, %v6452_v44 }
 0x818   : > { %v6391_v42 = vrot.slane %v6319_v35, 2  ;;  %v6392_v45 = vrot.slane %v6319_v35, 4  ;;  %v6393_v7 = vrot.slane %v6319_v35, 6  ;;  %6458 = vst [vmem:[#allocation1 + $0x23] ss:$4 sm:$0xff] %v6319_v35 }
 0x819   : > { %6567 = vst.msk [vmem:[#allocation2 + $0x10] sm:$0x3] %vm6566_vm1, %v6454_v55 }
 0x81a   : > { %6460 = vst [vmem:[#allocation1] ss:$4 sm:$0xff] %v6391_v42 }
 0x81b   : > { %6461 = vst [vmem:[#allocation1 + $0x1] ss:$4 sm:$0xff] %v6392_v45 }
 0x81c   : > { %6462 = vst [vmem:[#allocation1 + $0x2] ss:$4 sm:$0xff] %v6393_v7 }
 0x81f   : > { %v6459_v8 = vld.sshfl [vmem:[#allocation1 + $0x20] sm:$0xff pattern:$0x73625140]  ;;  %v6322_v50 = vpop.f32.mrf.mxu0 }
 0x820   : > { %v6394_v28 = vrot.slane %v6322_v50, 2  ;;  %6463 = vst [vmem:[#allocation1 + $0x3] ss:$4 sm:$0xff] %v6322_v50  ;;  %v6395_v18 = vrot.slane %v6322_v50, 4  ;;  %v6396_v43 = vrot.slane %v6322_v50, 6 }
 0x821   : > { %6568 = vst.msk [vmem:[#allocation2 + $0x18] sm:$0xff] %vm6563_vm0, %v6459_v8  ;;  %v16844_v8 = vld [vmem:[#allocation2 + $0x1] ss:$2 sm:$0xff] }
 0x822   : > { %6464 = vst [vmem:[#allocation1 + $0x20] ss:$4 sm:$0xff] %v6394_v28  ;;  %v16849_v28 = vld [vmem:[#allocation2] ss:$2 sm:$0xff] }
 0x827   : > { %v6465_v39 = vld.sshfl [vmem:[#allocation1] sm:$0xff pattern:$0x73625140]  ;;  %v6325_v27 = vpop.f32.mrf.mxu0 }
 0x828   : > { %6467 = vst [vmem:[#allocation1] ss:$4 sm:$0xff] %v6395_v18  ;;  %v6397_v7 = vrot.slane %v6325_v27, 2  ;;  %v6398_v13 = vrot.slane %v6325_v27, 4  ;;  %v6399_v51 = vrot.slane %v6325_v27, 6 }
 0x829   : > { %v6466_v35 = vld.sshfl [vmem:[#allocation1 + $0x20] sm:$0xff pattern:$0x73625140]  ;;  %6468 = vst [vmem:[#allocation1 + $0x1] ss:$4 sm:$0xff] %v6396_v43 }
 0x82a   : > { %6469 = vst [vmem:[#allocation1 + $0x2] ss:$4 sm:$0xff] %v6325_v27  ;;  %v16857_v27 = vld [vmem:[#allocation2 + $0x2] ss:$2 sm:$0xff] }
 0x82b   : > { %6470 = vst [vmem:[#allocation1 + $0x3] ss:$4 sm:$0xff] %v6397_v7 }
 0x82c   : > { %6471 = vst [vmem:[#allocation1 + $0x20] ss:$4 sm:$0xff] %v6398_v13 }
 0x82d   : > { %6472 = vst [vmem:[#allocation1 + $0x21] ss:$4 sm:$0xff] %v6399_v51 }
 0x82e   : > { %6569 = vst.msk [vmem:[#allocation2 + $0x20] sm:$0xff] %vm6563_vm0, %v6465_v39 }
 0x82f   : > { %v6328_v55 = vpop.f32.mrf.mxu0  ;;  %6570 = vst.msk [vmem:[#allocation2 + $0x28] sm:$0x3] %vm6566_vm1, %v6466_v35 }
 0x830   : > { %v6400_v44 = vrot.slane %v6328_v55, 2  ;;  %v6401_v42 = vrot.slane %v6328_v55, 4  ;;  %6473 = vst [vmem:[#allocation1 + $0x22] ss:$4 sm:$0xff] %v6328_v55  ;;  %v6402_v51 = vrot.slane %v6328_v55, 6 }
 0x831   : > { %v16870_v55 = vld [vmem:[#allocation2 + $0x3] ss:$2 sm:$0xff] }
 0x832   : > { %v6475_v45 = vld.sshfl [vmem:[#allocation1] sm:$0xff pattern:$0x73625140]  ;;  %6474 = vst [vmem:[#allocation1 + $0x23] ss:$4 sm:$0xff] %v6400_v44 }
 0x833   : > { %6477 = vst [vmem:[#allocation1] ss:$4 sm:$0xff] %v6401_v42 }
 0x834   : > { %6571 = vst.msk [vmem:[#allocation2 + $0x30] sm:$0xff] %vm6563_vm0, %v6475_v45 }
 0x835   : > { %v16847_v50 = vld [vmem:[#allocation2 + $0x19] ss:$2 sm:$0xff]  ;;  %v16851_v18 = vld [vmem:[#allocation2 + $0x18] ss:$2 sm:$0xff] }
 0x836   : > { %v10969_v43 = vpack.i.bf16 %v16847_v50, %v16844_v8  ;;  %v10964_v39 = vpack.i.bf16 %v16851_v18, %v16849_v28  ;;  %v16859_v7 = vld [vmem:[#allocation2 + $0x1a] ss:$2 sm:$0xff]  ;;  %v16867_v38 = vld [vmem:[#allocation2 + $0x1b] ss:$2 sm:$0xff] }
 0x837   : > { %v10974_v13 = vpack.i.bf16 %v16859_v7, %v16857_v27  ;;  %v6331_v35 = vpop.f32.mrf.mxu0 }
 0x838   : > { %10970 = vrot.lane.b32.xlu2 %v10969_v43, %s11572_s10  ;;  %10965 = vrot.lane.b32.xlu0 %v10964_v39, %s11572_s10  ;;  %v6403_v45 = vrot.slane %v6331_v35, 2  ;;  %v6404_v61 = vrot.slane %v6331_v35, 4  ;;  %v6405_v25 = vrot.slane %v6331_v35, 6  ;;  %v10979_v43 = vpack.i.bf16 %v16867_v38, %v16870_v55 }
 0x839   : > { %v6476_v44 = vld.sshfl [vmem:[#allocation1 + $0x20] sm:$0xff pattern:$0x73625140]  ;;  %10975 = vrot.lane.b32.xlu1 %v10974_v13, %s11572_s10 }
 0x83a   : > { %v6478_v42 = vld.sshfl [vmem:[#allocation1] sm:$0xff pattern:$0x73625140]  ;;  %6479 = vst [vmem:[#allocation1 + $0x20] ss:$4 sm:$0xff] %v6402_v51 }
 0x83b   : > { %6572 = vst.msk [vmem:[#allocation2 + $0x38] sm:$0xff] %vm6563_vm0, %v6476_v44 }
 0x83c   : > { %6573 = vst.msk [vmem:[#allocation2 + $0x40] sm:$0x3] %vm6566_vm1, %v6478_v42 }
 0x83d   : > { %6480 = vst [vmem:[#allocation1 + $0x21] ss:$4 sm:$0xff] %v6331_v35 }
 0x83e   : > { %6481 = vst [vmem:[#allocation1 + $0x22] ss:$4 sm:$0xff] %v6403_v45 }
 0x83f   : > { %6482 = vst [vmem:[#allocation1 + $0x23] ss:$4 sm:$0xff] %v6404_v61  ;;  %v6334_v39 = vpop.f32.mrf.mxu0 }
 0x840   : > { %6484 = vst [vmem:[#allocation1] ss:$4 sm:$0xff] %v6405_v25  ;;  %10980 = vrot.lane.b32.xlu0 %v10979_v43, %s11572_s10  ;;  %v6406_v13 = vrot.slane %v6334_v39, 2  ;;  %v6407_v51 = vrot.slane %v6334_v39, 4  ;;  %v6408_v42 = vrot.slane %v6334_v39, 6 }
 0x841   : > { %6485 = vst [vmem:[#allocation1 + $0x1] ss:$4 sm:$0xff] %v6334_v39  ;;  %v7851_v39 = vrot.slane %v16844_v8, 4 }
 0x842   : > { %6486 = vst [vmem:[#allocation1 + $0x2] ss:$4 sm:$0xff] %v6406_v13  ;;  %v7054_v21 = vld [vmem:[#allocation2 + $0x31] ss:$2 sm:$0xff]  ;;  %v7023_v12 = vld [vmem:[#allocation2 + $0x30] ss:$2 sm:$0xff] }
 0x843   : > { %6487 = vst [vmem:[#allocation1 + $0x3] ss:$4 sm:$0xff] %v6407_v51 }
 0x844   : > { %v16875_v44 = vpop.f32.mrf.mxu3 }
 0x846   : > { %v6483_v35 = vld.sshfl [vmem:[#allocation1 + $0x20] sm:$0xff pattern:$0x73625140] }
 0x847   : > { %6574 = vst.msk [vmem:[#allocation2 + $0x48] sm:$0xff] %vm6563_vm0, %v6483_v35  ;;  %v6337_v45 = vpop.f32.mrf.mxu0 }
 0x848   : > { %6488 = vst [vmem:[#allocation1 + $0x20] ss:$4 sm:$0xff] %v6408_v42  ;;  %v6409_v60 = vrot.slane %v6337_v45, 2  ;;  %v6410_v61 = vrot.slane %v6337_v45, 4  ;;  %v6411_v25 = vrot.slane %v6337_v45, 6  ;;  %v7403_v42 = vrot.slane %v16849_v28, 4 }
 0x84a   : > { %v6489_v11 = vld.sshfl [vmem:[#allocation1] sm:$0xff pattern:$0x73625140] }
 0x84b   : > { %6575 = vst.msk [vmem:[#allocation2 + $0x50] sm:$0xff] %vm6563_vm0, %v6489_v11  ;;  %v7863_v11 = vrot.slane %v16847_v50, 4 }
 0x84c   : > { %v16879_v43 = vpop.f32.mrf.mxu3  ;;  %6491 = vst [vmem:[#allocation1] ss:$4 sm:$0xff] %v6337_v45 }
 0x84d   : > { %6492 = vst [vmem:[#allocation1 + $0x1] ss:$4 sm:$0xff] %v6409_v60  ;;  %v16888_v60 = vsel %vm635_vm3, %v7054_v21, %v7851_v39  ;;  %v7401_v39 = vrot.slane %v7023_v12, 4 }
 0x84e   : > { %6493 = vst [vmem:[#allocation1 + $0x2] ss:$4 sm:$0xff] %v6410_v61 }
 0x84f   : > { %v6490_v13 = vld.sshfl [vmem:[#allocation1 + $0x20] sm:$0xff pattern:$0x73625140]  ;;  %6494 = vst [vmem:[#allocation1 + $0x3] ss:$4 sm:$0xff] %v6411_v25  ;;  %v6340_v35 = vpop.f32.mrf.mxu0  ;;  %v7849_v25 = vrot.slane %v7054_v21, 4 }
 0x850   : > { %6576 = vst.msk [vmem:[#allocation2 + $0x58] sm:$0x3] %vm6566_vm1, %v6490_v13  ;;  %v6412_v15 = vrot.slane %v6340_v35, 2  ;;  %v6413_v16 = vrot.slane %v6340_v35, 4  ;;  %v6414_v45 = vrot.slane %v6340_v35, 6 }
 0x851   : > { %20572 = vst [vmem:[#allocation93_spill] sm:$0xff] %v16888_v60  ;;  %v16897_v31 = vsel %vm635_vm3, %v7849_v25, %v16844_v8  ;;  %v8311_v25 = vrot.slane %v16859_v7, 4 }
 0x852   : > { %v7056_v61 = vld [vmem:[#allocation2 + $0x49] ss:$2 sm:$0xff]  ;;  %v7025_v10 = vld [vmem:[#allocation2 + $0x48] ss:$2 sm:$0xff]  ;;  %6495 = vst [vmem:[#allocation1 + $0x20] ss:$4 sm:$0xff] %v6340_v35  ;;  %v16910_v35 = vsel %vm635_vm3, %v7401_v39, %v16849_v28 }
 0x853   : > { %v10989_v13 = vpack.i.bf16 %v7056_v61, %v7054_v21  ;;  %v7861_v47 = vrot.slane %v7056_v61, 4  ;;  %v16893_v36 = vsel %vm635_vm3, %v7056_v61, %v7863_v11  ;;  %6496 = vst [vmem:[#allocation1 + $0x21] ss:$4 sm:$0xff] %v6412_v15  ;;  %v16905_v21 = vsel %vm635_vm3, %v7023_v12, %v7403_v42  ;;  %v7086_v61 = vld [vmem:[#allocation2 + $0x32] ss:$2 sm:$0xff] }
 0x854   : > { %v16883_v51 = vpop.f32.mrf.mxu3  ;;  %20573 = vst [vmem:[#allocation74_spill] sm:$0xff] %v16893_v36  ;;  %v7415_v11 = vrot.slane %v16851_v18, 4  ;;  %v10984_v8 = vpack.i.bf16 %v7025_v10, %v7023_v12  ;;  %v6418_v42 = vrot.slane %v16879_v43, 2  ;;  %v8297_v28 = vrot.slane %v7086_v61, 4 }
 0x855   : > { %10990 = vrot.lane.b32.xlu0 %v10989_v13, %s11572_s10  ;;  %v16902_v46 = vsel %vm635_vm3, %v7861_v47, %v16847_v50  ;;  %6497 = vst [vmem:[#allocation1 + $0x22] ss:$4 sm:$0xff] %v6413_v16  ;;  %v8299_v50 = vrot.slane %v16857_v27, 4  ;;  %v6419_v16 = vrot.slane %v16879_v43, 4  ;;  %v6420_v39 = vrot.slane %v16879_v43, 6 }
 0x856   : > { %v6499_v48 = vld.sshfl [vmem:[#allocation1] sm:$0xff pattern:$0x73625140]  ;;  %6498 = vst [vmem:[#allocation1 + $0x23] ss:$4 sm:$0xff] %v6414_v45  ;;  %10985 = vrot.lane.b32.xlu1 %v10984_v8, %s11572_s10  ;;  %v16922_v12 = vsel %vm635_vm3, %v7025_v10, %v7415_v11  ;;  %v16934_v8 = vsel %vm635_vm3, %v8297_v28, %v16857_v27 }
 0x857   : > { %6501 = vst [vmem:[#allocation1] ss:$4 sm:$0xff] %v16875_v44  ;;  %v7088_v47 = vld [vmem:[#allocation2 + $0x4a] ss:$2 sm:$0xff]  ;;  %v7118_v27 = vld [vmem:[#allocation2 + $0x33] ss:$2 sm:$0xff] }
 0x858   : > { %6577 = vst.msk [vmem:[#allocation2 + $0x60] sm:$0xff] %vm6563_vm0, %v6499_v48  ;;  %v7413_v48 = vrot.slane %v7025_v10, 4  ;;  %v10994_v45 = vpack.i.bf16 %v7088_v47, %v7086_v61  ;;  %v16929_v30 = vsel %vm635_vm3, %v7088_v47, %v8311_v25  ;;  %v6415_v10 = vrot.slane %v16875_v44, 2 }
 0x859   : > { %v8759_v25 = vrot.slane %v16867_v38, 4  ;;  %v8745_v28 = vrot.slane %v7118_v27, 4 }
 0x85a   : > { %v16914_v15 = vsel %vm635_vm3, %v7413_v48, %v16851_v18  ;;  %v16925_v18 = vsel %vm635_vm3, %v7086_v61, %v8299_v50  ;;  %v8309_v48 = vrot.slane %v7088_v47, 4  ;;  %10995 = vrot.lane.b32.xlu2 %v10994_v45, %s11572_s10  ;;  %v6416_v61 = vrot.slane %v16875_v44, 4 }
 0x85b   : > { %v6417_v50 = vrot.slane %v16875_v44, 6  ;;  %v6422_v44 = vrot.slane %v16883_v51, 4 }
 0x85c   : > { %v6352_v22 = vpop.f32.mrf.mxu3  ;;  %v16940_v11 = vsel %vm635_vm3, %v8309_v48, %v16859_v7 }
 0x85d   : > { %v6500_v47 = vld.sshfl [vmem:[#allocation1 + $0x20] sm:$0xff pattern:$0x73625140] }
 0x85e   : > { %v6502_v13 = vld.sshfl [vmem:[#allocation1] sm:$0xff pattern:$0x73625140]  ;;  %6503 = vst [vmem:[#allocation1 + $0x20] ss:$4 sm:$0xff] %v6415_v10  ;;  %v16958_v10 = vsel %vm635_vm3, %v8745_v28, %v16870_v55  ;;  %v6425_v28 = vrot.slane %v6352_v22, 4 }
 0x85f   : > { %6508 = vst [vmem:[#allocation1] ss:$4 sm:$0xff] %v6418_v42  ;;  %v8747_v42 = vrot.slane %v16870_v55, 4 }
 0x860   : > { %6509 = vst [vmem:[#allocation1 + $0x1] ss:$4 sm:$0xff] %v6419_v16  ;;  %v7120_v16 = vld [vmem:[#allocation2 + $0x4b] ss:$2 sm:$0xff] }
 0x861   : > { %6511 = vst [vmem:[#allocation1 + $0x3] ss:$4 sm:$0xff] %v16883_v51  ;;  %v16948_v7 = vsel %vm635_vm3, %v7118_v27, %v8747_v42  ;;  %v10999_v45 = vpack.i.bf16 %v7120_v16, %v7118_v27  ;;  %v6424_v42 = vrot.slane %v6352_v22, 2 }
 0x862   : > { %6510 = vst [vmem:[#allocation1 + $0x2] ss:$4 sm:$0xff] %v6420_v39  ;;  %v16952_v39 = vsel %vm635_vm3, %v7120_v16, %v8759_v25 }
 0x863   : > { %6579 = vst.msk [vmem:[#allocation2 + $0x70] sm:$0x3] %vm6566_vm1, %v6502_v13  ;;  %v8757_v13 = vrot.slane %v7120_v16, 4  ;;  %11000 = vrot.lane.b32.xlu1 %v10999_v45, %s11572_s10 }
 0x864   : > { %6504 = vst [vmem:[#allocation1 + $0x21] ss:$4 sm:$0xff] %v6416_v61  ;;  %v6355_v48 = vpop.f32.mrf.mxu3  ;;  %v6423_v61 = vrot.slane %v16883_v51, 6 }
 0x865   : > { %6505 = vst [vmem:[#allocation1 + $0x22] ss:$4 sm:$0xff] %v6417_v50  ;;  %v6428_v16 = vrot.slane %v6355_v48, 4 }
 0x866   : > { %6506 = vst [vmem:[#allocation1 + $0x23] ss:$4 sm:$0xff] %v16879_v43  ;;  %v16964_v43 = vsel %vm635_vm3, %v8757_v13, %v16867_v38  ;;  %v6426_v38 = vrot.slane %v6352_v22, 6  ;;  %v6427_v13 = vrot.slane %v6355_v48, 2 }
 0x867   : > { %6578 = vst.msk [vmem:[#allocation2 + $0x68] sm:$0xff] %vm6563_vm0, %v6500_v47  ;;  %v6421_v47 = vrot.slane %v16883_v51, 2 }
 0x869   : > { %v6513_v50 = vld.sshfl [vmem:[#allocation1] sm:$0xff pattern:$0x73625140] }
 0x86a   : > { %6515 = vst [vmem:[#allocation1] ss:$4 sm:$0xff] %v6422_v44 }
 0x86b   : > { %6516 = vst [vmem:[#allocation1 + $0x1] ss:$4 sm:$0xff] %v6423_v61 }
 0x86c   : > { %6517 = vst [vmem:[#allocation1 + $0x2] ss:$4 sm:$0xff] %v6352_v22  ;;  %v6358_v27 = vpop.f32.mrf.mxu3 }
 0x86d   : > { %6518 = vst [vmem:[#allocation1 + $0x3] ss:$4 sm:$0xff] %v6424_v42  ;;  %v6507_v55 = vld.sshfl [vmem:[#allocation1 + $0x20] sm:$0xff pattern:$0x73625140]  ;;  %v6432_v51 = vrot.slane %v6358_v27, 6 }
 0x86e   : > { %6581 = vst.msk [vmem:[#allocation2 + $0x80] sm:$0xff] %vm6563_vm0, %v6513_v50  ;;  %v6429_v42 = vrot.slane %v6355_v48, 6  ;;  %v6430_v22 = vrot.slane %v6358_v27, 2 }
 0x86f   : > { %6512 = vst [vmem:[#allocation1 + $0x20] ss:$4 sm:$0xff] %v6421_v47 }
 0x870   : > { %6580 = vst.msk [vmem:[#allocation2 + $0x78] sm:$0xff] %vm6563_vm0, %v6507_v55  ;;  %v6431_v55 = vrot.slane %v6358_v27, 4 }
 0x874   : > { %v6523_v25 = vld.sshfl [vmem:[#allocation1] sm:$0xff pattern:$0x73625140]  ;;  %v6361_v44 = vpop.f32.mrf.mxu3 }
 0x875   : > { %6583 = vst.msk [vmem:[#allocation2 + $0x90] sm:$0xff] %vm6563_vm0, %v6523_v25  ;;  %v6433_v50 = vrot.slane %v6361_v44, 2  ;;  %v6434_v25 = vrot.slane %v6361_v44, 4 }
 0x876   : > { %v6514_v45 = vld.sshfl [vmem:[#allocation1 + $0x20] sm:$0xff pattern:$0x73625140]  ;;  %6525 = vst [vmem:[#allocation1] ss:$4 sm:$0xff] %v6428_v16 }
 0x877   : > { %6519 = vst [vmem:[#allocation1 + $0x20] ss:$4 sm:$0xff] %v6425_v28  ;;  %v6435_v28 = vrot.slane %v6361_v44, 6 }
 0x878   : > { %6520 = vst [vmem:[#allocation1 + $0x21] ss:$4 sm:$0xff] %v6426_v38 }
 0x879   : > { %6521 = vst [vmem:[#allocation1 + $0x22] ss:$4 sm:$0xff] %v6355_v48  ;;  %v20574_v48 = vrot.slane %v16551_v59, 6 }
 0x87a   : > { %6522 = vst [vmem:[#allocation1 + $0x23] ss:$4 sm:$0xff] %v6427_v13  ;;  %v20576_v13 = vrot.slane %v16581_v5, 4 }
 0x87b   : > { %6582 = vst.msk [vmem:[#allocation2 + $0x88] sm:$0x3] %vm6566_vm1, %v6514_v45  ;;  %v20575_v45 = vrot.slane %v16581_v5, 2 }
 0x87d   : > { %v6526_v61 = vld.sshfl [vmem:[#allocation1] sm:$0xff pattern:$0x73625140] }
 0x87e   : > { %6532 = vst [vmem:[#allocation1] ss:$4 sm:$0xff] %v6432_v51  ;;  %v20577_v51 = vrot.slane %v16581_v5, 6 }
 0x87f   : > { %6585 = vst.msk [vmem:[#allocation2 + $0xa0] sm:$0x3] %vm6566_vm1, %v6526_v61  ;;  %v20580_v61 = vrot.slane %v16567_v37, 6 }
 0x880   : > { %6533 = vst [vmem:[#allocation1 + $0x1] ss:$4 sm:$0xff] %v6361_v44 }
 0x881   : > { %v6524_v47 = vld.sshfl [vmem:[#allocation1 + $0x20] sm:$0xff pattern:$0x73625140]  ;;  %6534 = vst [vmem:[#allocation1 + $0x2] ss:$4 sm:$0xff] %v6433_v50 }
 0x882   : > { %6527 = vst [vmem:[#allocation1 + $0x20] ss:$4 sm:$0xff] %v6429_v42  ;;  %v20583_v42 = vrot.slane %v16597_v20, 6 }
 0x883   : > { %6584 = vst.msk [vmem:[#allocation2 + $0x98] sm:$0xff] %vm6563_vm0, %v6524_v47  ;;  %v7058_v47 = vld [vmem:[#allocation2 + $0x61] ss:$2 sm:$0xff] }
 0x884   : > { %6528 = vst [vmem:[#allocation1 + $0x21] ss:$4 sm:$0xff] %v6358_v27 }
 0x885   : > { %6529 = vst [vmem:[#allocation1 + $0x22] ss:$4 sm:$0xff] %v6430_v22  ;;  %v7060_v22 = vld [vmem:[#allocation2 + $0x79] ss:$2 sm:$0xff] }
 0x886   : > { %6530 = vst [vmem:[#allocation1 + $0x23] ss:$4 sm:$0xff] %v6431_v55  ;;  %v11009_v55 = vpack.i.bf16 %v7060_v22, %v7058_v47 }
 0x887   : > { %6535 = vst [vmem:[#allocation1 + $0x3] ss:$4 sm:$0xff] %v6434_v25  ;;  %v7029_v25 = vld [vmem:[#allocation2 + $0x78] ss:$2 sm:$0xff] }
 0x888   : > { %11010 = vrot.lane.b32.xlu1 %v11009_v55, %s11572_s10 }
 0x88d   : > { %v6531_v16 = vld.sshfl [vmem:[#allocation1 + $0x20] sm:$0xff pattern:$0x73625140] }
 0x88e   : > { %6586 = vst.msk [vmem:[#allocation2 + $0xa8] sm:$0xff] %vm6563_vm0, %v6531_v16  ;;  %v6537_v38 = vld.sshfl [vmem:[#allocation1] sm:$0xff pattern:$0x73625140]  ;;  %v6081_v16 = vadd.s32 1, %v16530_v54 }
 0x88f   : > { %6536 = vst [vmem:[#allocation1 + $0x20] ss:$4 sm:$0xff] %v6435_v28  ;;  %v20584_v28 = vrot.slane %v16604_v58, 2 }
 0x890   : > { %6589 = vst [vmem:[#allocation1] ss:$4 sm:$0xff] %v16551_v59  ;;  %v20578_v59 = vrot.slane %v16567_v37, 2  ;;  %vm6084_vm2 = vcmp.eq.s32.totalorder %v16528_v1, %v6081_v16  ;;  %vm6083_vm4 = vcmp.eq.s32.totalorder %v16533_v56, %v6081_v16  ;;  %v20586_v1 = vrot.slane %v16604_v58, 4 }
 0x891   : > { %6591 = vst [vmem:[#allocation1 + $0x1] ss:$4 sm:$0xff] %v6107_v0  ;;  %vm6082_vm5 = vcmp.eq.s32.totalorder %v16525_v29, %v6081_v16 }
 0x892   : > { %6593 = vst [vmem:[#allocation1 + $0x2] ss:$4 sm:$0xff] %v6108_v2  ;;  %v20579_v2 = vrot.slane %v16567_v37, 4 }
 0x893   : > { %6595 = vst [vmem:[#allocation1 + $0x3] ss:$4 sm:$0xff] %v20574_v48  ;;  %v17017_v48 = vld [vmem:[#allocation2 + $0x7b] ss:$2 sm:$0xff] }
 0x894   : > { %6587 = vst.msk [vmem:[#allocation2 + $0xb0] sm:$0xff] %vm6563_vm0, %v6537_v38 }
 0x896   : > { %v6538_v27 = vld.sshfl [vmem:[#allocation1 + $0x20] sm:$0xff pattern:$0x73625140] }
 0x897   : > { %6597 = vst [vmem:[#allocation1 + $0x20] ss:$4 sm:$0xff] %v16581_v5  ;;  %v20581_v5 = vrot.slane %v16597_v20, 2 }
 0x898   : > { %6599 = vst [vmem:[#allocation1 + $0x21] ss:$4 sm:$0xff] %v20575_v45  ;;  %v7092_v45 = vld [vmem:[#allocation2 + $0x7a] ss:$2 sm:$0xff] }
 0x899   : > { %6601 = vst [vmem:[#allocation1 + $0x22] ss:$4 sm:$0xff] %v20576_v13  ;;  %v20585_v13 = vmov 0.0  }
 0x89a   : > { %6603 = vst [vmem:[#allocation1 + $0x23] ss:$4 sm:$0xff] %v20577_v51  ;;  %v16989_v0 = vld.sshfl [vmem:[#allocation1] sm:$0xff pattern:$0x73625140]  ;;  %v9951_v51 = vsel %vm6084_vm2, 1.0, %v20585_v13 }
 0x89b   : > { %6606 = vst [vmem:[#allocation1] ss:$4 sm:$0xff] %v16584_v49  ;;  %v20582_v49 = vrot.slane %v16597_v20, 4  ;;  %9973 = vmatpush.msk.msrb.mxu1 %vm6289_vm11, %v9951_v51  ;;  %10006 = vmatpush.msk.msrb.mxu2 %vm6289_vm11, %v9951_v51  ;;  %v20589_v13 = vmov 1.0   ;;  %vm9674_vm11 = vcmask 195584  }
 0x89c   : > { %6607 = vst [vmem:[#allocation1 + $0x1] ss:$4 sm:$0xff] %v16567_v37  ;;  %v7027_v37 = vld [vmem:[#allocation2 + $0x60] ss:$2 sm:$0xff] }
 0x89d   : > { %6608 = vst [vmem:[#allocation1 + $0x2] ss:$4 sm:$0xff] %v20578_v59  ;;  %v11004_v38 = vpack.i.bf16 %v7029_v25, %v7027_v37  ;;  %v7887_v59 = vrot.slane %v7060_v22, 4  ;;  %9974 = vmatpush.msk.msrb.mxu1 %vm6083_vm4, %v20589_v13  ;;  %10007 = vmatpush.msk.msrb.mxu2 %vm6083_vm4, %v20589_v13 }
 0x89e   : > { %6609 = vst [vmem:[#allocation1 + $0x3] ss:$4 sm:$0xff] %v20579_v2 }
 0x89f   : > { %6588 = vst.msk [vmem:[#allocation2 + $0xb8] sm:$0x3] %vm6566_vm1, %v6538_v27  ;;  %11005 = vrot.lane.b32.xlu2 %v11004_v38, %s11572_s10  ;;  %v7090_v27 = vld [vmem:[#allocation2 + $0x62] ss:$2 sm:$0xff]  ;;  %9975 = vmatpush.msk.msrb.mxu1 %vm6082_vm5, %v20589_v13 }
 0x8a0   : > { %v11014_v2 = vpack.i.bf16 %v7092_v45, %v7090_v27  ;;  %9976 = vmatmul.msk.f32.vlgmr.msrb.gmra.mxu1 %vm6252_vm12, %v16989_v0  ;;  %10008 = vmatpush.msk.msrb.mxu2 %vm6082_vm5, %v20589_v13 }
 0x8a1   : > { %v16998_v44 = vld.sshfl [vmem:[#allocation1 + $0x20] sm:$0xff pattern:$0x73625140] }
 0x8a2   : > { %6610 = vst [vmem:[#allocation1 + $0x20] ss:$4 sm:$0xff] %v20580_v61  ;;  %v17028_v61 = vld [vmem:[#allocation2 + $0x91] ss:$2 sm:$0xff]  ;;  %11015 = vrot.lane.b32.xlu0 %v11014_v2, %s11572_s10 }
 0x8a3   : > { %6611 = vst [vmem:[#allocation1 + $0x21] ss:$4 sm:$0xff] %v16597_v20  ;;  %v7875_v20 = vrot.slane %v7058_v47, 4 }
 0x8a4   : > { %6612 = vst [vmem:[#allocation1 + $0x22] ss:$4 sm:$0xff] %v20581_v5  ;;  %v7427_v5 = vrot.slane %v7027_v37, 4 }
 0x8a5   : > { %6613 = vst [vmem:[#allocation1 + $0x23] ss:$4 sm:$0xff] %v20582_v49  ;;  %v17007_v50 = vld.sshfl [vmem:[#allocation1] sm:$0xff pattern:$0x73625140]  ;;  %v17039_v55 = vsel %vm635_vm3, %v17028_v61, %v7875_v20 }
 0x8a6   : > { %6616 = vst [vmem:[#allocation1] ss:$4 sm:$0xff] %v20583_v42  ;;  %v17034_v49 = vld [vmem:[#allocation2 + $0xa9] ss:$2 sm:$0xff]  ;;  %v7873_v42 = vrot.slane %v17028_v61, 4 }
 0x8a7   : > { %6617 = vst [vmem:[#allocation1 + $0x1] ss:$4 sm:$0xff] %v16607_v9  ;;  %v17021_v9 = vld [vmem:[#allocation2 + $0x63] ss:$2 sm:$0xff]  ;;  %v7885_v51 = vrot.slane %v17034_v49, 4 }
 0x8a8   : > { %6618 = vst [vmem:[#allocation1 + $0x2] ss:$4 sm:$0xff] %v16604_v58  ;;  %v11019_v38 = vpack.i.bf16 %v17017_v48, %v17021_v9  ;;  %v17052_v20 = vsel %vm635_vm3, %v7873_v42, %v7058_v47  ;;  %v7439_v47 = vrot.slane %v7029_v25, 4  ;;  %v8771_v29 = vrot.slane %v17021_v9, 4  ;;  %9977 = vmatmul.msk.f32.gmra.mxu1 %vm6252_vm12, %v16998_v44 }
 0x8a9   : > { %6619 = vst [vmem:[#allocation1 + $0x3] ss:$4 sm:$0xff] %v20584_v28  ;;  %v20588_v28 = vrot.slane %v16604_v58, 6  ;;  %v17056_v58 = vsel %vm635_vm3, %v17034_v49, %v7887_v59  ;;  %v17072_v59 = vsel %vm635_vm3, %v7885_v51, %v7060_v22  ;;  %v7096_v22 = vld [vmem:[#allocation2 + $0xaa] ss:$2 sm:$0xff]  ;;  %v20600_v44 = vrot.slane %v16667_v62, 4 }
 0x8aa   : > { %20587 = vst [vmem:[#allocation58_spill] sm:$0xff] %v17039_v55  ;;  %v20593_v55 = vrot.slane %v16632_v26, 2  ;;  %11020 = vrot.lane.b32.xlu2 %v11019_v38, %s11572_s10  ;;  %v7128_v38 = vld [vmem:[#allocation2 + $0xab] ss:$2 sm:$0xff] }
 0x8ab   : > { %20590 = vst [vmem:[#allocation48_spill] sm:$0xff] %v17052_v20  ;;  %v20595_v20 = vrot.slane %v16632_v26, 6 }
 0x8ac   : > { %v17025_v54 = vld.sshfl [vmem:[#allocation1 + $0x20] sm:$0xff pattern:$0x73625140]  ;;  %20591 = vst [vmem:[#allocation66_spill] sm:$0xff] %v17056_v58 }
 0x8ad   : > { %6620 = vst [vmem:[#allocation1 + $0x20] ss:$4 sm:$0xff] %v20586_v1  ;;  %v7031_v1 = vld [vmem:[#allocation2 + $0x90] ss:$2 sm:$0xff] }
 0x8ae   : > { %6621 = vst [vmem:[#allocation1 + $0x21] ss:$4 sm:$0xff] %v20588_v28  ;;  %v7033_v28 = vld [vmem:[#allocation2 + $0xa8] ss:$2 sm:$0xff]  ;;  %v7425_v53 = vrot.slane %v7031_v1, 4  ;;  %v17059_v2 = vsel %vm635_vm3, %v7031_v1, %v7427_v5  ;;  %v20594_v5 = vrot.slane %v16632_v26, 4 }
 0x8af   : > { %6622 = vst [vmem:[#allocation1 + $0x22] ss:$4 sm:$0xff] %v16632_v26  ;;  %v7437_v42 = vrot.slane %v7033_v28, 4  ;;  %v11024_v58 = vpack.i.bf16 %v7033_v28, %v7031_v1  ;;  %v17084_v36 = vsel %vm635_vm3, %v7033_v28, %v7439_v47 }
 0x8b0   : > { %20592 = vst [vmem:[#allocation78_spill] sm:$0xff] %v17059_v2  ;;  %v17066_v60 = vld.sshfl [vmem:[#allocation1] sm:$0xff pattern:$0x73625140]  ;;  %v17079_v56 = vsel %vm635_vm3, %v7425_v53, %v7027_v37  ;;  %v8323_v2 = vrot.slane %v7090_v27, 4  ;;  %v8335_v53 = vrot.slane %v7092_v45, 4  ;;  %9978 = vmatmul.msk.f32.gmra.mxu1 %vm6252_vm12, %v17007_v50  ;;  %v17167_v50 = vpop.permute.xlu1 %10975 }
 0x8b1   : > { %6623 = vst [vmem:[#allocation1 + $0x23] ss:$4 sm:$0xff] %v20593_v55  ;;  %v7094_v55 = vld [vmem:[#allocation2 + $0x92] ss:$2 sm:$0xff]  ;;  %v17092_v0 = vsel %vm635_vm3, %v7437_v42, %v7029_v25  ;;  %v7126_v37 = vld [vmem:[#allocation2 + $0x93] ss:$2 sm:$0xff]  ;;  %11025 = vrot.lane.b32.xlu0 %v11024_v58, %s11572_s10 }
 0x8b2   : > { %6626 = vst [vmem:[#allocation1] ss:$4 sm:$0xff] %v20594_v5  ;;  %v8321_v26 = vrot.slane %v7094_v55, 4  ;;  %v17096_v51 = vsel %vm635_vm3, %v7094_v55, %v8323_v2  ;;  %v11034_v1 = vpack.i.bf16 %v7096_v22, %v7094_v55  ;;  %v8769_v13 = vrot.slane %v7126_v37, 4 }
 0x8b3   : > { %6627 = vst [vmem:[#allocation1 + $0x1] ss:$4 sm:$0xff] %v20595_v20  ;;  %v8333_v20 = vrot.slane %v7096_v22, 4  ;;  %v8783_v2 = vrot.slane %v17017_v48, 4  ;;  %v17116_v47 = vsel %vm635_vm3, %v7126_v37, %v8771_v29  ;;  %v20596_v5 = vrot.slane %v16658_v41, 2 }
 0x8b4   : > { %6628 = vst [vmem:[#allocation1 + $0x2] ss:$4 sm:$0xff] %v16652_v17  ;;  %v17100_v16 = vsel %vm635_vm3, %v8321_v26, %v7090_v27  ;;  %v17103_v17 = vsel %vm635_vm3, %v7096_v22, %v8335_v53  ;;  %11035 = vrot.lane.b32.xlu1 %v11034_v1, %s11572_s10  ;;  %v11029_v27 = vpack.i.bf16 %v17034_v49, %v17028_v61  ;;  %v20597_v42 = vrot.slane %v16658_v41, 4 }
 0x8b5   : > { %6629 = vst [vmem:[#allocation1 + $0x3] ss:$4 sm:$0xff] %v16658_v41  ;;  %v17108_v25 = vsel %vm635_vm3, %v8333_v20, %v7092_v45  ;;  %v17122_v58 = vsel %vm635_vm3, %v8769_v13, %v17021_v9  ;;  %v8781_v45 = vrot.slane %v7128_v38, 4  ;;  %v17129_v55 = vsel %vm635_vm3, %v7128_v38, %v8783_v2 }
 0x8b6   : > { %v20598_v61 = vrot.slane %v16658_v41, 6  ;;  %v11039_v49 = vpack.i.bf16 %v7128_v38, %v7126_v37  ;;  %11030 = vrot.lane.b32.xlu2 %v11029_v27, %s11572_s10  ;;  %v20599_v53 = vrot.slane %v16667_v62, 2  ;;  %v20601_v41 = vrot.slane %v16667_v62, 6  ;;  %20606 = vst [vmem:[#allocation32_spill] sm:$0xff] %v17167_v50 }
 0x8b7   : > { %v17135_v22 = vsel %vm635_vm3, %v8781_v45, %v17017_v48  ;;  %v20602_v26 = vrot.slane %v16693_v34, 2  ;;  %v20603_v37 = vrot.slane %v16693_v34, 4  ;;  %v20607_v20 = vrot.slane %v16700_v33, 4 }
 0x8b8   : > { %v17110_v28 = vld.sshfl [vmem:[#allocation1 + $0x20] sm:$0xff pattern:$0x73625140]  ;;  %9979 = vmatmul.msk.f32.gmra.mxu1 %vm6252_vm12, %v17025_v54  ;;  %v20608_v29 = vrot.slane %v16700_v33, 6  ;;  %v20609_v2 = vrot.slane %v16726_v14, 2  ;;  %v20610_v27 = vrot.slane %v16726_v14, 4 }
 0x8b9   : > { %6630 = vst [vmem:[#allocation1 + $0x20] ss:$4 sm:$0xff] %v20596_v5  ;;  %11040 = vrot.lane.b32.xlu0 %v11039_v49, %s11572_s10  ;;  %v20611_v45 = vrot.slane %v16726_v14, 6  ;;  %v20612_v49 = vrot.slane %v16735_v40, 2 }
 0x8ba   : > { %6631 = vst [vmem:[#allocation1 + $0x21] ss:$4 sm:$0xff] %v20597_v42 }
 0x8bb   : > { %6632 = vst [vmem:[#allocation1 + $0x22] ss:$4 sm:$0xff] %v20598_v61 }
 0x8bc   : > { %6633 = vst [vmem:[#allocation1 + $0x23] ss:$4 sm:$0xff] %v16667_v62  ;;  %v17138_v9 = vld.sshfl [vmem:[#allocation1] sm:$0xff pattern:$0x73625140]  ;;  %v20604_v62 = vrot.slane %v16693_v34, 6 }
 0x8bd   : > { %6636 = vst [vmem:[#allocation1] ss:$4 sm:$0xff] %v20599_v53 }
 0x8be   : > { %6637 = vst [vmem:[#allocation1 + $0x1] ss:$4 sm:$0xff] %v20600_v44 }
 0x8bf   : > { %6638 = vst [vmem:[#allocation1 + $0x2] ss:$4 sm:$0xff] %v20601_v41 }
 0x8c0   : > { %6639 = vst [vmem:[#allocation1 + $0x3] ss:$4 sm:$0xff] %v16688_v6  ;;  %v20605_v6 = vrot.slane %v16700_v33, 2  ;;  %9980 = vmatmul.msk.f32.gmra.mxu1 %vm6252_vm12, %v17066_v60  ;;  %v20613_v60 = vrot.slane %v16735_v40, 4 }
 0x8c3   : > { %v17151_v48 = vld.sshfl [vmem:[#allocation1 + $0x20] sm:$0xff pattern:$0x73625140] }
 0x8c4   : > { %6640 = vst [vmem:[#allocation1 + $0x20] ss:$4 sm:$0xff] %v16693_v34  ;;  %v10966_v34 = vpop.permute.xlu0 %10965 }
 0x8c5   : > { %6641 = vst [vmem:[#allocation1 + $0x21] ss:$4 sm:$0xff] %v20602_v26  ;;  %v10968_v13 = vunpack.i.h.bf16 %v10966_v34  ;;  %v10967_v5 = vunpack.i.l.bf16 %v10966_v34 }
 0x8c6   : > { %6642 = vst [vmem:[#allocation1 + $0x22] ss:$4 sm:$0xff] %v20603_v37 }
 0x8c7   : > { %6643 = vst [vmem:[#allocation1 + $0x23] ss:$4 sm:$0xff] %v20604_v62  ;;  %v17160_v1 = vld.sshfl [vmem:[#allocation1] sm:$0xff pattern:$0x73625140]  ;;  %v7639_v61 = vrot.slane %v10968_v13, 4 }
 0x8c8   : > { %6646 = vst [vmem:[#allocation1] ss:$4 sm:$0xff] %v16700_v33  ;;  %v10986_v33 = vpop.permute.xlu1 %10985  ;;  %v7627_v41 = vrot.slane %v10967_v5, 4  ;;  %9981 = vmatmul.msk.f32.gmra.mxu1 %vm6252_vm12, %v17110_v28 }
 0x8c9   : > { %6647 = vst [vmem:[#allocation1 + $0x1] ss:$4 sm:$0xff] %v20605_v6  ;;  %v10987_v42 = vunpack.i.l.bf16 %v10986_v33 }
 0x8ca   : > { %6648 = vst [vmem:[#allocation1 + $0x2] ss:$4 sm:$0xff] %v20607_v20 }
 0x8cb   : > { %6649 = vst [vmem:[#allocation1 + $0x3] ss:$4 sm:$0xff] %v20608_v29  ;;  %v7625_v37 = vrot.slane %v10987_v42, 4  ;;  %v7628_v20 = vsel %vm635_vm3, %v10987_v42, %v7627_v41  ;;  %v20614_v29 = vrot.slane %v16735_v40, 6 }
 0x8cd   : > { %v7626_v6 = vsel %vm635_vm3, %v7625_v37, %v10967_v5 }
 0x8ce   : > { %v17173_v38 = vld.sshfl [vmem:[#allocation1 + $0x20] sm:$0xff pattern:$0x73625140] }
 0x8cf   : > { %6650 = vst [vmem:[#allocation1 + $0x20] ss:$4 sm:$0xff] %v16729_v19  ;;  %v10988_v19 = vunpack.i.h.bf16 %v10986_v33 }
 0x8d0   : > { %6651 = vst [vmem:[#allocation1 + $0x21] ss:$4 sm:$0xff] %v16726_v14  ;;  %9982 = vmatmul.msk.f32.gmra.mxu1 %vm6252_vm12, %v17138_v9 }
 0x8d1   : > { %6652 = vst [vmem:[#allocation1 + $0x22] ss:$4 sm:$0xff] %v20609_v2  ;;  %v7637_v53 = vrot.slane %v10988_v19, 4  ;;  %v7640_v44 = vsel %vm635_vm3, %v10988_v19, %v7639_v61  ;;  %v20618_v19 = vrot.slane %v16758_v23, 6 }
 0x8d2   : > { %v6654_v54 = vld.sshfl [vmem:[#allocation1] sm:$0xff pattern:$0x73625140]  ;;  %6653 = vst [vmem:[#allocation1 + $0x23] ss:$4 sm:$0xff] %v20610_v27  ;;  %v7648_v26 = vperm.slane %v7640_v44, %v11869_v32  ;;  %v20615_v27 = vrot.slane %v16758_v23, 2 }
 0x8d3   : > { %9986 = vmatmul.msk.f32.vlgmr.msrb.gmra.mxu2 %vm6252_vm12, %v6654_v54  ;;  %6656 = vst [vmem:[#allocation1] ss:$4 sm:$0xff] %v20611_v45  ;;  %v7638_v62 = vsel %vm635_vm3, %v7637_v53, %v10968_v13  ;;  %v7632_v13 = vperm.slane %v7626_v6, %v11869_v32  ;;  %v7636_v54 = vperm.slane %v7628_v20, %v11869_v32  ;;  %v10981_v53 = vpop.permute.xlu0 %10980  ;;  %v20623_v44 = vrot.slane %v16775_v24, 4 }
 0x8d4   : > { %6657 = vst [vmem:[#allocation1 + $0x1] ss:$4 sm:$0xff] %v16735_v40  ;;  %v7685_v34 = vrot.slane %v7648_v26, 4  ;;  %v7644_v2 = vperm.slane %v7638_v62, %v11869_v32  ;;  %v20616_v40 = vrot.slane %v16758_v23, 4  ;;  %v10983_v41 = vunpack.i.h.bf16 %v10981_v53 }
 0x8d5   : > { %6658 = vst [vmem:[#allocation1 + $0x2] ss:$4 sm:$0xff] %v20612_v49  ;;  %v7675_v5 = vrot.slane %v7632_v13, 4  ;;  %v10982_v37 = vunpack.i.l.bf16 %v10981_v53  ;;  %v11001_v62 = vpop.permute.xlu1 %11000  ;;  %v20625_v20 = vrot.slane %v16792_v4, 2 }
 0x8d6   : > { %6659 = vst [vmem:[#allocation1 + $0x3] ss:$4 sm:$0xff] %v20613_v60  ;;  %v7673_v33 = vrot.slane %v7644_v2, 4  ;;  %v17211_v45 = vsel %vm635_vm3, %v7685_v34, %v7636_v54  ;;  %v20622_v60 = vrot.slane %v16775_v24, 2  ;;  %v8983_v6 = vrot.slane %v10983_v41, 4 }
 0x8d7   : > { %20617 = vst [vmem:[#allocation35_spill] sm:$0xff] %v17211_v45  ;;  %v17220_v61 = vsel %vm635_vm3, %v7644_v2, %v7675_v5  ;;  %v8971_v9 = vrot.slane %v10982_v37, 4  ;;  %v11002_v34 = vunpack.i.l.bf16 %v11001_v62 }
 0x8d8   : > { %v17216_v42 = vsel %vm635_vm3, %v7673_v33, %v7632_v13  ;;  %20620 = vst [vmem:[#allocation40_spill] sm:$0xff] %v17220_v61  ;;  %9983 = vmatmul.msk.f32.gmra.mxu1 %vm6252_vm12, %v17151_v48 }
 0x8d9   : > { %v6655_v14 = vld.sshfl [vmem:[#allocation1 + $0x20] sm:$0xff pattern:$0x73625140]  ;;  %20619 = vst [vmem:[#allocation27_spill] sm:$0xff] %v17216_v42 }
 0x8da   : > { %6660 = vst [vmem:[#allocation1 + $0x20] ss:$4 sm:$0xff] %v20614_v29  ;;  %v11003_v29 = vunpack.i.h.bf16 %v11001_v62  ;;  %v20635_v62 = vrot.slane %v16815_v63, 6 }
 0x8db   : > { %9987 = vmatmul.msk.f32.gmra.mxu2 %vm6252_vm12, %v6655_v14  ;;  %6661 = vst [vmem:[#allocation1 + $0x21] ss:$4 sm:$0xff] %v16762_v3  ;;  %v7687_v3 = vrot.slane %v7636_v54, 4  ;;  %v20624_v14 = vrot.slane %v16775_v24, 6  ;;  %v8969_v54 = vrot.slane %v11002_v34, 4 }
 0x8dc   : > { %6662 = vst [vmem:[#allocation1 + $0x22] ss:$4 sm:$0xff] %v16758_v23  ;;  %v8981_v2 = vrot.slane %v11003_v29, 4  ;;  %v8984_v13 = vsel %vm635_vm3, %v11003_v29, %v8983_v6  ;;  %v17284_v6 = vpop.permute.xlu2 %10970 }
 0x8dd   : > { %6663 = vst [vmem:[#allocation1 + $0x23] ss:$4 sm:$0xff] %v20615_v27  ;;  %v6664_v28 = vld.sshfl [vmem:[#allocation1] sm:$0xff pattern:$0x73625140]  ;;  %v17223_v49 = vsel %vm635_vm3, %v7648_v26, %v7687_v3  ;;  %v8972_v27 = vsel %vm635_vm3, %v11002_v34, %v8971_v9  ;;  %v8992_v48 = vperm.slane %v8984_v13, %v11869_v32 }
 0x8de   : > { %6666 = vst [vmem:[#allocation1] ss:$4 sm:$0xff] %v20616_v40  ;;  %v8982_v33 = vsel %vm635_vm3, %v8981_v2, %v10983_v41  ;;  %v8970_v40 = vsel %vm635_vm3, %v8969_v54, %v10982_v37  ;;  %v20632_v41 = vrot.slane %v16815_v63, 2 }
 0x8df   : > { %6667 = vst [vmem:[#allocation1 + $0x1] ss:$4 sm:$0xff] %v20618_v19  ;;  %v17253_v5 = vperm.slane %v8982_v33, %v11869_v32 }
 0x8e0   : > { %6668 = vst [vmem:[#allocation1 + $0x2] ss:$4 sm:$0xff] %v16775_v24  ;;  %v20626_v24 = vrot.slane %v16792_v4, 4  ;;  %9984 = vmatmul.msk.f32.gmra.mxu1 %vm6252_vm12, %v17160_v1 }
 0x8e1   : > { %20621 = vst [vmem:[#allocation101_spill] sm:$0xff] %v17223_v49  ;;  %v9017_v19 = vrot.slane %v17253_v5, 4 }
 0x8e2   : > { %6669 = vst [vmem:[#allocation1 + $0x3] ss:$4 sm:$0xff] %v20622_v60  ;;  %v17257_v60 = vperm.slane %v8970_v40, %v11869_v32 }
 0x8e3   : > { %9988 = vmatmul.msk.f32.gmra.mxu2 %vm6252_vm12, %v6664_v28  ;;  %v8980_v28 = vperm.slane %v8972_v27, %v11869_v32  ;;  %20628 = vst [vmem:[#allocation87_spill] sm:$0xff] %v17253_v5 }
 0x8e4   : > { %v6665_v23 = vld.sshfl [vmem:[#allocation1 + $0x20] sm:$0xff pattern:$0x73625140]  ;;  %20629 = vst [vmem:[#allocation98_spill] sm:$0xff] %v17257_v60  ;;  %v17272_v37 = vsel %vm635_vm3, %v9017_v19, %v17257_v60  ;;  %v17286_v9 = vpop.permute.xlu2 %10995 }
 0x8e5   : > { %6670 = vst [vmem:[#allocation1 + $0x20] ss:$4 sm:$0xff] %v20623_v44  ;;  %v9031_v3 = vrot.slane %v8980_v28, 4 }
 0x8e6   : > { %6671 = vst [vmem:[#allocation1 + $0x21] ss:$4 sm:$0xff] %v20624_v14  ;;  %v20634_v14 = vrot.slane %v16815_v63, 4 }
 0x8e7   : > { %6672 = vst [vmem:[#allocation1 + $0x22] ss:$4 sm:$0xff] %v16802_v57  ;;  %v20627_v57 = vrot.slane %v16792_v4, 6 }
 0x8e8   : > { %6673 = vst [vmem:[#allocation1 + $0x23] ss:$4 sm:$0xff] %v16792_v4  ;;  %v9029_v4 = vrot.slane %v8992_v48, 4  ;;  %9985 = vmatmul.msk.f32.gmra.mxu1 %vm6252_vm12, %v17173_v38 }
 0x8e9   : > { %v6674_v26 = vld.sshfl [vmem:[#allocation1] sm:$0xff pattern:$0x73625140]  ;;  %20633 = vst [vmem:[#allocation86_spill] sm:$0xff] %v17272_v37 }
 0x8ea   : > { %6676 = vst [vmem:[#allocation1] ss:$4 sm:$0xff] %v20625_v20  ;;  %v17260_v53 = vsel %vm635_vm3, %v9029_v4, %v8980_v28  ;;  %v17288_v20 = vpop.permute.xlu0 %10990 }
 0x8eb   : > { %9989 = vmatmul.msk.f32.gmra.mxu2 %vm6252_vm12, %v6665_v23  ;;  %6677 = vst [vmem:[#allocation1 + $0x1] ss:$4 sm:$0xff] %v20626_v24  ;;  %v17263_v23 = vsel %vm635_vm3, %v8992_v48, %v9031_v3 }
 0x8ec   : > { %6678 = vst [vmem:[#allocation1 + $0x2] ss:$4 sm:$0xff] %v20627_v57 }
 0x8ed   : > { %6679 = vst [vmem:[#allocation1 + $0x3] ss:$4 sm:$0xff] %v16815_v63 }
 0x8ee   : > { %20630 = vst [vmem:[#allocation79_spill] sm:$0xff] %v17260_v53 }
 0x8ef   : > { %20631 = vst [vmem:[#allocation96_spill] sm:$0xff] %v17263_v23  ;;  %v6675_v44 = vld.sshfl [vmem:[#allocation1 + $0x20] sm:$0xff pattern:$0x73625140] }
 0x8f0   : > { %6680 = vst [vmem:[#allocation1 + $0x20] ss:$4 sm:$0xff] %v20632_v41 }
 0x8f1   : > { %6681 = vst [vmem:[#allocation1 + $0x21] ss:$4 sm:$0xff] %v20634_v14 }
 0x8f2   : > { %6682 = vst [vmem:[#allocation1 + $0x22] ss:$4 sm:$0xff] %v20635_v62 }
 0x8f3   : > { %9990 = vmatmul.msk.f32.gmra.mxu2 %vm6252_vm12, %v6674_v26  ;;  %6683 = vst [vmem:[#allocation1 + $0x23] ss:$4 sm:$0xff] %v16829_v52 }
 0x8f4   : > { %v6684_v1 = vld.sshfl [vmem:[#allocation1] sm:$0xff pattern:$0x73625140]  ;;  %20636 = vst [vmem:[#allocation31_spill] sm:$0xff] %v17284_v6 }
 0x8f5   : > { %20637 = vst [vmem:[#allocation92_spill] sm:$0xff] %v17286_v9  ;;  %v20660_v9 = vld [vmem:[#allocation93_spill] sm:$0xff] }
 0x8f6   : > { %20638 = vst [vmem:[#allocation89_spill] sm:$0xff] %v17288_v20  ;;  %v17501_v20 = vperm.slane %v20660_v9, %v11869_v32 }
 0x8f8   : > { %20661 = vst [vmem:[#allocation37_spill] sm:$0xff] %v17501_v20 }
 0x8f9   : > { %v11006_v63 = vpop.permute.xlu2 %11005 }
 0x8fa   : > { %v6685_v26 = vld.sshfl [vmem:[#allocation1 + $0x20] sm:$0xff pattern:$0x73625140]  ;;  %v11008_v52 = vunpack.i.h.bf16 %v11006_v63  ;;  %v11007_v34 = vunpack.i.l.bf16 %v11006_v63 }
 0x8fb   : > { %9991 = vmatmul.msk.f32.gmra.mxu2 %vm6252_vm12, %v6675_v44 }
 0x8fc   : > { %v7663_v24 = vrot.slane %v11008_v52, 4  ;;  %v7651_v57 = vrot.slane %v11007_v34, 4 }
 0x903   : > { %9992 = vmatmul.msk.f32.gmra.mxu2 %vm6252_vm12, %v6684_v1 }
 0x904   : > { %v11021_v54 = vpop.permute.xlu2 %11020 }
 0x905   : > { %v11023_v3 = vunpack.i.h.bf16 %v11021_v54  ;;  %v11022_v63 = vunpack.i.l.bf16 %v11021_v54 }
 0x90b   : > { %9993 = vmatmul.msk.f32.gmra.mxu2 %vm6252_vm12, %v6685_v26 }
 0x914   : > { %v17290_v29 = vpop.permute.xlu0 %11015 }
 0x915   : > { %20639 = vst [vmem:[#allocation103_spill] sm:$0xff] %v17290_v29  ;;  %v8752_v29 = vperm.slane %v16958_v10, %v11869_v32  ;;  %v7424_v10 = vperm.slane %v16922_v12, %v11869_v32 }
 0x91d   : > { %v6742_v26 = vpop.f32.mrf.mxu1 }
 0x91e   : > { %6868 = vst [vmem:[#allocation1] ss:$4 sm:$0xff] %v6742_v26  ;;  %v6814_v54 = vrot.slane %v6742_v26, 2 }
 0x920   : > { %6870 = vst [vmem:[#allocation1 + $0x1] ss:$4 sm:$0xff] %v6814_v54 }
 0x923   : > { %v11026_v38 = vpop.permute.xlu0 %11025 }
 0x924   : > { %v11028_v2 = vunpack.i.h.bf16 %v11026_v38  ;;  %v11027_v13 = vunpack.i.l.bf16 %v11026_v38 }
 0x926   : > { %v7661_v27 = vrot.slane %v11028_v2, 4  ;;  %v7664_v48 = vsel %vm635_vm3, %v11028_v2, %v7663_v24  ;;  %v7649_v28 = vrot.slane %v11027_v13, 4  ;;  %v7652_v33 = vsel %vm635_vm3, %v11027_v13, %v7651_v57 }
 0x927   : > { %v7672_v40 = vperm.slane %v7664_v48, %v11869_v32  ;;  %v7660_v4 = vperm.slane %v7652_v33, %v11869_v32  ;;  %v9007_v13 = vrot.slane %v11023_v3, 4  ;;  %v8995_v33 = vrot.slane %v11022_v63, 4 }
 0x928   : > { %v7662_v19 = vsel %vm635_vm3, %v7661_v27, %v11008_v52  ;;  %v7650_v44 = vsel %vm635_vm3, %v7649_v28, %v11007_v34 }
 0x929   : > { %v7668_v41 = vperm.slane %v7662_v19, %v11869_v32  ;;  %v7709_v14 = vrot.slane %v7672_v40, 4  ;;  %v7656_v62 = vperm.slane %v7650_v44, %v11869_v32  ;;  %v7711_v1 = vrot.slane %v7660_v4, 4 }
 0x92b   : > { %v7697_v38 = vrot.slane %v7668_v41, 4  ;;  %v7699_v24 = vrot.slane %v7656_v62, 4  ;;  %v17301_v57 = vsel %vm635_vm3, %v7709_v14, %v7660_v4  ;;  %v17304_v2 = vsel %vm635_vm3, %v7672_v40, %v7711_v1  ;;  %v11041_v52 = vpop.permute.xlu0 %11040 }
 0x92c   : > { %20640 = vst [vmem:[#allocation73_spill] sm:$0xff] %v17301_v57  ;;  %v11043_v48 = vunpack.i.h.bf16 %v11041_v52  ;;  %v11042_v28 = vunpack.i.l.bf16 %v11041_v52 }
 0x92d   : > { %20641 = vst [vmem:[#allocation80_spill] sm:$0xff] %v17304_v2  ;;  %v17307_v34 = vsel %vm635_vm3, %v7697_v38, %v7656_v62  ;;  %v17310_v27 = vsel %vm635_vm3, %v7668_v41, %v7699_v24  ;;  %v6745_v62 = vpop.f32.mrf.mxu1 }
 0x92e   : > { %20642 = vst [vmem:[#allocation59_spill] sm:$0xff] %v17307_v34  ;;  %v9005_v19 = vrot.slane %v11043_v48, 4  ;;  %v9008_v44 = vsel %vm635_vm3, %v11043_v48, %v9007_v13  ;;  %v8993_v14 = vrot.slane %v11042_v28, 4  ;;  %v8996_v1 = vsel %vm635_vm3, %v11042_v28, %v8995_v33 }
 0x92f   : > { %20643 = vst [vmem:[#allocation70_spill] sm:$0xff] %v17310_v27  ;;  %v9016_v4 = vperm.slane %v9008_v44, %v11869_v32  ;;  %v9004_v24 = vperm.slane %v8996_v1, %v11869_v32  ;;  %v6815_v34 = vrot.slane %v6742_v26, 4  ;;  %v6816_v13 = vrot.slane %v6742_v26, 6 }
 0x930   : > { %v9006_v40 = vsel %vm635_vm3, %v9005_v19, %v11023_v3  ;;  %6876 = vst [vmem:[#allocation1 + $0x20] ss:$4 sm:$0xff] %v6745_v62  ;;  %v8994_v52 = vsel %vm635_vm3, %v8993_v14, %v11022_v63  ;;  %v6817_v48 = vrot.slane %v6745_v62, 2  ;;  %v6818_v19 = vrot.slane %v6745_v62, 4 }
 0x931   : > { %v17317_v38 = vperm.slane %v9006_v40, %v11869_v32  ;;  %v9053_v41 = vrot.slane %v9016_v4, 4  ;;  %v17323_v3 = vperm.slane %v8994_v52, %v11869_v32  ;;  %v9055_v33 = vrot.slane %v9004_v24, 4  ;;  %6872 = vst [vmem:[#allocation1 + $0x2] ss:$4 sm:$0xff] %v6815_v34 }
 0x932   : > { %v6819_v44 = vrot.slane %v6745_v62, 6  ;;  %6874 = vst [vmem:[#allocation1 + $0x3] ss:$4 sm:$0xff] %v6816_v13 }
 0x933   : > { %20644 = vst [vmem:[#allocation41_spill] sm:$0xff] %v17317_v38  ;;  %v9041_v54 = vrot.slane %v17317_v38, 4  ;;  %v17326_v28 = vsel %vm635_vm3, %v9053_v41, %v9004_v24  ;;  %v17333_v63 = vsel %vm635_vm3, %v9016_v4, %v9055_v33 }
 0x934   : > { %20645 = vst [vmem:[#allocation45_spill] sm:$0xff] %v17323_v3 }
 0x935   : > { %20646 = vst [vmem:[#allocation19_spill] sm:$0xff] %v17326_v28  ;;  %v17330_v40 = vsel %vm635_vm3, %v9041_v54, %v17323_v3  ;;  %v6748_v26 = vpop.f32.mrf.mxu1 }
 0x936   : > { %20647 = vst [vmem:[#allocation36_spill] sm:$0xff] %v17330_v40  ;;  %v6820_v1 = vrot.slane %v6748_v26, 2  ;;  %v6821_v41 = vrot.slane %v6748_v26, 4  ;;  %v6822_v62 = vrot.slane %v6748_v26, 6 }
 0x937   : > { %20648 = vst [vmem:[#allocation44_spill] sm:$0xff] %v17333_v63 }
 0x938   : > { %6878 = vst [vmem:[#allocation1 + $0x21] ss:$4 sm:$0xff] %v6817_v48 }
 0x939   : > { %6880 = vst [vmem:[#allocation1 + $0x22] ss:$4 sm:$0xff] %v6818_v19  ;;  %v6883_v14 = vld.sshfl [vmem:[#allocation1] sm:$0xff pattern:$0x73625140] }
 0x93a   : > { %6882 = vst [vmem:[#allocation1 + $0x23] ss:$4 sm:$0xff] %v6819_v44 }
 0x93b   : > { %6995 = vst.msk [vmem:[#allocation3] sm:$0xff] %vm6563_vm0, %v6883_v14 }
 0x93c   : > { %6885 = vst [vmem:[#allocation1] ss:$4 sm:$0xff] %v6748_v26 }
 0x93d   : > { %v6751_v24 = vpop.f32.mrf.mxu1 }
 0x93e   : > { %v6823_v4 = vrot.slane %v6751_v24, 2  ;;  %v6824_v52 = vrot.slane %v6751_v24, 4  ;;  %v6825_v48 = vrot.slane %v6751_v24, 6 }
 0x941   : > { %v6884_v34 = vld.sshfl [vmem:[#allocation1 + $0x20] sm:$0xff pattern:$0x73625140] }
 0x942   : > { %6996 = vst.msk [vmem:[#allocation3 + $0x8] sm:$0xff] %vm6563_vm0, %v6884_v34 }
 0x943   : > { %6887 = vst [vmem:[#allocation1 + $0x20] ss:$4 sm:$0xff] %v6820_v1  ;;  %v6886_v13 = vld.sshfl [vmem:[#allocation1] sm:$0xff pattern:$0x73625140] }
 0x944   : > { %6888 = vst [vmem:[#allocation1 + $0x21] ss:$4 sm:$0xff] %v6821_v41 }
 0x945   : > { %6889 = vst [vmem:[#allocation1 + $0x22] ss:$4 sm:$0xff] %v6822_v62  ;;  %v6754_v54 = vpop.f32.mrf.mxu1 }
 0x946   : > { %6890 = vst [vmem:[#allocation1 + $0x23] ss:$4 sm:$0xff] %v6751_v24  ;;  %v6826_v33 = vrot.slane %v6754_v54, 2  ;;  %v6827_v26 = vrot.slane %v6754_v54, 4  ;;  %v6828_v1 = vrot.slane %v6754_v54, 6 }
 0x947   : > { %6997 = vst.msk [vmem:[#allocation3 + $0x10] sm:$0x3] %vm6566_vm1, %v6886_v13 }
 0x948   : > { %6892 = vst [vmem:[#allocation1] ss:$4 sm:$0xff] %v6823_v4  ;;  %v17343_v4 = vperm.slane %v16897_v31, %v11869_v32  ;;  %v7408_v31 = vperm.slane %v16910_v35, %v11869_v32 }
 0x949   : > { %6893 = vst [vmem:[#allocation1 + $0x1] ss:$4 sm:$0xff] %v6824_v52  ;;  %v17345_v13 = vld [vmem:[#allocation3] ss:$2 sm:$0xff] }
 0x94a   : > { %6894 = vst [vmem:[#allocation1 + $0x2] ss:$4 sm:$0xff] %v6825_v48  ;;  %v8308_v48 = vperm.slane %v16925_v18, %v11869_v32 }
 0x94b   : > { %6895 = vst [vmem:[#allocation1 + $0x3] ss:$4 sm:$0xff] %v6754_v54 }
 0x94c   : > { %v8359_v35 = vrot.slane %v8308_v48, 4 }
 0x94d   : > { %v6891_v19 = vld.sshfl [vmem:[#allocation1 + $0x20] sm:$0xff pattern:$0x73625140]  ;;  %v6757_v44 = vpop.f32.mrf.mxu1 }
 0x94e   : > { %6998 = vst.msk [vmem:[#allocation3 + $0x18] sm:$0xff] %vm6563_vm0, %v6891_v19  ;;  %v6829_v41 = vrot.slane %v6757_v44, 2  ;;  %v6830_v34 = vrot.slane %v6757_v44, 4  ;;  %v6831_v24 = vrot.slane %v6757_v44, 6  ;;  %v17351_v19 = vld [vmem:[#allocation3 + $0x1] ss:$2 sm:$0xff] }
 0x94f   : > { %6896 = vst [vmem:[#allocation1 + $0x20] ss:$4 sm:$0xff] %v6826_v33  ;;  %v17374_v40 = vld [vmem:[#allocation3 + $0x2] ss:$2 sm:$0xff] }
 0x952   : > { %v6897_v14 = vld.sshfl [vmem:[#allocation1] sm:$0xff pattern:$0x73625140] }
 0x953   : > { %6999 = vst.msk [vmem:[#allocation3 + $0x20] sm:$0xff] %vm6563_vm0, %v6897_v14 }
 0x954   : > { %6899 = vst [vmem:[#allocation1] ss:$4 sm:$0xff] %v6827_v26 }
 0x955   : > { %6900 = vst [vmem:[#allocation1 + $0x1] ss:$4 sm:$0xff] %v6828_v1  ;;  %v6760_v52 = vpop.f32.mrf.mxu1  ;;  %v8320_v1 = vperm.slane %v16929_v30, %v11869_v32  ;;  %v8316_v30 = vperm.slane %v16940_v11, %v11869_v32  ;;  %v8764_v11 = vperm.slane %v16964_v43, %v11869_v32 }
 0x956   : > { %v6898_v62 = vld.sshfl [vmem:[#allocation1 + $0x20] sm:$0xff pattern:$0x73625140]  ;;  %6901 = vst [vmem:[#allocation1 + $0x2] ss:$4 sm:$0xff] %v6757_v44  ;;  %v6832_v54 = vrot.slane %v6760_v52, 2  ;;  %v17394_v53 = vpop.f32.mrf.mxu2 }
 0x957   : > { %6902 = vst [vmem:[#allocation1 + $0x3] ss:$4 sm:$0xff] %v6829_v41  ;;  %v6833_v44 = vrot.slane %v6760_v52, 4  ;;  %v7899_v41 = vrot.slane %v17343_v4, 4  ;;  %v17392_v37 = vsel %vm635_vm3, %v8320_v1, %v8359_v35  ;;  %v6834_v23 = vrot.slane %v6760_v52, 6 }
 0x958   : > { %7000 = vst.msk [vmem:[#allocation3 + $0x28] sm:$0x3] %vm6566_vm1, %v6898_v62  ;;  %v8756_v62 = vperm.slane %v16948_v7, %v11869_v32  ;;  %v7420_v7 = vperm.slane %v16914_v15, %v11869_v32  ;;  %v17389_v15 = vld [vmem:[#allocation3 + $0x3] ss:$2 sm:$0xff] }
 0x959   : > { %6903 = vst [vmem:[#allocation1 + $0x20] ss:$4 sm:$0xff] %v6830_v34  ;;  %v8304_v34 = vperm.slane %v16934_v8, %v11869_v32  ;;  %v7868_v8 = vperm.slane %v16902_v46, %v11869_v32 }
 0x95a   : > { %v17349_v33 = vld [vmem:[#allocation3 + $0x18] ss:$2 sm:$0xff]  ;;  %v17355_v14 = vld [vmem:[#allocation3 + $0x19] ss:$2 sm:$0xff]  ;;  %6904 = vst [vmem:[#allocation1 + $0x21] ss:$4 sm:$0xff] %v6831_v24  ;;  %v8768_v24 = vperm.slane %v16952_v39, %v11869_v32 }
 0x95b   : > { %v11044_v26 = vpack.i.bf16 %v17349_v33, %v17345_v13  ;;  %v11049_v18 = vpack.i.bf16 %v17355_v14, %v17351_v19  ;;  %6905 = vst [vmem:[#allocation1 + $0x22] ss:$4 sm:$0xff] %v6760_v52  ;;  %v8347_v2 = vrot.slane %v8304_v34, 4  ;;  %v8807_v46 = vrot.slane %v8756_v62, 4 }
 0x95c   : > { %6906 = vst [vmem:[#allocation1 + $0x23] ss:$4 sm:$0xff] %v6832_v54  ;;  %v7451_v54 = vrot.slane %v7408_v31, 4  ;;  %v8805_v57 = vrot.slane %v8768_v24, 4  ;;  %v17406_v45 = vsel %vm635_vm3, %v7868_v8, %v7899_v41  ;;  %v7449_v35 = vrot.slane %v7420_v7, 4 }
 0x95d   : > { %11045 = vrot.lane.b32.xlu1 %v11044_v26, %s11572_s10  ;;  %11050 = vrot.lane.b32.xlu0 %v11049_v18, %s11572_s10  ;;  %v8357_v26 = vrot.slane %v8320_v1, 4  ;;  %v6763_v63 = vpop.f32.mrf.mxu1  ;;  %v17403_v61 = vsel %vm635_vm3, %v8316_v30, %v8347_v2  ;;  %v8793_v52 = vrot.slane %v8764_v11, 4 }
 0x95e   : > { %v6907_v27 = vld.sshfl [vmem:[#allocation1] sm:$0xff pattern:$0x73625140]  ;;  %v6835_v43 = vrot.slane %v6763_v63, 2  ;;  %v17409_v1 = vsel %vm635_vm3, %v7420_v7, %v7451_v54  ;;  %v6836_v42 = vrot.slane %v6763_v63, 4  ;;  %v6837_v6 = vrot.slane %v6763_v63, 6 }
 0x95f   : > { %v17380_v28 = vld [vmem:[#allocation3 + $0x1a] ss:$2 sm:$0xff]  ;;  %v17382_v39 = vld [vmem:[#allocation3 + $0x1b] ss:$2 sm:$0xff]  ;;  %6909 = vst [vmem:[#allocation1] ss:$4 sm:$0xff] %v6833_v44  ;;  %v17415_v2 = vsel %vm635_vm3, %v8357_v26, %v8308_v48  ;;  %v17418_v41 = vsel %vm635_vm3, %v8805_v57, %v8756_v62  ;;  %v7412_v54 = vperm.slane %v16905_v21, %v11869_v32 }
 0x960   : > { %v11054_v18 = vpack.i.bf16 %v17380_v28, %v17374_v40  ;;  %7001 = vst.msk [vmem:[#allocation3 + $0x30] sm:$0xff] %vm6563_vm0, %v6907_v27  ;;  %v8345_v44 = vrot.slane %v8316_v30, 4  ;;  %v11059_v49 = vpack.i.bf16 %v17382_v39, %v17389_v15  ;;  %v17400_v27 = vsel %vm635_vm3, %v8768_v24, %v8807_v46 }
 0x961   : > { %v7897_v7 = vrot.slane %v7868_v8, 4  ;;  %v7463_v62 = vrot.slane %v7412_v54, 4  ;;  %v7461_v8 = vrot.slane %v7424_v10, 4  ;;  %v7515_v46 = vrot.slane %v17345_v13, 4 }
 0x962   : > { %11055 = vrot.lane.b32.xlu2 %v11054_v18, %s11572_s10  ;;  %v17421_v30 = vsel %vm635_vm3, %v8345_v44, %v8304_v34 }
 0x963   : > { %v6908_v18 = vld.sshfl [vmem:[#allocation1 + $0x20] sm:$0xff pattern:$0x73625140]  ;;  %20649 = vst [vmem:[#allocation91_spill] sm:$0xff] %v17421_v30  ;;  %v17436_v21 = vsel %vm635_vm3, %v7897_v7, %v17343_v4  ;;  %v17448_v26 = vsel %vm635_vm3, %v7461_v8, %v7412_v54  ;;  %v7963_v4 = vrot.slane %v17351_v19, 4 }
 0x964   : > { %6911 = vst [vmem:[#allocation1 + $0x20] ss:$4 sm:$0xff] %v6834_v23  ;;  %v17431_v23 = vsel %vm635_vm3, %v8793_v52, %v8752_v29 }
 0x965   : > { %11060 = vrot.lane.b32.xlu1 %v11059_v49, %s11572_s10  ;;  %6912 = vst [vmem:[#allocation1 + $0x21] ss:$4 sm:$0xff] %v6763_v63  ;;  %v17428_v49 = vsel %vm635_vm3, %v7449_v35, %v7408_v31  ;;  %v6766_v57 = vpop.f32.mrf.mxu1  ;;  %v8795_v63 = vrot.slane %v8752_v29, 4 }
 0x966   : > { %v6910_v24 = vld.sshfl [vmem:[#allocation1] sm:$0xff pattern:$0x73625140]  ;;  %6913 = vst [vmem:[#allocation1 + $0x22] ss:$4 sm:$0xff] %v6835_v43  ;;  %v6838_v48 = vrot.slane %v6766_v57, 2 }
 0x967   : > { %6914 = vst [vmem:[#allocation1 + $0x23] ss:$4 sm:$0xff] %v6836_v42  ;;  %v6839_v34 = vrot.slane %v6766_v57, 4  ;;  %v17439_v12 = vsel %vm635_vm3, %v8764_v11, %v8795_v63  ;;  %v17441_v42 = vpop.f32.mrf.mxu2  ;;  %v6840_v31 = vrot.slane %v6766_v57, 6 }
 0x968   : > { %6916 = vst [vmem:[#allocation1] ss:$4 sm:$0xff] %v6837_v6  ;;  %v17444_v6 = vsel %vm635_vm3, %v7424_v10, %v7463_v62 }
 0x969   : > { %6917 = vst [vmem:[#allocation1 + $0x1] ss:$4 sm:$0xff] %v6766_v57 }
 0x96a   : > { %7002 = vst.msk [vmem:[#allocation3 + $0x38] sm:$0xff] %vm6563_vm0, %v6908_v18 }
 0x96b   : > { %6918 = vst [vmem:[#allocation1 + $0x2] ss:$4 sm:$0xff] %v6838_v48 }
 0x96c   : > { %6919 = vst [vmem:[#allocation1 + $0x3] ss:$4 sm:$0xff] %v6839_v34 }
 0x96d   : > { %7003 = vst.msk [vmem:[#allocation3 + $0x40] sm:$0x3] %vm6566_vm1, %v6910_v24  ;;  %v6769_v11 = vpop.f32.mrf.mxu1 }
 0x96e   : > { %v6915_v29 = vld.sshfl [vmem:[#allocation1 + $0x20] sm:$0xff pattern:$0x73625140]  ;;  %v6841_v43 = vrot.slane %v6769_v11, 2  ;;  %v6842_v24 = vrot.slane %v6769_v11, 4  ;;  %v6843_v57 = vrot.slane %v6769_v11, 6 }
 0x96f   : > { %7004 = vst.msk [vmem:[#allocation3 + $0x48] sm:$0xff] %vm6563_vm0, %v6915_v29  ;;  %v17466_v34 = vpop.f32.mrf.mxu2  ;;  %v20653_v29 = vld [vmem:[#allocation74_spill] sm:$0xff] }
 0x970   : > { %6920 = vst [vmem:[#allocation1 + $0x20] ss:$4 sm:$0xff] %v6840_v31  ;;  %v6851_v30 = vrot.slane %v17466_v34, 4 }
 0x971   : > { %v7070_v44 = vld [vmem:[#allocation3 + $0x31] ss:$2 sm:$0xff]  ;;  %v7038_v18 = vld [vmem:[#allocation3 + $0x30] ss:$2 sm:$0xff] }
 0x972   : > { %v7961_v35 = vrot.slane %v7070_v44, 4  ;;  %v17454_v52 = vsel %vm635_vm3, %v7070_v44, %v7963_v4  ;;  %v7513_v10 = vrot.slane %v7038_v18, 4  ;;  %v17457_v54 = vsel %vm635_vm3, %v7038_v18, %v7515_v46 }
 0x973   : > { %20650 = vst [vmem:[#allocation83_spill] sm:$0xff] %v17454_v52  ;;  %v6921_v7 = vld.sshfl [vmem:[#allocation1] sm:$0xff pattern:$0x73625140]  ;;  %v17475_v4 = vperm.slane %v20653_v29, %v11869_v32 }
 0x974   : > { %20651 = vst [vmem:[#allocation38_spill] sm:$0xff] %v17457_v54  ;;  %v17462_v63 = vsel %vm635_vm3, %v7961_v35, %v17351_v19  ;;  %v17464_v48 = vld [vmem:[#allocation3 + $0x33] ss:$2 sm:$0xff]  ;;  %v17470_v62 = vsel %vm635_vm3, %v7513_v10, %v17345_v13  ;;  %v6846_v35 = vrot.slane %v17394_v53, 6 }
 0x975   : > { %7005 = vst.msk [vmem:[#allocation3 + $0x50] sm:$0xff] %vm6563_vm0, %v6921_v7  ;;  %v8857_v8 = vrot.slane %v17464_v48, 4  ;;  %v20655_v19 = vld [vmem:[#allocation66_spill] sm:$0xff]  ;;  %v7975_v7 = vrot.slane %v17355_v14, 4 }
 0x976   : > { %6923 = vst [vmem:[#allocation1] ss:$4 sm:$0xff] %v6769_v11  ;;  %v17479_v46 = vperm.slane %v20655_v19, %v11869_v32  ;;  %v6844_v11 = vrot.slane %v17394_v53, 2  ;;  %v20658_v10 = vld [vmem:[#allocation78_spill] sm:$0xff] }
 0x977   : > { %20652 = vst [vmem:[#allocation90_spill] sm:$0xff] %v17470_v62  ;;  %v6922_v31 = vld.sshfl [vmem:[#allocation1 + $0x20] sm:$0xff pattern:$0x73625140]  ;;  %v17485_v13 = vsel %vm635_vm3, %v8857_v8, %v17389_v15 }
 0x978   : > { %6924 = vst [vmem:[#allocation1 + $0x1] ss:$4 sm:$0xff] %v6841_v43  ;;  %v6845_v43 = vrot.slane %v17394_v53, 4 }
 0x979   : > { %6925 = vst [vmem:[#allocation1 + $0x2] ss:$4 sm:$0xff] %v6842_v24  ;;  %v7527_v24 = vrot.slane %v17349_v33, 4 }
 0x97a   : > { %6926 = vst [vmem:[#allocation1 + $0x3] ss:$4 sm:$0xff] %v6843_v57  ;;  %v17494_v57 = vperm.slane %v20658_v10, %v11869_v32 }
 0x97b   : > { %20654 = vst [vmem:[#allocation75_spill] sm:$0xff] %v17475_v4 }
 0x97c   : > { %20656 = vst [vmem:[#allocation84_spill] sm:$0xff] %v17479_v46  ;;  %v7072_v29 = vld [vmem:[#allocation3 + $0x49] ss:$2 sm:$0xff] }
 0x97d   : > { %7006 = vst.msk [vmem:[#allocation3 + $0x58] sm:$0x3] %vm6566_vm1, %v6922_v31  ;;  %v7040_v31 = vld [vmem:[#allocation3 + $0x48] ss:$2 sm:$0xff]  ;;  %v11069_v19 = vpack.i.bf16 %v7072_v29, %v7070_v44  ;;  %v7973_v8 = vrot.slane %v7072_v29, 4  ;;  %v17497_v54 = vsel %vm635_vm3, %v7072_v29, %v7975_v7 }
 0x97e   : > { %20657 = vst [vmem:[#allocation97_spill] sm:$0xff] %v17485_v13  ;;  %v11064_v52 = vpack.i.bf16 %v7040_v31, %v7038_v18  ;;  %v7525_v50 = vrot.slane %v7040_v31, 4 }
 0x97f   : > { %6927 = vst [vmem:[#allocation1 + $0x20] ss:$4 sm:$0xff] %v17394_v53  ;;  %v17504_v53 = vsel %vm635_vm3, %v7040_v31, %v7527_v24  ;;  %v17514_v18 = vsel %vm635_vm3, %v7973_v8, %v17355_v14  ;;  %11070 = vrot.lane.b32.xlu1 %v11069_v19, %s11572_s10  ;;  %v17524_v24 = vpop.f32.mrf.mxu2  ;;  %v20667_v31 = vld [vmem:[#allocation48_spill] sm:$0xff]  ;;  %v17544_v8 = vperm.slane %v17096_v51, %v11869_v32 }
 0x980   : > { %6928 = vst [vmem:[#allocation1 + $0x21] ss:$4 sm:$0xff] %v6844_v11  ;;  %v20663_v11 = vld [vmem:[#allocation58_spill] sm:$0xff]  ;;  %11065 = vrot.lane.b32.xlu2 %v11064_v52, %s11572_s10  ;;  %v17528_v29 = vsel %vm635_vm3, %v7525_v50, %v17349_v33  ;;  %v17532_v19 = vperm.slane %v20667_v31, %v11869_v32  ;;  %v17536_v52 = vperm.slane %v17072_v59, %v11869_v32 }
 0x981   : > { %20659 = vst [vmem:[#allocation42_spill] sm:$0xff] %v17497_v54  ;;  %v17509_v44 = vperm.slane %v20663_v11, %v11869_v32  ;;  %v6931_v14 = vld.sshfl [vmem:[#allocation1] sm:$0xff pattern:$0x73625140]  ;;  %v17552_v31 = vperm.slane %v17103_v17, %v11869_v32  ;;  %v17565_v51 = vperm.slane %v17122_v58, %v11869_v32  ;;  %v17569_v17 = vperm.slane %v17116_v47, %v11869_v32  ;;  %v20669_v54 = vld [vmem:[#allocation26_spill] sm:$0xff] }
 0x982   : > { %6929 = vst [vmem:[#allocation1 + $0x22] ss:$4 sm:$0xff] %v6845_v43  ;;  %v17521_v43 = vperm.slane %v17084_v36, %v11869_v32  ;;  %v17540_v36 = vperm.slane %v17079_v56, %v11869_v32  ;;  %v17546_v11 = vld [vmem:[#allocation3 + $0x32] ss:$2 sm:$0xff]  ;;  %v17561_v56 = vperm.slane %v17092_v0, %v11869_v32  ;;  %v6847_v0 = vrot.slane %v17441_v42, 2 }
 0x983   : > { %20662 = vst [vmem:[#allocation39_spill] sm:$0xff] %v17504_v53  ;;  %v17586_v47 = vperm.slane %v17100_v16, %v11869_v32  ;;  %v6849_v16 = vrot.slane %v17441_v42, 6 }
 0x984   : > { %6930 = vst [vmem:[#allocation1 + $0x23] ss:$4 sm:$0xff] %v6846_v35  ;;  %v8423_v35 = vrot.slane %v17380_v28, 4  ;;  %v7104_v50 = vld [vmem:[#allocation3 + $0x4a] ss:$2 sm:$0xff] }
 0x985   : > { %20664 = vst [vmem:[#allocation29_spill] sm:$0xff] %v17509_v44  ;;  %v17548_v33 = vld [vmem:[#allocation3 + $0x4b] ss:$2 sm:$0xff]  ;;  %v11074_v59 = vpack.i.bf16 %v7104_v50, %v17546_v11  ;;  %v8421_v9 = vrot.slane %v7104_v50, 4 }
 0x986   : > { %20665 = vst [vmem:[#allocation77_spill] sm:$0xff] %v17514_v18  ;;  %v17556_v7 = vsel %vm635_vm3, %v7104_v50, %v8423_v35  ;;  %v8869_v10 = vrot.slane %v17548_v33, 4  ;;  %v17576_v50 = vperm.slane %v17129_v55, %v11869_v32  ;;  %v11079_v35 = vpack.i.bf16 %v17548_v33, %v17464_v48 }
 0x987   : > { %20666 = vst [vmem:[#allocation21_spill] sm:$0xff] %v17528_v29  ;;  %v17581_v58 = vsel %vm635_vm3, %v8421_v9, %v17380_v28  ;;  %11075 = vrot.lane.b32.xlu0 %v11074_v59, %s11572_s10  ;;  %v17598_v28 = vperm.slane %v17108_v25, %v11869_v32  ;;  %v17611_v25 = vperm.slane %v17392_v37, %v20669_v54  ;;  %v7921_v29 = vrot.slane %v17536_v52, 4 }
 0x988   : > { %6933 = vst [vmem:[#allocation1] ss:$4 sm:$0xff] %v17441_v42  ;;  %v17593_v55 = vsel %vm635_vm3, %v8869_v10, %v17382_v39  ;;  %v17606_v10 = vperm.slane %v17135_v22, %v11869_v32  ;;  %11080 = vrot.lane.b32.xlu2 %v11079_v35, %s11572_s10  ;;  %v17618_v59 = vperm.slane %v17400_v27, %v20669_v54 }
 0x989   : > { %7007 = vst.msk [vmem:[#allocation3 + $0x60] sm:$0xff] %vm6563_vm0, %v6931_v14  ;;  %v6848_v14 = vrot.slane %v17441_v42, 4  ;;  %v8411_v42 = vrot.slane %v17374_v40, 4  ;;  %v17622_v35 = vperm.slane %v17403_v61, %v20669_v54  ;;  %v17626_v37 = vperm.slane %v17406_v45, %v20669_v54  ;;  %v17639_v61 = vpop.f32.mrf.mxu2 }
 0x98a   : > { %20668 = vst [vmem:[#allocation65_spill] sm:$0xff] %v17593_v55  ;;  %v17644_v45 = vperm.slane %v17418_v41, %v20669_v54  ;;  %v17650_v27 = vperm.slane %v17428_v49, %v20669_v54  ;;  %v17654_v9 = vperm.slane %v17431_v23, %v20669_v54  ;;  %v17659_v41 = vperm.slane %v17436_v21, %v20669_v54 }
 0x98b   : > { %v6932_v53 = vld.sshfl [vmem:[#allocation1 + $0x20] sm:$0xff pattern:$0x73625140]  ;;  %v17667_v49 = vperm.slane %v17444_v6, %v20669_v54  ;;  %v6853_v21 = vrot.slane %v17524_v24, 2  ;;  %v6854_v55 = vrot.slane %v17524_v24, 4  ;;  %v17683_v23 = vperm.slane %v17439_v12, %v20669_v54 }
 0x98c   : > { %6935 = vst [vmem:[#allocation1 + $0x20] ss:$4 sm:$0xff] %v6847_v0  ;;  %v6850_v0 = vrot.slane %v17466_v34, 2  ;;  %v7947_v6 = vrot.slane %v17659_v41, 4  ;;  %v6856_v3 = vrot.slane %v17639_v61, 2  ;;  %v8409_v12 = vrot.slane %v17546_v11, 4 }
 0x98d   : > { %6936 = vst [vmem:[#allocation1 + $0x21] ss:$4 sm:$0xff] %v6848_v14  ;;  %v17630_v14 = vperm.slane %v17409_v1, %v20669_v54  ;;  %v6852_v1 = vrot.slane %v17466_v34, 6  ;;  %v6858_v62 = vrot.slane %v17639_v61, 6 }
 0x98e   : > { %6937 = vst [vmem:[#allocation1 + $0x22] ss:$4 sm:$0xff] %v6849_v16  ;;  %v17634_v16 = vperm.slane %v17415_v2, %v20669_v54 }
 0x98f   : > { %v6934_v22 = vld.sshfl [vmem:[#allocation1] sm:$0xff pattern:$0x73625140]  ;;  %6938 = vst [vmem:[#allocation1 + $0x23] ss:$4 sm:$0xff] %v17466_v34  ;;  %v20670_v34 = vrot.slane %v17475_v4, 4 }
 0x990   : > { %6940 = vst [vmem:[#allocation1] ss:$4 sm:$0xff] %v6850_v0  ;;  %v7503_v38 = vrot.slane %v17630_v14, 4  ;;  %v6855_v4 = vrot.slane %v17524_v24, 6 }
 0x991   : > { %6941 = vst [vmem:[#allocation1 + $0x1] ss:$4 sm:$0xff] %v6851_v30  ;;  %v7910_v0 = vsel %vm635_vm3, %v20670_v34, %v17501_v20  ;;  %v7951_v30 = vrot.slane %v17626_v37, 4  ;;  %v7923_v20 = vrot.slane %v17532_v19, 4  ;;  %v6857_v34 = vrot.slane %v17639_v61, 4  ;;  %v17713_v18 = vpop.f32.mrf.mxu2 }
 0x992   : > { %6942 = vst [vmem:[#allocation1 + $0x2] ss:$4 sm:$0xff] %v6852_v1  ;;  %v7499_v1 = vrot.slane %v17650_v27, 4  ;;  %v17686_v2 = vperm.slane %v7910_v0, %v20669_v54  ;;  %v17698_v0 = vperm.slane %v17448_v26, %v20669_v54 }
 0x993   : > { %6943 = vst [vmem:[#allocation1 + $0x3] ss:$4 sm:$0xff] %v17524_v24  ;;  %v7475_v24 = vrot.slane %v17540_v36, 4 }
 0x994   : > { %7008 = vst.msk [vmem:[#allocation3 + $0x68] sm:$0xff] %vm6563_vm0, %v6932_v53  ;;  %v7473_v53 = vrot.slane %v17561_v56, 4 }
 0x995   : > { %20671 = vst [vmem:[#allocation76_spill] sm:$0xff] %v17686_v2  ;;  %v7476_v13 = vsel %vm635_vm3, %v17561_v56, %v7475_v24 }
 0x996   : > { %7009 = vst.msk [vmem:[#allocation3 + $0x70] sm:$0x3] %vm6566_vm1, %v6934_v22  ;;  %v6939_v5 = vld.sshfl [vmem:[#allocation1 + $0x20] sm:$0xff pattern:$0x73625140]  ;;  %v7924_v22 = vsel %vm635_vm3, %v17536_v52, %v7923_v20  ;;  %v7484_v26 = vperm.slane %v7476_v13, %v20669_v54  ;;  %v8412_v20 = vsel %vm635_vm3, %v17546_v11, %v8411_v42  ;;  %v7474_v56 = vsel %vm635_vm3, %v7473_v53, %v17540_v36 }
 0x997   : > { %6944 = vst [vmem:[#allocation1 + $0x20] ss:$4 sm:$0xff] %v6853_v21  ;;  %v7932_v60 = vperm.slane %v7924_v22, %v20669_v54  ;;  %v7922_v52 = vsel %vm635_vm3, %v7921_v29, %v17532_v19  ;;  %v17727_v21 = vperm.slane %v7474_v56, %v20669_v54  ;;  %v8410_v42 = vsel %vm635_vm3, %v8409_v12, %v17374_v40 }
 0x998   : > { %7010 = vst.msk [vmem:[#allocation3 + $0x78] sm:$0xff] %vm6563_vm0, %v6939_v5  ;;  %v17724_v13 = vsel %vm635_vm3, %v7484_v26, %v7503_v38  ;;  %v17733_v29 = vperm.slane %v7922_v52, %v20669_v54  ;;  %v7501_v19 = vrot.slane %v7484_v26, 4  ;;  %v20672_v38 = vrot.slane %v17389_v15, 4 }
 0x999   : > { %v17721_v22 = vsel %vm635_vm3, %v7932_v60, %v7951_v30  ;;  %v7949_v11 = vrot.slane %v7932_v60, 4  ;;  %v17737_v30 = vperm.slane %v8412_v20, %v11869_v32  ;;  %v17747_v60 = vsel %vm635_vm3, %v17727_v21, %v7499_v1 }
 0x99a   : > { %v6945_v5 = vld.sshfl [vmem:[#allocation1] sm:$0xff pattern:$0x73625140]  ;;  %v17743_v53 = vsel %vm635_vm3, %v17464_v48, %v20672_v38  ;;  %20673 = vst [vmem:[#allocation52_spill] sm:$0xff] %v17747_v60  ;;  %v20674_v12 = vrot.slane %v17544_v8, 4  ;;  %v20675_v15 = vrot.slane %v17569_v17, 4  ;;  %v17764_v1 = vsel %vm635_vm3, %v17733_v29, %v7947_v6 }
 0x99b   : > { %7011 = vst.msk [vmem:[#allocation3 + $0x80] sm:$0xff] %vm6563_vm0, %v6945_v5  ;;  %v17751_v40 = vsel %vm635_vm3, %v7949_v11, %v17626_v37  ;;  %v6859_v37 = vrot.slane %v17713_v18, 2  ;;  %v17772_v52 = vsel %vm635_vm3, %v7501_v19, %v17630_v14  ;;  %v20678_v6 = vrot.slane %v17552_v31, 4  ;;  %v17786_v14 = vld [vmem:[#allocation3 + $0x61] ss:$2 sm:$0xff] }
 0x99c   : > { %6947 = vst [vmem:[#allocation1] ss:$4 sm:$0xff] %v6854_v55  ;;  %v8384_v26 = vsel %vm635_vm3, %v17552_v31, %v20674_v12  ;;  %v8832_v48 = vsel %vm635_vm3, %v17576_v50, %v20675_v15  ;;  %v8371_v55 = vrot.slane %v17586_v47, 4  ;;  %v8369_v12 = vrot.slane %v17598_v28, 4 }
 0x99d   : > { %6948 = vst [vmem:[#allocation1 + $0x1] ss:$4 sm:$0xff] %v6855_v4  ;;  %v8392_v4 = vperm.slane %v8384_v26, %v20669_v54  ;;  %v8840_v56 = vperm.slane %v8832_v48, %v20669_v54  ;;  %v8382_v11 = vsel %vm635_vm3, %v20678_v6, %v17544_v8  ;;  %v20681_v19 = vrot.slane %v17611_v25, 4 }
 0x99e   : > { %20676 = vst [vmem:[#allocation61_spill] sm:$0xff] %v17764_v1  ;;  %v6946_v20 = vld.sshfl [vmem:[#allocation1 + $0x20] sm:$0xff pattern:$0x73625140]  ;;  %v8372_v5 = vsel %vm635_vm3, %v17598_v28, %v8371_v55  ;;  %v20682_v15 = vrot.slane %v17618_v59, 4  ;;  %v17805_v48 = vsel %vm635_vm3, %v8369_v12, %v17586_v47  ;;  %v20686_v47 = vrot.slane %v17565_v51, 4 }
 0x99f   : > { %6949 = vst [vmem:[#allocation1 + $0x2] ss:$4 sm:$0xff] %v17639_v61  ;;  %v20679_v61 = vrot.slane %v17576_v50, 4  ;;  %v17791_v26 = vsel %vm635_vm3, %v8392_v4, %v20681_v19  ;;  %v8380_v8 = vperm.slane %v8372_v5, %v20669_v54  ;;  %v8853_v50 = vrot.slane %v8840_v56, 4 }
 0x9a0   : > { %20677 = vst [vmem:[#allocation28_spill] sm:$0xff] %v17772_v52  ;;  %v17796_v31 = vsel %vm635_vm3, %v8840_v56, %v20682_v15  ;;  %v8405_v55 = vrot.slane %v8392_v4, 4  ;;  %v17828_v4 = vpop.f32.mrf.mxu2  ;;  %v8471_v19 = vrot.slane %v17737_v30, 4  ;;  %v20688_v15 = vrot.slane %v17634_v16, 4 }
 0x9a1   : > { %7012 = vst.msk [vmem:[#allocation3 + $0x88] sm:$0x3] %vm6566_vm1, %v6946_v20  ;;  %v8830_v38 = vsel %vm635_vm3, %v20679_v61, %v17569_v17  ;;  %v17799_v17 = vld [vmem:[#allocation3 + $0x60] ss:$2 sm:$0xff]  ;;  %v17808_v20 = vperm.slane %v8410_v42, %v11869_v32  ;;  %v8820_v42 = vsel %vm635_vm3, %v17606_v10, %v20686_v47 }
 0x9a2   : > { %6950 = vst [vmem:[#allocation1 + $0x3] ss:$4 sm:$0xff] %v6856_v3  ;;  %v8388_v3 = vperm.slane %v8382_v11, %v20669_v54  ;;  %v8836_v28 = vperm.slane %v8830_v38, %v20669_v54  ;;  %v17810_v6 = vld [vmem:[#allocation3 + $0x79] ss:$2 sm:$0xff]  ;;  %v17812_v5 = vld [vmem:[#allocation3 + $0x78] ss:$2 sm:$0xff]  ;;  %v17821_v11 = vsel %vm635_vm3, %v8853_v50, %v17618_v59  ;;  %v17852_v36 = vsel %vm635_vm3, %v8405_v55, %v17611_v25 }
 0x9a3   : > { %20680 = vst [vmem:[#allocation57_spill] sm:$0xff] %v17786_v14  ;;  %v11089_v61 = vpack.i.bf16 %v17810_v6, %v17786_v14  ;;  %v11084_v38 = vpack.i.bf16 %v17812_v5, %v17799_v17  ;;  %v20687_v59 = vrot.slane %v17479_v46, 4  ;;  %v6861_v46 = vrot.slane %v17713_v18, 6 }
 0x9a4   : > { %6951 = vst [vmem:[#allocation1 + $0x20] ss:$4 sm:$0xff] %v6857_v34  ;;  %v20685_v34 = vrot.slane %v17622_v35, 4  ;;  %v17843_v50 = vsel %vm635_vm3, %v8388_v3, %v20688_v15  ;;  %v8849_v24 = vrot.slane %v8836_v28, 4  ;;  %v8828_v15 = vperm.slane %v8820_v42, %v20669_v54 }
 0x9a5   : > { %20683 = vst [vmem:[#allocation71_spill] sm:$0xff] %v17805_v48  ;;  %v7934_v12 = vsel %vm635_vm3, %v20687_v59, %v17509_v44  ;;  %11090 = vrot.lane.b32.xlu2 %v11089_v61, %s11572_s10  ;;  %11085 = vrot.lane.b32.xlu0 %v11084_v38, %s11572_s10  ;;  %v8397_v59 = vrot.slane %v8380_v8, 4  ;;  %v17859_v44 = vld [vmem:[#allocation3 + $0x62] ss:$2 sm:$0xff]  ;;  %v8401_v1 = vrot.slane %v8388_v3, 4  ;;  %v20691_v55 = vrot.slane %v17521_v43, 4 }
 0x9a6   : > { %6952 = vst [vmem:[#allocation1 + $0x21] ss:$4 sm:$0xff] %v6858_v62  ;;  %v17817_v56 = vsel %vm635_vm3, %v8380_v8, %v20685_v34  ;;  %v6860_v62 = vrot.slane %v17713_v18, 4  ;;  %v20689_v34 = vrot.slane %v17644_v45, 4  ;;  %v17864_v25 = vperm.slane %v7934_v12, %v20669_v54 }
 0x9a7   : > { %20684 = vst [vmem:[#allocation67_spill] sm:$0xff] %v17810_v6  ;;  %v7486_v61 = vsel %vm635_vm3, %v20691_v55, %v17494_v57  ;;  %v6862_v8 = vrot.slane %v17828_v4, 2  ;;  %v8845_v12 = vrot.slane %v8828_v15, 4  ;;  %v20694_v55 = vrot.slane %v17382_v39, 4 }
 0x9a8   : > { %6953 = vst [vmem:[#allocation1 + $0x22] ss:$4 sm:$0xff] %v17713_v18  ;;  %v17848_v47 = vsel %vm635_vm3, %v8836_v28, %v20689_v34  ;;  %v17861_v34 = vld [vmem:[#allocation3 + $0x7a] ss:$2 sm:$0xff]  ;;  %v17876_v18 = vperm.slane %v17743_v53, %v11869_v32  ;;  %v17881_v28 = vld [vmem:[#allocation3 + $0x7b] ss:$2 sm:$0xff]  ;;  %v17891_v53 = vsel %vm635_vm3, %v8849_v24, %v17644_v45 }
 0x9a9   : > { %6954 = vst [vmem:[#allocation1 + $0x23] ss:$4 sm:$0xff] %v6859_v37  ;;  %v8817_v37 = vrot.slane %v17606_v10, 4  ;;  %v17872_v10 = vperm.slane %v17556_v7, %v11869_v32  ;;  %v11094_v3 = vpack.i.bf16 %v17861_v34, %v17859_v44  ;;  %v6955_v42 = vld.sshfl [vmem:[#allocation1] sm:$0xff pattern:$0x73625140]  ;;  %v17887_v7 = vsel %vm635_vm3, %v8397_v59, %v17622_v35 }
 0x9aa   : > { %20690 = vst [vmem:[#allocation53_spill] sm:$0xff] %v17864_v25  ;;  %v8872_v52 = vsel %vm635_vm3, %v17548_v33, %v20694_v55  ;;  %v17904_v35 = vsel %vm635_vm3, %v8401_v1, %v17634_v16  ;;  %v7497_v45 = vrot.slane %v17727_v21, 4  ;;  %v17911_v33 = vsel %vm635_vm3, %v8845_v12, %v17683_v23 }
 0x9ab   : > { %6957 = vst [vmem:[#allocation1] ss:$4 sm:$0xff] %v6860_v62  ;;  %v8818_v38 = vsel %vm635_vm3, %v8817_v37, %v17565_v51  ;;  %11095 = vrot.lane.b32.xlu1 %v11094_v3, %s11572_s10  ;;  %v17898_v62 = vld [vmem:[#allocation3 + $0x63] ss:$2 sm:$0xff]  ;;  %v7945_v24 = vrot.slane %v17733_v29, 4  ;;  %v20697_v37 = vrot.slane %v17686_v2, 4 }
 0x9ac   : > { %20692 = vst [vmem:[#allocation46_spill] sm:$0xff] %v17887_v7  ;;  %v8824_v51 = vperm.slane %v8818_v38, %v20669_v54  ;;  %v11099_v39 = vpack.i.bf16 %v17881_v28, %v17898_v62  ;;  %v20699_v16 = vrot.slane %v17654_v9, 4  ;;  %v17927_v1 = vsel %vm635_vm3, %v7497_v45, %v17650_v27 }
 0x9ad   : > { %20693 = vst [vmem:[#allocation62_spill] sm:$0xff] %v17891_v53  ;;  %v17918_v59 = vsel %vm635_vm3, %v17864_v25, %v20697_v37  ;;  %v7492_v38 = vperm.slane %v7486_v61, %v20669_v54  ;;  %v6863_v29 = vrot.slane %v17828_v4, 4  ;;  %v6864_v12 = vrot.slane %v17828_v4, 6 }
 0x9ae   : > { %7013 = vst.msk [vmem:[#allocation3 + $0x90] sm:$0xff] %vm6563_vm0, %v6955_v42  ;;  %v17923_v21 = vsel %vm635_vm3, %v8824_v51, %v20699_v16  ;;  %v8841_v42 = vrot.slane %v8824_v51, 4  ;;  %v17934_v55 = vsel %vm635_vm3, %v7945_v24, %v17659_v41  ;;  %v20703_v37 = vrot.slane %v17494_v57, 4  ;;  %11100 = vrot.lane.b32.xlu0 %v11099_v39, %s11572_s10 }
 0x9af   : > { %20695 = vst [vmem:[#allocation47_spill] sm:$0xff] %v17904_v35  ;;  %v8472_v27 = vsel %vm635_vm3, %v17872_v10, %v8471_v19  ;;  %v20705_v41 = vrot.slane %v17698_v0, 4  ;;  %v7505_v57 = vrot.slane %v7492_v38, 4  ;;  %v17958_v51 = vperm.slane %v8872_v52, %v11869_v32 }
 0x9b0   : > { %20696 = vst [vmem:[#allocation43_spill] sm:$0xff] %v17911_v33  ;;  %v6956_v3 = vld.sshfl [vmem:[#allocation1 + $0x20] sm:$0xff pattern:$0x73625140]  ;;  %v7488_v16 = vsel %vm635_vm3, %v17521_v43, %v20703_v37  ;;  %v17955_v43 = vperm.slane %v17581_v58, %v11869_v32  ;;  %v17968_v45 = vperm.slane %v17462_v63, %v11869_v32  ;;  %v8459_v39 = vrot.slane %v17808_v20, 4  ;;  %v20712_v63 = vld [vmem:[#allocation77_spill] sm:$0xff] }
 0x9b1   : > { %20698 = vst [vmem:[#allocation51_spill] sm:$0xff] %v17918_v59  ;;  %v6793_v59 = vpop.f32.mrf.mxu2  ;;  %v17951_v61 = vsel %vm635_vm3, %v7492_v38, %v20705_v41  ;;  %v17973_v58 = vsel %vm635_vm3, %v7505_v57, %v17698_v0  ;;  %v8919_v52 = vrot.slane %v17876_v18, 4  ;;  %v17983_v38 = vperm.slane %v20712_v63, %v11869_v32  ;;  %v20714_v41 = vld [vmem:[#allocation98_spill] sm:$0xff] }
 0x9b2   : > { %20700 = vst [vmem:[#allocation63_spill] sm:$0xff] %v17923_v21  ;;  %v6958_v24 = vld.sshfl [vmem:[#allocation1] sm:$0xff pattern:$0x73625140]  ;;  %v6866_v37 = vrot.slane %v6793_v59, 4  ;;  %v9019_v57 = vrot.slane %v20714_v41, 4 }
 0x9b3   : > { %20701 = vst [vmem:[#allocation60_spill] sm:$0xff] %v17927_v1  ;;  %v8920_v0 = vsel %vm635_vm3, %v17958_v51, %v8919_v52  ;;  %v20716_v52 = vld [vmem:[#allocation21_spill] sm:$0xff]  ;;  %v7551_v1 = vrot.slane %v17812_v5, 4  ;;  %v8895_v25 = vrot.slane %v17881_v28, 4 }
 0x9b4   : > { %6959 = vst [vmem:[#allocation1 + $0x20] ss:$4 sm:$0xff] %v6861_v46  ;;  %v17946_v46 = vsel %vm635_vm3, %v8841_v42, %v17654_v9  ;;  %v7496_v9 = vperm.slane %v7488_v16, %v20669_v54  ;;  %v8011_v16 = vrot.slane %v17968_v45, 4  ;;  %v20719_v41 = vld [vmem:[#allocation45_spill] sm:$0xff] }
 0x9b5   : > { %20702 = vst [vmem:[#allocation104_spill] sm:$0xff] %v17934_v55 }
 0x9b6   : > { %6960 = vst [vmem:[#allocation1 + $0x21] ss:$4 sm:$0xff] %v17828_v4  ;;  %v20707_v4 = vrot.slane %v17683_v23, 4  ;;  %v6865_v23 = vrot.slane %v6793_v59, 2 }
 0x9b7   : > { %20704 = vst [vmem:[#allocation82_spill] sm:$0xff] %v17946_v46 }
 0x9b8   : > { %20706 = vst [vmem:[#allocation25_spill] sm:$0xff] %v17951_v61  ;;  %v17963_v19 = vsel %vm635_vm3, %v8828_v15, %v20707_v4  ;;  %v7509_v15 = vrot.slane %v7496_v9, 4  ;;  %v20715_v4 = vld [vmem:[#allocation90_spill] sm:$0xff] }
 0x9b9   : > { %6961 = vst [vmem:[#allocation1 + $0x22] ss:$4 sm:$0xff] %v6862_v8  ;;  %v20710_v8 = vrot.slane %v17667_v49, 4 }
 0x9ba   : > { %20708 = vst [vmem:[#allocation81_spill] sm:$0xff] %v17963_v19 }
 0x9bb   : > { %6962 = vst [vmem:[#allocation1 + $0x23] ss:$4 sm:$0xff] %v6863_v29  ;;  %v17979_v42 = vsel %vm635_vm3, %v7496_v9, %v20710_v8  ;;  %v8460_v29 = vsel %vm635_vm3, %v17955_v43, %v8459_v39  ;;  %v17997_v9 = vperm.slane %v20715_v4, %v11869_v32  ;;  %v8012_v39 = vsel %vm635_vm3, %v17983_v38, %v8011_v16 }
 0x9bc   : > { %20709 = vst [vmem:[#allocation33_spill] sm:$0xff] %v17973_v58  ;;  %v6867_v8 = vrot.slane %v6793_v59, 6 }
 0x9bd   : > { %6964 = vst [vmem:[#allocation1] ss:$4 sm:$0xff] %v6864_v12  ;;  %v17991_v12 = vsel %vm635_vm3, %v7509_v15, %v17667_v49  ;;  %v18005_v49 = vperm.slane %v20716_v52, %v11869_v32  ;;  %v7539_v52 = vrot.slane %v17799_v17, 4 }
 0x9be   : > { %20711 = vst [vmem:[#allocation69_spill] sm:$0xff] %v17979_v42 }
 0x9bf   : > { %6965 = vst [vmem:[#allocation1 + $0x1] ss:$4 sm:$0xff] %v6793_v59 }
 0x9c0   : > { %6966 = vst [vmem:[#allocation1 + $0x2] ss:$4 sm:$0xff] %v6865_v23  ;;  %v20717_v23 = vld [vmem:[#allocation97_spill] sm:$0xff] }
 0x9c1   : > { %20713 = vst [vmem:[#allocation68_spill] sm:$0xff] %v17991_v12  ;;  %v18009_v15 = vperm.slane %v20717_v23, %v11869_v32 }
 0x9c2   : > { %6967 = vst [vmem:[#allocation1 + $0x3] ss:$4 sm:$0xff] %v6866_v37  ;;  %v6963_v63 = vld.sshfl [vmem:[#allocation1 + $0x20] sm:$0xff pattern:$0x73625140] }
 0x9c3   : > { %7014 = vst.msk [vmem:[#allocation3 + $0x98] sm:$0xff] %vm6563_vm0, %v6956_v3  ;;  %v20718_v37 = vld [vmem:[#allocation87_spill] sm:$0xff] }
 0x9c4   : > { %7015 = vst.msk [vmem:[#allocation3 + $0xa0] sm:$0x3] %vm6566_vm1, %v6958_v24  ;;  %v9020_v3 = vsel %vm635_vm3, %v20718_v37, %v9019_v57  ;;  %v7563_v24 = vrot.slane %v17997_v9, 4 }
 0x9c5   : > { %7016 = vst.msk [vmem:[#allocation3 + $0xa8] sm:$0xff] %vm6563_vm0, %v6963_v63  ;;  %v18021_v59 = vperm.slane %v9020_v3, %v20669_v54  ;;  %v8435_v63 = vrot.slane %v17859_v44, 4  ;;  %v18036_v3 = vperm.slane %v8472_v27, %v20669_v54 }
 0x9c6   : > { %6968 = vst [vmem:[#allocation1 + $0x20] ss:$4 sm:$0xff] %v6867_v8  ;;  %v7564_v23 = vsel %vm635_vm3, %v18005_v49, %v7563_v24  ;;  %v8447_v24 = vrot.slane %v17861_v34, 4 }
 0x9c7   : > { %20720 = vst [vmem:[#allocation85_spill] sm:$0xff] %v18021_v59  ;;  %v18099_v21 = vperm.slane %v7564_v23, %v20669_v54 }
 0x9c9   : > { %v6969_v42 = vld.sshfl [vmem:[#allocation1] sm:$0xff pattern:$0x73625140] }
 0x9ca   : > { %7017 = vst.msk [vmem:[#allocation3 + $0xb0] sm:$0xff] %vm6563_vm0, %v6969_v42  ;;  %v7046_v57 = vld [vmem:[#allocation3 + $0x90] ss:$2 sm:$0xff]  ;;  %v18025_v37 = vld [vmem:[#allocation3 + $0x91] ss:$2 sm:$0xff]  ;;  %v20723_v42 = vld [vmem:[#allocation65_spill] sm:$0xff] }
 0x9cb   : > { %20721 = vst [vmem:[#allocation105_spill] sm:$0xff] %v18025_v37  ;;  %v7537_v8 = vrot.slane %v7046_v57, 4  ;;  %v18028_v16 = vsel %vm635_vm3, %v7046_v57, %v7539_v52  ;;  %v18030_v4 = vld [vmem:[#allocation3 + $0x92] ss:$2 sm:$0xff]  ;;  %v7985_v12 = vrot.slane %v18025_v37, 4  ;;  %v18041_v61 = vperm.slane %v20723_v42, %v11869_v32 }
 0x9cc   : > { %20722 = vst [vmem:[#allocation24_spill] sm:$0xff] %v18028_v16  ;;  %v18033_v58 = vld [vmem:[#allocation3 + $0x93] ss:$2 sm:$0xff]  ;;  %v8433_v52 = vrot.slane %v18030_v4, 4  ;;  %v8883_v16 = vrot.slane %v17898_v62, 4  ;;  %v8436_v46 = vsel %vm635_vm3, %v18030_v4, %v8435_v63  ;;  %v18061_v63 = vperm.slane %v8920_v0, %v20669_v54 }
 0x9cd   : > { %v7538_v19 = vsel %vm635_vm3, %v7537_v8, %v17799_v17  ;;  %v8881_v27 = vrot.slane %v18033_v58, 4  ;;  %v6970_v42 = vld.sshfl [vmem:[#allocation1 + $0x20] sm:$0xff pattern:$0x73625140]  ;;  %v7986_v2 = vsel %vm635_vm3, %v7985_v12, %v17786_v14  ;;  %v18064_v8 = vperm.slane %v8460_v29, %v20669_v54 }
 0x9ce   : > { %v8434_v55 = vsel %vm635_vm3, %v8433_v52, %v17859_v44  ;;  %7018 = vst.msk [vmem:[#allocation3 + $0xb8] sm:$0x3] %vm6566_vm1, %v6970_v42  ;;  %v18067_v35 = vperm.slane %v7538_v19, %v11869_v32  ;;  %v18070_v44 = vperm.slane %v8436_v46, %v11869_v32  ;;  %v8884_v12 = vsel %vm635_vm3, %v18033_v58, %v8883_v16 }
 0x9cf   : > { %20724 = vst [vmem:[#allocation49_spill] sm:$0xff] %v18064_v8  ;;  %v18075_v52 = vperm.slane %v8012_v39, %v20669_v54  ;;  %v18078_v17 = vperm.slane %v8434_v55, %v11869_v32  ;;  %v18083_v29 = vperm.slane %v7986_v2, %v11869_v32  ;;  %v8882_v19 = vsel %vm635_vm3, %v8881_v27, %v17898_v62 }
 0x9d0   : > { %v18088_v46 = vperm.slane %v8884_v12, %v11869_v32  ;;  %v8967_v53 = vrot.slane %v18061_v63, 4  ;;  %v8511_v2 = vrot.slane %v18064_v8, 4 }
 0x9d1   : > { %v7048_v42 = vld [vmem:[#allocation3 + $0xa8] ss:$2 sm:$0xff]  ;;  %v18080_v0 = vld [vmem:[#allocation3 + $0xa9] ss:$2 sm:$0xff]  ;;  %20726 = vst [vmem:[#allocation30_spill] sm:$0xff] %v18083_v29  ;;  %v8063_v27 = vrot.slane %v18075_v52, 4 }
 0x9d2   : > { %20725 = vst [vmem:[#allocation50_spill] sm:$0xff] %v18080_v0  ;;  %v11104_v14 = vpack.i.bf16 %v7048_v42, %v7046_v57  ;;  %v7549_v16 = vrot.slane %v7048_v42, 4  ;;  %v18091_v39 = vsel %vm635_vm3, %v7048_v42, %v7551_v1  ;;  %v11109_v55 = vpack.i.bf16 %v18080_v0, %v18025_v37 }
 0x9d3   : > { %20727 = vst [vmem:[#allocation34_spill] sm:$0xff] %v18091_v39  ;;  %v7997_v33 = vrot.slane %v18080_v0, 4  ;;  %v8495_v1 = vrot.slane %v18070_v44, 4  ;;  %v18107_v57 = vperm.slane %v8882_v19, %v11869_v32  ;;  %v8035_v42 = vrot.slane %v18083_v29, 4 }
 0x9d4   : > { %v7550_v62 = vsel %vm635_vm3, %v7549_v16, %v17812_v5  ;;  %11105 = vrot.lane.b32.xlu1 %v11104_v14, %s11572_s10  ;;  %11110 = vrot.lane.b32.xlu0 %v11109_v55, %s11572_s10  ;;  %v7587_v5 = vrot.slane %v18067_v35, 4  ;;  %v8943_v19 = vrot.slane %v18088_v46, 4  ;;  %v8483_v39 = vrot.slane %v18078_v17, 4 }
 0x9d5   : > { %v18111_v12 = vperm.slane %v7550_v62, %v11869_v32  ;;  %v7998_v23 = vsel %vm635_vm3, %v7997_v33, %v17810_v6  ;;  %v7112_v14 = vld [vmem:[#allocation3 + $0xaa] ss:$2 sm:$0xff]  ;;  %v7144_v55 = vld [vmem:[#allocation3 + $0xab] ss:$2 sm:$0xff]  ;;  %v20728_v37 = vrot.slane %v18009_v15, 4  ;;  %v7615_v29 = vrot.slane %v18099_v21, 4 }
 0x9d6   : > { %v18118_v16 = vperm.slane %v7998_v23, %v11869_v32  ;;  %v11114_v33 = vpack.i.bf16 %v7112_v14, %v18030_v4  ;;  %v8445_v0 = vrot.slane %v7112_v14, 4  ;;  %v8448_v6 = vsel %vm635_vm3, %v7112_v14, %v8447_v24 }
 0x9d7   : > { %v8908_v62 = vsel %vm635_vm3, %v18041_v61, %v20728_v37  ;;  %v8456_v23 = vperm.slane %v8448_v6, %v11869_v32  ;;  %v8893_v60 = vrot.slane %v7144_v55, 4  ;;  %v8896_v7 = vsel %vm635_vm3, %v7144_v55, %v8895_v25 }
 0x9d8   : > { %v8036_v8 = vsel %vm635_vm3, %v18118_v16, %v8035_v42  ;;  %v8446_v48 = vsel %vm635_vm3, %v8445_v0, %v17861_v34  ;;  %11115 = vrot.lane.b32.xlu2 %v11114_v33, %s11572_s10  ;;  %v8904_v4 = vperm.slane %v8896_v7, %v11869_v32  ;;  %v7588_v24 = vsel %vm635_vm3, %v18111_v12, %v7587_v5 }
 0x9d9   : > { %v18138_v37 = vperm.slane %v8036_v8, %v20669_v54  ;;  %v18143_v6 = vperm.slane %v8446_v48, %v11869_v32  ;;  %v11119_v25 = vpack.i.bf16 %v7144_v55, %v18033_v58  ;;  %v8894_v42 = vsel %vm635_vm3, %v8893_v60, %v17881_v28 }
 0x9da   : > { %v8496_v34 = vsel %vm635_vm3, %v8456_v23, %v8495_v1  ;;  %v18150_v0 = vperm.slane %v8894_v42, %v11869_v32  ;;  %v8944_v8 = vsel %vm635_vm3, %v8904_v4, %v8943_v19  ;;  %v8931_v5 = vrot.slane %v18107_v57, 4 }
 0x9db   : > { %v18153_v7 = vperm.slane %v8496_v34, %v20669_v54  ;;  %v8952_v48 = vperm.slane %v8944_v8, %v20669_v54  ;;  %v8484_v58 = vsel %vm635_vm3, %v18143_v6, %v8483_v39  ;;  %v8064_v60 = vsel %vm635_vm3, %v18138_v37, %v8063_v27 }
 0x9dc   : > { %11120 = vrot.lane.b32.xlu1 %v11119_v25, %s11572_s10  ;;  %v18164_v28 = vperm.slane %v7588_v24, %v20669_v54  ;;  %v8493_v1 = vrot.slane %v8456_v23, 4  ;;  %v20729_v14 = vrot.slane %v18036_v3, 4  ;;  %v18171_v19 = vperm.slane %v8484_v58, %v20669_v54  ;;  %s11587_s10 = smov 24  }
 0x9dd   : > { %v11139_v33 = vpack.i.bf16 %v8064_v60, %v17721_v22  ;;  %v8968_v39 = vsel %vm635_vm3, %v8952_v48, %v8967_v53  ;;  %v8965_v24 = vrot.slane %v8952_v48, 4  ;;  %v8941_v42 = vrot.slane %v8904_v4, 4 }
 0x9de   : > { %v8520_v55 = vsel %vm635_vm3, %v18153_v7, %v20729_v14  ;;  %v7616_v27 = vsel %vm635_vm3, %v18164_v28, %v7615_v29  ;;  %v11124_v23 = vpack.i.bf16 %v17796_v31, %v8968_v39  ;;  %v8512_v34 = vsel %vm635_vm3, %v18171_v19, %v8511_v2  ;;  %v20731_v14 = vld [vmem:[#allocation41_spill] sm:$0xff] }
 0x9df   : > { %v11129_v25 = vpack.i.bf16 %v17791_v26, %v8520_v55  ;;  %v11134_v8 = vpack.i.bf16 %v7616_v27, %v17724_v13  ;;  %v20730_v58 = vrot.slane %v20719_v41, 4  ;;  %v11144_v26 = vpack.i.bf16 %v8512_v34, %v17817_v56 }
 0x9e0   : > { %v8966_v53 = vsel %vm635_vm3, %v8965_v24, %v18061_v63  ;;  %v8932_v29 = vsel %vm635_vm3, %v18150_v0, %v8931_v5  ;;  %11125 = vrot.lane.b32.xlu0 %v11124_v23, %s11586_s5  ;;  %v18195_v31 = vperm.slane %v8908_v62, %v20669_v54  ;;  %v20732_v41 = vrot.slane %v17872_v10, 4 }
 0x9e1   : > { %v9044_v22 = vsel %vm635_vm3, %v20731_v14, %v20730_v58  ;;  %11130 = vrot.lane.b32.xlu2 %v11129_v25, %s11586_s5  ;;  %v11159_v13 = vpack.i.bf16 %v17821_v11, %v8966_v53  ;;  %v8457_v63 = vrot.slane %v17955_v43, 4  ;;  %v8494_v4 = vsel %vm635_vm3, %v8493_v1, %v18070_v44 }
 0x9e2   : > { %v8470_v56 = vsel %vm635_vm3, %v20732_v41, %v17737_v30  ;;  %v20733_v5 = vrot.slane %v17958_v51, 4  ;;  %v18212_v62 = vperm.slane %v8932_v29, %v20669_v54  ;;  %v18215_v10 = vperm.slane %v8494_v4, %v20669_v54  ;;  %v20740_v4 = vld [vmem:[#allocation49_spill] sm:$0xff] }
 0x9e3   : > { %v18203_v2 = vperm.slane %v8470_v56, %v20669_v54  ;;  %v8942_v43 = vsel %vm635_vm3, %v8941_v42, %v18088_v46  ;;  %v7561_v48 = vrot.slane %v18005_v49, 4  ;;  %v18225_v51 = vperm.slane %v9044_v22, %v20669_v54 }
 0x9e4   : > { %v8918_v11 = vsel %vm635_vm3, %v20733_v5, %v17876_v18  ;;  %11145 = vrot.lane.b32.xlu1 %v11144_v26, %s11587_s10  ;;  %v8959_v44 = vrot.slane %v18195_v31, 4  ;;  %v18230_v60 = vperm.slane %v8942_v43, %v20669_v54  ;;  %v8905_v55 = vrot.slane %v18041_v61, 4  ;;  %v20741_v43 = vld [vmem:[#allocation46_spill] sm:$0xff] }
 0x9e5   : > { %v18218_v30 = vperm.slane %v8918_v11, %v20669_v54  ;;  %20734 = vst [vmem:[#allocation23_spill] sm:$0xff] %v18225_v51  ;;  %v8515_v18 = vrot.slane %v18203_v2, 4  ;;  %v9071_v46 = vrot.slane %v18021_v59, 4  ;;  %v8458_v25 = vsel %vm635_vm3, %v8457_v63, %v17808_v20 }
 0x9e6   : > { %v8960_v39 = vsel %vm635_vm3, %v18212_v62, %v8959_v44  ;;  %v7562_v23 = vsel %vm635_vm3, %v7561_v48, %v17997_v9  ;;  %v8481_v20 = vrot.slane %v18143_v6, 4  ;;  %v7585_v34 = vrot.slane %v18111_v12, 4  ;;  %v20742_v44 = vld [vmem:[#allocation52_spill] sm:$0xff] }
 0x9e7   : > { %v8963_v1 = vrot.slane %v18218_v30, 4  ;;  %v8516_v49 = vsel %vm635_vm3, %v18215_v10, %v8515_v18  ;;  %v9072_v42 = vsel %vm635_vm3, %v18225_v51, %v9071_v46  ;;  %v8061_v58 = vrot.slane %v18138_v37, 4 }
 0x9e8   : > { %v11164_v27 = vpack.i.bf16 %v17843_v50, %v8516_v49  ;;  %11135 = vrot.lane.b32.xlu0 %v11134_v8, %s11587_s10  ;;  %v8517_v50 = vrot.slane %v18153_v7, 4  ;;  %v11149_v14 = vpack.i.bf16 %v8960_v39, %v9072_v42  ;;  %v8906_v22 = vsel %vm635_vm3, %v8905_v55, %v18009_v15  ;;  %v18327_v39 = vpop.permute.xlu2 %11030  ;;  %v20747_v42 = vld [vmem:[#allocation28_spill] sm:$0xff] }
 0x9e9   : > { %v8964_v24 = vsel %vm635_vm3, %v18230_v60, %v8963_v1  ;;  %11140 = vrot.lane.b32.xlu2 %v11139_v33, %s11587_s10  ;;  %v8009_v9 = vrot.slane %v17983_v38, 4  ;;  %v8482_v12 = vsel %vm635_vm3, %v8481_v20, %v18078_v17  ;;  %v7586_v6 = vsel %vm635_vm3, %v7585_v34, %v18067_v35  ;;  %v20736_v38 = vld [vmem:[#allocation91_spill] sm:$0xff] }
 0x9ea   : > { %v11154_v61 = vpack.i.bf16 %v17848_v47, %v8964_v24  ;;  %v8518_v47 = vsel %vm635_vm3, %v8517_v50, %v18036_v3  ;;  %v8062_v37 = vsel %vm635_vm3, %v8061_v58, %v18075_v52  ;;  %v18269_v15 = vperm.slane %v8458_v25, %v20669_v54 }
 0x9eb   : > { %v11169_v33 = vpack.i.bf16 %v17852_v36, %v8518_v47  ;;  %v18272_v3 = vperm.slane %v7562_v23, %v20669_v54  ;;  %v18276_v7 = vperm.slane %v20736_v38, %v20669_v54  ;;  %v11199_v36 = vpack.i.bf16 %v8062_v37, %v17751_v40  ;;  %v20738_v40 = vld [vmem:[#allocation71_spill] sm:$0xff]  ;;  %v20752_v38 = vld [vmem:[#allocation50_spill] sm:$0xff] }
 0x9ec   : > { %11150 = vrot.lane.b32.xlu1 %v11149_v14, %s11587_s10  ;;  %v18280_v17 = vperm.slane %v8482_v12, %v20669_v54  ;;  %v18283_v35 = vperm.slane %v7586_v6, %v20669_v54  ;;  %v8929_v52 = vrot.slane %v18150_v0, 4  ;;  %v8010_v8 = vsel %vm635_vm3, %v8009_v9, %v17968_v45  ;;  %v20748_v14 = vld [vmem:[#allocation67_spill] sm:$0xff] }
 0x9ed   : > { %20735 = vst [vmem:[#allocation95_spill] sm:$0xff] %v18272_v3  ;;  %v8509_v26 = vrot.slane %v18171_v19, 4  ;;  %v18293_v53 = vperm.slane %v20738_v40, %v20669_v54  ;;  %v8507_v29 = vrot.slane %v18269_v15, 4  ;;  %v7611_v41 = vrot.slane %v18272_v3, 4  ;;  %v20749_v47 = vld [vmem:[#allocation63_spill] sm:$0xff] }
 0x9ee   : > { %20737 = vst [vmem:[#allocation20_spill] sm:$0xff] %v18283_v35  ;;  %v8395_v0 = vrot.slane %v18276_v7, 4  ;;  %v8930_v19 = vsel %vm635_vm3, %v8929_v52, %v18107_v57  ;;  %v8033_v56 = vrot.slane %v18118_v16, 4  ;;  %v18307_v63 = vperm.slane %v8906_v22, %v20669_v54  ;;  %v20744_v16 = vld [vmem:[#allocation30_spill] sm:$0xff]  ;;  %v20751_v6 = vld [vmem:[#allocation43_spill] sm:$0xff] }
 0x9ef   : > { %v8508_v45 = vsel %vm635_vm3, %v18280_v17, %v8507_v29  ;;  %v8510_v5 = vsel %vm635_vm3, %v8509_v26, %v20740_v4  ;;  %v18316_v55 = vperm.slane %v8930_v19, %v20669_v54  ;;  %v7613_v57 = vrot.slane %v18164_v28, 4  ;;  %v20753_v52 = vld [vmem:[#allocation47_spill] sm:$0xff]  ;;  %v18369_v26 = vpop.permute.xlu1 %11010  ;;  %v20755_v29 = vld [vmem:[#allocation32_spill] sm:$0xff] }
 0x9f0   : > { %11165 = vrot.lane.b32.xlu0 %v11164_v27, %s11588_s18  ;;  %20739 = vst [vmem:[#allocation102_spill] sm:$0xff] %v18307_v63  ;;  %v8396_v11 = vsel %vm635_vm3, %v18293_v53, %v8395_v0  ;;  %v11204_v48 = vpack.i.bf16 %v8510_v5, %v20741_v43  ;;  %v8034_v46 = vsel %vm635_vm3, %v8033_v56, %v20744_v16  ;;  %v8955_v49 = vrot.slane %v18307_v63, 4  ;;  %v20757_v19 = vld [vmem:[#allocation92_spill] sm:$0xff]  ;;  %v20759_v43 = vld [vmem:[#allocation57_spill] sm:$0xff] }
 0x9f1   : > { %11160 = vrot.lane.b32.xlu2 %v11159_v13, %s11578_s17  ;;  %v7612_v13 = vsel %vm635_vm3, %v18283_v35, %v7611_v41  ;;  %v11184_v18 = vpack.i.bf16 %v8508_v45, %v8396_v11  ;;  %20743 = vst [vmem:[#allocation72_spill] sm:$0xff] %v18316_v55  ;;  %v18325_v25 = vperm.slane %v8010_v8, %v20669_v54  ;;  %v8961_v23 = vrot.slane %v18230_v60, 4  ;;  %v20750_v60 = vld [vmem:[#allocation62_spill] sm:$0xff]  ;;  %v20756_v41 = vld [vmem:[#allocation89_spill] sm:$0xff] }
 0x9f2   : > { %v11174_v1 = vpack.i.bf16 %v7612_v13, %v20742_v44  ;;  %v8956_v27 = vsel %vm635_vm3, %v18316_v55, %v8955_v49  ;;  %v18332_v28 = vperm.slane %v8034_v46, %v20669_v54  ;;  %v7614_v24 = vsel %vm635_vm3, %v7613_v57, %v18099_v21  ;;  %v20760_v44 = vld [vmem:[#allocation31_spill] sm:$0xff]  ;;  %v20761_v49 = vld [vmem:[#allocation105_spill] sm:$0xff] }
 0x9f3   : > { %20745 = vst [vmem:[#allocation64_spill] sm:$0xff] %v18325_v25  ;;  %v8059_v20 = vrot.slane %v18325_v25, 4  ;;  %v8957_v34 = vrot.slane %v18212_v62, 4  ;;  %v8513_v50 = vrot.slane %v18215_v10, 4  ;;  %v11033_v58 = vunpack.i.h.bf16 %v18327_v39 }
 0x9f4   : > { %11155 = vrot.lane.b32.xlu1 %v11154_v61, %s11588_s18  ;;  %20746 = vst [vmem:[#allocation94_spill] sm:$0xff] %v18332_v28  ;;  %v11194_v61 = vpack.i.bf16 %v7614_v24, %v20747_v42  ;;  %v7999_v22 = vrot.slane %v20748_v14, 4  ;;  %v11189_v9 = vpack.i.bf16 %v8956_v27, %v20749_v47  ;;  %v18347_v21 = vsel %vm635_vm3, %v8961_v23, %v18218_v30 }
 0x9f5   : > { %v11214_v12 = vpack.i.bf16 %v20750_v60, %v18347_v21  ;;  %v18355_v62 = vsel %vm635_vm3, %v8957_v34, %v18195_v31  ;;  %v18359_v10 = vsel %vm635_vm3, %v8513_v50, %v18203_v2  ;;  %v20754_v31 = vld [vmem:[#allocation61_spill] sm:$0xff]  ;;  %v10978_v2 = vunpack.i.h.bf16 %v20755_v29 }
 0x9f6   : > { %v11209_v37 = vpack.i.bf16 %v18355_v62, %v20751_v6  ;;  %v8000_v30 = vsel %vm635_vm3, %v20752_v38, %v7999_v22  ;;  %v11219_v8 = vpack.i.bf16 %v20753_v52, %v18359_v10  ;;  %v10993_v0 = vunpack.i.h.bf16 %v20756_v41 }
 0x9f7   : > { %v8109_v45 = vrot.slane %v11033_v58, 4  ;;  %v10977_v13 = vunpack.i.l.bf16 %v20755_v29  ;;  %v18379_v56 = vperm.slane %v8000_v30, %v11869_v32  ;;  %v10997_v4 = vunpack.i.l.bf16 %v20757_v19 }
 0x9f8   : > { %11185 = vrot.lane.b32.xlu0 %v11184_v18, %s11589_s20  ;;  %v11013_v5 = vunpack.i.h.bf16 %v18369_v26  ;;  %v11032_v11 = vunpack.i.l.bf16 %v18327_v39  ;;  %v7987_v18 = vrot.slane %v20759_v43, 4  ;;  %v8535_v57 = vrot.slane %v10978_v2, 4 }
 0x9f9   : > { %11175 = vrot.lane.b32.xlu2 %v11174_v1, %s11589_s20  ;;  %20758 = vst [vmem:[#allocation22_spill] sm:$0xff] %v18379_v56  ;;  %v10973_v1 = vunpack.i.h.bf16 %v20760_v44  ;;  %v8085_v16 = vrot.slane %v10993_v0, 4  ;;  %v10972_v24 = vunpack.i.l.bf16 %v20760_v44  ;;  %v8523_v42 = vrot.slane %v10977_v13, 4 }
 0x9fa   : > { %v8110_v46 = vsel %vm635_vm3, %v8109_v45, %v11013_v5  ;;  %v7988_v27 = vsel %vm635_vm3, %v20761_v49, %v7987_v18  ;;  %v10992_v23 = vunpack.i.l.bf16 %v20756_v41  ;;  %v8521_v14 = vrot.slane %v10997_v4, 4 }
 0x9fb   : > { %v8097_v22 = vrot.slane %v11032_v11, 4  ;;  %v8524_v47 = vsel %vm635_vm3, %v10997_v4, %v8523_v42  ;;  %v18406_v30 = vperm.slane %v7988_v27, %v11869_v32  ;;  %v11012_v29 = vunpack.i.l.bf16 %v18369_v26 }
 0x9fc   : > { %11170 = vrot.lane.b32.xlu1 %v11169_v33, %s11578_s17  ;;  %v8060_v33 = vsel %vm635_vm3, %v18332_v28, %v8059_v20  ;;  %v8045_v20 = vrot.slane %v18379_v56, 4  ;;  %v8075_v41 = vrot.slane %v10972_v24, 4  ;;  %v8073_v45 = vrot.slane %v10992_v23, 4 }
 0x9fd   : > { %v11179_v40 = vpack.i.bf16 %v8060_v33, %v20754_v31  ;;  %v20762_v33 = vld [vmem:[#allocation42_spill] sm:$0xff]  ;;  %20764 = vst [vmem:[#allocation56_spill] sm:$0xff] %v18406_v30  ;;  %v8087_v31 = vrot.slane %v10973_v1, 4  ;;  %v8522_v4 = vsel %vm635_vm3, %v8521_v14, %v10977_v13  ;;  %v18419_v43 = vperm.slane %v8524_v47, %v11869_v32  ;;  %v11036_v47 = vpop.permute.xlu1 %11035 }
 0x9fe   : > { %v18403_v38 = vperm.slane %v20762_v33, %v11869_v32  ;;  %v8098_v18 = vsel %vm635_vm3, %v8097_v22, %v11012_v29  ;;  %v8076_v13 = vsel %vm635_vm3, %v10992_v23, %v8075_v41  ;;  %v8528_v14 = vperm.slane %v8522_v4, %v11869_v32  ;;  %v18447_v33 = vpop.permute.xlu2 %11055 }
 0x9ff   : > { %v8088_v26 = vsel %vm635_vm3, %v10993_v0, %v8087_v31  ;;  %v8074_v0 = vsel %vm635_vm3, %v8073_v45, %v10972_v24  ;;  %v18437_v42 = vperm.slane %v8098_v18, %v11869_v32  ;;  %v8583_v23 = vrot.slane %v18419_v43, 4 }
 0xa00   : > { %11200 = vrot.lane.b32.xlu0 %v11199_v36, %s11576_s15  ;;  %v10998_v36 = vunpack.i.h.bf16 %v20757_v19  ;;  %20763 = vst [vmem:[#allocation88_spill] sm:$0xff] %v18403_v38  ;;  %v8046_v19 = vsel %vm635_vm3, %v8045_v20, %v18406_v30  ;;  %v20768_v20 = vld [vmem:[#allocation83_spill] sm:$0xff]  ;;  %v8096_v22 = vperm.slane %v8088_v26, %v11869_v32  ;;  %v8084_v31 = vperm.slane %v8076_v13, %v11869_v32  ;;  %v20771_v13 = vld [vmem:[#allocation53_spill] sm:$0xff] }
 0xa01   : > { %11190 = vrot.lane.b32.xlu2 %v11189_v9, %s11589_s20  ;;  %v18399_v9 = vperm.slane %v8110_v46, %v11869_v32  ;;  %v18432_v49 = vperm.slane %v8046_v19, %v20669_v54  ;;  %v8080_v45 = vperm.slane %v8074_v0, %v11869_v32  ;;  %v8111_v19 = vrot.slane %v11013_v5, 4 }
 0xa02   : > { %v8533_v34 = vrot.slane %v10998_v36, 4  ;;  %v8536_v50 = vsel %vm635_vm3, %v10998_v36, %v8535_v57  ;;  %v20765_v57 = vld [vmem:[#allocation37_spill] sm:$0xff]  ;;  %v8099_v26 = vrot.slane %v11012_v29, 4  ;;  %v11038_v60 = vunpack.i.h.bf16 %v11036_v47 }
 0xa03   : > { %20767 = vst [vmem:[#allocation100_spill] sm:$0xff] %v18432_v49  ;;  %v8065_v18 = vrot.slane %v18432_v49, 4  ;;  %v8112_v62 = vsel %vm635_vm3, %v11033_v58, %v8111_v19  ;;  %v20776_v58 = vld [vmem:[#allocation76_spill] sm:$0xff]  ;;  %v8123_v19 = vrot.slane %v8080_v45, 4 }
 0xa04   : > { %11180 = vrot.lane.b32.xlu1 %v11179_v40, %s11589_s20  ;;  %v8086_v40 = vsel %vm635_vm3, %v8085_v16, %v10973_v1  ;;  %v8534_v36 = vsel %vm635_vm3, %v8533_v34, %v10978_v2  ;;  %v8145_v1 = vrot.slane %v18399_v9, 4  ;;  %v18441_v34 = vperm.slane %v20768_v20, %v11869_v32 }
 0xa05   : > { %v18424_v44 = vperm.slane %v8086_v40, %v11869_v32  ;;  %v8540_v27 = vperm.slane %v8534_v36, %v11869_v32  ;;  %v20770_v36 = vld [vmem:[#allocation103_spill] sm:$0xff]  ;;  %v8571_v20 = vrot.slane %v8528_v14, 4  ;;  %v8135_v2 = vrot.slane %v8084_v31, 4 }
 0xa06   : > { %20769 = vst [vmem:[#allocation55_spill] sm:$0xff] %v18441_v34  ;;  %v8146_v40 = vsel %vm635_vm3, %v8145_v1, %v18437_v42  ;;  %v11018_v4 = vunpack.i.h.bf16 %v20770_v36  ;;  %v11017_v21 = vunpack.i.l.bf16 %v20770_v36  ;;  %v8133_v36 = vrot.slane %v8096_v22, 4 }
 0xa07   : > { %v8121_v24 = vrot.slane %v18424_v44, 4  ;;  %v8569_v1 = vrot.slane %v8540_v27, 4  ;;  %v18472_v5 = vperm.slane %v8146_v40, %v20669_v54  ;;  %v8100_v40 = vsel %vm635_vm3, %v11032_v11, %v8099_v26 }
 0xa08   : > { %v8559_v6 = vrot.slane %v11018_v4, 4  ;;  %v8108_v49 = vperm.slane %v8100_v40, %v11869_v32  ;;  %v8572_v52 = vsel %vm635_vm3, %v8540_v27, %v8571_v20  ;;  %v20781_v40 = vld [vmem:[#allocation27_spill] sm:$0xff] }
 0xa09   : > { %11205 = vrot.lane.b32.xlu2 %v11204_v48, %s11576_s15  ;;  %v18411_v48 = vperm.slane %v8536_v50, %v11869_v32  ;;  %20773 = vst [vmem:[#allocation99_spill] sm:$0xff] %v18472_v5  ;;  %v8169_v11 = vrot.slane %v18472_v5, 4  ;;  %v18530_v20 = vperm.slane %v8572_v52, %v20669_v54 }
 0xa0b   : > { %v8581_v50 = vrot.slane %v18411_v48, 4 }
 0xa0c   : > { %11195 = vrot.lane.b32.xlu1 %v11194_v61, %s11576_s15  ;;  %v8021_v61 = vrot.slane %v18403_v38, 4  ;;  %v20803_v38 = vld [vmem:[#allocation59_spill] sm:$0xff] }
 0xa0d   : > { %v8582_v29 = vsel %vm635_vm3, %v8581_v50, %v18419_v43  ;;  %v8560_v50 = vsel %vm635_vm3, %v11038_v60, %v8559_v6  ;;  %v8584_v6 = vsel %vm635_vm3, %v18411_v48, %v8583_v23  ;;  %v8134_v48 = vsel %vm635_vm3, %v8133_v36, %v8084_v31 }
 0xa0e   : > { %v8022_v41 = vsel %vm635_vm3, %v8021_v61, %v18441_v34  ;;  %v7953_v61 = vrot.slane %v20771_v13, 4  ;;  %v8557_v13 = vrot.slane %v11038_v60, 4  ;;  %v8570_v60 = vsel %vm635_vm3, %v8569_v1, %v8528_v14 }
 0xa0f   : > { %v18469_v0 = vperm.slane %v8022_v41, %v20669_v54  ;;  %v8547_v41 = vrot.slane %v11017_v21, 4  ;;  %v18514_v14 = vperm.slane %v8582_v29, %v20669_v54  ;;  %v8136_v23 = vsel %vm635_vm3, %v8096_v22, %v8135_v2 }
 0xa10   : > { %v7954_v39 = vsel %vm635_vm3, %v7953_v61, %v20776_v58  ;;  %v18520_v61 = vperm.slane %v8570_v60, %v20669_v54  ;;  %v18523_v27 = vperm.slane %v8584_v6, %v20669_v54  ;;  %v8159_v31 = vrot.slane %v8108_v49, 4  ;;  %v20786_v6 = vld [vmem:[#allocation79_spill] sm:$0xff] }
 0xa11   : > { %11215 = vrot.lane.b32.xlu2 %v11214_v12, %s11577_s22  ;;  %v11037_v12 = vunpack.i.l.bf16 %v11036_v47  ;;  %20772 = vst [vmem:[#allocation54_spill] sm:$0xff] %v18469_v0  ;;  %v8122_v47 = vsel %vm635_vm3, %v8121_v24, %v8080_v45  ;;  %v18489_v24 = vpop.permute.xlu2 %11065  ;;  %v8568_v45 = vperm.slane %v8560_v50, %v11869_v32  ;;  %v18535_v29 = vperm.slane %v8134_v48, %v20669_v54 }
 0xa12   : > { %v18486_v43 = vperm.slane %v8122_v47, %v20669_v54  ;;  %20775 = vst [vmem:[#allocation66_spill] sm:$0xff] %v18489_v24  ;;  %v18538_v36 = vperm.slane %v8136_v23, %v20669_v54  ;;  %v18565_v52 = vperm.slane %v20786_v6, %v20669_v54  ;;  %v7704_v34 = vperm.slane %v20803_v38, %v20669_v54 }
 0xa13   : > { %v8545_v16 = vrot.slane %v11037_v12, 4  ;;  %v8548_v26 = vsel %vm635_vm3, %v11037_v12, %v8547_v41  ;;  %20779 = vst [vmem:[#allocation58_spill] sm:$0xff] %v18535_v29  ;;  %v18546_v41 = vperm.slane %v20781_v40, %v20669_v54 }
 0xa14   : > { %11210 = vrot.lane.b32.xlu1 %v11209_v37, %s11576_s15  ;;  %v8066_v37 = vsel %vm635_vm3, %v8065_v18, %v18469_v0  ;;  %20774 = vst [vmem:[#allocation74_spill] sm:$0xff] %v18486_v43  ;;  %v8120_v18 = vperm.slane %v8112_v62, %v11869_v32  ;;  %v18506_v10 = vsel %vm635_vm3, %v8169_v11, %v18486_v43  ;;  %v8147_v62 = vrot.slane %v18437_v42, 4 }
 0xa15   : > { %v11224_v47 = vpack.i.bf16 %v7954_v39, %v8066_v37  ;;  %20777 = vst [vmem:[#allocation78_spill] sm:$0xff] %v18506_v10  ;;  %v8546_v12 = vsel %vm635_vm3, %v8545_v16, %v11017_v21  ;;  %v8556_v1 = vperm.slane %v8548_v26, %v11869_v32  ;;  %v8124_v16 = vsel %vm635_vm3, %v18424_v44, %v8123_v19  ;;  %v18527_v21 = vpop.permute.xlu1 %11045  ;;  %v20783_v39 = vld [vmem:[#allocation40_spill] sm:$0xff]  ;;  %v20784_v19 = vld [vmem:[#allocation101_spill] sm:$0xff] }
 0xa16   : > { %20778 = vst [vmem:[#allocation93_spill] sm:$0xff] %v18527_v21  ;;  %v8552_v22 = vperm.slane %v8546_v12, %v11869_v32  ;;  %v8605_v44 = vrot.slane %v8568_v45, 4  ;;  %v18542_v37 = vperm.slane %v8124_v16, %v20669_v54  ;;  %v18554_v11 = vperm.slane %v20783_v39, %v20669_v54  ;;  %v20785_v26 = vld [vmem:[#allocation96_spill] sm:$0xff]  ;;  %v20787_v16 = vld [vmem:[#allocation86_spill] sm:$0xff] }
 0xa17   : > { %20780 = vst [vmem:[#allocation48_spill] sm:$0xff] %v18538_v36  ;;  %v8607_v58 = vrot.slane %v8556_v1, 4  ;;  %v7696_v42 = vperm.slane %v20784_v19, %v20669_v54  ;;  %v18572_v40 = vperm.slane %v20787_v16, %v20669_v54  ;;  %v18583_v19 = vpop.permute.xlu0 %11050  ;;  %v20795_v16 = vld [vmem:[#allocation73_spill] sm:$0xff] }
 0xa18   : > { %v8595_v48 = vrot.slane %v8552_v22, 4 }
 0xa19   : > { %11220 = vrot.lane.b32.xlu2 %v11219_v8, %s11577_s22  ;;  %v8558_v8 = vsel %vm635_vm3, %v8557_v13, %v11018_v4  ;;  %v8157_v4 = vrot.slane %v8120_v18, 4  ;;  %v20782_v13 = vld [vmem:[#allocation35_spill] sm:$0xff]  ;;  %v18568_v23 = vpop.permute.xlu2 %11080  ;;  %v7735_v51 = vrot.slane %v7696_v42, 4 }
 0xa1a   : > { %v8564_v2 = vperm.slane %v8558_v8, %v11869_v32  ;;  %v18550_v50 = vperm.slane %v20782_v13, %v20669_v54  ;;  %v8160_v8 = vsel %vm635_vm3, %v8120_v18, %v8159_v31  ;;  %v18576_v13 = vsel %vm635_vm3, %v18399_v9, %v8147_v62  ;;  %v20793_v62 = vld [vmem:[#allocation75_spill] sm:$0xff] }
 0xa1b   : > { %v8158_v60 = vsel %vm635_vm3, %v8157_v4, %v8108_v49  ;;  %v8606_v49 = vsel %vm635_vm3, %v8605_v44, %v8556_v1  ;;  %v20788_v4 = vld [vmem:[#allocation44_spill] sm:$0xff]  ;;  %v8608_v31 = vsel %vm635_vm3, %v8568_v45, %v8607_v58  ;;  %v20792_v9 = vrot.slane %v20765_v57, 4 }
 0xa1c   : > { %11225 = vrot.lane.b32.xlu1 %v11224_v47, %s11577_s22  ;;  %v18560_v47 = vperm.slane %v20785_v26, %v20669_v54  ;;  %v8593_v12 = vrot.slane %v8564_v2, 4  ;;  %v18581_v39 = vperm.slane %v20788_v4, %v20669_v54  ;;  %v18586_v18 = vperm.slane %v8158_v60, %v20669_v54  ;;  %v20790_v26 = vld [vmem:[#allocation38_spill] sm:$0xff]  ;;  %v20796_v60 = vld [vmem:[#allocation80_spill] sm:$0xff] }
 0xa1d   : > { %v18591_v6 = vperm.slane %v20790_v26, %v11869_v32  ;;  %v7912_v1 = vsel %vm635_vm3, %v20793_v62, %v20792_v9  ;;  %v18598_v44 = vperm.slane %v8160_v8, %v20669_v54  ;;  %v7716_v4 = vperm.slane %v20795_v16, %v20669_v54  ;;  %v20797_v62 = vld [vmem:[#allocation19_spill] sm:$0xff]  ;;  %v20802_v9 = vld [vmem:[#allocation70_spill] sm:$0xff] }
 0xa1e   : > { %20789 = vst [vmem:[#allocation26_spill] sm:$0xff] %v18586_v18  ;;  %v7720_v10 = vperm.slane %v20796_v60, %v20669_v54  ;;  %v9079_v45 = vrot.slane %v18560_v47, 4  ;;  %v18606_v58 = vsel %vm635_vm3, %v8593_v12, %v8552_v22  ;;  %v8596_v26 = vsel %vm635_vm3, %v8564_v2, %v8595_v48  ;;  %v18620_v60 = vpop.permute.xlu1 %11060 }
 0xa1f   : > { %20791 = vst [vmem:[#allocation77_spill] sm:$0xff] %v18591_v6  ;;  %v18610_v57 = vperm.slane %v8606_v49, %v20669_v54  ;;  %v18614_v8 = vperm.slane %v8608_v31, %v20669_v54  ;;  %v18618_v16 = vperm.slane %v20797_v62, %v20669_v54  ;;  %v18627_v2 = vperm.slane %v7912_v1, %v20669_v54  ;;  %v20799_v49 = vld [vmem:[#allocation39_spill] sm:$0xff]  ;;  %v18647_v62 = vpop.permute.xlu0 %11075 }
 0xa20   : > { %20794 = vst [vmem:[#allocation98_spill] sm:$0xff] %v18598_v44  ;;  %v18624_v22 = vsel %vm635_vm3, %v18581_v39, %v9079_v45  ;;  %v18633_v31 = vperm.slane %v20799_v49, %v11869_v32  ;;  %v11062_v12 = vunpack.i.l.bf16 %v18620_v60  ;;  %v20801_v48 = vunpack.i.h.bf16 %v18489_v24 }
 0xa21   : > { %20798 = vst [vmem:[#allocation90_spill] sm:$0xff] %v18627_v2  ;;  %v18645_v56 = vpop.permute.xlu2 %11090  ;;  %v7708_v0 = vperm.slane %v20802_v9, %v20669_v54  ;;  %v7727_v45 = vrot.slane %v18554_v11, 4  ;;  %v7731_v59 = vrot.slane %v18550_v50, 4  ;;  %v11082_v1 = vunpack.i.l.bf16 %v18568_v23 }
 0xa22   : > { %20800 = vst [vmem:[#allocation21_spill] sm:$0xff] %v18633_v31  ;;  %v7749_v2 = vrot.slane %v20801_v48, 4  ;;  %v7723_v48 = vrot.slane %v18546_v41, 4  ;;  %v7733_v49 = vrot.slane %v7720_v10, 4  ;;  %v18661_v30 = vsel %vm635_vm3, %v7720_v10, %v7735_v51 }
 0xa23   : > { %v18658_v63 = vsel %vm635_vm3, %v7708_v0, %v7727_v45  ;;  %20804 = vst [vmem:[#allocation97_spill] sm:$0xff] %v18661_v30  ;;  %v18664_v9 = vsel %vm635_vm3, %v7716_v4, %v7731_v59  ;;  %v7729_v55 = vrot.slane %v7716_v4, 4  ;;  %v20806_v6 = vunpack.i.l.bf16 %v18489_v24 }
 0xa24   : > { %20805 = vst [vmem:[#allocation87_spill] sm:$0xff] %v18664_v9  ;;  %v11083_v5 = vunpack.i.h.bf16 %v18568_v23  ;;  %v18670_v38 = vsel %vm635_vm3, %v7704_v34, %v7723_v48  ;;  %v7725_v46 = vrot.slane %v7708_v0, 4  ;;  %v8604_v35 = vperm.slane %v8596_v26, %v20669_v54 }
 0xa25   : > { %v7737_v3 = vrot.slane %v20806_v6, 4  ;;  %20807 = vst [vmem:[#allocation45_spill] sm:$0xff] %v18670_v38  ;;  %v18674_v45 = vsel %vm635_vm3, %v7733_v49, %v7696_v42  ;;  %v18678_v51 = vsel %vm635_vm3, %v7729_v55, %v18550_v50  ;;  %v7721_v59 = vrot.slane %v7704_v34, 4 }
 0xa26   : > { %20808 = vst [vmem:[#allocation65_spill] sm:$0xff] %v18674_v45  ;;  %v20810_v10 = vunpack.i.h.bf16 %v18620_v60  ;;  %v9083_v6 = vrot.slane %v11062_v12, 4  ;;  %v20811_v23 = vunpack.i.h.bf16 %v18527_v21  ;;  %v18687_v0 = vsel %vm635_vm3, %v7725_v46, %v18554_v11  ;;  %v18707_v9 = vpop.permute.xlu1 %11070  ;;  %v20817_v45 = vld [vmem:[#allocation36_spill] sm:$0xff] }
 0xa27   : > { %20809 = vst [vmem:[#allocation41_spill] sm:$0xff] %v18678_v51  ;;  %v9081_v26 = vrot.slane %v11082_v1, 4  ;;  %v8623_v42 = vrot.slane %v18530_v20, 4  ;;  %v9077_v49 = vrot.slane %v18581_v39, 4  ;;  %v18693_v55 = vsel %vm635_vm3, %v7721_v59, %v18546_v41  ;;  %v18709_v41 = vpop.permute.xlu0 %11085 }
 0xa28   : > { %v9095_v4 = vrot.slane %v20810_v10, 4  ;;  %v7750_v48 = vsel %vm635_vm3, %v7749_v2, %v20811_v23  ;;  %20812 = vst [vmem:[#allocation91_spill] sm:$0xff] %v18687_v0  ;;  %v20814_v34 = vunpack.i.l.bf16 %v18527_v21  ;;  %v8631_v2 = vrot.slane %v18523_v27, 4 }
 0xa29   : > { %20813 = vst [vmem:[#allocation71_spill] sm:$0xff] %v18693_v55  ;;  %v9075_v46 = vrot.slane %v18565_v52, 4  ;;  %v8627_v11 = vrot.slane %v18514_v14, 4  ;;  %v18704_v23 = vperm.slane %v7750_v48, %v11869_v32  ;;  %v18712_v59 = vsel %vm635_vm3, %v8604_v35, %v8623_v42 }
 0xa2a   : > { %v7738_v50 = vsel %vm635_vm3, %v7737_v3, %v20814_v34  ;;  %v9096_v39 = vsel %vm635_vm3, %v11083_v5, %v9095_v4  ;;  %v18716_v3 = vsel %vm635_vm3, %v9077_v49, %v18560_v47  ;;  %v18720_v34 = vsel %vm635_vm3, %v18614_v8, %v8631_v2 }
 0xa2b   : > { %v18724_v48 = vsel %vm635_vm3, %v18618_v16, %v9075_v46  ;;  %v18728_v4 = vsel %vm635_vm3, %v18610_v57, %v8627_v11  ;;  %v8629_v55 = vrot.slane %v18614_v8, 4  ;;  %v11052_v42 = vunpack.i.l.bf16 %v18583_v19 }
 0xa2c   : > { %20815 = vst [vmem:[#allocation49_spill] sm:$0xff] %v18728_v4  ;;  %v7744_v51 = vperm.slane %v7738_v50, %v11869_v32  ;;  %v9082_v47 = vsel %vm635_vm3, %v9081_v26, %v11062_v12  ;;  %v9084_v49 = vsel %vm635_vm3, %v11082_v1, %v9083_v6  ;;  %v9104_v2 = vperm.slane %v9096_v39, %v11869_v32 }
 0xa2d   : > { %v11072_v30 = vunpack.i.l.bf16 %v18707_v9  ;;  %v18739_v46 = vsel %vm635_vm3, %v8629_v55, %v18523_v27  ;;  %v8600_v11 = vperm.slane %v18606_v58, %v20669_v54  ;;  %v8619_v8 = vrot.slane %v18520_v61, 4 }
 0xa2e   : > { %20816 = vst [vmem:[#allocation46_spill] sm:$0xff] %v18739_v46  ;;  %v9048_v50 = vperm.slane %v20817_v45, %v20669_v54  ;;  %v9067_v12 = vrot.slane %v18572_v40, 4  ;;  %v8621_v26 = vrot.slane %v8604_v35, 4  ;;  %v7785_v1 = vrot.slane %v18704_v23, 4 }
 0xa2f   : > { %v9093_v6 = vrot.slane %v11083_v5, 4  ;;  %v18749_v39 = vperm.slane %v9082_v47, %v11869_v32  ;;  %v9092_v27 = vperm.slane %v9084_v49, %v11869_v32  ;;  %v18753_v55 = vsel %vm635_vm3, %v8600_v11, %v8619_v8 }
 0xa30   : > { %20819 = vst [vmem:[#allocation30_spill] sm:$0xff] %v18753_v55  ;;  %v18756_v58 = vsel %vm635_vm3, %v9048_v50, %v9067_v12  ;;  %v18760_v45 = vsel %vm635_vm3, %v8621_v26, %v18530_v20  ;;  %v8625_v35 = vrot.slane %v18610_v57, 4  ;;  %v8187_v5 = vrot.slane %v11052_v42, 4  ;;  %v18784_v55 = vpop.permute.xlu1 %11095 }
 0xa31   : > { %20818 = vst [vmem:[#allocation52_spill] sm:$0xff] %v18749_v39  ;;  %v8185_v38 = vrot.slane %v11072_v30, 4  ;;  %v20823_v49 = vrot.slane %v18293_v53, 4  ;;  %v20825_v26 = vunpack.i.h.bf16 %v18583_v19  ;;  %v20826_v0 = vunpack.i.h.bf16 %v18620_v60 }
 0xa32   : > { %v18698_v10 = vpop.permute.xlu2 %11115  ;;  %20820 = vst [vmem:[#allocation28_spill] sm:$0xff] %v18756_v58  ;;  %v20824_v58 = vunpack.i.l.bf16 %v18447_v33  ;;  %v11073_v31 = vunpack.i.h.bf16 %v18707_v9  ;;  %v8188_v53 = vsel %vm635_vm3, %v11072_v30, %v8187_v5  ;;  %v9131_v12 = vrot.slane %v18749_v39, 4 }
 0xa33   : > { %20821 = vst [vmem:[#allocation67_spill] sm:$0xff] %v18760_v45  ;;  %v18770_v8 = vsel %vm635_vm3, %v20823_v49, %v18276_v7  ;;  %v8199_v57 = vrot.slane %v20825_v26, 4  ;;  %v9141_v45 = vrot.slane %v9104_v2, 4  ;;  %v9094_v24 = vsel %vm635_vm3, %v9093_v6, %v20826_v0 }
 0xa34   : > { %v8635_v20 = vrot.slane %v20824_v58, 4  ;;  %v7786_v7 = vsel %vm635_vm3, %v7785_v1, %v7744_v51  ;;  %v7787_v49 = vrot.slane %v7744_v51, 4  ;;  %v18786_v58 = vpop.permute.xlu0 %11100  ;;  %v18790_v26 = vsel %vm635_vm3, %v8625_v35, %v18514_v14 }
 0xa35   : > { %20827 = vst [vmem:[#allocation62_spill] sm:$0xff] %v18790_v26  ;;  %v8186_v60 = vsel %vm635_vm3, %v8185_v38, %v11052_v42  ;;  %v11077_v0 = vunpack.i.l.bf16 %v18647_v62  ;;  %v9073_v9 = vrot.slane %v18618_v16, 4  ;;  %v8617_v30 = vrot.slane %v8600_v11, 4 }
 0xa36   : > { %v18796_v1 = vperm.slane %v9094_v24, %v11869_v32  ;;  %v9142_v51 = vsel %vm635_vm3, %v9141_v45, %v9092_v27  ;;  %v18800_v6 = vperm.slane %v8188_v53, %v11869_v32  ;;  %v9065_v5 = vrot.slane %v9048_v50, 4 }
 0xa37   : > { %v8197_v14 = vrot.slane %v11073_v31, 4  ;;  %v18805_v38 = vsel %vm635_vm3, %v9073_v9, %v18565_v52  ;;  %v18809_v16 = vsel %vm635_vm3, %v8617_v30, %v18520_v61  ;;  %v20830_v24 = vunpack.i.h.bf16 %v18447_v33 }
 0xa38   : > { %20828 = vst [vmem:[#allocation43_spill] sm:$0xff] %v18805_v38  ;;  %v18814_v11 = vperm.slane %v8186_v60, %v11869_v32  ;;  %v18823_v52 = vsel %vm635_vm3, %v18704_v23, %v7787_v49  ;;  %v18826_v50 = vperm.slane %v7786_v7, %v20669_v54  ;;  %v9132_v61 = vsel %vm635_vm3, %v18796_v1, %v9131_v12 }
 0xa39   : > { %20829 = vst [vmem:[#allocation50_spill] sm:$0xff] %v18809_v16  ;;  %v8647_v42 = vrot.slane %v20830_v24, 4  ;;  %v8636_v45 = vsel %vm635_vm3, %v11077_v0, %v8635_v20  ;;  %v20036_v23 = vunpack.i.l.bf16 %v18784_v55  ;;  %v11078_v20 = vunpack.i.h.bf16 %v18647_v62 }
 0xa3a   : > { %20832 = vst [vmem:[#allocation61_spill] sm:$0xff] %v18826_v50  ;;  %v8183_v7 = vrot.slane %v18538_v36, 4  ;;  %v18850_v49 = vperm.slane %v9132_v61, %v20669_v54  ;;  %v18854_v60 = vperm.slane %v8636_v45, %v11869_v32  ;;  %v18862_v62 = vperm.slane %v18576_v13, %v20669_v54 }
 0xa3b   : > { %v18764_v47 = vpop.permute.xlu2 %11130  ;;  %v8659_v61 = vrot.slane %v20036_v23, 4  ;;  %v8645_v30 = vrot.slane %v11078_v20, 4  ;;  %v8648_v13 = vsel %vm635_vm3, %v11078_v20, %v8647_v42  ;;  %v11117_v23 = vunpack.i.l.bf16 %v18698_v10 }
 0xa3c   : > { %20822 = vst [vmem:[#allocation63_spill] sm:$0xff] %v18764_v47  ;;  %v9143_v47 = vrot.slane %v9092_v27, 4  ;;  %v8200_v27 = vsel %vm635_vm3, %v11073_v31, %v8199_v57  ;;  %v18834_v31 = vperm.slane %v9142_v51, %v20669_v54  ;;  %v20834_v57 = vunpack.i.h.bf16 %v18583_v19 }
 0xa3d   : > { %v18845_v12 = vperm.slane %v8200_v27, %v11869_v32  ;;  %20835 = vst [vmem:[#allocation89_spill] sm:$0xff] %v18850_v49  ;;  %v8633_v51 = vrot.slane %v11077_v0, 4  ;;  %v18873_v45 = vsel %vm635_vm3, %v18598_v44, %v8183_v7  ;;  %v20837_v7 = vunpack.i.l.bf16 %v18447_v33 }
 0xa3e   : > { %v9144_v39 = vsel %vm635_vm3, %v9104_v2, %v9143_v47  ;;  %v18819_v2 = vsel %vm635_vm3, %v9065_v5, %v18572_v40  ;;  %v8247_v47 = vrot.slane %v18800_v6, 4  ;;  %v8198_v53 = vsel %vm635_vm3, %v8197_v14, %v20834_v57 }
 0xa3f   : > { %20831 = vst [vmem:[#allocation47_spill] sm:$0xff] %v18819_v2  ;;  %v18837_v40 = vperm.slane %v9144_v39, %v20669_v54  ;;  %v8235_v39 = vrot.slane %v18814_v11, 4  ;;  %v18865_v24 = vperm.slane %v8198_v53, %v11869_v32  ;;  %v11093_v57 = vunpack.i.h.bf16 %v18645_v56 }
 0xa40   : > { %v8248_v27 = vsel %vm635_vm3, %v18845_v12, %v8247_v47  ;;  %v11092_v5 = vunpack.i.l.bf16 %v18645_v56  ;;  %v8695_v47 = vrot.slane %v18854_v60, 4  ;;  %v8634_v0 = vsel %vm635_vm3, %v8633_v51, %v20837_v7 }
 0xa41   : > { %v8236_v53 = vsel %vm635_vm3, %v18865_v24, %v8235_v39  ;;  %v18884_v16 = vperm.slane %v8248_v27, %v20669_v54  ;;  %v20838_v2 = vunpack.i.h.bf16 %v18784_v55  ;;  %v18894_v39 = vperm.slane %v8648_v13, %v11869_v32 }
 0xa42   : > { %v8660_v56 = vsel %vm635_vm3, %v11117_v23, %v8659_v61  ;;  %v11103_v26 = vunpack.i.h.bf16 %v18786_v58  ;;  %v18899_v27 = vperm.slane %v8236_v53, %v20669_v54  ;;  %v8223_v21 = vrot.slane %v11093_v57, 4 }
 0xa43   : > { %v18831_v35 = vpop.permute.xlu2 %11140  ;;  %v8671_v38 = vrot.slane %v20838_v2, 4  ;;  %v20840_v51 = vunpack.i.h.bf16 %v18447_v33  ;;  %v20045_v2 = vunpack.i.h.bf16 %v18698_v10  ;;  %v18908_v13 = vperm.slane %v8634_v0, %v11869_v32 }
 0xa44   : > { %20833 = vst [vmem:[#allocation32_spill] sm:$0xff] %v18831_v35  ;;  %v8696_v61 = vsel %vm635_vm3, %v18894_v39, %v8695_v47  ;;  %v18917_v33 = vperm.slane %v8660_v56, %v11869_v32  ;;  %v9119_v25 = vrot.slane %v11103_v26, 4 }
 0xa45   : > { %v18904_v7 = vsel %vm635_vm3, %v8645_v30, %v20840_v51  ;;  %v8672_v53 = vsel %vm635_vm3, %v20045_v2, %v8671_v38  ;;  %v8657_v2 = vrot.slane %v11117_v23, 4 }
 0xa46   : > { %v18856_v9 = vpop.permute.xlu1 %11105  ;;  %v11111_v19 = vpop.permute.xlu0 %11110  ;;  %v18928_v56 = vperm.slane %v8672_v53, %v11869_v32 }
 0xa47   : > { %20836 = vst [vmem:[#allocation92_spill] sm:$0xff] %v18856_v9  ;;  %v11112_v14 = vunpack.i.l.bf16 %v11111_v19  ;;  %v11113_v50 = vunpack.i.h.bf16 %v11111_v19  ;;  %v11102_v19 = vunpack.i.l.bf16 %v18786_v58  ;;  %v20051_v0 = vunpack.i.l.bf16 %v18856_v9 }
 0xa49   : > { %v8209_v20 = vrot.slane %v11112_v14, 4  ;;  %v8224_v36 = vsel %vm635_vm3, %v11113_v50, %v8223_v21  ;;  %v8221_v58 = vrot.slane %v11113_v50, 4  ;;  %v9107_v30 = vrot.slane %v11102_v19, 4 }
 0xa4a   : > { %v18935_v21 = vperm.slane %v8224_v36, %v11869_v32  ;;  %v7761_v23 = vrot.slane %v20051_v0, 4 }
 0xa4b   : > { %v18891_v42 = vpop.permute.xlu2 %11160  ;;  %v8210_v51 = vsel %vm635_vm3, %v8209_v20, %v11092_v5  ;;  %v8719_v20 = vrot.slane %v18917_v33, 4  ;;  %v8222_v28 = vsel %vm635_vm3, %v8221_v58, %v11093_v57 }
 0xa4c   : > { %20839 = vst [vmem:[#allocation57_spill] sm:$0xff] %v18891_v42  ;;  %v8211_v42 = vrot.slane %v11092_v5, 4  ;;  %v18931_v5 = vperm.slane %v8210_v51, %v11869_v32 }
 0xa4e   : > { %v11121_v46 = vpop.permute.xlu1 %11120  ;;  %v8212_v47 = vsel %vm635_vm3, %v11112_v14, %v8211_v42 }
 0xa4f   : > { %v18925_v18 = vperm.slane %v8212_v47, %v11869_v32  ;;  %v11123_v35 = vunpack.i.h.bf16 %v11121_v46  ;;  %v11122_v38 = vunpack.i.l.bf16 %v11121_v46 }
 0xa51   : > { %v8271_v50 = vrot.slane %v18925_v18, 4  ;;  %v9117_v14 = vrot.slane %v11123_v35, 4  ;;  %v9105_v53 = vrot.slane %v11122_v38, 4  ;;  %v9108_v51 = vsel %vm635_vm3, %v11122_v38, %v9107_v30 }
 0xa52   : > { %v18938_v42 = vpop.permute.xlu0 %11125  ;;  %v9116_v43 = vperm.slane %v9108_v51, %v11869_v32  ;;  %v9120_v29 = vsel %vm635_vm3, %v11123_v35, %v9119_v25  ;;  %v8295_v38 = vrot.slane %v18884_v16, 4  ;;  %v20844_v25 = vunpack.i.l.bf16 %v18709_v41 }
 0xa53   : > { %20841 = vst [vmem:[#allocation31_spill] sm:$0xff] %v18938_v42  ;;  %v18940_v47 = vpop.permute.xlu2 %11175  ;;  %v8272_v36 = vsel %vm635_vm3, %v18935_v21, %v8271_v50  ;;  %v8259_v42 = vrot.slane %v18931_v5, 4  ;;  %v9106_v46 = vsel %vm635_vm3, %v9105_v53, %v11102_v19  ;;  %v9118_v0 = vsel %vm635_vm3, %v9117_v14, %v11103_v26 }
 0xa54   : > { %20842 = vst [vmem:[#allocation105_spill] sm:$0xff] %v18940_v47  ;;  %v18953_v44 = vperm.slane %v8272_v36, %v20669_v54  ;;  %v18960_v57 = vperm.slane %v9106_v46, %v11869_v32  ;;  %v9128_v30 = vperm.slane %v9120_v29, %v11869_v32  ;;  %v9167_v58 = vrot.slane %v9116_v43, 4 }
 0xa55   : > { %v7762_v35 = vsel %vm635_vm3, %v7761_v23, %v20844_v25  ;;  %v18968_v50 = vperm.slane %v8222_v28, %v11869_v32  ;;  %v11177_v26 = vunpack.i.l.bf16 %v18940_v47  ;;  %v18972_v19 = vperm.slane %v9118_v0, %v11869_v32 }
 0xa56   : > { %v18957_v4 = vpop.permute.xlu1 %11145  ;;  %20843 = vst [vmem:[#allocation42_spill] sm:$0xff] %v18960_v57  ;;  %v9155_v14 = vrot.slane %v18960_v57, 4  ;;  %v9168_v29 = vsel %vm635_vm3, %v9128_v30, %v9167_v58  ;;  %v8296_v46 = vsel %vm635_vm3, %v18953_v44, %v8295_v38  ;;  %v20845_v53 = vunpack.i.h.bf16 %v18856_v9  ;;  %v20846_v57 = vld [vmem:[#allocation60_spill] sm:$0xff] }
 0xa57   : > { %v8260_v28 = vsel %vm635_vm3, %v18968_v50, %v8259_v42  ;;  %v18983_v23 = vperm.slane %v9168_v29, %v20669_v54  ;;  %v9191_v36 = vrot.slane %v18837_v40, 4  ;;  %v9165_v25 = vrot.slane %v9128_v30, 4 }
 0xa58   : > { %v7773_v51 = vrot.slane %v20845_v53, 4  ;;  %v9156_v0 = vsel %vm635_vm3, %v18972_v19, %v9155_v14  ;;  %v18990_v58 = vsel %vm9641_vm10, %v20846_v57, %v11177_v26  ;;  %v11239_v38 = vpack.i.bf16 %v18873_v45, %v8296_v46 }
 0xa59   : > { %v18998_v42 = vperm.slane %v8696_v61, %v20669_v54  ;;  %v8720_v29 = vsel %vm635_vm3, %v18928_v56, %v8719_v20  ;;  %v19004_v30 = vperm.slane %v7762_v35, %v11869_v32  ;;  %v19009_v45 = vperm.slane %v8260_v28, %v20669_v54 }
 0xa5a   : > { %v18993_v9 = vpop.permute.xlu0 %11135  ;;  %11240 = vrot.lane.b32.xlu0 %v11239_v38, %s11586_s5  ;;  %v9192_v26 = vsel %vm635_vm3, %v18983_v23, %v9191_v36  ;;  %v19014_v61 = vperm.slane %v9156_v0, %v20669_v54  ;;  %v20849_v20 = vunpack.i.l.bf16 %v18784_v55  ;;  %v8287_v35 = vrot.slane %v18899_v27, 4 }
 0xa5b   : > { %20847 = vst [vmem:[#allocation37_spill] sm:$0xff] %v18993_v9  ;;  %v18995_v53 = vpop.permute.xlu2 %11190  ;;  %v11229_v46 = vpack.i.bf16 %v18624_v22, %v9192_v26  ;;  %v9183_v47 = vrot.slane %v18850_v49, 4  ;;  %v19025_v28 = vperm.slane %v8720_v29, %v20669_v54  ;;  %v20850_v36 = vunpack.i.h.bf16 %v18709_v41 }
 0xa5c   : > { %20848 = vst [vmem:[#allocation83_spill] sm:$0xff] %v18995_v53  ;;  %v11192_v57 = vunpack.i.l.bf16 %v18995_v53  ;;  %v8658_v14 = vsel %vm635_vm3, %v8657_v2, %v20849_v20  ;;  %v9166_v9 = vsel %vm635_vm3, %v9165_v25, %v9116_v43  ;;  %v20851_v53 = vld [vmem:[#allocation82_spill] sm:$0xff]  ;;  %v20852_v20 = vunpack.i.h.bf16 %v18698_v10 }
 0xa5d   : > { %v7774_v0 = vsel %vm635_vm3, %v7773_v51, %v20850_v36  ;;  %v7811_v26 = vrot.slane %v19004_v30, 4  ;;  %v8288_v49 = vsel %vm635_vm3, %v19009_v45, %v8287_v35  ;;  %11230 = vrot.lane.b32.xlu1 %v11229_v46, %s11586_s5  ;;  %v9184_v29 = vsel %vm635_vm3, %v19014_v61, %v9183_v47 }
 0xa5e   : > { %v19021_v38 = vpop.permute.xlu1 %11150  ;;  %v19033_v2 = vsel %vm9641_vm10, %v20851_v53, %v11192_v57  ;;  %v8669_v22 = vrot.slane %v20852_v20, 4  ;;  %v8693_v51 = vrot.slane %v18894_v39, 4  ;;  %v19045_v43 = vperm.slane %v8658_v14, %v11869_v32 }
 0xa5f   : > { %v11254_v25 = vpack.i.bf16 %v9184_v29, %v18712_v59  ;;  %v8743_v10 = vrot.slane %v18998_v42, 4  ;;  %v8683_v53 = vrot.slane %v18908_v13, 4  ;;  %v19051_v57 = vperm.slane %v7774_v0, %v11869_v32 }
 0xa60   : > { %v19054_v35 = vperm.slane %v9166_v9, %v20669_v54  ;;  %v20853_v46 = vrot.slane %v18542_v37, 4  ;;  %v19062_v47 = vperm.slane %v18904_v7, %v11869_v32  ;;  %v8717_v59 = vrot.slane %v18928_v56, 4 }
 0xa61   : > { %11255 = vrot.lane.b32.xlu2 %v11254_v25, %s11587_s10  ;;  %v8744_v9 = vsel %vm635_vm3, %v19025_v28, %v8743_v10  ;;  %v20854_v0 = vunpack.i.h.bf16 %v18784_v55  ;;  %v7812_v29 = vsel %vm635_vm3, %v19051_v57, %v7811_v26  ;;  %v9189_v7 = vrot.slane %v18983_v23, 4 }
 0xa62   : > { %v8176_v39 = vsel %vm635_vm3, %v18862_v62, %v20853_v46  ;;  %v19065_v36 = vpop.permute.xlu0 %11165  ;;  %v9187_v46 = vrot.slane %v18834_v31, 4  ;;  %v20855_v56 = vrot.slane %v18845_v12, 4  ;;  %v8694_v55 = vsel %vm635_vm3, %v8693_v51, %v18854_v60 }
 0xa63   : > { %v11249_v14 = vpack.i.bf16 %v8288_v49, %v8176_v39  ;;  %v8670_v20 = vsel %vm635_vm3, %v8669_v22, %v20854_v0  ;;  %v19079_v49 = vperm.slane %v18823_v52, %v20669_v54  ;;  %v8707_v22 = vrot.slane %v19045_v43, 4 }
 0xa64   : > { %v8246_v25 = vsel %vm635_vm3, %v20855_v56, %v18800_v6  ;;  %v8684_v23 = vsel %vm635_vm3, %v19062_v47, %v8683_v53  ;;  %v8269_v26 = vrot.slane %v18935_v21, 4  ;;  %v11234_v52 = vpack.i.bf16 %v18720_v34, %v8744_v9 }
 0xa65   : > { %11250 = vrot.lane.b32.xlu0 %v11249_v14, %s11587_s10  ;;  %v9188_v12 = vsel %vm635_vm3, %v19054_v35, %v9187_v46  ;;  %v19098_v6 = vperm.slane %v8670_v20, %v11869_v32  ;;  %v8718_v60 = vsel %vm635_vm3, %v8717_v59, %v18917_v33  ;;  %v8505_v51 = vrot.slane %v18280_v17, 4 }
 0xa66   : > { %v19093_v10 = vpop.permute.xlu1 %11155  ;;  %v19104_v39 = vperm.slane %v7812_v29, %v20669_v54  ;;  %v8233_v21 = vrot.slane %v18865_v24, 4  ;;  %v19108_v34 = vperm.slane %v8246_v25, %v20669_v54  ;;  %v19111_v53 = vperm.slane %v8694_v55, %v20669_v54  ;;  %11235 = vrot.lane.b32.xlu1 %v11234_v52, %s11586_s5  ;;  %v11206_v29 = vpop.permute.xlu2 %11205 }
 0xa67   : > { %v9190_v14 = vsel %vm635_vm3, %v9189_v7, %v18837_v40  ;;  %v19117_v33 = vperm.slane %v8684_v23, %v20669_v54  ;;  %v8708_v17 = vsel %vm635_vm3, %v19098_v6, %v8707_v22  ;;  %v11259_v59 = vpack.i.bf16 %v18724_v48, %v9188_v12 }
 0xa68   : > { %v7839_v24 = vrot.slane %v19079_v49, 4  ;;  %v8681_v9 = vrot.slane %v19062_v47, 4  ;;  %v19125_v0 = vperm.slane %v8718_v60, %v20669_v54  ;;  %v8270_v40 = vsel %vm635_vm3, %v8269_v26, %v18925_v18 }
 0xa69   : > { %v11148_v20 = vunpack.i.h.bf16 %v18957_v4  ;;  %v11147_v7 = vunpack.i.l.bf16 %v18957_v4  ;;  %v11264_v46 = vpack.i.bf16 %v18716_v3, %v9190_v14  ;;  %v8506_v48 = vsel %vm635_vm3, %v8505_v51, %v18269_v15  ;;  %11260 = vrot.lane.b32.xlu2 %v11259_v59, %s11588_s18 }
 0xa6a   : > { %v11186_v56 = vpop.permute.xlu0 %11185  ;;  %v7840_v47 = vsel %vm635_vm3, %v19104_v39, %v7839_v24  ;;  %v19138_v18 = vperm.slane %v8708_v17, %v20669_v54  ;;  %v8739_v22 = vrot.slane %v19111_v53, 4  ;;  %v11208_v23 = vunpack.i.h.bf16 %v11206_v29 }
 0xa6b   : > { %v11188_v25 = vunpack.i.h.bf16 %v11186_v56  ;;  %v11187_v55 = vunpack.i.l.bf16 %v11186_v56  ;;  %v11207_v4 = vunpack.i.l.bf16 %v11206_v29  ;;  %v8735_v3 = vrot.slane %v19117_v33, 4 }
 0xa6c   : > { %v11244_v52 = vpack.i.bf16 %v7840_v47, %v18658_v63  ;;  %v8740_v60 = vsel %vm635_vm3, %v19125_v0, %v8739_v22  ;;  %v9129_v51 = vrot.slane %v18796_v1, 4  ;;  %v19153_v14 = vperm.slane %v8270_v40, %v20669_v54  ;;  %v20857_v47 = vld [vmem:[#allocation98_spill] sm:$0xff] }
 0xa6d   : > { %11265 = vrot.lane.b32.xlu0 %v11264_v46, %s11578_s17  ;;  %v9651_v15 = vsel %vm9641_vm10, %v8506_v48, %v11188_v25  ;;  %v9650_v26 = vsel %vm9641_vm10, %v18770_v8, %v11187_v55  ;;  %v8705_v24 = vrot.slane %v19098_v6, 4  ;;  %v8736_v8 = vsel %vm635_vm3, %v19138_v18, %v8735_v3  ;;  %v20856_v46 = vld [vmem:[#allocation49_spill] sm:$0xff]  ;;  %v20858_v22 = vld [vmem:[#allocation58_spill] sm:$0xff] }
 0xa6e   : > { %v19147_v12 = vpop.permute.xlu1 %11170  ;;  %v9666_v17 = vsel %vm1923_vm6, %v9650_v26, %v11207_v4  ;;  %v9667_v59 = vsel %vm1923_vm6, %v9651_v15, %v11208_v23  ;;  %11245 = vrot.lane.b32.xlu1 %v11244_v52, %s11587_s10  ;;  %v8234_v40 = vsel %vm635_vm3, %v8233_v21, %v18814_v11  ;;  %v11274_v48 = vpack.i.bf16 %v20856_v46, %v8740_v60  ;;  %v20859_v4 = vld [vmem:[#allocation81_spill] sm:$0xff]  ;;  %v20860_v21 = vld [vmem:[#allocation74_spill] sm:$0xff]  ;;  %v20862_v52 = vld [vmem:[#allocation32_spill] sm:$0xff] }
 0xa6f   : > { %v19162_v63 = vsel %vm9674_vm11, %v9666_v17, %v11147_v7  ;;  %v19165_v29 = vsel %vm9674_vm11, %v9667_v59, %v11148_v20  ;;  %v8291_v56 = vrot.slane %v19108_v34, 4  ;;  %v8181_v6 = vrot.slane %v20857_v47, 4  ;;  %v20863_v59 = vld [vmem:[#allocation26_spill] sm:$0xff] }
 0xa70   : > { %v8682_v25 = vsel %vm635_vm3, %v8681_v9, %v18908_v13  ;;  %v7809_v55 = vrot.slane %v19051_v57, 4  ;;  %v8179_v7 = vrot.slane %v20858_v22, 4  ;;  %v8293_v23 = vrot.slane %v18953_v44, 4  ;;  %v20861_v44 = vld [vmem:[#allocation94_spill] sm:$0xff] }
 0xa71   : > { %v8257_v20 = vrot.slane %v18968_v50, 4  ;;  %v11269_v3 = vpack.i.bf16 %v8736_v8, %v20859_v4  ;;  %11275 = vrot.lane.b32.xlu2 %v11274_v48, %s11588_s18  ;;  %v8292_v11 = vsel %vm635_vm3, %v19153_v14, %v8291_v56  ;;  %v8171_v15 = vrot.slane %v20860_v21, 4 }
 0xa72   : > { %v19184_v26 = vperm.slane %v8234_v40, %v20669_v54  ;;  %v8706_v13 = vsel %vm635_vm3, %v8705_v24, %v19045_v43  ;;  %v8741_v57 = vrot.slane %v19025_v28, 4  ;;  %v8057_v9 = vrot.slane %v20861_v44, 4  ;;  %v11201_v17 = vpop.permute.xlu0 %11200  ;;  %v20864_v40 = vld [vmem:[#allocation48_spill] sm:$0xff] }
 0xa73   : > { %v19191_v50 = vperm.slane %v8682_v25, %v20669_v54  ;;  %v11143_v60 = vunpack.i.h.bf16 %v20862_v52  ;;  %v8180_v8 = vsel %vm635_vm3, %v20863_v59, %v8179_v7  ;;  %v8182_v46 = vsel %vm635_vm3, %v8181_v6, %v20864_v40 }
 0xa74   : > { %v11142_v43 = vunpack.i.l.bf16 %v20862_v52  ;;  %v7810_v28 = vsel %vm635_vm3, %v7809_v55, %v19004_v30  ;;  %v11284_v24 = vpack.i.bf16 %v8180_v8, %v8292_v11  ;;  %v8294_v56 = vsel %vm635_vm3, %v8293_v23, %v18884_v16  ;;  %v20865_v30 = vld [vmem:[#allocation64_spill] sm:$0xff] }
 0xa75   : > { %11270 = vrot.lane.b32.xlu0 %v11269_v3, %s11587_s10  ;;  %v8258_v47 = vsel %vm635_vm3, %v8257_v20, %v18931_v5  ;;  %v19207_v7 = vperm.slane %v8706_v13, %v20669_v54  ;;  %v11203_v3 = vunpack.i.h.bf16 %v11201_v17  ;;  %v11202_v6 = vunpack.i.l.bf16 %v11201_v17  ;;  %v20866_v23 = vld [vmem:[#allocation104_spill] sm:$0xff] }
 0xa76   : > { %v11181_v48 = vpop.permute.xlu1 %11180  ;;  %v8742_v21 = vsel %vm635_vm3, %v8741_v57, %v18998_v42  ;;  %11285 = vrot.lane.b32.xlu1 %v11284_v24, %s11588_s18  ;;  %v8058_v55 = vsel %vm635_vm3, %v8057_v9, %v20865_v30  ;;  %v11289_v20 = vpack.i.bf16 %v8182_v46, %v8294_v56  ;;  %v8731_v11 = vrot.slane %v19191_v50, 4  ;;  %v20867_v13 = vld [vmem:[#allocation20_spill] sm:$0xff]  ;;  %v20868_v57 = vld [vmem:[#allocation46_spill] sm:$0xff] }
 0xa77   : > { %v11183_v25 = vunpack.i.h.bf16 %v11181_v48  ;;  %v11182_v4 = vunpack.i.l.bf16 %v11181_v48  ;;  %v7609_v44 = vrot.slane %v20867_v13, 4  ;;  %v19222_v42 = vperm.slane %v8258_v47, %v20669_v54  ;;  %v20869_v48 = vld [vmem:[#allocation105_spill] sm:$0xff]  ;;  %v20873_v30 = vld [vmem:[#allocation52_spill] sm:$0xff] }
 0xa78   : > { %v11279_v8 = vpack.i.bf16 %v20868_v57, %v8742_v21  ;;  %v8732_v9 = vsel %vm635_vm3, %v19207_v7, %v8731_v11  ;;  %v9153_v24 = vrot.slane %v18972_v19, 4  ;;  %v11178_v56 = vunpack.i.h.bf16 %v20869_v48  ;;  %v20874_v19 = vld [vmem:[#allocation29_spill] sm:$0xff] }
 0xa79   : > { %v9647_v16 = vsel %vm9641_vm10, %v8058_v55, %v11183_v25  ;;  %v9646_v5 = vsel %vm9641_vm10, %v20866_v23, %v11182_v4  ;;  %11290 = vrot.lane.b32.xlu2 %v11289_v20, %s11578_s17  ;;  %v19237_v47 = vperm.slane %v7810_v28, %v20669_v54  ;;  %v8283_v25 = vrot.slane %v19184_v26, 4  ;;  %v20870_v4 = vld [vmem:[#allocation34_spill] sm:$0xff]  ;;  %v20876_v28 = vld [vmem:[#allocation84_spill] sm:$0xff]  ;;  %v20877_v23 = vld [vmem:[#allocation61_spill] sm:$0xff] }
 0xa7a   : > { %v9662_v52 = vsel %vm1923_vm6, %v9646_v5, %v11202_v6  ;;  %v9663_v17 = vsel %vm1923_vm6, %v9647_v16, %v11203_v3  ;;  %v19242_v3 = vperm.slane %v20870_v4, %v11869_v32  ;;  %v20871_v6 = vld [vmem:[#allocation93_spill] sm:$0xff]  ;;  %v20875_v55 = vrot.slane %v20874_v19, 4  ;;  %v20878_v20 = vld [vmem:[#allocation30_spill] sm:$0xff] }
 0xa7b   : > { %v19229_v40 = vsel %vm9674_vm11, %v9662_v52, %v11142_v43  ;;  %v19232_v46 = vsel %vm9674_vm11, %v9663_v17, %v11143_v60  ;;  %v20872_v21 = vunpack.i.l.bf16 %v20871_v6  ;;  %v9130_v60 = vsel %vm635_vm3, %v9129_v51, %v20873_v30  ;;  %v20879_v52 = vld [vmem:[#allocation99_spill] sm:$0xff] }
 0xa7c   : > { %v19255_v16 = vsel %vm635_vm3, %v20876_v28, %v20875_v55  ;;  %v7835_v5 = vrot.slane %v20877_v23, 4  ;;  %v11304_v11 = vpack.i.bf16 %v8732_v9, %v20878_v20  ;;  %v8172_v17 = vsel %vm635_vm3, %v20879_v52, %v8171_v15  ;;  %v20880_v51 = vld [vmem:[#allocation95_spill] sm:$0xff]  ;;  %v20882_v55 = vld [vmem:[#allocation77_spill] sm:$0xff]  ;;  %v20885_v20 = vld [vmem:[#allocation66_spill] sm:$0xff] }
 0xa7d   : > { %v7739_v43 = vrot.slane %v20872_v21, 4  ;;  %11280 = vrot.lane.b32.xlu0 %v11279_v8, %s11578_s17  ;;  %v8284_v1 = vsel %vm635_vm3, %v19222_v42, %v8283_v25  ;;  %v7610_v57 = vsel %vm635_vm3, %v7609_v44, %v20880_v51  ;;  %v8285_v4 = vrot.slane %v19009_v45, 4  ;;  %v20881_v21 = vld [vmem:[#allocation42_spill] sm:$0xff]  ;;  %v20888_v51 = vld [vmem:[#allocation72_spill] sm:$0xff] }
 0xa7e   : > { %v11196_v13 = vpop.permute.xlu1 %11195  ;;  %v9154_v30 = vsel %vm635_vm3, %v9153_v24, %v20881_v21  ;;  %v9643_v19 = vsel %vm9641_vm10, %v7610_v57, %v11178_v56  ;;  %v7836_v9 = vsel %vm635_vm3, %v19237_v47, %v7835_v5  ;;  %11305 = vrot.lane.b32.xlu1 %v11304_v11, %s11589_s20  ;;  %v8173_v15 = vrot.slane %v18862_v62, 4  ;;  %v20884_v24 = vld [vmem:[#allocation21_spill] sm:$0xff] }
 0xa7f   : > { %v11198_v8 = vunpack.i.h.bf16 %v11196_v13  ;;  %v11197_v48 = vunpack.i.l.bf16 %v11196_v13  ;;  %v11299_v45 = vpack.i.bf16 %v8284_v1, %v8172_v17  ;;  %v20883_v28 = vrot.slane %v20882_v55, 4  ;;  %v20889_v1 = vld [vmem:[#allocation45_spill] sm:$0xff] }
 0xa80   : > { %v20886_v5 = vunpack.i.l.bf16 %v20885_v20  ;;  %v19290_v62 = vperm.slane %v9130_v60, %v20669_v54  ;;  %v7837_v52 = vrot.slane %v19104_v39, 4  ;;  %v8953_v17 = vrot.slane %v20888_v51, 4 }
 0xa81   : > { %v19275_v25 = vsel %vm1923_vm6, %v18990_v58, %v11197_v48  ;;  %v19278_v44 = vsel %vm1923_vm6, %v9643_v19, %v11198_v8  ;;  %v19284_v56 = vsel %vm635_vm3, %v20884_v24, %v20883_v28  ;;  %v20887_v58 = vunpack.i.l.bf16 %v18709_v41  ;;  %11300 = vrot.lane.b32.xlu2 %v11299_v45, %s11589_s20  ;;  %v20891_v48 = vld [vmem:[#allocation24_spill] sm:$0xff]  ;;  %v20893_v28 = vld [vmem:[#allocation83_spill] sm:$0xff] }
 0xa82   : > { %v7740_v11 = vsel %vm635_vm3, %v20886_v5, %v7739_v43  ;;  %v11294_v57 = vpack.i.bf16 %v7836_v9, %v20889_v1  ;;  %v8286_v8 = vsel %vm635_vm3, %v8285_v4, %v18899_v27  ;;  %v20890_v43 = vrot.slane %v20884_v24, 4  ;;  %v20892_v19 = vld [vmem:[#allocation56_spill] sm:$0xff] }
 0xa83   : > { %v7763_v13 = vrot.slane %v20887_v58, 4  ;;  %v19306_v21 = vperm.slane %v20891_v48, %v11869_v32  ;;  %v8047_v39 = vrot.slane %v20892_v19, 4  ;;  %v11193_v5 = vunpack.i.h.bf16 %v20893_v28  ;;  %v20895_v58 = vld [vmem:[#allocation92_spill] sm:$0xff] }
 0xa84   : > { %v7574_v60 = vsel %vm635_vm3, %v20890_v43, %v20882_v55  ;;  %v19311_v9 = vperm.slane %v9154_v30, %v20669_v54  ;;  %v7597_v45 = vrot.slane %v19242_v3, 4  ;;  %v20894_v27 = vunpack.i.h.bf16 %v20871_v6 }
 0xa85   : > { %v20896_v24 = vunpack.i.l.bf16 %v20895_v58  ;;  %11295 = vrot.lane.b32.xlu0 %v11294_v57, %s11589_s20  ;;  %v8174_v51 = vsel %vm635_vm3, %v8173_v15, %v18542_v37  ;;  %v19323_v1 = vperm.slane %v7740_v11, %v11869_v32  ;;  %v9179_v30 = vrot.slane %v19290_v62, 4 }
 0xa86   : > { %v7751_v4 = vrot.slane %v20894_v27, 4  ;;  %v11319_v43 = vpack.i.bf16 %v8286_v8, %v8174_v51  ;;  %v19326_v48 = vpop.permute.xlu1 %11210  ;;  %v7838_v6 = vsel %vm635_vm3, %v7837_v52, %v19079_v49  ;;  %v20897_v19 = vunpack.i.h.bf16 %v18709_v41 }
 0xa87   : > { %v7764_v55 = vsel %vm635_vm3, %v20896_v24, %v7763_v13  ;;  %v20898_v13 = vld [vmem:[#allocation102_spill] sm:$0xff]  ;;  %v11213_v27 = vunpack.i.h.bf16 %v19326_v48  ;;  %v8737_v37 = vrot.slane %v19125_v0, 4  ;;  %v11153_v8 = vunpack.i.h.bf16 %v19021_v38 }
 0xa88   : > { %v7775_v28 = vrot.slane %v20897_v19, 4  ;;  %v8954_v57 = vsel %vm635_vm3, %v8953_v17, %v20898_v13  ;;  %v19337_v15 = vperm.slane %v7764_v55, %v11869_v32  ;;  %v9180_v49 = vsel %vm635_vm3, %v19311_v9, %v9179_v30  ;;  %11320 = vrot.lane.b32.xlu1 %v11319_v43, %s11576_s15  ;;  %v20901_v55 = vld [vmem:[#allocation91_spill] sm:$0xff]  ;;  %v20904_v43 = vld [vmem:[#allocation88_spill] sm:$0xff] }
 0xa89   : > { %v9655_v11 = vsel %vm9641_vm10, %v8954_v57, %v11193_v5  ;;  %v20899_v41 = vunpack.i.h.bf16 %v20885_v20  ;;  %v20900_v17 = vunpack.i.h.bf16 %v20895_v58  ;;  %v11314_v51 = vpack.i.bf16 %v7838_v6, %v20901_v55  ;;  %v20902_v30 = vld [vmem:[#allocation55_spill] sm:$0xff]  ;;  %v20905_v57 = vld [vmem:[#allocation28_spill] sm:$0xff] }
 0xa8a   : > { %v9671_v24 = vsel %vm1923_vm6, %v9655_v11, %v11213_v27  ;;  %v9181_v19 = vrot.slane %v19014_v61, 4  ;;  %v20903_v13 = vrot.slane %v20902_v30, 4  ;;  %v11309_v58 = vpack.i.bf16 %v9180_v49, %v20905_v57  ;;  %v20906_v6 = vld [vmem:[#allocation23_spill] sm:$0xff] }
 0xa8b   : > { %v7752_v52 = vsel %vm635_vm3, %v20899_v41, %v7751_v4  ;;  %v7776_v0 = vsel %vm635_vm3, %v20900_v17, %v7775_v28  ;;  %v19353_v5 = vsel %vm9674_vm11, %v9671_v24, %v11153_v8  ;;  %v7580_v4 = vperm.slane %v7574_v60, %v20669_v54  ;;  %11315 = vrot.lane.b32.xlu2 %v11314_v51, %s11576_s15  ;;  %v20907_v17 = vld [vmem:[#allocation22_spill] sm:$0xff]  ;;  %v20909_v51 = vld [vmem:[#allocation89_spill] sm:$0xff] }
 0xa8c   : > { %v8024_v20 = vsel %vm635_vm3, %v20904_v43, %v20903_v13  ;;  %v8738_v28 = vsel %vm635_vm3, %v8737_v37, %v19111_v53  ;;  %v9069_v27 = vrot.slane %v20906_v6, 4  ;;  %v8177_v11 = vrot.slane %v20863_v59, 4  ;;  %v20908_v37 = vld [vmem:[#allocation62_spill] sm:$0xff] }
 0xa8d   : > { %v7799_v61 = vrot.slane %v19323_v1, 4  ;;  %v7823_v8 = vrot.slane %v19337_v15, 4  ;;  %v8733_v41 = vrot.slane %v19138_v18, 4  ;;  %v8048_v60 = vsel %vm635_vm3, %v20907_v17, %v8047_v39  ;;  %11310 = vrot.lane.b32.xlu0 %v11309_v58, %s11589_s20  ;;  %v20910_v39 = vld [vmem:[#allocation85_spill] sm:$0xff] }
 0xa8e   : > { %v7784_v49 = vperm.slane %v7776_v0, %v11869_v32  ;;  %v8032_v24 = vperm.slane %v8024_v20, %v20669_v54  ;;  %v7598_v53 = vsel %vm635_vm3, %v7597_v45, %v19306_v21  ;;  %v8289_v59 = vrot.slane %v19153_v14, 4 }
 0xa8f   : > { %v11349_v55 = vpack.i.bf16 %v20908_v37, %v8738_v28  ;;  %v9182_v30 = vsel %vm635_vm3, %v9181_v19, %v20909_v51  ;;  %v7604_v18 = vperm.slane %v7598_v53, %v20669_v54  ;;  %v7619_v13 = vrot.slane %v7580_v4, 4 }
 0xa90   : > { %v9070_v0 = vsel %vm635_vm3, %v9069_v27, %v20910_v39  ;;  %v8056_v43 = vperm.slane %v8048_v60, %v20669_v54  ;;  %v19387_v20 = vsel %vm635_vm3, %v8177_v11, %v20858_v22  ;;  %v19391_v14 = vsel %vm635_vm3, %v8289_v59, %v19108_v34  ;;  %v20911_v34 = vld [vmem:[#allocation25_spill] sm:$0xff]  ;;  %v20913_v60 = vld [vmem:[#allocation67_spill] sm:$0xff]  ;;  %v20915_v39 = vld [vmem:[#allocation100_spill] sm:$0xff] }
 0xa91   : > { %v7824_v45 = vsel %vm635_vm3, %v7784_v49, %v7823_v8  ;;  %v8734_v19 = vsel %vm635_vm3, %v8733_v41, %v19117_v33  ;;  %11350 = vrot.lane.b32.xlu1 %v11349_v55, %s11577_s22  ;;  %v19398_v57 = vsel %vm635_vm3, %v7604_v18, %v7619_v13  ;;  %v11374_v58 = vpack.i.bf16 %v19387_v20, %v19391_v14  ;;  %v20912_v8 = vld [vmem:[#allocation90_spill] sm:$0xff] }
 0xa92   : > { %v11329_v28 = vpack.i.bf16 %v9182_v30, %v9070_v0  ;;  %v7944_v22 = vperm.slane %v19255_v16, %v20669_v54  ;;  %v8071_v6 = vrot.slane %v8032_v24, 4  ;;  %v11389_v27 = vpack.i.bf16 %v20911_v34, %v19398_v57  ;;  %v20914_v55 = vld [vmem:[#allocation54_spill] sm:$0xff]  ;;  %v20917_v34 = vld [vmem:[#allocation51_spill] sm:$0xff] }
 0xa93   : > { %v7760_v11 = vperm.slane %v7752_v52, %v11869_v32  ;;  %v7959_v33 = vrot.slane %v20912_v8, 4  ;;  %v7599_v41 = vrot.slane %v19306_v21, 4  ;;  %v7832_v17 = vperm.slane %v7824_v45, %v20669_v54 }
 0xa94   : > { %v11324_v53 = vpack.i.bf16 %v8734_v19, %v20913_v60  ;;  %11330 = vrot.lane.b32.xlu2 %v11329_v28, %s11576_s15  ;;  %v8072_v59 = vsel %vm635_vm3, %v8056_v43, %v8071_v6  ;;  %v8069_v37 = vrot.slane %v8056_v43, 4  ;;  %v8067_v51 = vrot.slane %v20914_v55, 4 }
 0xa95   : > { %v7800_v16 = vsel %vm635_vm3, %v7760_v11, %v7799_v61  ;;  %v7960_v32 = vsel %vm635_vm3, %v7944_v22, %v7959_v33  ;;  %v7600_v21 = vsel %vm635_vm3, %v19242_v3, %v7599_v41  ;;  %v7617_v52 = vrot.slane %v7604_v18, 4 }
 0xa96   : > { %11325 = vrot.lane.b32.xlu0 %v11324_v53, %s11576_s15  ;;  %v7957_v30 = vrot.slane %v7944_v22, 4  ;;  %v11354_v13 = vpack.i.bf16 %v7960_v32, %v8072_v59  ;;  %v8068_v0 = vsel %vm635_vm3, %v20915_v39, %v8067_v51  ;;  %v7608_v45 = vperm.slane %v7600_v21, %v20669_v54  ;;  %v20916_v22 = vld [vmem:[#allocation33_spill] sm:$0xff]  ;;  %s10002_s15 = sshll.u32 %s11651_s28, 4 }
 0xa97   : > { %v7808_v61 = vperm.slane %v7800_v16, %v20669_v54  ;;  %v7821_v43 = vrot.slane %v7784_v49, 4  ;;  %v7845_v19 = vrot.slane %v7832_v17, 4  ;;  %v7618_v57 = vsel %vm635_vm3, %v7617_v52, %v7580_v4  ;;  %v20920_v52 = vld [vmem:[#allocation69_spill] sm:$0xff]  ;;  %s9796_s8 = scalar_lea.hbm %s19787_s6, %s10002_s15 }
 0xa98   : > { %v8070_v28 = vsel %vm635_vm3, %v8069_v37, %v8032_v24  ;;  %v7584_v3 = vperm.slane %v19284_v56, %v20669_v54  ;;  %v7621_v18 = vrot.slane %v7608_v45, 4  ;;  %v11379_v6 = vpack.i.bf16 %v20916_v22, %v7618_v57  ;;  %v20918_v56 = vld [vmem:[#allocation68_spill] sm:$0xff]  ;;  %v19471_v22 = vpop.permute.xlu1 %11225  ;;  %s9800_s21 = sshll.u32 %s9796_s8, 4  ;;  %s9801_s21 = int_to_ptr.hbm [resolvable:$true] %s9800_s21 }
 0xa99   : > { %11355 = vrot.lane.b32.xlu1 %v11354_v13, %s11586_s5  ;;  %v11334_v33 = vpack.i.bf16 %v20917_v34, %v8068_v0  ;;  %v7797_v41 = vrot.slane %v7760_v11, 4  ;;  %v7958_v60 = vsel %vm635_vm3, %v7957_v30, %v20912_v8  ;;  %v7822_v4 = vsel %vm635_vm3, %v7821_v43, %v19337_v15  ;;  %v20919_v8 = vld [vmem:[#allocation65_spill] sm:$0xff]  ;;  %v20922_v43 = vld [vmem:[#allocation43_spill] sm:$0xff]  ;;  %s11478_s16 = sshra.s32 %s9801_s21, 4  ;;  %s11479_s16 = int_to_ptr.hbm [resolvable:$true] %s11478_s16 }
 0xa9a   : > { %v7622_v49 = vsel %vm635_vm3, %v7621_v18, %v7584_v3  ;;  %v11339_v24 = vpack.i.bf16 %v7958_v60, %v8070_v28  ;;  %v7846_v53 = vsel %vm635_vm3, %v7845_v19, %v7808_v61  ;;  %v9185_v16 = vrot.slane %v19054_v35, 4  ;;  %v20921_v13 = vld [vmem:[#allocation97_spill] sm:$0xff]  ;;  %v20924_v28 = vld [vmem:[#allocation87_spill] sm:$0xff]  ;;  %s11480_s26 = scalar_lea.hbm %s11479_s16, 16  ;;  %p11485_p0 = scmp.lt.s32.totalorder %s11479_s16, %s19787_s6 }
 0xa9b   : > { %v11394_v59 = vpack.i.bf16 %v20918_v56, %v7622_v49  ;;  %v7847_v37 = vrot.slane %v7808_v61, 4  ;;  %v7623_v55 = vrot.slane %v7584_v3, 4  ;;  %v7828_v11 = vperm.slane %v7822_v4, %v20669_v54  ;;  %p11481_p4 = scmp.ne.s32.totalorder %s11479_s16, %s11480_s26  ;;  %p11486_p7 = scmp.lt.s32.totalorder %s11484_s19, %s11480_s26 }
 0xa9c   : > { %11335 = vrot.lane.b32.xlu2 %v11334_v33, %s11588_s18  ;;  %v11364_v51 = vpack.i.bf16 %v20919_v8, %v7846_v53  ;;  %v7798_v21 = vsel %vm635_vm3, %v7797_v41, %v19323_v1  ;;  %v9186_v35 = vsel %vm635_vm3, %v9185_v16, %v18834_v31  ;;  %v20923_v31 = vld [vmem:[#allocation41_spill] sm:$0xff] }
 0xa9d   : > { %v7848_v32 = vsel %vm635_vm3, %v7832_v17, %v7847_v37  ;;  %v7624_v15 = vsel %vm635_vm3, %v7608_v45, %v7623_v55  ;;  %v7804_v0 = vperm.slane %v7798_v21, %v20669_v54  ;;  %v7841_v61 = vrot.slane %v7828_v11, 4  ;;  %v11216_v54 = vpop.permute.xlu2 %11215  ;;  %v20925_v8 = vld [vmem:[#allocation57_spill] sm:$0xff]  ;;  %p11482_p6 = pnand %p11481_p4, %p11682_p11  ;;  %p11487_p5 = por %p11486_p7, %p11485_p0 }
 0xa9e   : > { %11340 = vrot.lane.b32.xlu0 %v11339_v24, %s11578_s17  ;;  %v11399_v30 = vpack.i.bf16 %v20920_v52, %v7624_v15  ;;  %v11369_v39 = vpack.i.bf16 %v20921_v13, %v7848_v32  ;;  %v11344_v19 = vpack.i.bf16 %v20922_v43, %v9186_v35  ;;  %v11212_v55 = vunpack.i.l.bf16 %v19326_v48 }
 0xa9f   : > { %v7843_v17 = vrot.slane %v7804_v0, 4  ;;  %v7842_v1 = vsel %vm635_vm3, %v7841_v61, %v7804_v0  ;;  %v11162_v32 = vunpack.i.l.bf16 %v20925_v8  ;;  %v11217_v15 = vunpack.i.l.bf16 %v11216_v54  ;;  %p11483_p13 = pneg %p11482_p6 }
 0xaa0   : > { %v11384_v57 = vpack.i.bf16 %v20923_v31, %v7842_v1  ;;  %v9670_v21 = vsel %vm1923_vm6, %v19033_v2, %v11212_v55  ;;  %v11152_v13 = vunpack.i.l.bf16 %v19021_v38  ;;  %v11218_v43 = vunpack.i.h.bf16 %v11216_v54  ;;  %v20927_v31 = vld [vmem:[#allocation47_spill] sm:$0xff] }
 0xaa1   : > { %11365 = vrot.lane.b32.xlu1 %v11364_v51, %s11578_s17  ;;  %v7844_v45 = vsel %vm635_vm3, %v7828_v11, %v7843_v17  ;;  %v11163_v51 = vunpack.i.h.bf16 %v20925_v8  ;;  %v9704_v17 = vsel %vm1929_vm7, %v19353_v5, %v11217_v15  ;;  %v11158_v2 = vunpack.i.h.bf16 %v19093_v10  ;;  %p11488_p8 = pnand %p11487_p5, %p11483_p13 }
 0xaa2   : > { %v11359_v3 = vpack.i.bf16 %v20924_v28, %v7844_v45 }
 0xaa4   : > { %11370 = vrot.lane.b32.xlu2 %v11369_v39, %s11586_s5  ;;  %v11157_v39 = vunpack.i.l.bf16 %v19093_v10 }
 0xaa5   : > { %v11221_v18 = vpop.permute.xlu2 %11220 }
 0xaa6   : > { %11345 = vrot.lane.b32.xlu0 %v11344_v19, %s11577_s22  ;;  %v9721_v38 = vsel %vm9707_vm13, %v9704_v17, %v11157_v39  ;;  %v11223_v55 = vunpack.i.h.bf16 %v11221_v18  ;;  %v20928_v39 = vld [vmem:[#allocation78_spill] sm:$0xff]  ;;  %v11168_v17 = vunpack.i.h.bf16 %v19065_v36 }
 0xaa9   : > { %11390 = vrot.lane.b32.xlu1 %v11389_v27, %s11588_s18 }
 0xaac   : > { %11385 = vrot.lane.b32.xlu2 %v11384_v57, %s11577_s22 }
 0xaae   : > { %11360 = vrot.lane.b32.xlu0 %v11359_v3, %s11588_s18  ;;  %v9737_v3 = vsel %vm1935_vm8, %v9721_v38, %v11162_v32 }
 0xab4   : > { %11395 = vrot.lane.b32.xlu2 %v11394_v59, %s11578_s17 }
 0xab6   : > { %11375 = vrot.lane.b32.xlu0 %v11374_v58, %s11577_s22 }
 0xabb   : > { %v19468_v27 = vpop.permute.xlu2 %11255 }
 0xabe   : > { %11380 = vrot.lane.b32.xlu0 %v11379_v6, %s11577_s22 }
 0xac3   : > { %v19473_v34 = vpop.permute.xlu2 %11260 }
 0xac6   : > { %11400 = vrot.lane.b32.xlu0 %v11399_v30, %s11586_s5  ;;  %v20926_v30 = vld [vmem:[#allocation31_spill] sm:$0xff] }
 0xac7   : > { %v11127_v35 = vunpack.i.l.bf16 %v20926_v30  ;;  %v11128_v10 = vunpack.i.h.bf16 %v20926_v30  ;;  %v9699_v30 = vsel %vm1929_vm7, %v19162_v63, %v11223_v55  ;;  %v20930_v55 = vld [vmem:[#allocation37_spill] sm:$0xff] }
 0xac8   : > { %v9716_v63 = vsel %vm9707_vm13, %v9699_v30, %v11168_v17 }
 0xac9   : > { %v19536_v15 = vsel %vm9740_vm14, %v9737_v3, %v11127_v35 }
 0xacb   : > { %v19479_v60 = vpop.permute.xlu2 %11275 }
 0xacc   : > { %v19475_v33 = vpop.permute.xlu0 %11240 }
 0xacf   : > { %v19477_v41 = vpop.permute.xlu1 %11230 }
 0xad3   : > { %v19487_v58 = vpop.permute.xlu2 %11290 }
 0xad7   : > { %v19481_v49 = vpop.permute.xlu0 %11250 }
 0xad8   : > { %v19483_v20 = vpop.permute.xlu1 %11235  ;;  %v11252_v35 = vunpack.i.l.bf16 %v19481_v49 }
 0xadb   : > { %v19493_v24 = vpop.permute.xlu2 %11300 }
 0xadc   : > { %v11302_v1 = vunpack.i.l.bf16 %v19493_v24 }
 0xade   : > { %v9648_v32 = vsel %vm9641_vm10, %v20928_v39, %v11302_v1  ;;  %v11173_v1 = vunpack.i.h.bf16 %v19147_v12  ;;  %v8729_v39 = vrot.slane %v19207_v7, 4 }
 0xadf   : > { %v19485_v14 = vpop.permute.xlu0 %11265 }
 0xae0   : > { %v19489_v6 = vpop.permute.xlu1 %11245  ;;  %v9732_v3 = vsel %vm1935_vm8, %v9716_v63, %v11173_v1  ;;  %v8730_v17 = vsel %vm635_vm3, %v8729_v39, %v19191_v50  ;;  %v11227_v1 = vunpack.i.l.bf16 %v19471_v22  ;;  %v8281_v63 = vrot.slane %v19222_v42, 4 }
 0xae1   : > { %v11232_v39 = vunpack.i.l.bf16 %v19477_v41 }
 0xae5   : > { %v19499_v59 = vpop.permute.xlu2 %11315 }
 0xae7   : > { %v19491_v4 = vpop.permute.xlu0 %11270 }
 0xae8   : > { %v19495_v53 = vpop.permute.xlu1 %11285  ;;  %v11272_v11 = vunpack.i.l.bf16 %v19491_v4 }
 0xaea   : > { %v9687_v48 = vsel %vm9674_vm11, %v9670_v21, %v11272_v11  ;;  %v11222_v11 = vunpack.i.l.bf16 %v11221_v18 }
 0xaeb   : > { %v9703_v54 = vsel %vm1929_vm7, %v9687_v48, %v11218_v43 }
 0xaec   : > { %v9720_v21 = vsel %vm9707_vm13, %v9703_v54, %v11158_v2  ;;  %v11167_v2 = vunpack.i.l.bf16 %v19065_v36 }
 0xaed   : > { %v9736_v48 = vsel %vm1935_vm8, %v9720_v21, %v11163_v51 }
 0xaee   : > { %v19511_v52 = vpop.permute.xlu2 %11330  ;;  %v19544_v43 = vsel %vm9740_vm14, %v9736_v48, %v11128_v10 }
 0xaef   : > { %v19497_v56 = vpop.permute.xlu0 %11280  ;;  %v11332_v45 = vunpack.i.l.bf16 %v19511_v52 }
 0xaf0   : > { %v19501_v16 = vpop.permute.xlu1 %11305 }
 0xaf6   : > { %v19585_v30 = vpop.permute.xlu2 %11335 }
 0xaf7   : > { %v19503_v37 = vpop.permute.xlu0 %11295 }
 0xafa   : > { %v19517_v61 = vpop.permute.xlu1 %11320 }
 0xafb   : > { %v11322_v28 = vunpack.i.l.bf16 %v19517_v61 }
 0xafd   : > { %v9664_v18 = vsel %vm1923_vm6, %v9648_v32, %v11322_v28 }
 0xafe   : > { %v19554_v51 = vsel %vm9674_vm11, %v9664_v18, %v11252_v35  ;;  %v11308_v18 = vunpack.i.h.bf16 %v19501_v16 }
 0xaff   : > { %v11311_v0 = vpop.permute.xlu0 %11310 }
 0xb00   : > { %v11312_v19 = vunpack.i.l.bf16 %v11311_v0  ;;  %v11313_v10 = vunpack.i.h.bf16 %v11311_v0 }
 0xb02   : > { %v9656_v57 = vsel %vm9641_vm10, %v20927_v31, %v11312_v19  ;;  %v20929_v31 = vld [vmem:[#allocation63_spill] sm:$0xff] }
 0xb03   : > { %v9672_v5 = vsel %vm1923_vm6, %v9656_v57, %v11332_v45  ;;  %v11172_v45 = vunpack.i.l.bf16 %v19147_v12  ;;  %v11132_v57 = vunpack.i.l.bf16 %v20929_v31  ;;  %v11138_v12 = vunpack.i.h.bf16 %v20930_v55  ;;  %v11351_v35 = vpop.permute.xlu1 %11350 }
 0xb04   : > { %v19533_v8 = vsel %vm9674_vm11, %v9672_v5, %v11152_v13  ;;  %v9700_v13 = vsel %vm1929_vm7, %v19165_v29, %v11222_v11  ;;  %v11133_v29 = vunpack.i.h.bf16 %v20929_v31  ;;  %v11137_v11 = vunpack.i.l.bf16 %v20930_v55  ;;  %v20931_v31 = vld [vmem:[#allocation50_spill] sm:$0xff] }
 0xb05   : > { %v9717_v38 = vsel %vm9707_vm13, %v9700_v13, %v11167_v2  ;;  %v9177_v5 = vrot.slane %v19311_v9, 4  ;;  %v19582_v48 = vsel %vm9674_vm11, %v19278_v44, %v11138_v12  ;;  %v11307_v13 = vunpack.i.l.bf16 %v19501_v16 }
 0xb06   : > { %v9733_v28 = vsel %vm1935_vm8, %v9717_v38, %v11172_v45  ;;  %v19568_v54 = vsel %vm9740_vm14, %v9732_v3, %v11133_v29  ;;  %v19578_v32 = vsel %vm9674_vm11, %v19275_v25, %v11137_v11  ;;  %v11333_v25 = vunpack.i.h.bf16 %v19511_v52 }
 0xb07   : > { %v19565_v36 = vsel %vm9740_vm14, %v9733_v28, %v11132_v57  ;;  %v9178_v9 = vsel %vm635_vm3, %v9177_v5, %v19290_v62  ;;  %v9653_v2 = vsel %vm9641_vm10, %v8730_v17, %v11308_v18  ;;  %v11258_v45 = vunpack.i.h.bf16 %v19468_v27 }
 0xb08   : > { %v11326_v19 = vpop.permute.xlu0 %11325  ;;  %v9657_v7 = vsel %vm9641_vm10, %v9178_v9, %v11313_v10  ;;  %v11257_v16 = vunpack.i.l.bf16 %v19468_v27  ;;  %v11273_v52 = vunpack.i.h.bf16 %v19491_v4  ;;  %v9652_v50 = vsel %vm9641_vm10, %v20931_v31, %v11307_v13 }
 0xb09   : > { %v11328_v0 = vunpack.i.h.bf16 %v11326_v19  ;;  %v11327_v44 = vunpack.i.l.bf16 %v11326_v19  ;;  %v9673_v62 = vsel %vm1923_vm6, %v9657_v7, %v11333_v25  ;;  %v11263_v29 = vunpack.i.h.bf16 %v19473_v34 }
 0xb0a   : > { %v11262_v55 = vunpack.i.l.bf16 %v19473_v34  ;;  %v11268_v12 = vunpack.i.h.bf16 %v19485_v14  ;;  %v9690_v42 = vsel %vm9674_vm11, %v9673_v62, %v11258_v45  ;;  %v11267_v4 = vunpack.i.l.bf16 %v19485_v14 }
 0xb0b   : > { %v9669_v38 = vsel %vm1923_vm6, %v9653_v2, %v11328_v0  ;;  %v9668_v57 = vsel %vm1923_vm6, %v9652_v50, %v11327_v44  ;;  %v11352_v11 = vunpack.i.l.bf16 %v11351_v35  ;;  %v19618_v0 = vpop.permute.xlu2 %11370  ;;  %v11353_v13 = vunpack.i.h.bf16 %v11351_v35  ;;  %v19626_v2 = vpop.permute.xlu1 %11355 }
 0xb0c   : > { %v9686_v27 = vsel %vm9674_vm11, %v9669_v38, %v11273_v52  ;;  %v9685_v18 = vsel %vm9674_vm11, %v9668_v57, %v11257_v16  ;;  %v11233_v17 = vunpack.i.h.bf16 %v19477_v41  ;;  %v7833_v44 = vrot.slane %v19237_v47, 4 }
 0xb0d   : > { %v9702_v7 = vsel %vm1929_vm7, %v9686_v27, %v11352_v11  ;;  %v9701_v62 = vsel %vm1929_vm7, %v9685_v18, %v11353_v13  ;;  %v11278_v35 = vunpack.i.h.bf16 %v19479_v60  ;;  %v11298_v38 = vunpack.i.h.bf16 %v19503_v37 }
 0xb0e   : > { %v11228_v41 = vunpack.i.h.bf16 %v19471_v22  ;;  %v19639_v47 = vsel %vm1929_vm7, %v19232_v46, %v11227_v1  ;;  %v11282_v50 = vunpack.i.l.bf16 %v19497_v56  ;;  %v11323_v46 = vunpack.i.h.bf16 %v19517_v61 }
 0xb0f   : > { %v9718_v57 = vsel %vm9707_vm13, %v9701_v62, %v11278_v35  ;;  %v11338_v13 = vunpack.i.h.bf16 %v19585_v30 }
 0xb10   : > { %v19573_v21 = vpop.permute.xlu0 %11340 }
 0xb18   : > { %v11346_v19 = vpop.permute.xlu0 %11345 }
 0xb19   : > { %v11348_v28 = vunpack.i.h.bf16 %v11346_v19  ;;  %v11347_v3 = vunpack.i.l.bf16 %v11346_v19  ;;  %v11303_v19 = vunpack.i.h.bf16 %v19493_v24  ;;  %v11237_v24 = vunpack.i.l.bf16 %v19483_v20 }
 0xb1b   : > { %v9705_v5 = vsel %vm1929_vm7, %v19533_v8, %v11348_v28  ;;  %v9706_v10 = vsel %vm1929_vm7, %v9690_v42, %v11347_v3  ;;  %v11277_v8 = vunpack.i.l.bf16 %v19479_v60  ;;  %v8282_v60 = vsel %vm635_vm3, %v8281_v63, %v19184_v26 }
 0xb1c   : > { %v9723_v34 = vsel %vm9707_vm13, %v9706_v10, %v11262_v55  ;;  %v9722_v9 = vsel %vm9707_vm13, %v9705_v5, %v11263_v29  ;;  %v7834_v29 = vsel %vm635_vm3, %v7833_v44, %v20877_v23  ;;  %v11283_v28 = vunpack.i.h.bf16 %v19497_v56 }
 0xb1d   : > { %v9739_v14 = vsel %vm1935_vm8, %v9723_v34, %v11267_v4  ;;  %v9738_v25 = vsel %vm1935_vm8, %v9722_v9, %v11268_v12  ;;  %v9719_v31 = vsel %vm9707_vm13, %v9702_v7, %v11277_v8  ;;  %v11297_v3 = vunpack.i.l.bf16 %v19503_v37  ;;  %v20932_v4 = vld [vmem:[#allocation71_spill] sm:$0xff] }
 0xb1e   : > { %v9756_v45 = vsel %vm9740_vm14, %v9739_v14, %v11232_v39  ;;  %v9755_v52 = vsel %vm9740_vm14, %v9738_v25, %v11233_v17  ;;  %v9735_v1 = vsel %vm1935_vm8, %v9719_v31, %v11282_v50  ;;  %v11243_v55 = vunpack.i.h.bf16 %v19475_v33  ;;  %v11366_v39 = vpop.permute.xlu1 %11365 }
 0xb1f   : > { %9758 = vmatpush.msra.mxu2 %v9756_v45  ;;  %v11242_v26 = vunpack.i.l.bf16 %v19475_v33  ;;  %v9645_v23 = vsel %vm9641_vm10, %v7834_v29, %v11298_v38  ;;  %v11293_v63 = vunpack.i.h.bf16 %v19487_v58  ;;  %v11292_v56 = vunpack.i.l.bf16 %v19487_v58 }
 0xb20   : > { %v19632_v16 = vpop.permute.xlu0 %11360  ;;  %v11318_v37 = vunpack.i.h.bf16 %v19499_v59  ;;  %v9734_v61 = vsel %vm1935_vm8, %v9718_v57, %v11283_v28  ;;  %v11238_v12 = vunpack.i.h.bf16 %v19483_v20  ;;  %v9649_v33 = vsel %vm9641_vm10, %v8282_v60, %v11303_v19 }
 0xb21   : > { %9759 = vmatpush.msra.mxu2 %v9755_v52  ;;  %v9752_v27 = vsel %vm9740_vm14, %v9735_v1, %v11237_v24  ;;  %v11248_v42 = vunpack.i.h.bf16 %v19489_v6  ;;  %v9644_v11 = vsel %vm9641_vm10, %v20932_v4, %v11297_v3  ;;  %v9665_v5 = vsel %vm1923_vm6, %v9649_v33, %v11323_v46 }
 0xb22   : > { %v9661_v58 = vsel %vm1923_vm6, %v9645_v23, %v11318_v37  ;;  %v11247_v10 = vunpack.i.l.bf16 %v19489_v6  ;;  %v11288_v20 = vunpack.i.h.bf16 %v19495_v53  ;;  %v9751_v34 = vsel %vm9740_vm14, %v9734_v61, %v11238_v12 }
 0xb23   : > { %9760 = vmatpush.msra.mxu2 %v19536_v15  ;;  %v11253_v15 = vunpack.i.h.bf16 %v19481_v49  ;;  %v11317_v49 = vunpack.i.l.bf16 %v19499_v59  ;;  %v11287_v9 = vunpack.i.l.bf16 %v19495_v53  ;;  %v11337_v8 = vunpack.i.l.bf16 %v19585_v30 }
 0xb24   : > { %v9678_v6 = vsel %vm9674_vm11, %v9661_v58, %v11248_v42  ;;  %v11342_v44 = vunpack.i.l.bf16 %v19573_v21  ;;  %v11362_v35 = vunpack.i.l.bf16 %v19632_v16  ;;  %v11343_v52 = vunpack.i.h.bf16 %v19573_v21 }
 0xb25   : > { %9761 = vmatpush.msra.mxu2 %v19544_v43  ;;  %v11386_v43 = vpop.permute.xlu2 %11385  ;;  %v9660_v25 = vsel %vm1923_vm6, %v9644_v11, %v11317_v49  ;;  %v9682_v59 = vsel %vm9674_vm11, %v9665_v5, %v11253_v15  ;;  %v11357_v31 = vunpack.i.l.bf16 %v19626_v2  ;;  %v11363_v60 = vunpack.i.h.bf16 %v19632_v16 }
 0xb26   : > { %v11387_v17 = vunpack.i.l.bf16 %v11386_v43  ;;  %v11388_v62 = vunpack.i.h.bf16 %v11386_v43  ;;  %v9713_v29 = vsel %vm9707_vm13, %v19639_v47, %v11337_v8  ;;  %v9695_v21 = vsel %vm1929_vm7, %v19229_v40, %v11228_v41  ;;  %v11391_v41 = vpop.permute.xlu1 %11390 }
 0xb27   : > { %9762 = vmatpush.msra.mxu2 %v9752_v27  ;;  %v9729_v57 = vsel %vm1935_vm8, %v9713_v29, %v11342_v44  ;;  %v9677_v28 = vsel %vm9674_vm11, %v9660_v25, %v11247_v10  ;;  %v11358_v16 = vunpack.i.h.bf16 %v19626_v2  ;;  %v9712_v46 = vsel %vm9707_vm13, %v9695_v21, %v11338_v13 }
 0xb28   : > { %v11376_v18 = vpop.permute.xlu0 %11375  ;;  %v9693_v47 = vsel %vm1929_vm7, %v9677_v28, %v11388_v62  ;;  %v11367_v22 = vunpack.i.l.bf16 %v11366_v39  ;;  %v9728_v40 = vsel %vm1935_vm8, %v9712_v46, %v11343_v52  ;;  %v9746_v24 = vsel %vm9740_vm14, %v9729_v57, %v11357_v31 }
 0xb29   : > { %v11378_v7 = vunpack.i.h.bf16 %v11376_v18  ;;  %v11377_v14 = vunpack.i.l.bf16 %v11376_v18  ;;  %9763 = vmatpush.msra.mxu2 %v9751_v34  ;;  %v9710_v23 = vsel %vm9707_vm13, %v9693_v47, %v11363_v60  ;;  %v9745_v61 = vsel %vm9740_vm14, %v9728_v40, %v11358_v16  ;;  %v9757_v34 = vld [vmem:[#allocation7] sm:$0xff] }
 0xb2a   : > { %v11392_v12 = vunpack.i.l.bf16 %v11391_v41  ;;  %v11373_v27 = vunpack.i.h.bf16 %v19618_v0  ;;  %v11393_v11 = vunpack.i.h.bf16 %v11391_v41 }
 0xb2b   : > { %v9697_v45 = vsel %vm1929_vm7, %v19554_v51, %v11378_v7  ;;  %v9698_v53 = vsel %vm1929_vm7, %v9682_v59, %v11377_v14  ;;  %9764 = vmatpush.msra.mxu2 %v19565_v36 }
 0xb2c   : > { %v9715_v38 = vsel %vm9707_vm13, %v9698_v53, %v11287_v9  ;;  %v9714_v30 = vsel %vm9707_vm13, %v9697_v45, %v11288_v20 }
 0xb2d   : > { %9765 = vmatpush.msra.mxu2 %v19568_v54  ;;  %v9731_v50 = vsel %vm1935_vm8, %v9715_v38, %v11292_v56  ;;  %v9730_v51 = vsel %vm1935_vm8, %v9714_v30, %v11293_v63  ;;  %v9694_v54 = vsel %vm1929_vm7, %v9678_v6, %v11387_v17  ;;  %v11368_v63 = vunpack.i.h.bf16 %v11366_v39  ;;  %v11396_v15 = vpop.permute.xlu2 %11395 }
 0xb2e   : > { %v9748_v36 = vsel %vm9740_vm14, %v9731_v50, %v11242_v26  ;;  %v9747_v19 = vsel %vm9740_vm14, %v9730_v51, %v11243_v55  ;;  %v9711_v1 = vsel %vm9707_vm13, %v9694_v54, %v11362_v35  ;;  %v11372_v56 = vunpack.i.l.bf16 %v19618_v0 }
 0xb2f   : > { %9766 = vmatpush.msra.mxu2 %v9748_v36  ;;  %v9727_v2 = vsel %vm1935_vm8, %v9711_v1, %v11367_v22  ;;  %v9726_v33 = vsel %vm1935_vm8, %v9710_v23, %v11368_v63  ;;  %v11397_v5 = vunpack.i.l.bf16 %v11396_v15  ;;  %v11398_v20 = vunpack.i.h.bf16 %v11396_v15 }
 0xb30   : > { %v11381_v3 = vpop.permute.xlu0 %11380  ;;  %v9744_v4 = vsel %vm9740_vm14, %v9727_v2, %v11372_v56  ;;  %v9743_v43 = vsel %vm9740_vm14, %v9726_v33, %v11373_v27 }
 0xb31   : > { %v11382_v55 = vunpack.i.l.bf16 %v11381_v3  ;;  %9767 = vmatpush.msra.mxu2 %v9747_v19  ;;  %v11383_v26 = vunpack.i.h.bf16 %v11381_v3 }
 0xb33   : > { %9768 = vmatpush.msra.mxu2 %v9746_v24  ;;  %v9692_v37 = vsel %vm1929_vm7, %v19582_v48, %v11382_v55  ;;  %v9691_v42 = vsel %vm1929_vm7, %v19578_v32, %v11383_v26 }
 0xb34   : > { %v9709_v58 = vsel %vm9707_vm13, %v9692_v37, %v11392_v12  ;;  %v9708_v0 = vsel %vm9707_vm13, %v9691_v42, %v11393_v11 }
 0xb35   : > { %9769 = vmatpush.msra.mxu2 %v9745_v61  ;;  %v9725_v32 = vsel %vm1935_vm8, %v9709_v58, %v11397_v5  ;;  %v9724_v18 = vsel %vm1935_vm8, %v9708_v0, %v11398_v20 }
 0xb37   : > { %9770 = vmatpush.msra.mxu2 %v9744_v4 }
 0xb38   : > { %v11401_v48 = vpop.permute.xlu0 %11400 }
 0xb39   : > { %v11403_v10 = vunpack.i.h.bf16 %v11401_v48  ;;  %v11402_v49 = vunpack.i.l.bf16 %v11401_v48  ;;  %9771 = vmatpush.msra.mxu2 %v9743_v43 }
 0xb3b   : > { %v9742_v39 = vsel %vm9740_vm14, %v9725_v32, %v11402_v49  ;;  %v9741_v9 = vsel %vm9740_vm14, %v9724_v18, %v11403_v10 }
 0xb3c   : > { %9772 = vmatpush.msra.mxu2 %v9742_v39 }
 0xb3e   : > { %9773 = vmatpush.msra.mxu2 %v9741_v9 }
 0xb3f   : > { %9774 = vmatmul.f32.vlgmr.msra.gmra.mxu2 %v9757_v34 }
 0xb40   : > { %11491 = shalt.err (!%p11488_p8)
}
 0xb41   : > { %10015 = dma.vmem_to_hbm [thread:$0]  (%p11682_p11), %s9799_s29, 256, %s9801_s21, %s9780_s23  }
 0xb42   : > { %s9939_s11 = sshll.u32 %s11727_s9, 3  ;;  %s9998_s18 = sshll.u32 %s11651_s28, 3 }
 0xb43   : > { %s9810_s22 = scalar_lea.hbm %s19788_s7, %s9998_s18  ;;  %s324_s17 = scalar_lea.vmem [#allocation10], %s9939_s11 }
 0xb44   : > { %s9812_s8 = sshll.u32 %s324_s17, 4  ;;  %s9814_s16 = sshll.u32 %s9810_s22, 4  ;;  %s9813_s8 = int_to_ptr.vmem [resolvable:$true] %s9812_s8  ;;  %s9815_s16 = int_to_ptr.hbm [resolvable:$true] %s9814_s16 }
 0xb45   : > { %s9785_s26 = scalar_lea.sflag [#allocation11], %s11727_s9  ;;  %s11506_s30 = sshra.s32 %s9815_s16, 4  ;;  %s11507_s30 = int_to_ptr.hbm [resolvable:$true] %s11506_s30 }
 0xb46   : > { %s11508_s12 = scalar_lea.hbm %s11507_s30, 8  ;;  %s11512_s21 = scalar_lea.hbm %s19788_s7, 16 }
 0xb47   : > { %p11509_p9 = scmp.ne.s32.totalorder %s11507_s30, %s11508_s12  ;;  %p11513_p2 = scmp.lt.s32.totalorder %s11507_s30, %s19788_s7 }
 0xb48   : > { %p11514_p3 = scmp.lt.s32.totalorder %s11512_s21, %s11508_s12 }
 0xb49   : > { %p11510_p10 = pnand %p11509_p9, %p11682_p11 }
 0xb4a   : > { %p11515_p4 = por %p11514_p3, %p11513_p2 }
 0xb4b   : > { %p11511_p1 = pneg %p11510_p10 }
 0xb4d   : > { %p11516_p6 = pnand %p11515_p4, %p11511_p1 }
 0xbc2   : > { %v9775_v13 = vpop.f32.mrf.mxu2 }
 0xbc3   : > { %9778 = vst.msk [vmem:[%s324_s17] sm:$0xff] %vm1941_vm9, %v9775_v13 }
 0xbc4   : > { %11519 = shalt.err (!%p11516_p6)
}
 0xbc5   : > { %10016 = dma.vmem_to_hbm [thread:$0]  (%p11682_p11), %s9813_s8, 128, %s9815_s16, %s9785_s26  }
 0xbc6 PF: > { %s9826_s9 = sand.u32 1, %s11554_s24   ;;  %p20933_p13 = scmp.ge.s32.totalorder %s11566_s27, 2 }
 0xbc7   : > { %s9827_s5 = scalar_lea.sflag [#allocation6], %s9826_s9 }
 0xbc8   : > { %p10028_p0 = pnand %p20933_p13, %p11686_p12 }
 0xbca   : > { %p10029_p7 = pneg %p10028_p0 }
 0xbcc   : > { %11545 = dma.done.wait (%p10029_p7), %s9827_s5, 256  }
 0xbcd   : > { %11547 = vsyncadd (%p10029_p7), %s9827_s5, 4294967040  ;;  %s9837_s10 = scalar_lea.sflag [#allocation11], %s9826_s9 }
 0xbce   : > { %11549 = dma.done.wait (%p10029_p7), %s9837_s10, 128  }
 0xbcf   : > { %11551 = vsyncadd (%p10029_p7), %s9837_s10, 4294967168  ;;  %s20934_s27 = sld [smem:[#allocation17_spill]]  ;;  %s20937_s24 = smov %s11558_s25 }
 0xbd0   : > { %s20935_s11 = sld [smem:[#allocation16_spill]] }
 0xbd1   : > { %s20936_s26 = sld [smem:[#allocation18_spill]] }
 0xbd5   : > { %p25_p11 = scmp.ge.s32.totalorder %s20934_s27, 4  }
 0xbd6   : > { %s20938_s25 = smov %s20935_s11 }
 0xbd7   :  { %27 = sbr.rel (!%p25_p11) target bundleno = 10 (0xa), region = 200 }
 0xbdc   :  { %9843 = vsyncpa [#allocation5], 1 }
 0xbdd   :  { %9845 = vsyncpa [#allocation5 + $0x1], 1 }
 0xbde   :  { %9846 = vsyncpa [#allocation8], 1 }
 0xbdf   :  { %9847 = vsyncpa [#allocation6], 1 }
 0xbe0   :  { %9849 = vsyncpa [#allocation6 + $0x1], 1 }
 0xbe1   :  { %9850 = vsyncpa [#allocation11], 1 }
 0xbe2   :  { %9852 = vsyncpa [#allocation11 + $0x1], 1 }

</bundles_post_ra>
